<compile_context>
chip_gen: v7x
topology: tpu7x:2x2x1
jax: 0.10.0
libtpu: 0.0.40
codegen_flags: <defaults>
</compile_context>

<pallas_src>
import jax
import jax.numpy as jnp
from jax.experimental import pallas as pl
from jax.experimental.pallas import tpu as pltpu

LANE = 128


def _round_up(n, m):
    return (n + m - 1) // m * m


def _vmem_limit_bytes():
    """Generation-aware VMEM budget: ~3/4 of physical, capped at 112 MiB.

    v5e/v6e (128 MiB physical) -> ~96 MiB; v7x (64 MiB physical) -> ~48 MiB.
    """
    cap = 64 * 1024 * 1024
    try:
        info = pltpu.get_tpu_info()
        cap = getattr(info, "vmem_capacity_bytes", None) or cap
    except Exception:
        pass
    return int(min(cap * 3 // 4, 112 * 1024 * 1024))


# --------------------------------------------------------------------------
# Fused Pallas kernel: conv3x3+bn+relu -> conv3x3+bn -> +residual -> relu
# --------------------------------------------------------------------------
def fused_basic_block_kernel(xpad_ref, w1_ref, w2_ref, b1_ref, b2_ref,
                             out_ref, xbf, patch, y1pad):
    _, Hp, Wp, Cp = xpad_ref.shape          # padded f32 input tile; Cp = Cin_p == Cout_p
    H, W = Hp - 2, Wp - 2

    # ---- single f32 -> bf16 cast pass (replaces 9 per-tap casts) ----
    xbf[...] = xpad_ref[0].astype(jnp.bfloat16)

    # ---- conv1: im2col into the shared bf16 patch slab, one MXU matmul ----
    for kh in range(3):
        for kw in range(3):
            t = kh * 3 + kw
            patch[:, t * Cp:(t + 1) * Cp] = (
                xbf[kh:kh + H, kw:kw + W, :].reshape(H * W, Cp))
    acc1 = jnp.dot(patch[...], w1_ref[...],
                   preferred_element_type=jnp.float32)          # (H*W, Cp) f32
    y1 = jnp.maximum(acc1 + b1_ref[...], 0.0)                   # bn1 bias + relu1

    # ---- bf16 haloed y1: zero ONLY the 1-px border (interior overwritten) ----
    y1pad[0:1, :, :] = jnp.zeros((1, Wp, Cp), jnp.bfloat16)
    y1pad[H + 1:H + 2, :, :] = jnp.zeros((1, Wp, Cp), jnp.bfloat16)
    y1pad[1:H + 1, 0:1, :] = jnp.zeros((H, 1, Cp), jnp.bfloat16)
    y1pad[1:H + 1, W + 1:W + 2, :] = jnp.zeros((H, 1, Cp), jnp.bfloat16)
    y1pad[1:H + 1, 1:W + 1, :] = y1.reshape(H, W, Cp).astype(jnp.bfloat16)

    # ---- conv2: reuse the SAME patch slab (conv1 patches are dead) ----
    for kh in range(3):
        for kw in range(3):
            t = kh * 3 + kw
            patch[:, t * Cp:(t + 1) * Cp] = (
                y1pad[kh:kh + H, kw:kw + W, :].reshape(H * W, Cp))
    acc2 = jnp.dot(patch[...], w2_ref[...],
                   preferred_element_type=jnp.float32)          # (H*W, Cp) f32

    # ---- bn2 bias + residual + relu2 (f32; residual exact from f32 input) ----
    res = xpad_ref[0, 1:H + 1, 1:W + 1, :].reshape(H * W, Cp)
    out = jnp.maximum(acc2 + b2_ref[...] + res, 0.0)
    out_ref[...] = out.reshape(1, H, W, Cp)


# --------------------------------------------------------------------------
# Wrapper: BN folding, channel padding (lane density), layout glue
# --------------------------------------------------------------------------
def _fold_bn_into_conv(w, gamma, beta, mean, var, eps=1e-5):
    scale = gamma / jnp.sqrt(var + eps)                    # (Cout,)
    w_folded = w.astype(jnp.float32) * scale[None, None, None, :]
    bias = beta - mean * scale                             # (Cout,)
    return w_folded, bias.astype(jnp.float32)


def _pad_weight(w, cin_p, cout_p):
    """(3,3,Cin,Cout) f32 -> (9*Cin_p, Cout_p) bf16 im2col weight matrix."""
    kh, kw, cin, cout = w.shape
    wp = jnp.zeros((kh, kw, cin_p, cout_p), jnp.float32)
    wp = wp.at[:, :, :cin, :cout].set(w)
    return wp.reshape(kh * kw * cin_p, cout_p).astype(jnp.bfloat16)


def _pad_bias(b, cout_p):
    bp = jnp.zeros((1, cout_p), jnp.float32)
    return bp.at[0, :b.shape[0]].set(b)


@jax.jit
def basic_block_forward(x_nchw, params):
    """BasicBlock.forward (stride=1, no downsample). Input/output are NCHW."""
    x = jnp.transpose(x_nchw, (0, 2, 3, 1)).astype(jnp.float32)   # -> NHWC
    B, H, W, Cin = x.shape
    Cout = params["w1"].shape[-1]
    assert Cin == Cout, "stride=1 / no-downsample path requires inplanes == planes"
    Cin_p = _round_up(Cin, LANE)          # lane-dense channel padding
    Cout_p = _round_up(Cout, LANE)
    assert Cin_p == Cout_p                # lets conv1/conv2 share one patch slab
    Hp, Wp = H + 2, W + 2

    # Fold BN scale into weights; kernel only adds bias.
    w1f, b1 = _fold_bn_into_conv(params["w1"], params["gamma1"], params["beta1"],
                                 params["mean1"], params["var1"])
    w2f, b2 = _fold_bn_into_conv(params["w2"], params["gamma2"], params["beta2"],
                                 params["mean2"], params["var2"])
    w1m = _pad_weight(w1f, Cin_p, Cout_p)      # (9*Cin_p, Cout_p) bf16
    w2m = _pad_weight(w2f, Cout_p, Cout_p)     # (9*Cout_p, Cout_p) bf16
    b1p = _pad_bias(b1, Cout_p)                # (1, Cout_p) f32
    b2p = _pad_bias(b2, Cout_p)

    # Single wrapper-side pad: 1-px spatial halo + channel pad to 128-multiple.
    xpad = jnp.pad(x, ((0, 0), (1, 1), (1, 1), (0, Cin_p - Cin)))

    # Advisory cost model: two im2col matmuls per image + I/O + weights.
    flops = 2 * B * 2 * H * W * (9 * Cin_p) * Cout_p
    bytes_accessed = (B * Hp * Wp * Cin_p * 4            # padded input
                      + B * H * W * Cout_p * 4           # output
                      + (9 * Cin_p + 9 * Cout_p) * Cout_p * 2   # bf16 weights
                      + 2 * Cout_p * 4)                  # biases
    cost = pl.CostEstimate(flops=flops, transcendentals=0,
                           bytes_accessed=bytes_accessed)

    out_padded = pl.pallas_call(
        fused_basic_block_kernel,
        grid=(B,),
        in_specs=[
            pl.BlockSpec((1, Hp, Wp, Cin_p), lambda b: (b, 0, 0, 0)),
            pl.BlockSpec((9 * Cin_p, Cout_p), lambda b: (0, 0)),
            pl.BlockSpec((9 * Cout_p, Cout_p), lambda b: (0, 0)),
            pl.BlockSpec((1, Cout_p), lambda b: (0, 0)),
            pl.BlockSpec((1, Cout_p), lambda b: (0, 0)),
        ],
        out_specs=pl.BlockSpec((1, H, W, Cout_p), lambda b: (b, 0, 0, 0)),
        out_shape=jax.ShapeDtypeStruct((B, H, W, Cout_p), jnp.float32),
        scratch_shapes=[
            pltpu.VMEM((Hp, Wp, Cin_p), jnp.bfloat16),      # bf16 cast of input tile
            pltpu.VMEM((H * W, 9 * Cin_p), jnp.bfloat16),   # shared im2col slab
            pltpu.VMEM((Hp, Wp, Cout_p), jnp.bfloat16),     # bf16 haloed y1
        ],
        compiler_params=pltpu.CompilerParams(
            dimension_semantics=("parallel",),               # megacore over batch
            vmem_limit_bytes=_vmem_limit_bytes()),
        cost_estimate=cost,
    )(xpad, w1m, w2m, b1p, b2p)

    # Drop channel padding only if it exists; keep lane-dense output otherwise.
    out = out_padded if Cout_p == Cout else out_padded[..., :Cout]
    return jnp.transpose(out, (0, 3, 1, 2))                 # -> NCHW


# --------------------------------------------------------------------------
# Pure-JAX reference (for correctness check)
# --------------------------------------------------------------------------
def reference_forward(x_nchw, params, eps=1e-5):
    x = jnp.transpose(x_nchw, (0, 2, 3, 1)).astype(jnp.float32)

    def conv(inp, w):
        return jax.lax.conv_general_dilated(
            inp, w, window_strides=(1, 1), padding="SAME",
            dimension_numbers=("NHWC", "HWIO", "NHWC"))

    def bn(y, g, b, m, v):
        return (y - m) / jnp.sqrt(v + eps) * g + b

    y = jnp.maximum(bn(conv(x, params["w1"]), params["gamma1"], params["beta1"],
                       params["mean1"], params["var1"]), 0.0)
    y = bn(conv(y, params["w2"]), params["gamma2"], params["beta2"],
           params["mean2"], params["var2"])
    y = jnp.maximum(y + x, 0.0)
    return jnp.transpose(y, (0, 3, 1, 2))


# --------------------------------------------------------------------------
# Main
# --------------------------------------------------------------------------
if __name__ == "__main__":
    key = jax.random.PRNGKey(0)
    ks = jax.random.split(key, 11)

    B, C, H, W = 2, 4, 16, 16      # inplanes == planes, stride=1
    planes = C

    x = jax.random.normal(ks[0], (B, C, H, W), dtype=jnp.float32)

    params = {
        "w1":     0.1 * jax.random.normal(ks[1], (3, 3, C, planes), dtype=jnp.float32),
        "gamma1": jax.random.uniform(ks[2], (planes,), minval=0.5, maxval=1.5, dtype=jnp.float32),
        "beta1":  0.1 * jax.random.normal(ks[3], (planes,), dtype=jnp.float32),
        "mean1":  0.1 * jax.random.normal(ks[4], (planes,), dtype=jnp.float32),
        "var1":   jax.random.uniform(ks[5], (planes,), minval=0.5, maxval=1.5, dtype=jnp.float32),
        "w2":     0.1 * jax.random.normal(ks[6], (3, 3, planes, planes), dtype=jnp.float32),
        "gamma2": jax.random.uniform(ks[7], (planes,), minval=0.5, maxval=1.5, dtype=jnp.float32),
        "beta2":  0.1 * jax.random.normal(ks[8], (planes,), dtype=jnp.float32),
        "mean2":  0.1 * jax.random.normal(ks[9], (planes,), dtype=jnp.float32),
        "var2":   jax.random.uniform(ks[10], (planes,), minval=0.5, maxval=1.5, dtype=jnp.float32),
    }

    out = jax.block_until_ready(basic_block_forward(x, params))
    ref = jax.block_until_ready(reference_forward(x, params))

    assert out.shape == (B, planes, H, W), out.shape
    max_err = float(jnp.max(jnp.abs(out - ref)))
    # bf16 MXU operands (f32 accumulation / f32 epilogue) => looser tolerance.
    assert jnp.allclose(out, ref, atol=5e-2, rtol=2e-2), max_err

    print("KERNEL_OK")
</pallas_src>

<mosaic_0001>
module attributes {stable_mosaic.version = 11 : i64} {
  func.func @fused_basic_block_kernel(%arg0: i32, %arg1: memref<1x18x18x128xf32, #tpu.memory_space<vmem>>, %arg2: memref<1152x128xbf16, #tpu.memory_space<vmem>>, %arg3: memref<1152x128xbf16, #tpu.memory_space<vmem>>, %arg4: memref<1x128xf32, #tpu.memory_space<vmem>>, %arg5: memref<1x128xf32, #tpu.memory_space<vmem>>, %arg6: memref<1x16x16x128xf32, #tpu.memory_space<vmem>>, %arg7: memref<18x18x128xbf16, #tpu.memory_space<vmem>>, %arg8: memref<256x1152xbf16, #tpu.memory_space<vmem>>, %arg9: memref<18x18x128xbf16, #tpu.memory_space<vmem>>) attributes {dimension_semantics = [#tpu.dimension_semantics<parallel>], iteration_bounds = array<i64: 2>, scalar_prefetch = 0 : i64, scratch_operands = 3 : i64, tpu.core_type = #tpu.core_type<tc>, window_params = [{transform_indices = @transform_0, window_bounds = array<i64: 1, 18, 18, 128>}, {pipeline_mode = #tpu.pipeline_mode<synchronous>, transform_indices = @transform_1, window_bounds = array<i64: 1152, 128>}, {pipeline_mode = #tpu.pipeline_mode<synchronous>, transform_indices = @transform_2, window_bounds = array<i64: 1152, 128>}, {pipeline_mode = #tpu.pipeline_mode<synchronous>, transform_indices = @transform_3, window_bounds = array<i64: 1, 128>}, {pipeline_mode = #tpu.pipeline_mode<synchronous>, transform_indices = @transform_4, window_bounds = array<i64: 1, 128>}, {transform_indices = @transform_5, window_bounds = array<i64: 1, 16, 16, 128>}]} {
    %c0 = arith.constant 0 : index
    %c0_0 = arith.constant 0 : index
    %c0_1 = arith.constant 0 : index
    %c0_2 = arith.constant 0 : index
    %0 = vector.load %arg1[%c0, %c0_0, %c0_1, %c0_2] : memref<1x18x18x128xf32, #tpu.memory_space<vmem>>, vector<1x18x18x128xf32>
    %1 = vector.shape_cast %0 : vector<1x18x18x128xf32> to vector<18x18x128xf32>
    %2 = arith.truncf %1 : vector<18x18x128xf32> to vector<18x18x128xbf16>
    %c0_3 = arith.constant 0 : index
    %c0_4 = arith.constant 0 : index
    %c0_5 = arith.constant 0 : index
    %3 = vector.load %arg7[%c0_3, %c0_4, %c0_5] : memref<18x18x128xbf16, #tpu.memory_space<vmem>>, vector<18x18x128xbf16>
    tpu.vector_store %arg7[%c0_3, %c0_4, %c0_5], %2 {strides = array<i32>} : memref<18x18x128xbf16, #tpu.memory_space<vmem>>, vector<18x18x128xbf16>,
    %c0_6 = arith.constant 0 : index
    %c0_7 = arith.constant 0 : index
    %c0_8 = arith.constant 0 : index
    %4 = vector.load %arg7[%c0_6, %c0_7, %c0_8] : memref<18x18x128xbf16, #tpu.memory_space<vmem>>, vector<16x16x128xbf16>
    %5 = vector.shape_cast %4 : vector<16x16x128xbf16> to vector<256x128xbf16>
    %c0_9 = arith.constant 0 : index
    %c0_10 = arith.constant 0 : index
    %6 = vector.load %arg8[%c0_9, %c0_10] : memref<256x1152xbf16, #tpu.memory_space<vmem>>, vector<256x128xbf16>
    tpu.vector_store %arg8[%c0_9, %c0_10], %5 {strides = array<i32>} : memref<256x1152xbf16, #tpu.memory_space<vmem>>, vector<256x128xbf16>,
    %c0_11 = arith.constant 0 : index
    %c1 = arith.constant 1 : index
    %c0_12 = arith.constant 0 : index
    %7 = vector.load %arg7[%c0_11, %c1, %c0_12] : memref<18x18x128xbf16, #tpu.memory_space<vmem>>, vector<16x16x128xbf16>
    %8 = vector.shape_cast %7 : vector<16x16x128xbf16> to vector<256x128xbf16>
    %c0_13 = arith.constant 0 : index
    %c128 = arith.constant 128 : index
    %9 = vector.load %arg8[%c0_13, %c128] : memref<256x1152xbf16, #tpu.memory_space<vmem>>, vector<256x128xbf16>
    tpu.vector_store %arg8[%c0_13, %c128], %8 {strides = array<i32>} : memref<256x1152xbf16, #tpu.memory_space<vmem>>, vector<256x128xbf16>,
    %c0_14 = arith.constant 0 : index
    %c2 = arith.constant 2 : index
    %c0_15 = arith.constant 0 : index
    %10 = vector.load %arg7[%c0_14, %c2, %c0_15] : memref<18x18x128xbf16, #tpu.memory_space<vmem>>, vector<16x16x128xbf16>
    %11 = vector.shape_cast %10 : vector<16x16x128xbf16> to vector<256x128xbf16>
    %c0_16 = arith.constant 0 : index
    %c256 = arith.constant 256 : index
    %12 = vector.load %arg8[%c0_16, %c256] : memref<256x1152xbf16, #tpu.memory_space<vmem>>, vector<256x128xbf16>
    tpu.vector_store %arg8[%c0_16, %c256], %11 {strides = array<i32>} : memref<256x1152xbf16, #tpu.memory_space<vmem>>, vector<256x128xbf16>,
    %c1_17 = arith.constant 1 : index
    %c0_18 = arith.constant 0 : index
    %c0_19 = arith.constant 0 : index
    %13 = vector.load %arg7[%c1_17, %c0_18, %c0_19] : memref<18x18x128xbf16, #tpu.memory_space<vmem>>, vector<16x16x128xbf16>
    %14 = vector.shape_cast %13 : vector<16x16x128xbf16> to vector<256x128xbf16>
    %c0_20 = arith.constant 0 : index
    %c384 = arith.constant 384 : index
    %15 = vector.load %arg8[%c0_20, %c384] : memref<256x1152xbf16, #tpu.memory_space<vmem>>, vector<256x128xbf16>
    tpu.vector_store %arg8[%c0_20, %c384], %14 {strides = array<i32>} : memref<256x1152xbf16, #tpu.memory_space<vmem>>, vector<256x128xbf16>,
    %c1_21 = arith.constant 1 : index
    %c1_22 = arith.constant 1 : index
    %c0_23 = arith.constant 0 : index
    %16 = vector.load %arg7[%c1_21, %c1_22, %c0_23] : memref<18x18x128xbf16, #tpu.memory_space<vmem>>, vector<16x16x128xbf16>
    %17 = vector.shape_cast %16 : vector<16x16x128xbf16> to vector<256x128xbf16>
    %c0_24 = arith.constant 0 : index
    %c512 = arith.constant 512 : index
    %18 = vector.load %arg8[%c0_24, %c512] : memref<256x1152xbf16, #tpu.memory_space<vmem>>, vector<256x128xbf16>
    tpu.vector_store %arg8[%c0_24, %c512], %17 {strides = array<i32>} : memref<256x1152xbf16, #tpu.memory_space<vmem>>, vector<256x128xbf16>,
    %c1_25 = arith.constant 1 : index
    %c2_26 = arith.constant 2 : index
    %c0_27 = arith.constant 0 : index
    %19 = vector.load %arg7[%c1_25, %c2_26, %c0_27] : memref<18x18x128xbf16, #tpu.memory_space<vmem>>, vector<16x16x128xbf16>
    %20 = vector.shape_cast %19 : vector<16x16x128xbf16> to vector<256x128xbf16>
    %c0_28 = arith.constant 0 : index
    %c640 = arith.constant 640 : index
    %21 = vector.load %arg8[%c0_28, %c640] : memref<256x1152xbf16, #tpu.memory_space<vmem>>, vector<256x128xbf16>
    tpu.vector_store %arg8[%c0_28, %c640], %20 {strides = array<i32>} : memref<256x1152xbf16, #tpu.memory_space<vmem>>, vector<256x128xbf16>,
    %c2_29 = arith.constant 2 : index
    %c0_30 = arith.constant 0 : index
    %c0_31 = arith.constant 0 : index
    %22 = vector.load %arg7[%c2_29, %c0_30, %c0_31] : memref<18x18x128xbf16, #tpu.memory_space<vmem>>, vector<16x16x128xbf16>
    %23 = vector.shape_cast %22 : vector<16x16x128xbf16> to vector<256x128xbf16>
    %c0_32 = arith.constant 0 : index
    %c768 = arith.constant 768 : index
    %24 = vector.load %arg8[%c0_32, %c768] : memref<256x1152xbf16, #tpu.memory_space<vmem>>, vector<256x128xbf16>
    tpu.vector_store %arg8[%c0_32, %c768], %23 {strides = array<i32>} : memref<256x1152xbf16, #tpu.memory_space<vmem>>, vector<256x128xbf16>,
    %c2_33 = arith.constant 2 : index
    %c1_34 = arith.constant 1 : index
    %c0_35 = arith.constant 0 : index
    %25 = vector.load %arg7[%c2_33, %c1_34, %c0_35] : memref<18x18x128xbf16, #tpu.memory_space<vmem>>, vector<16x16x128xbf16>
    %26 = vector.shape_cast %25 : vector<16x16x128xbf16> to vector<256x128xbf16>
    %c0_36 = arith.constant 0 : index
    %c896 = arith.constant 896 : index
    %27 = vector.load %arg8[%c0_36, %c896] : memref<256x1152xbf16, #tpu.memory_space<vmem>>, vector<256x128xbf16>
    tpu.vector_store %arg8[%c0_36, %c896], %26 {strides = array<i32>} : memref<256x1152xbf16, #tpu.memory_space<vmem>>, vector<256x128xbf16>,
    %c2_37 = arith.constant 2 : index
    %c2_38 = arith.constant 2 : index
    %c0_39 = arith.constant 0 : index
    %28 = vector.load %arg7[%c2_37, %c2_38, %c0_39] : memref<18x18x128xbf16, #tpu.memory_space<vmem>>, vector<16x16x128xbf16>
    %29 = vector.shape_cast %28 : vector<16x16x128xbf16> to vector<256x128xbf16>
    %c0_40 = arith.constant 0 : index
    %c1024 = arith.constant 1024 : index
    %30 = vector.load %arg8[%c0_40, %c1024] : memref<256x1152xbf16, #tpu.memory_space<vmem>>, vector<256x128xbf16>
    tpu.vector_store %arg8[%c0_40, %c1024], %29 {strides = array<i32>} : memref<256x1152xbf16, #tpu.memory_space<vmem>>, vector<256x128xbf16>,
    %c0_41 = arith.constant 0 : index
    %c0_42 = arith.constant 0 : index
    %31 = vector.load %arg8[%c0_41, %c0_42] : memref<256x1152xbf16, #tpu.memory_space<vmem>>, vector<256x1152xbf16>
    %c0_43 = arith.constant 0 : index
    %c0_44 = arith.constant 0 : index
    %32 = vector.load %arg2[%c0_43, %c0_44] : memref<1152x128xbf16, #tpu.memory_space<vmem>>, vector<1152x128xbf16>
    %cst = arith.constant dense<0.000000e+00> : vector<256x128xf32>
    %33 = tpu.matmul %31, %32, %cst {dimension_numbers = #tpu.dot_dimension_numbers<[1], [0], [0], [1], [0, 0, 1, 1], [], []>} : vector<256x1152xbf16>, vector<1152x128xbf16>, vector<256x128xf32> -> vector<256x128xf32>
    %c0_45 = arith.constant 0 : index
    %c0_46 = arith.constant 0 : index
    %34 = vector.load %arg4[%c0_45, %c0_46] : memref<1x128xf32, #tpu.memory_space<vmem>>, vector<1x128xf32>
    %35 = vector.broadcast %34 : vector<1x128xf32> to vector<256x128xf32>
    %36 = arith.addf %33, %35 : vector<256x128xf32>
    %cst_47 = arith.constant 0.000000e+00 : f32
    %37 = vector.broadcast %cst_47 : f32 to vector<256x128xf32>
    %38 = arith.maximumf %36, %37 : vector<256x128xf32>
    %cst_48 = arith.constant 0.000000e+00 : bf16
    %39 = vector.broadcast %cst_48 : bf16 to vector<1x18x128xbf16>
    %c0_49 = arith.constant 0 : index
    %c0_50 = arith.constant 0 : index
    %c0_51 = arith.constant 0 : index
    %40 = vector.load %arg9[%c0_49, %c0_50, %c0_51] : memref<18x18x128xbf16, #tpu.memory_space<vmem>>, vector<1x18x128xbf16>
    tpu.vector_store %arg9[%c0_49, %c0_50, %c0_51], %39 {strides = array<i32>} : memref<18x18x128xbf16, #tpu.memory_space<vmem>>, vector<1x18x128xbf16>,
    %cst_52 = arith.constant 0.000000e+00 : bf16
    %41 = vector.broadcast %cst_52 : bf16 to vector<1x18x128xbf16>
    %c17 = arith.constant 17 : index
    %c0_53 = arith.constant 0 : index
    %c0_54 = arith.constant 0 : index
    %42 = vector.load %arg9[%c17, %c0_53, %c0_54] : memref<18x18x128xbf16, #tpu.memory_space<vmem>>, vector<1x18x128xbf16>
    tpu.vector_store %arg9[%c17, %c0_53, %c0_54], %41 {strides = array<i32>} : memref<18x18x128xbf16, #tpu.memory_space<vmem>>, vector<1x18x128xbf16>,
    %cst_55 = arith.constant 0.000000e+00 : bf16
    %43 = vector.broadcast %cst_55 : bf16 to vector<16x1x128xbf16>
    %c1_56 = arith.constant 1 : index
    %c0_57 = arith.constant 0 : index
    %c0_58 = arith.constant 0 : index
    %44 = vector.load %arg9[%c1_56, %c0_57, %c0_58] : memref<18x18x128xbf16, #tpu.memory_space<vmem>>, vector<16x1x128xbf16>
    tpu.vector_store %arg9[%c1_56, %c0_57, %c0_58], %43 {strides = array<i32>} : memref<18x18x128xbf16, #tpu.memory_space<vmem>>, vector<16x1x128xbf16>,
    %cst_59 = arith.constant 0.000000e+00 : bf16
    %45 = vector.broadcast %cst_59 : bf16 to vector<16x1x128xbf16>
    %c1_60 = arith.constant 1 : index
    %c17_61 = arith.constant 17 : index
    %c0_62 = arith.constant 0 : index
    %46 = vector.load %arg9[%c1_60, %c17_61, %c0_62] : memref<18x18x128xbf16, #tpu.memory_space<vmem>>, vector<16x1x128xbf16>
    tpu.vector_store %arg9[%c1_60, %c17_61, %c0_62], %45 {strides = array<i32>} : memref<18x18x128xbf16, #tpu.memory_space<vmem>>, vector<16x1x128xbf16>,
    %47 = vector.shape_cast %38 : vector<256x128xf32> to vector<16x16x128xf32>
    %48 = arith.truncf %47 : vector<16x16x128xf32> to vector<16x16x128xbf16>
    %c1_63 = arith.constant 1 : index
    %c1_64 = arith.constant 1 : index
    %c0_65 = arith.constant 0 : index
    %49 = vector.load %arg9[%c1_63, %c1_64, %c0_65] : memref<18x18x128xbf16, #tpu.memory_space<vmem>>, vector<16x16x128xbf16>
    tpu.vector_store %arg9[%c1_63, %c1_64, %c0_65], %48 {strides = array<i32>} : memref<18x18x128xbf16, #tpu.memory_space<vmem>>, vector<16x16x128xbf16>,
    %c0_66 = arith.constant 0 : index
    %c0_67 = arith.constant 0 : index
    %c0_68 = arith.constant 0 : index
    %50 = vector.load %arg9[%c0_66, %c0_67, %c0_68] : memref<18x18x128xbf16, #tpu.memory_space<vmem>>, vector<16x16x128xbf16>
    %51 = vector.shape_cast %50 : vector<16x16x128xbf16> to vector<256x128xbf16>
    %c0_69 = arith.constant 0 : index
    %c0_70 = arith.constant 0 : index
    %52 = vector.load %arg8[%c0_69, %c0_70] : memref<256x1152xbf16, #tpu.memory_space<vmem>>, vector<256x128xbf16>
    tpu.vector_store %arg8[%c0_69, %c0_70], %51 {strides = array<i32>} : memref<256x1152xbf16, #tpu.memory_space<vmem>>, vector<256x128xbf16>,
    %c0_71 = arith.constant 0 : index
    %c1_72 = arith.constant 1 : index
    %c0_73 = arith.constant 0 : index
    %53 = vector.load %arg9[%c0_71, %c1_72, %c0_73] : memref<18x18x128xbf16, #tpu.memory_space<vmem>>, vector<16x16x128xbf16>
    %54 = vector.shape_cast %53 : vector<16x16x128xbf16> to vector<256x128xbf16>
    %c0_74 = arith.constant 0 : index
    %c128_75 = arith.constant 128 : index
    %55 = vector.load %arg8[%c0_74, %c128_75] : memref<256x1152xbf16, #tpu.memory_space<vmem>>, vector<256x128xbf16>
    tpu.vector_store %arg8[%c0_74, %c128_75], %54 {strides = array<i32>} : memref<256x1152xbf16, #tpu.memory_space<vmem>>, vector<256x128xbf16>,
    %c0_76 = arith.constant 0 : index
    %c2_77 = arith.constant 2 : index
    %c0_78 = arith.constant 0 : index
    %56 = vector.load %arg9[%c0_76, %c2_77, %c0_78] : memref<18x18x128xbf16, #tpu.memory_space<vmem>>, vector<16x16x128xbf16>
    %57 = vector.shape_cast %56 : vector<16x16x128xbf16> to vector<256x128xbf16>
    %c0_79 = arith.constant 0 : index
    %c256_80 = arith.constant 256 : index
    %58 = vector.load %arg8[%c0_79, %c256_80] : memref<256x1152xbf16, #tpu.memory_space<vmem>>, vector<256x128xbf16>
    tpu.vector_store %arg8[%c0_79, %c256_80], %57 {strides = array<i32>} : memref<256x1152xbf16, #tpu.memory_space<vmem>>, vector<256x128xbf16>,
    %c1_81 = arith.constant 1 : index
    %c0_82 = arith.constant 0 : index
    %c0_83 = arith.constant 0 : index
    %59 = vector.load %arg9[%c1_81, %c0_82, %c0_83] : memref<18x18x128xbf16, #tpu.memory_space<vmem>>, vector<16x16x128xbf16>
    %60 = vector.shape_cast %59 : vector<16x16x128xbf16> to vector<256x128xbf16>
    %c0_84 = arith.constant 0 : index
    %c384_85 = arith.constant 384 : index
    %61 = vector.load %arg8[%c0_84, %c384_85] : memref<256x1152xbf16, #tpu.memory_space<vmem>>, vector<256x128xbf16>
    tpu.vector_store %arg8[%c0_84, %c384_85], %60 {strides = array<i32>} : memref<256x1152xbf16, #tpu.memory_space<vmem>>, vector<256x128xbf16>,
    %c1_86 = arith.constant 1 : index
    %c1_87 = arith.constant 1 : index
    %c0_88 = arith.constant 0 : index
    %62 = vector.load %arg9[%c1_86, %c1_87, %c0_88] : memref<18x18x128xbf16, #tpu.memory_space<vmem>>, vector<16x16x128xbf16>
    %63 = vector.shape_cast %62 : vector<16x16x128xbf16> to vector<256x128xbf16>
    %c0_89 = arith.constant 0 : index
    %c512_90 = arith.constant 512 : index
    %64 = vector.load %arg8[%c0_89, %c512_90] : memref<256x1152xbf16, #tpu.memory_space<vmem>>, vector<256x128xbf16>
    tpu.vector_store %arg8[%c0_89, %c512_90], %63 {strides = array<i32>} : memref<256x1152xbf16, #tpu.memory_space<vmem>>, vector<256x128xbf16>,
    %c1_91 = arith.constant 1 : index
    %c2_92 = arith.constant 2 : index
    %c0_93 = arith.constant 0 : index
    %65 = vector.load %arg9[%c1_91, %c2_92, %c0_93] : memref<18x18x128xbf16, #tpu.memory_space<vmem>>, vector<16x16x128xbf16>
    %66 = vector.shape_cast %65 : vector<16x16x128xbf16> to vector<256x128xbf16>
    %c0_94 = arith.constant 0 : index
    %c640_95 = arith.constant 640 : index
    %67 = vector.load %arg8[%c0_94, %c640_95] : memref<256x1152xbf16, #tpu.memory_space<vmem>>, vector<256x128xbf16>
    tpu.vector_store %arg8[%c0_94, %c640_95], %66 {strides = array<i32>} : memref<256x1152xbf16, #tpu.memory_space<vmem>>, vector<256x128xbf16>,
    %c2_96 = arith.constant 2 : index
    %c0_97 = arith.constant 0 : index
    %c0_98 = arith.constant 0 : index
    %68 = vector.load %arg9[%c2_96, %c0_97, %c0_98] : memref<18x18x128xbf16, #tpu.memory_space<vmem>>, vector<16x16x128xbf16>
    %69 = vector.shape_cast %68 : vector<16x16x128xbf16> to vector<256x128xbf16>
    %c0_99 = arith.constant 0 : index
    %c768_100 = arith.constant 768 : index
    %70 = vector.load %arg8[%c0_99, %c768_100] : memref<256x1152xbf16, #tpu.memory_space<vmem>>, vector<256x128xbf16>
    tpu.vector_store %arg8[%c0_99, %c768_100], %69 {strides = array<i32>} : memref<256x1152xbf16, #tpu.memory_space<vmem>>, vector<256x128xbf16>,
    %c2_101 = arith.constant 2 : index
    %c1_102 = arith.constant 1 : index
    %c0_103 = arith.constant 0 : index
    %71 = vector.load %arg9[%c2_101, %c1_102, %c0_103] : memref<18x18x128xbf16, #tpu.memory_space<vmem>>, vector<16x16x128xbf16>
    %72 = vector.shape_cast %71 : vector<16x16x128xbf16> to vector<256x128xbf16>
    %c0_104 = arith.constant 0 : index
    %c896_105 = arith.constant 896 : index
    %73 = vector.load %arg8[%c0_104, %c896_105] : memref<256x1152xbf16, #tpu.memory_space<vmem>>, vector<256x128xbf16>
    tpu.vector_store %arg8[%c0_104, %c896_105], %72 {strides = array<i32>} : memref<256x1152xbf16, #tpu.memory_space<vmem>>, vector<256x128xbf16>,
    %c2_106 = arith.constant 2 : index
    %c2_107 = arith.constant 2 : index
    %c0_108 = arith.constant 0 : index
    %74 = vector.load %arg9[%c2_106, %c2_107, %c0_108] : memref<18x18x128xbf16, #tpu.memory_space<vmem>>, vector<16x16x128xbf16>
    %75 = vector.shape_cast %74 : vector<16x16x128xbf16> to vector<256x128xbf16>
    %c0_109 = arith.constant 0 : index
    %c1024_110 = arith.constant 1024 : index
    %76 = vector.load %arg8[%c0_109, %c1024_110] : memref<256x1152xbf16, #tpu.memory_space<vmem>>, vector<256x128xbf16>
    tpu.vector_store %arg8[%c0_109, %c1024_110], %75 {strides = array<i32>} : memref<256x1152xbf16, #tpu.memory_space<vmem>>, vector<256x128xbf16>,
    %c0_111 = arith.constant 0 : index
    %c0_112 = arith.constant 0 : index
    %77 = vector.load %arg8[%c0_111, %c0_112] : memref<256x1152xbf16, #tpu.memory_space<vmem>>, vector<256x1152xbf16>
    %c0_113 = arith.constant 0 : index
    %c0_114 = arith.constant 0 : index
    %78 = vector.load %arg3[%c0_113, %c0_114] : memref<1152x128xbf16, #tpu.memory_space<vmem>>, vector<1152x128xbf16>
    %cst_115 = arith.constant dense<0.000000e+00> : vector<256x128xf32>
    %79 = tpu.matmul %77, %78, %cst_115 {dimension_numbers = #tpu.dot_dimension_numbers<[1], [0], [0], [1], [0, 0, 1, 1], [], []>} : vector<256x1152xbf16>, vector<1152x128xbf16>, vector<256x128xf32> -> vector<256x128xf32>
    %c0_116 = arith.constant 0 : index
    %c1_117 = arith.constant 1 : index
    %c1_118 = arith.constant 1 : index
    %c0_119 = arith.constant 0 : index
    %80 = vector.load %arg1[%c0_116, %c1_117, %c1_118, %c0_119] : memref<1x18x18x128xf32, #tpu.memory_space<vmem>>, vector<1x16x16x128xf32>
    %81 = vector.shape_cast %80 : vector<1x16x16x128xf32> to vector<16x16x128xf32>
    %82 = vector.shape_cast %81 : vector<16x16x128xf32> to vector<256x128xf32>
    %c0_120 = arith.constant 0 : index
    %c0_121 = arith.constant 0 : index
    %83 = vector.load %arg5[%c0_120, %c0_121] : memref<1x128xf32, #tpu.memory_space<vmem>>, vector<1x128xf32>
    %84 = vector.broadcast %83 : vector<1x128xf32> to vector<256x128xf32>
    %85 = arith.addf %79, %84 : vector<256x128xf32>
    %86 = arith.addf %85, %82 : vector<256x128xf32>
    %cst_122 = arith.constant 0.000000e+00 : f32
    %87 = vector.broadcast %cst_122 : f32 to vector<256x128xf32>
    %88 = arith.maximumf %86, %87 : vector<256x128xf32>
    %89 = vector.shape_cast %88 : vector<256x128xf32> to vector<1x16x16x128xf32>
    %c0_123 = arith.constant 0 : index
    %c0_124 = arith.constant 0 : index
    %c0_125 = arith.constant 0 : index
    %c0_126 = arith.constant 0 : index
    %90 = vector.load %arg6[%c0_123, %c0_124, %c0_125, %c0_126] : memref<1x16x16x128xf32, #tpu.memory_space<vmem>>, vector<1x16x16x128xf32>
    tpu.vector_store %arg6[%c0_123, %c0_124, %c0_125, %c0_126], %89 {strides = array<i32>} : memref<1x16x16x128xf32, #tpu.memory_space<vmem>>, vector<1x16x16x128xf32>,
    return
  }
  func.func @transform_0(%arg0: i32) -> (i32, i32, i32, i32) {
    %c0_i32 = arith.constant 0 : i32
    %c0_i32_0 = arith.constant 0 : i32
    %c0_i32_1 = arith.constant 0 : i32
    %c0_i32_2 = arith.constant 0 : i32
    return %arg0, %c0_i32, %c0_i32_0, %c0_i32_1 : i32, i32, i32, i32
  }
  func.func @transform_1(%arg0: i32) -> (i32, i32) {
    %c0_i32 = arith.constant 0 : i32
    %c0_i32_0 = arith.constant 0 : i32
    %c0_i32_1 = arith.constant 0 : i32
    return %c0_i32, %c0_i32_0 : i32, i32
  }
  func.func @transform_2(%arg0: i32) -> (i32, i32) {
    %c0_i32 = arith.constant 0 : i32
    %c0_i32_0 = arith.constant 0 : i32
    %c0_i32_1 = arith.constant 0 : i32
    return %c0_i32, %c0_i32_0 : i32, i32
  }
  func.func @transform_3(%arg0: i32) -> (i32, i32) {
    %c0_i32 = arith.constant 0 : i32
    %c0_i32_0 = arith.constant 0 : i32
    %c0_i32_1 = arith.constant 0 : i32
    return %c0_i32, %c0_i32_0 : i32, i32
  }
  func.func @transform_4(%arg0: i32) -> (i32, i32) {
    %c0_i32 = arith.constant 0 : i32
    %c0_i32_0 = arith.constant 0 : i32
    %c0_i32_1 = arith.constant 0 : i32
    return %c0_i32, %c0_i32_0 : i32, i32
  }
  func.func @transform_5(%arg0: i32) -> (i32, i32, i32, i32) {
    %c0_i32 = arith.constant 0 : i32
    %c0_i32_0 = arith.constant 0 : i32
    %c0_i32_1 = arith.constant 0 : i32
    %c0_i32_2 = arith.constant 0 : i32
    return %arg0, %c0_i32, %c0_i32_0, %c0_i32_1 : i32, i32, i32, i32
  }
}

</mosaic_0001>

<bundles_post_ra>
// kernel: basic_block_forward.1
= control target key start
LH: loop header
LB: loop body
LE: loop exit
PB: predicated region body
PF: predicated region fallthrough
CT: control target
= control target key end

     0   :  { %s12290_s18 = smov 0   ;;  %s15502_s0 = inlined_call_operand.vmem [shape: f32[2,18,18,128], index: 0, kind: input, shape index: {}]   ;;  %s15503_s1 = inlined_call_operand.vmem [shape: bf16[1152,128], index: 1, kind: input, shape index: {}]   ;;  %s15504_s2 = inlined_call_operand.vmem [shape: bf16[1152,128], index: 2, kind: input, shape index: {}]   ;;  %s15505_s3 = inlined_call_operand.vmem [shape: f32[1,128], index: 3, kind: input, shape index: {}]   ;;  %s15506_s4 = inlined_call_operand.vmem [shape: f32[1,128], index: 4, kind: input, shape index: {}]   ;;  %s15507_s5 = inlined_call_operand.vmem [shape: f32[2,16,16,128], index: 5, kind: output, shape index: {}]  }
   0x1 LB: > { %s10162_s19 = sadd.s32 4294967295, %s12257_s18   ;;  %p10166_p0 = scmp.ge.s32.totalorder %s12257_s18, 1  ;;  %s12257_s18 = sphi %s12290_s18, %s15_s18  }
   0x2   : > { %p187_p1 = scmp.lt.s32.totalorder %s12257_s18, 3 }
   0x4   : > { %p188_p2 = pnand %p10166_p0, %p187_p1 }
   0x6   : > { %191 = sbr.rel (%p188_p2) target bundleno = 1196 (0x4ac), region = 40 }
   0xd   : > { %v12010_v0 = vld [vmem:[%s15503_s1 + $0x40] sm:$0xff]   ;;  %v12014_v4 = vld [vmem:[%s15503_s1 + $0x48] sm:$0xff]   ;;  %v12018_v8 = vld [vmem:[%s15503_s1 + $0x50] sm:$0xff]   ;;  %p215_p3 = scmp.lt.s32.totalorder %s10162_s19, 1  ;;  %vm1323_vm0 = vcmask 1042432   ;;  %vm1324_vm1 = vcmask 1046532  }
   0xe   : > { %v12011_v1 = vld [vmem:[%s15503_s1] sm:$0xff]   ;;  %10960 = vmatprep.subr.bf16.mxu0 %v12010_v0  ;;  %v12015_v5 = vld [vmem:[%s15503_s1 + $0x8] sm:$0xff]   ;;  %v12019_v9 = vld [vmem:[%s15503_s1 + $0x10] sm:$0xff]   ;;  %vm760_vm2 = vsmask.f32 3328  ;;  %vm4980_vm6 = vcmask 1040384  }
   0xf   : > { %v12012_v2 = vld [vmem:[%s15503_s1 + $0xc0] sm:$0xff]   ;;  %10961 = vmatpush3.bf16.msra.mxu0 %v12011_v1  ;;  %v12016_v6 = vld [vmem:[%s15503_s1 + $0xc8] sm:$0xff]   ;;  %v12020_v10 = vld [vmem:[%s15503_s1 + $0xd0] sm:$0xff]   ;;  %s15639_s19 = smov (!%p215_p3, %s10162_s19), 1  ;;  %vm761_vm3 = vsmask.f32 7440 }
  0x10   : > { %v12013_v3 = vld [vmem:[%s15503_s1 + $0x80] sm:$0xff]   ;;  %11072 = vmatprep.subr.bf16.mxu1 %v12012_v2  ;;  %10962 = vmatprep.subr.bf16.mxu0 %v12014_v4  ;;  %v12017_v7 = vld [vmem:[%s15503_s1 + $0x88] sm:$0xff]   ;;  %v12021_v11 = vld [vmem:[%s15503_s1 + $0x90] sm:$0xff]   ;;  %s12000_s24 = smul.u32 432, %s15639_s19  ;;  %vm4981_vm7 = vsmask.f32 256 }
  0x11   : > { %11073 = vmatpush3.bf16.msra.mxu1 %v12013_v3  ;;  %v12022_v12 = vld [vmem:[%s15503_s1 + $0x58] sm:$0xff]   ;;  %v12026_v16 = vld [vmem:[%s15503_s1 + $0x60] sm:$0xff]   ;;  %v12030_v20 = vld [vmem:[%s15503_s1 + $0x68] sm:$0xff]   ;;  %vm5031_vm9 = vsmask.f32 7938  ;;  %vm5499_vm11 = vcmask 1043456  }
  0x12   : > { %11074 = vmatprep.subr.bf16.mxu1 %v12016_v6  ;;  %v12023_v13 = vld [vmem:[%s15503_s1 + $0x18] sm:$0xff]   ;;  %v12027_v17 = vld [vmem:[%s15503_s1 + $0x20] sm:$0xff]   ;;  %v12031_v21 = vld [vmem:[%s15503_s1 + $0x28] sm:$0xff]   ;;  %s12395_s10 = scalar_lea.vmem %s15502_s0, %s12000_s24  ;;  %vm5177_vm12 = vsmask.f32 4368  ;;  %s10820_s29 = sshll.u32 %s15639_s19, 8 }
  0x13   : > { %10963 = vmatpush3.bf16.msra.mxu0 %v12015_v5  ;;  %v12024_v14 = vld [vmem:[%s15503_s1 + $0xd8] sm:$0xff]   ;;  %v12028_v18 = vld [vmem:[%s15503_s1 + $0xe0] sm:$0xff]   ;;  %v12032_v22 = vld [vmem:[%s15503_s1 + $0xe8] sm:$0xff]   ;;  %s15408_s19 = scalar_lea.vmem %s15507_s5, %s10820_s29 }
  0x14   : > { %10964 = vmatprep.subr.bf16.mxu0 %v12018_v8  ;;  %v12025_v15 = vld [vmem:[%s15503_s1 + $0x98] sm:$0xff]   ;;  %v12029_v19 = vld [vmem:[%s15503_s1 + $0xa0] sm:$0xff]   ;;  %v12033_v23 = vld [vmem:[%s15503_s1 + $0xa8] sm:$0xff]  }
  0x15   : > { %11075 = vmatpush3.bf16.msra.mxu1 %v12017_v7  ;;  %v12034_v24 = vld [vmem:[%s15503_s1 + $0x70] sm:$0xff]   ;;  %v12038_v28 = vld [vmem:[%s15503_s1 + $0x78] sm:$0xff]   ;;  %v226_v31 = vld [vmem:[%s12395_s10] sm:$0xff] }
  0x16   : > { %11076 = vmatprep.subr.bf16.mxu1 %v12020_v10  ;;  %v12035_v25 = vld [vmem:[%s15503_s1 + $0x30] sm:$0xff]   ;;  %v12039_v29 = vld [vmem:[%s15503_s1 + $0x38] sm:$0xff]   ;;  %v227_v32 = vld [vmem:[%s12395_s10 + $0x8] sm:$0xff] }
  0x17   : > { %10965 = vmatpush3.bf16.msra.mxu0 %v12019_v9  ;;  %v12036_v26 = vld [vmem:[%s15503_s1 + $0xf0] sm:$0xff]   ;;  %v12040_v30 = vld [vmem:[%s15503_s1 + $0xf8] sm:$0xff]   ;;  %v10910_v35 = vpack.c.bf16 %v227_v32, %v226_v31  ;;  %v12043_v37 = vld [vmem:[%s15503_s1 + $0x140] sm:$0xff]  }
  0x18   : > { %10966 = vmatprep.subr.bf16.mxu0 %v12022_v12  ;;  %v12037_v27 = vld [vmem:[%s15503_s1 + $0xb0] sm:$0xff]   ;;  %v12041_v36 = vld [vmem:[%s15503_s1 + $0xb8] sm:$0xff]   ;;  %v230_v39 = vld [vmem:[%s12395_s10 + $0x20] sm:$0xff] }
  0x19   : > { %11077 = vmatpush3.bf16.msra.mxu1 %v12021_v11  ;;  %v228_v33 = vld [vmem:[%s12395_s10 + $0x10] sm:$0x3]  ;;  %10911 = vst [vmem:[#allocation2] sm:$0xff] %v10910_v35   ;;  %v229_v38 = vld [vmem:[%s12395_s10 + $0x18] sm:$0xff]  ;;  %v10825_v41 = vpack.c.bf16 %v230_v39, %v230_v39  ;;  %v231_v42 = vld [vmem:[%s12395_s10 + $0x28] sm:$0x3] }
  0x1a   : > { %11078 = vmatprep.subr.bf16.mxu1 %v12024_v14  ;;  %v10823_v34 = vpack.c.bf16 %v228_v33, %v228_v33  ;;  %v10824_v40 = vpack.c.bf16 %v229_v38, %v229_v38  ;;  %v232_v43 = vld [vmem:[%s12395_s10 + $0x30] sm:$0xff]  ;;  %v10826_v44 = vpack.c.bf16 %v231_v42, %v231_v42  ;;  %v233_v45 = vld [vmem:[%s12395_s10 + $0x38] sm:$0xff]  ;;  %v234_v46 = vld [vmem:[%s12395_s10 + $0x40] sm:$0x3]  ;;  %v15512_v14 = vmov 0 }
  0x1b   : > { %10967 = vmatpush3.bf16.msra.mxu0 %v12023_v13  ;;  %518 = vst [vmem:[#allocation2 + $0x10] sm:$0xf] %v10825_v41  ;;  %v10915_v47 = vpack.c.bf16 %v233_v45, %v232_v43  ;;  %v10829_v48 = vpack.c.bf16 %v234_v46, %v234_v46  ;;  %v235_v49 = vld [vmem:[%s12395_s10 + $0x48] sm:$0xff]  ;;  %v236_v50 = vld [vmem:[%s12395_s10 + $0x50] sm:$0xff]  ;;  %v237_v53 = vld [vmem:[%s12395_s10 + $0x58] sm:$0x3] }
  0x1c   : > { %10968 = vmatprep.subr.bf16.mxu0 %v12026_v16  ;;  %516 = vst [vmem:[#allocation2 + $0x8] sm:$0x1] %v10823_v34  ;;  %517 = vst [vmem:[#allocation2 + $0xc] sm:$0xf] %v10824_v40  ;;  %v10830_v51 = vpack.c.bf16 %v235_v49, %v235_v49  ;;  %v10831_v52 = vpack.c.bf16 %v236_v50, %v236_v50  ;;  %v10832_v57 = vpack.c.bf16 %v237_v53, %v237_v53  ;;  %v12051_v50 = vld [vmem:[%s15503_s1 + $0x108] sm:$0xff]  }
  0x1d   : > { %11079 = vmatpush3.bf16.msra.mxu1 %v12025_v15  ;;  %519 = vst [vmem:[#allocation2 + $0x14] sm:$0x1] %v10826_v44  ;;  %10952 = vst [vmem:[#allocation2 + $0x18] sm:$0xff] %v10915_v47   ;;  %v12049_v44 = vld [vmem:[%s15503_s1 + $0x148] sm:$0xff]  }
  0x1e   : > { %11080 = vmatprep.subr.bf16.mxu1 %v12028_v18  ;;  %522 = vst [vmem:[#allocation2 + $0x20] sm:$0x1] %v10829_v48  ;;  %523 = vst [vmem:[#allocation2 + $0x24] sm:$0xf] %v10830_v51 }
  0x1f   : > { %10969 = vmatpush3.bf16.msra.mxu0 %v12027_v17  ;;  %524 = vst [vmem:[#allocation2 + $0x28] sm:$0xf] %v10831_v52  ;;  %525 = vst [vmem:[#allocation2 + $0x2c] sm:$0x1] %v10832_v57 }
  0x20   : > { %10970 = vmatprep.subr.bf16.mxu0 %v12030_v20  ;;  %v712_v54 = vld [vmem:[#allocation2] sm:$0xf]  ;;  %v713_v55 = vld [vmem:[#allocation2 + $0x4] sm:$0xf]  ;;  %vm12423_vm4 = vmor %vm1323_vm0, %vm1324_vm1 }
  0x21   : > { %11081 = vmatpush3.bf16.msra.mxu1 %v12029_v19  ;;  %v764_v58 = vshrl.u32 %v712_v54, 16  ;;  %v767_v59 = vshll.u32 %v712_v54, 16  ;;  %v773_v60 = vshll.u32 %v713_v55, 16  ;;  %v777_v61 = vshrl.u32 %v713_v55, 16  ;;  %v1227_v63 = vld [vmem:[#allocation2] sm:$0xe]  ;;  %vm12429_vm5 = vmor %vm760_vm2, %vm761_vm3 }
  0x22   : > { %11082 = vmatprep.subr.bf16.mxu1 %v12032_v22  ;;  %v1228_v7 = vld [vmem:[#allocation2 + $0x4] sm:$0xf]  ;;  %v10256_v11 = vrot.slane %v1227_v63, 9  ;;  %v15513_v14 = vsel %vm12429_vm5, 4294967295, %v15512_v14  ;;  %v716_v16 = vld [vmem:[#allocation2 + $0x10] sm:$0xf]  ;;  %vm13759_vm8 = vmand %vm4980_vm6, %vm4981_vm7 }
  0x23   : > { %10971 = vmatpush3.bf16.msra.mxu0 %v12031_v21  ;;  %v714_v56 = vld [vmem:[#allocation2 + $0x8] sm:$0x1]  ;;  %v766_v0 = vrot.slane %v764_v58, 4  ;;  %v769_v1 = vrot.slane %v767_v59, 5  ;;  %v775_v2 = vrot.slane %v773_v60, 5  ;;  %v779_v3 = vrot.slane %v777_v61, 4  ;;  %vm13770_vm10 = vmand %vm4980_vm6, %vm5031_vm9 }
  0x24   : > { %10972 = vmatprep.subr.bf16.mxu0 %v12034_v24  ;;  %v783_v62 = vshll.u32 %v714_v56, 16  ;;  %v12044_v6 = vld [vmem:[#allocation2 + $0xc] sm:$0xff]   ;;  %v1229_v10 = vld [vmem:[#allocation2 + $0x8] sm:$0x1]  ;;  %v1328_v12 = vrot.slane %v1228_v7, 5  ;;  %15514 = vst [vmem:[#allocation5_spill] sm:$0xff] %v15513_v14  ;;  %vm13994_vm13 = vmand %vm5499_vm11, %vm5031_vm9 }
  0x25   : > { %11083 = vmatpush3.bf16.msra.mxu1 %v12033_v23  ;;  %v770_v8 = vor.u32 %v769_v1, %v766_v0  ;;  %v780_v9 = vor.u32 %v779_v3, %v775_v2  ;;  %v715_v13 = vld [vmem:[#allocation2 + $0xc] sm:$0xf]  ;;  %4328 = vmatprep.mubr.bf16.mxu1 %v12044_v6  ;;  %v1331_v15 = vrot.slane %v1229_v10, 5  ;;  %v717_v17 = vld [vmem:[#allocation2 + $0x14] sm:$0x1]  ;;  %v12042_v21 = vld [vmem:[#allocation2] sm:$0xff]  }
  0x26   : > { %11084 = vmatprep.subr.bf16.mxu1 %v12036_v26  ;;  %v785_v5 = vrot.slane %v783_v62, 5  ;;  %v788_v18 = vshrl.u32 %v715_v13, 16  ;;  %v1329_v22 = vsel %vm12423_vm4, %v10256_v11, %v1328_v12  ;;  %v1330_v23 = vrot.slane %v1328_v12, 4  ;;  %v12045_v24 = vld [vmem:[%s15503_s1 + $0x100] sm:$0xff]   ;;  %v12047_v33 = vld [vmem:[#allocation2 + $0x18] sm:$0xff]   ;;  %v12046_v61 = vld [vmem:[#allocation2 + $0xc] sm:$0xff]  }
  0x27   : > { %10973 = vmatpush3.bf16.msra.mxu0 %v12035_v25  ;;  %v771_v19 = vrot.slane %v770_v8, 4  ;;  %v781_v20 = vrot.slane %v780_v9, 4  ;;  %v791_v26 = vshll.u32 %v715_v13, 16  ;;  %v807_v32 = vshll.u32 %v717_v17, 16  ;;  %v1230_v38 = vld [vmem:[#allocation2 + $0xc] sm:$0xe]  ;;  %vm14001_vm14 = vmor %vm4981_vm7, %vm5177_vm12 }
  0x28   : > { %10974 = vmatprep.subr.bf16.mxu0 %v12038_v28  ;;  %v790_v25 = vrot.slane %v788_v18, 4  ;;  %v801_v28 = vshrl.u32 %v716_v16, 16  ;;  %v1332_v31 = vsel %vm12423_vm4, %v1330_v23, %v1331_v15  ;;  %v1231_v39 = vld [vmem:[#allocation2 + $0x10] sm:$0xf]  ;;  %v1232_v41 = vld [vmem:[#allocation2 + $0x14] sm:$0x1] }
  0x29   : > { %11085 = vmatpush3.bf16.msra.mxu1 %v12037_v27  ;;  %v797_v27 = vshll.u32 %v716_v16, 16  ;;  %v10272_v35 = vcombine.low %v1329_v22, %v1332_v31  ;;  %v10257_v42 = vrot.slane %v1230_v38, 9  ;;  %v1335_v43 = vrot.slane %v1231_v39, 5  ;;  %v718_v48 = vld [vmem:[#allocation2 + $0x18] sm:$0xf]  ;;  %v12050_v1 = vld [vmem:[#allocation2 + $0x24] sm:$0xff]  }
  0x2a   : > { %11086 = vmatprep.subr.bf16.mxu1 %v12040_v30  ;;  %v786_v30 = vsel %vm12429_vm5, %v781_v20, %v785_v5  ;;  %v803_v40 = vrot.slane %v801_v28, 4  ;;  %v809_v46 = vrot.slane %v807_v32, 5  ;;  %v1338_v47 = vrot.slane %v1232_v41, 5  ;;  %v719_v49 = vld [vmem:[#allocation2 + $0x1c] sm:$0xf] }
  0x2b   : > { %10975 = vmatpush3.bf16.msra.mxu0 %v12039_v29  ;;  %v776_v29 = vsel %vm12429_vm5, %v771_v19, %v775_v2  ;;  %v1336_v52 = vsel %vm12423_vm4, %v10257_v42, %v1335_v43  ;;  %v1337_v53 = vrot.slane %v1335_v43, 4  ;;  %v720_v54 = vld [vmem:[#allocation2 + $0x20] sm:$0x1]  ;;  %v812_v55 = vshrl.u32 %v718_v48, 16  ;;  %v1233_v7 = vld [vmem:[#allocation2 + $0x18] sm:$0xe] }
  0x2c   : > { %11184 = vmatprep.subr.bf16.mxu0 %v12043_v37  ;;  %v10240_v34 = vcombine.low %v776_v29, %v786_v30  ;;  %v799_v37 = vrot.slane %v797_v27, 5  ;;  %v815_v57 = vshll.u32 %v718_v48, 16  ;;  %v821_v58 = vshll.u32 %v719_v49, 16  ;;  %v1234_v11 = vld [vmem:[#allocation2 + $0x1c] sm:$0xf]  ;;  %v239_v30 = vld [vmem:[%s12395_s10 + $0x68] sm:$0xff] }
  0x2d   : > { %11087 = vmatpush3.bf16.msra.mxu1 %v12041_v36  ;;  %v793_v36 = vrot.slane %v791_v26, 5  ;;  %v825_v59 = vshrl.u32 %v719_v49, 16  ;;  %v1339_v62 = vsel %vm12423_vm4, %v1337_v53, %v1338_v47  ;;  %v814_v63 = vrot.slane %v812_v55, 4  ;;  %v1235_v12 = vld [vmem:[#allocation2 + $0x20] sm:$0x1]  ;;  %v12048_v42 = vld [vmem:[#allocation2 + $0x18] sm:$0xff]  }
  0x2e   : > { %4167 = vmatprep.mubr.bf16.mxu0 %v10240_v34  ;;  %v804_v51 = vor.u32 %v803_v40, %v799_v37  ;;  %v831_v0 = vshll.u32 %v720_v54, 16  ;;  %v10273_v3 = vcombine.low %v1336_v52, %v1339_v62  ;;  %v817_v5 = vrot.slane %v815_v57, 5  ;;  %v721_v18 = vld [vmem:[#allocation2 + $0x24] sm:$0xf]  ;;  %v722_v19 = vld [vmem:[#allocation2 + $0x28] sm:$0xf] }
  0x2f   : > { %v794_v45 = vor.u32 %v793_v36, %v790_v25  ;;  %4168 = vmatmul.mubr.bf16.vlgmr.msra.gmra.mrb[0].mxu0 %v12042_v21  ;;  %v823_v6 = vrot.slane %v821_v58, 5  ;;  %v827_v9 = vrot.slane %v825_v59, 4  ;;  %v10258_v16 = vrot.slane %v1233_v7, 9  ;;  %v723_v22 = vld [vmem:[#allocation2 + $0x2c] sm:$0x1]  ;;  %v238_v25 = vld [vmem:[%s12395_s10 + $0x60] sm:$0xff] }
  0x30   : > { %4329 = vmatmul.mubr.bf16.vlgmr.msra.gmra.mrb[0].mxu1 %v10272_v35  ;;  %11185 = vmatpush3.bf16.msra.mxu0 %v12045_v24  ;;  %v805_v60 = vrot.slane %v804_v51, 4  ;;  %v833_v10 = vrot.slane %v831_v0, 5  ;;  %v818_v15 = vor.u32 %v817_v5, %v814_v63  ;;  %v1342_v17 = vrot.slane %v1234_v11, 5  ;;  %v1236_v39 = vld [vmem:[#allocation2 + $0x24] sm:$0xe]  ;;  %v12055_v48 = vld [vmem:[%s15503_s1 + $0x150] sm:$0xff]  }
  0x31   : > { %4336 = vmatprep.mubr.bf16.mxu1 %v12047_v33  ;;  %v795_v56 = vrot.slane %v794_v45, 4  ;;  %11186 = vmatprep.subr.bf16.mxu0 %v12049_v44  ;;  %v828_v20 = vor.u32 %v827_v9, %v823_v6  ;;  %v1345_v21 = vrot.slane %v1235_v12, 5  ;;  %v836_v23 = vshrl.u32 %v721_v18, 16  ;;  %v1237_v40 = vld [vmem:[#allocation2 + $0x28] sm:$0xf]  ;;  %v241_v57 = vld [vmem:[%s12395_s10 + $0x78] sm:$0xff] }
  0x32   : > { %v810_v8 = vsel %vm12429_vm5, %v805_v60, %v809_v46  ;;  %v839_v24 = vshll.u32 %v721_v18, 16  ;;  %v819_v26 = vrot.slane %v818_v15, 4  ;;  %v1343_v27 = vsel %vm12423_vm4, %v10258_v16, %v1342_v17  ;;  %v1238_v46 = vld [vmem:[#allocation2 + $0x2c] sm:$0x1]  ;;  %v240_v47 = vld [vmem:[%s12395_s10 + $0x70] sm:$0x3] }
  0x33   : > { %v800_v2 = vsel %vm12429_vm5, %v795_v56, %v799_v37  ;;  %v1344_v28 = vrot.slane %v1342_v17, 4  ;;  %v845_v29 = vshll.u32 %v722_v19, 16  ;;  %v829_v31 = vrot.slane %v828_v20, 4  ;;  %v242_v58 = vld [vmem:[%s12395_s10 + $0x80] sm:$0xff]  ;;  %v12057_v59 = vld [vmem:[%s15503_s1 + $0x110] sm:$0xff]   ;;  %v245_v5 = vld [vmem:[%s12395_s10 + $0x98] sm:$0xff] }
  0x34   : > { %v10241_v13 = vcombine.low %v800_v2, %v810_v8  ;;  %11187 = vmatpush3.bf16.msra.mxu0 %v12051_v50  ;;  %v838_v32 = vrot.slane %v836_v23, 4  ;;  %v841_v33 = vrot.slane %v839_v24, 5  ;;  %v849_v34 = vshrl.u32 %v722_v19, 16  ;;  %v243_v63 = vld [vmem:[%s12395_s10 + $0x88] sm:$0x3]  ;;  %v248_v16 = vld [vmem:[%s12395_s10 + $0xb0] sm:$0xff] }
  0x35   : > { %v824_v35 = vsel %vm12429_vm5, %v819_v26, %v823_v6  ;;  %v1346_v36 = vsel %vm12423_vm4, %v1344_v28, %v1345_v21  ;;  %v847_v37 = vrot.slane %v845_v29, 5  ;;  %v855_v38 = vshll.u32 %v723_v22, 16  ;;  %11188 = vmatprep.subr.bf16.mxu0 %v12055_v48  ;;  %v246_v6 = vld [vmem:[%s12395_s10 + $0xa0] sm:$0x3]  ;;  %v247_v15 = vld [vmem:[%s12395_s10 + $0xa8] sm:$0xff]  ;;  %v12063_v20 = vld [vmem:[%s15503_s1 + $0x118] sm:$0xff]  }
  0x36   : > { %4175 = vmatprep.mubr.bf16.mxu0 %v10241_v13  ;;  %v834_v41 = vsel %vm12429_vm5, %v829_v31, %v833_v10  ;;  %v10274_v43 = vcombine.low %v1343_v27, %v1346_v36  ;;  %v842_v44 = vor.u32 %v841_v33, %v838_v32  ;;  %v851_v45 = vrot.slane %v849_v34, 4  ;;  %v12061_v10 = vld [vmem:[%s15503_s1 + $0x158] sm:$0xff]   ;;  %v12052_v22 = vld [vmem:[#allocation2 + $0x24] sm:$0xff]   ;;  %v252_v26 = vld [vmem:[%s12395_s10 + $0xd0] sm:$0x3] }
  0x37   : > { %4176 = vmatmul.mubr.bf16.gmra.mrb[4].mxu0 %v12046_v61  ;;  %v10242_v49 = vcombine.low %v824_v35, %v834_v41  ;;  %v857_v50 = vrot.slane %v855_v38, 5  ;;  %v10920_v51 = vpack.c.bf16 %v239_v30, %v238_v25  ;;  %v10259_v52 = vrot.slane %v1236_v39, 9  ;;  %v249_v21 = vld [vmem:[%s12395_s10 + $0xb8] sm:$0x3]  ;;  %v250_v24 = vld [vmem:[%s12395_s10 + $0xc0] sm:$0xff]  ;;  %v251_v25 = vld [vmem:[%s12395_s10 + $0xc8] sm:$0xff] }
  0x38   : > { %4337 = vmatmul.mubr.bf16.gmra.mrb[4].mxu1 %v10273_v3  ;;  %v843_v53 = vrot.slane %v842_v44, 4  ;;  %v852_v54 = vor.u32 %v851_v45, %v847_v37  ;;  %v1349_v55 = vrot.slane %v1237_v40, 5  ;;  %v1352_v56 = vrot.slane %v1238_v46, 5  ;;  %11189 = vmatpush3.bf16.msra.mxu0 %v12057_v59  ;;  %v244_v3 = vld [vmem:[%s12395_s10 + $0x90] sm:$0xff]  ;;  %v12067_v30 = vld [vmem:[%s15503_s1 + $0x160] sm:$0xff]  }
  0x39   : > { %4344 = vmatprep.mubr.bf16.mxu1 %v12050_v1  ;;  %4183 = vmatprep.mubr.bf16.mxu0 %v10242_v49  ;;  %10953 = vst [vmem:[#allocation2 + $0x30] sm:$0xff] %v10920_v51   ;;  %v10835_v60 = vpack.c.bf16 %v240_v47, %v240_v47  ;;  %v10836_v61 = vpack.c.bf16 %v241_v57, %v241_v57 }
  0x3a   : > { %v10837_v62 = vpack.c.bf16 %v242_v58, %v242_v58  ;;  %v848_v0 = vsel %vm12429_vm5, %v843_v53, %v847_v37  ;;  %v853_v1 = vrot.slane %v852_v54, 4  ;;  %v1351_v2 = vrot.slane %v1349_v55, 4  ;;  %11190 = vmatprep.subr.bf16.mxu0 %v12061_v10 }
  0x3b   : > { %528 = vst [vmem:[#allocation2 + $0x38] sm:$0x1] %v10835_v60  ;;  %529 = vst [vmem:[#allocation2 + $0x3c] sm:$0xf] %v10836_v61  ;;  %v10838_v7 = vpack.c.bf16 %v243_v63, %v243_v63  ;;  %v10925_v8 = vpack.c.bf16 %v245_v5, %v244_v3  ;;  %v10841_v9 = vpack.c.bf16 %v246_v6, %v246_v6 }
  0x3c   : > { %530 = vst [vmem:[#allocation2 + $0x40] sm:$0xf] %v10837_v62  ;;  %v858_v11 = vsel %vm12429_vm5, %v853_v1, %v857_v50  ;;  %v1350_v12 = vsel %vm12423_vm4, %v10259_v52, %v1349_v55  ;;  %v1353_v13 = vsel %vm12423_vm4, %v1351_v2, %v1352_v56  ;;  %v10842_v18 = vpack.c.bf16 %v247_v15, %v247_v15 }
  0x3d   : > { %v10243_v17 = vcombine.low %v848_v0, %v858_v11  ;;  %531 = vst [vmem:[#allocation2 + $0x44] sm:$0x1] %v10838_v7  ;;  %10954 = vst [vmem:[#allocation2 + $0x48] sm:$0xff] %v10925_v8   ;;  %v10843_v19 = vpack.c.bf16 %v248_v16, %v248_v16  ;;  %v10844_v23 = vpack.c.bf16 %v249_v21, %v249_v21  ;;  %11191 = vmatpush3.bf16.msra.mxu0 %v12063_v20 }
  0x3e   : > { %534 = vst [vmem:[#allocation2 + $0x50] sm:$0x1] %v10841_v9  ;;  %v10275_v27 = vcombine.low %v1350_v12, %v1353_v13  ;;  %535 = vst [vmem:[#allocation2 + $0x54] sm:$0xf] %v10842_v18  ;;  %v10930_v28 = vpack.c.bf16 %v251_v25, %v250_v24  ;;  %v10847_v29 = vpack.c.bf16 %v252_v26, %v252_v26  ;;  %11192 = vmatprep.subr.bf16.mxu0 %v12067_v30 }
  0x3f   : > { %4184 = vmatmul.mubr.bf16.gmra.mrb[8].mxu0 %v12048_v42  ;;  %536 = vst [vmem:[#allocation2 + $0x58] sm:$0xf] %v10843_v19  ;;  %537 = vst [vmem:[#allocation2 + $0x5c] sm:$0x1] %v10844_v23 }
  0x40   : > { %4345 = vmatmul.mubr.bf16.gmra.mrb[8].mxu1 %v10274_v43  ;;  %4191 = vmatprep.mubr.bf16.mxu0 %v10243_v17  ;;  %v12053_v31 = vld [vmem:[#allocation2 + $0x30] sm:$0xff]   ;;  %10955 = vst [vmem:[#allocation2 + $0x60] sm:$0xff] %v10930_v28   ;;  %540 = vst [vmem:[#allocation2 + $0x68] sm:$0x1] %v10847_v29 }
  0x41   : > { %v724_v32 = vld [vmem:[#allocation2 + $0x30] sm:$0xf]  ;;  %v725_v33 = vld [vmem:[#allocation2 + $0x34] sm:$0xf]  ;;  %4352 = vmatprep.mubr.bf16.mxu1 %v12053_v31 }
  0x42   : > { %v726_v34 = vld [vmem:[#allocation2 + $0x38] sm:$0x1]  ;;  %v860_v35 = vshrl.u32 %v724_v32, 16  ;;  %v863_v36 = vshll.u32 %v724_v32, 16  ;;  %v869_v37 = vshll.u32 %v725_v33, 16  ;;  %v873_v38 = vshrl.u32 %v725_v33, 16 }
  0x43   : > { %v879_v39 = vshll.u32 %v726_v34, 16  ;;  %v12056_v45 = vld [vmem:[#allocation2 + $0x3c] sm:$0xff]   ;;  %v1239_v46 = vld [vmem:[#allocation2 + $0x30] sm:$0xe]  ;;  %v1240_v47 = vld [vmem:[#allocation2 + $0x34] sm:$0xf] }
  0x44   : > { %v862_v40 = vrot.slane %v860_v35, 4  ;;  %v865_v41 = vrot.slane %v863_v36, 5  ;;  %v871_v42 = vrot.slane %v869_v37, 5  ;;  %v875_v43 = vrot.slane %v873_v38, 4  ;;  %v1241_v50 = vld [vmem:[#allocation2 + $0x38] sm:$0x1] }
  0x45   : > { %v881_v44 = vrot.slane %v879_v39, 5  ;;  %v10260_v51 = vrot.slane %v1239_v46, 9  ;;  %v1356_v52 = vrot.slane %v1240_v47, 5  ;;  %v727_v53 = vld [vmem:[#allocation2 + $0x3c] sm:$0xf]  ;;  %v1359_v54 = vrot.slane %v1241_v50, 5 }
  0x46   : > { %v866_v48 = vor.u32 %v865_v41, %v862_v40  ;;  %v876_v49 = vor.u32 %v875_v43, %v871_v42  ;;  %v728_v55 = vld [vmem:[#allocation2 + $0x40] sm:$0xf]  ;;  %v729_v56 = vld [vmem:[#allocation2 + $0x44] sm:$0x1]  ;;  %v884_v57 = vshrl.u32 %v727_v53, 16  ;;  %v12054_v60 = vld [vmem:[#allocation2 + $0x30] sm:$0xff]  }
  0x47   : > { %4192 = vmatmul.mubr.bf16.gmra.mrb[12].mxu0 %v12052_v22  ;;  %v1357_v61 = vsel %vm12423_vm4, %v10260_v51, %v1356_v52  ;;  %v1358_v62 = vrot.slane %v1356_v52, 4  ;;  %v887_v0 = vshll.u32 %v727_v53, 16  ;;  %v893_v1 = vshll.u32 %v728_v55, 16  ;;  %v12059_v8 = vld [vmem:[#allocation2 + $0x48] sm:$0xff]   ;;  %v1242_v13 = vld [vmem:[#allocation2 + $0x3c] sm:$0xe] }
  0x48   : > { %4353 = vmatmul.mubr.bf16.gmra.mrb[12].mxu1 %v10275_v27  ;;  %v867_v58 = vrot.slane %v866_v48, 4  ;;  %v877_v59 = vrot.slane %v876_v49, 4  ;;  %v886_v63 = vrot.slane %v884_v57, 4  ;;  %v897_v2 = vshrl.u32 %v728_v55, 16  ;;  %v1243_v15 = vld [vmem:[#allocation2 + $0x40] sm:$0xf] }
  0x49   : > { %4360 = vmatprep.mubr.bf16.mxu1 %v12056_v45  ;;  %v1360_v6 = vsel %vm12423_vm4, %v1358_v62, %v1359_v54  ;;  %v903_v7 = vshll.u32 %v729_v56, 16  ;;  %v889_v11 = vrot.slane %v887_v0, 5  ;;  %v895_v12 = vrot.slane %v893_v1, 5  ;;  %v1244_v17 = vld [vmem:[#allocation2 + $0x44] sm:$0x1]  ;;  %v12058_v35 = vld [vmem:[#allocation2 + $0x3c] sm:$0xff]  }
  0x4a   : > { %v872_v3 = vsel %vm12429_vm5, %v867_v58, %v871_v42  ;;  %v882_v5 = vsel %vm12429_vm5, %v877_v59, %v881_v44  ;;  %v10276_v10 = vcombine.low %v1357_v61, %v1360_v6  ;;  %v899_v16 = vrot.slane %v897_v2, 4  ;;  %v730_v23 = vld [vmem:[#allocation2 + $0x48] sm:$0xf]  ;;  %v731_v24 = vld [vmem:[#allocation2 + $0x4c] sm:$0xf]  ;;  %v12062_v39 = vld [vmem:[#allocation2 + $0x54] sm:$0xff]  }
  0x4b   : > { %v10244_v9 = vcombine.low %v872_v3, %v882_v5  ;;  %v10261_v18 = vrot.slane %v1242_v13, 9  ;;  %v1363_v19 = vrot.slane %v1243_v15, 5  ;;  %v890_v20 = vor.u32 %v889_v11, %v886_v63  ;;  %v732_v28 = vld [vmem:[#allocation2 + $0x50] sm:$0x1]  ;;  %v1245_v44 = vld [vmem:[#allocation2 + $0x48] sm:$0xe] }
  0x4c   : > { %v905_v21 = vrot.slane %v903_v7, 5  ;;  %v1366_v22 = vrot.slane %v1244_v17, 5  ;;  %v900_v25 = vor.u32 %v899_v16, %v895_v12  ;;  %v908_v29 = vshrl.u32 %v730_v23, 16  ;;  %v1246_v48 = vld [vmem:[#allocation2 + $0x4c] sm:$0xf]  ;;  %v12065_v16 = vld [vmem:[#allocation2 + $0x60] sm:$0xff]  }
  0x4d   : > { %4199 = vmatprep.mubr.bf16.mxu0 %v10244_v9  ;;  %v1364_v26 = vsel %vm12423_vm4, %v10261_v18, %v1363_v19  ;;  %v1365_v27 = vrot.slane %v1363_v19, 4  ;;  %v891_v30 = vrot.slane %v890_v20, 4  ;;  %v911_v31 = vshll.u32 %v730_v23, 16  ;;  %v1247_v49 = vld [vmem:[#allocation2 + $0x50] sm:$0x1]  ;;  %v12060_v11 = vld [vmem:[#allocation2 + $0x48] sm:$0xff]  }
  0x4e   : > { %v917_v32 = vshll.u32 %v731_v24, 16  ;;  %v921_v33 = vshrl.u32 %v731_v24, 16  ;;  %v901_v34 = vrot.slane %v900_v25, 4  ;;  %v910_v37 = vrot.slane %v908_v29, 4  ;;  %v733_v54 = vld [vmem:[#allocation2 + $0x54] sm:$0xf] }
  0x4f   : > { %4200 = vmatmul.mubr.bf16.gmra.mrb[16].mxu0 %v12054_v60  ;;  %v1367_v36 = vsel %vm12423_vm4, %v1365_v27, %v1366_v22  ;;  %v927_v38 = vshll.u32 %v732_v28, 16  ;;  %v896_v40 = vsel %vm12429_vm5, %v891_v30, %v895_v12  ;;  %v913_v42 = vrot.slane %v911_v31, 5  ;;  %v734_v55 = vld [vmem:[#allocation2 + $0x58] sm:$0xf]  ;;  %v735_v58 = vld [vmem:[#allocation2 + $0x5c] sm:$0x1] }
  0x50   : > { %4361 = vmatmul.mubr.bf16.gmra.mrb[16].mxu1 %v10276_v10  ;;  %v10277_v41 = vcombine.low %v1364_v26, %v1367_v36  ;;  %v919_v43 = vrot.slane %v917_v32, 5  ;;  %v906_v45 = vsel %vm12429_vm5, %v901_v34, %v905_v21  ;;  %v923_v46 = vrot.slane %v921_v33, 4  ;;  %v1248_v17 = vld [vmem:[#allocation2 + $0x54] sm:$0xe]  ;;  %v1249_v18 = vld [vmem:[#allocation2 + $0x58] sm:$0xf] }
  0x51   : > { %4368 = vmatprep.mubr.bf16.mxu1 %v12059_v8  ;;  %v929_v47 = vrot.slane %v927_v38, 5  ;;  %v10245_v50 = vcombine.low %v896_v40, %v906_v45  ;;  %v914_v51 = vor.u32 %v913_v42, %v910_v37  ;;  %v10262_v52 = vrot.slane %v1245_v44, 9  ;;  %v1250_v21 = vld [vmem:[#allocation2 + $0x5c] sm:$0x1]  ;;  %v736_v28 = vld [vmem:[#allocation2 + $0x60] sm:$0xf] }
  0x52   : > { %v1370_v53 = vrot.slane %v1246_v48, 5  ;;  %v924_v56 = vor.u32 %v923_v46, %v919_v43  ;;  %v1373_v57 = vrot.slane %v1247_v49, 5  ;;  %v932_v59 = vshrl.u32 %v733_v54, 16  ;;  %v253_v24 = vld [vmem:[%s12395_s10 + $0xd8] sm:$0xff]  ;;  %v737_v29 = vld [vmem:[#allocation2 + $0x64] sm:$0xf] }
  0x53   : > { %v935_v60 = vshll.u32 %v733_v54, 16  ;;  %4207 = vmatprep.mubr.bf16.mxu0 %v10245_v50  ;;  %v915_v61 = vrot.slane %v914_v51, 4  ;;  %v941_v0 = vshll.u32 %v734_v55, 16  ;;  %v945_v5 = vshrl.u32 %v734_v55, 16  ;;  %v738_v32 = vld [vmem:[#allocation2 + $0x68] sm:$0x1] }
  0x54   : > { %v1371_v62 = vsel %vm12423_vm4, %v10262_v52, %v1370_v53  ;;  %v1372_v63 = vrot.slane %v1370_v53, 4  ;;  %v925_v1 = vrot.slane %v924_v56, 4  ;;  %v934_v2 = vrot.slane %v932_v59, 4  ;;  %v12069_v40 = vld [vmem:[%s15503_s1 + $0x120] sm:$0xff]   ;;  %v256_v45 = vld [vmem:[%s12395_s10 + $0xf0] sm:$0xff]  ;;  %v257_v56 = vld [vmem:[%s12395_s10 + $0xf8] sm:$0xff] }
  0x55   : > { %v937_v3 = vrot.slane %v935_v60, 5  ;;  %v920_v6 = vsel %vm12429_vm5, %v915_v61, %v919_v43  ;;  %v943_v8 = vrot.slane %v941_v0, 5  ;;  %v951_v9 = vshll.u32 %v735_v58, 16  ;;  %11193 = vmatpush3.bf16.msra.mxu0 %v12069_v40  ;;  %v1251_v54 = vld [vmem:[#allocation2 + $0x60] sm:$0xe] }
  0x56   : > { %v1374_v7 = vsel %vm12423_vm4, %v1372_v63, %v1373_v57  ;;  %v930_v10 = vsel %vm12429_vm5, %v925_v1, %v929_v47  ;;  %v947_v15 = vrot.slane %v945_v5, 4  ;;  %v10263_v22 = vrot.slane %v1248_v17, 9  ;;  %v1252_v55 = vld [vmem:[#allocation2 + $0x64] sm:$0xf]  ;;  %v12064_v57 = vld [vmem:[#allocation2 + $0x54] sm:$0xff]  }
  0x57   : > { %4208 = vmatmul.mubr.bf16.gmra.mrb[20].mxu0 %v12058_v35  ;;  %v10278_v12 = vcombine.low %v1371_v62, %v1374_v7  ;;  %v938_v13 = vor.u32 %v937_v3, %v934_v2  ;;  %v10246_v19 = vcombine.low %v920_v6, %v930_v10  ;;  %v953_v20 = vrot.slane %v951_v9, 5  ;;  %v254_v35 = vld [vmem:[%s12395_s10 + $0xe0] sm:$0xff]  ;;  %v1253_v59 = vld [vmem:[#allocation2 + $0x68] sm:$0x1] }
  0x58   : > { %4369 = vmatmul.mubr.bf16.gmra.mrb[20].mxu1 %v10277_v41  ;;  %v1377_v23 = vrot.slane %v1249_v18, 5  ;;  %v948_v26 = vor.u32 %v947_v15, %v943_v8  ;;  %v1380_v27 = vrot.slane %v1250_v21, 5  ;;  %v10848_v30 = vpack.c.bf16 %v253_v24, %v253_v24  ;;  %v255_v62 = vld [vmem:[%s12395_s10 + $0xe8] sm:$0x3]  ;;  %v258_v5 = vld [vmem:[%s12395_s10 + $0x100] sm:$0x3] }
  0x59   : > { %4376 = vmatprep.mubr.bf16.mxu1 %v12062_v39  ;;  %v939_v25 = vrot.slane %v938_v13, 4  ;;  %4215 = vmatprep.mubr.bf16.mxu0 %v10246_v19  ;;  %v956_v33 = vshrl.u32 %v736_v28, 16  ;;  %v959_v34 = vshll.u32 %v736_v28, 16  ;;  %v965_v38 = vshll.u32 %v737_v29, 16  ;;  %v12073_v9 = vld [vmem:[%s15503_s1 + $0x168] sm:$0xff]   ;;  %v260_v19 = vld [vmem:[%s12395_s10 + $0x110] sm:$0xff] }
  0x5a   : > { %v1379_v31 = vrot.slane %v1377_v23, 4  ;;  %v949_v37 = vrot.slane %v948_v26, 4  ;;  %v969_v39 = vshrl.u32 %v737_v29, 16  ;;  %541 = vst [vmem:[#allocation2 + $0x6c] sm:$0xf] %v10848_v30  ;;  %v1378_v41 = vsel %vm12423_vm4, %v10263_v22, %v1377_v23  ;;  %v259_v10 = vld [vmem:[%s12395_s10 + $0x108] sm:$0xff]  ;;  %11194 = vmatprep.subr.bf16.mxu0 %v12073_v9 }
  0x5b   : > { %v944_v36 = vsel %vm12429_vm5, %v939_v25, %v943_v8  ;;  %v958_v42 = vrot.slane %v956_v33, 4  ;;  %v961_v43 = vrot.slane %v959_v34, 5  ;;  %v975_v44 = vshll.u32 %v738_v32, 16  ;;  %v262_v23 = vld [vmem:[%s12395_s10 + $0x120] sm:$0xff]  ;;  %v261_v28 = vld [vmem:[%s12395_s10 + $0x118] sm:$0x3] }
  0x5c   : > { %v954_v46 = vsel %vm12429_vm5, %v949_v37, %v953_v20  ;;  %v1381_v47 = vsel %vm12423_vm4, %v1379_v31, %v1380_v27  ;;  %v967_v48 = vrot.slane %v965_v38, 5  ;;  %v971_v49 = vrot.slane %v969_v39, 4  ;;  %v12075_v20 = vld [vmem:[%s15503_s1 + $0x128] sm:$0xff]   ;;  %v12079_v30 = vld [vmem:[%s15503_s1 + $0x170] sm:$0xff]   ;;  %v12066_v38 = vld [vmem:[#allocation2 + $0x60] sm:$0xff]  }
  0x5d   : > { %v10247_v50 = vcombine.low %v944_v36, %v954_v46  ;;  %v962_v51 = vor.u32 %v961_v43, %v958_v42  ;;  %v977_v52 = vrot.slane %v975_v44, 5  ;;  %v10849_v53 = vpack.c.bf16 %v254_v35, %v254_v35  ;;  %v263_v29 = vld [vmem:[%s12395_s10 + $0x128] sm:$0xff]  ;;  %11195 = vmatpush3.bf16.msra.mxu0 %v12075_v20  ;;  %v264_v33 = vld [vmem:[%s12395_s10 + $0x130] sm:$0x3] }
  0x5e   : > { %v972_v58 = vor.u32 %v971_v49, %v967_v48  ;;  %v10264_v60 = vrot.slane %v1251_v54, 9  ;;  %v1384_v61 = vrot.slane %v1252_v55, 5  ;;  %v10935_v63 = vpack.c.bf16 %v257_v56, %v256_v45  ;;  %11196 = vmatprep.subr.bf16.mxu0 %v12079_v30  ;;  %v265_v49 = vld [vmem:[%s12395_s10 + $0x138] sm:$0xff] }
  0x5f   : > { %4216 = vmatmul.mubr.bf16.gmra.mrb[24].mxu0 %v12060_v11  ;;  %v10279_v0 = vcombine.low %v1378_v41, %v1381_v47  ;;  %v963_v1 = vrot.slane %v962_v51, 4  ;;  %542 = vst [vmem:[#allocation2 + $0x70] sm:$0xf] %v10849_v53  ;;  %v1387_v2 = vrot.slane %v1253_v59, 5  ;;  %v10850_v3 = vpack.c.bf16 %v255_v62, %v255_v62 }
  0x60   : > { %4377 = vmatmul.mubr.bf16.gmra.mrb[24].mxu1 %v10278_v12  ;;  %4223 = vmatprep.mubr.bf16.mxu0 %v10247_v50  ;;  %v973_v6 = vrot.slane %v972_v58, 4  ;;  %v1386_v7 = vrot.slane %v1384_v61, 4  ;;  %10956 = vst [vmem:[#allocation2 + $0x78] sm:$0xff] %v10935_v63   ;;  %v10853_v8 = vpack.c.bf16 %v258_v5, %v258_v5  ;;  %v10854_v13 = vpack.c.bf16 %v259_v10, %v259_v10 }
  0x61   : > { %4384 = vmatprep.mubr.bf16.mxu1 %v12065_v16  ;;  %v968_v11 = vsel %vm12429_vm5, %v963_v1, %v967_v48  ;;  %543 = vst [vmem:[#allocation2 + $0x74] sm:$0x1] %v10850_v3  ;;  %v739_v12 = vld [vmem:[#allocation2 + $0x6c] sm:$0xf]  ;;  %v10855_v22 = vpack.c.bf16 %v260_v19, %v260_v19  ;;  %v1385_v24 = vsel %vm12423_vm4, %v10264_v60, %v1384_v61 }
  0x62   : > { %v978_v15 = vsel %vm12429_vm5, %v973_v6, %v977_v52  ;;  %v980_v16 = vshrl.u32 %v739_v12, 16  ;;  %v983_v17 = vshll.u32 %v739_v12, 16  ;;  %v12553_v18 = vld [vmem:[#allocation2 + $0x6c] sm:$0xe]  ;;  %546 = vst [vmem:[#allocation2 + $0x80] sm:$0x1] %v10853_v8  ;;  %v1388_v25 = vsel %vm12423_vm4, %v1386_v7, %v1387_v2 }
  0x63   : > { %v10248_v21 = vcombine.low %v968_v11, %v978_v15  ;;  %547 = vst [vmem:[#allocation2 + $0x84] sm:$0xf] %v10854_v13  ;;  %548 = vst [vmem:[#allocation2 + $0x88] sm:$0xf] %v10855_v22  ;;  %v10856_v31 = vpack.c.bf16 %v261_v28, %v261_v28  ;;  %v10940_v32 = vpack.c.bf16 %v263_v29, %v262_v23  ;;  %v10265_v42 = vrot.slane %v12553_v18, 9 }
  0x64   : > { %v982_v26 = vrot.slane %v980_v16, 4  ;;  %v985_v27 = vrot.slane %v983_v17, 5  ;;  %v10859_v37 = vpack.c.bf16 %v264_v33, %v264_v33  ;;  %v10280_v39 = vcombine.low %v1385_v24, %v1388_v25 }
  0x65   : > { %549 = vst [vmem:[#allocation2 + $0x8c] sm:$0x1] %v10856_v31  ;;  %10957 = vst [vmem:[#allocation2 + $0x90] sm:$0xff] %v10940_v32   ;;  %v10860_v53 = vpack.c.bf16 %v265_v49, %v265_v49 }
  0x66   : > { %v12068_v34 = vld [vmem:[#allocation2 + $0x6c] sm:$0xff]   ;;  %v986_v36 = vor.u32 %v985_v27, %v982_v26  ;;  %552 = vst [vmem:[#allocation2 + $0x98] sm:$0x1] %v10859_v37 }
  0x67   : > { %4224 = vmatmul.mubr.bf16.gmra.mrb[28].mxu0 %v12064_v57  ;;  %v740_v35 = vld [vmem:[#allocation2 + $0x70] sm:$0xf]  ;;  %v12071_v45 = vld [vmem:[#allocation2 + $0x78] sm:$0xff]   ;;  %553 = vst [vmem:[#allocation2 + $0x9c] sm:$0xf] %v10860_v53 }
  0x68   : > { %4385 = vmatmul.mubr.bf16.gmra.mrb[28].mxu1 %v10279_v0  ;;  %4231 = vmatprep.mubr.bf16.mxu0 %v10248_v21  ;;  %v989_v40 = vshll.u32 %v740_v35, 16  ;;  %v993_v41 = vshrl.u32 %v740_v35, 16  ;;  %v741_v43 = vld [vmem:[#allocation2 + $0x74] sm:$0x1]  ;;  %v987_v44 = vrot.slane %v986_v36, 4  ;;  %v12070_v10 = vld [vmem:[#allocation2 + $0x6c] sm:$0xff]  }
  0x69   : > { %4392 = vmatprep.mubr.bf16.mxu1 %v12068_v34  ;;  %v999_v48 = vshll.u32 %v741_v43, 16  ;;  %v1255_v50 = vld [vmem:[#allocation2 + $0x70] sm:$0xf]  ;;  %v1256_v51 = vld [vmem:[#allocation2 + $0x74] sm:$0x1]  ;;  %v266_v35 = vld [vmem:[%s12395_s10 + $0x140] sm:$0xff] }
  0x6a   : > { %v991_v46 = vrot.slane %v989_v40, 5  ;;  %v995_v47 = vrot.slane %v993_v41, 4  ;;  %v742_v52 = vld [vmem:[#allocation2 + $0x78] sm:$0xf]  ;;  %v1391_v57 = vrot.slane %v1255_v50, 5  ;;  %v1394_v60 = vrot.slane %v1256_v51, 5 }
  0x6b   : > { %v1001_v56 = vrot.slane %v999_v48, 5  ;;  %v743_v58 = vld [vmem:[#allocation2 + $0x7c] sm:$0xf]  ;;  %v744_v59 = vld [vmem:[#allocation2 + $0x80] sm:$0x1]  ;;  %v1004_v61 = vshrl.u32 %v742_v52, 16 }
  0x6c   : > { %v992_v54 = vsel %vm12429_vm5, %v987_v44, %v991_v46  ;;  %v996_v55 = vor.u32 %v995_v47, %v991_v46  ;;  %v1007_v62 = vshll.u32 %v742_v52, 16  ;;  %v1013_v63 = vshll.u32 %v743_v58, 16  ;;  %v1257_v13 = vld [vmem:[#allocation2 + $0x78] sm:$0xe]  ;;  %v12074_v19 = vld [vmem:[#allocation2 + $0x84] sm:$0xff]   ;;  %v12081_v40 = vld [vmem:[%s15503_s1 + $0x130] sm:$0xff]  }
  0x6d   : > { %v1392_v1 = vsel %vm12423_vm4, %v10265_v42, %v1391_v57  ;;  %v1393_v2 = vrot.slane %v1391_v57, 4  ;;  %v1017_v3 = vshrl.u32 %v743_v58, 16  ;;  %v1006_v5 = vrot.slane %v1004_v61, 4  ;;  %v1258_v20 = vld [vmem:[#allocation2 + $0x7c] sm:$0xf]  ;;  %v12077_v50 = vld [vmem:[#allocation2 + $0x90] sm:$0xff]   ;;  %11197 = vmatpush3.bf16.msra.mxu0 %v12081_v40 }
  0x6e   : > { %v997_v0 = vrot.slane %v996_v55, 4  ;;  %v1009_v6 = vrot.slane %v1007_v62, 5  ;;  %v1015_v7 = vrot.slane %v1013_v63, 5  ;;  %v1023_v8 = vshll.u32 %v744_v59, 16  ;;  %v1259_v21 = vld [vmem:[#allocation2 + $0x80] sm:$0x1] }
  0x6f   : > { %4232 = vmatmul.mubr.bf16.gmra.mrb[32].mxu0 %v12066_v38  ;;  %v1395_v11 = vsel %vm12423_vm4, %v1393_v2, %v1394_v60  ;;  %v1019_v12 = vrot.slane %v1017_v3, 4  ;;  %v10266_v23 = vrot.slane %v1257_v13, 9  ;;  %v1398_v24 = vrot.slane %v1258_v20, 5  ;;  %v745_v26 = vld [vmem:[#allocation2 + $0x84] sm:$0xf]  ;;  %v12072_v46 = vld [vmem:[#allocation2 + $0x78] sm:$0xff]  }
  0x70   : > { %4393 = vmatmul.mubr.bf16.gmra.mrb[32].mxu1 %v10280_v39  ;;  %v1002_v9 = vsel %vm12429_vm5, %v997_v0, %v1001_v56  ;;  %v10281_v16 = vcombine.low %v1392_v1, %v1395_v11  ;;  %v1010_v17 = vor.u32 %v1009_v6, %v1006_v5  ;;  %v1025_v18 = vrot.slane %v1023_v8, 5  ;;  %v746_v28 = vld [vmem:[#allocation2 + $0x88] sm:$0xf]  ;;  %v747_v29 = vld [vmem:[#allocation2 + $0x8c] sm:$0x1]  ;;  %v12082_v58 = vld [vmem:[%s15503_s1 + $0x1c0] sm:$0xff]  }
  0x71   : > { %4400 = vmatprep.mubr.bf16.mxu1 %v12071_v45  ;;  %v10249_v15 = vcombine.low %v992_v54, %v1002_v9  ;;  %v1020_v22 = vor.u32 %v1019_v12, %v1015_v7  ;;  %v1401_v25 = vrot.slane %v1259_v21, 5  ;;  %v1028_v30 = vshrl.u32 %v745_v26, 16  ;;  %v1260_v51 = vld [vmem:[#allocation2 + $0x84] sm:$0xe]  ;;  %v1261_v52 = vld [vmem:[#allocation2 + $0x88] sm:$0xf]  ;;  %11296 = vmatprep.subr.bf16.mxu1 %v12082_v58 }
  0x72   : > { %v1011_v27 = vrot.slane %v1010_v17, 4  ;;  %v1399_v32 = vsel %vm12423_vm4, %v10266_v23, %v1398_v24  ;;  %v1400_v33 = vrot.slane %v1398_v24, 4  ;;  %v1031_v34 = vshll.u32 %v745_v26, 16  ;;  %v1262_v55 = vld [vmem:[#allocation2 + $0x8c] sm:$0x1]  ;;  %v12083_v0 = vld [vmem:[%s15503_s1 + $0x180] sm:$0xff]  }
  0x73   : > { %4239 = vmatprep.mubr.bf16.mxu0 %v10249_v15  ;;  %v1021_v31 = vrot.slane %v1020_v22, 4  ;;  %v1030_v37 = vrot.slane %v1028_v30, 4  ;;  %v1037_v38 = vshll.u32 %v746_v28, 16  ;;  %v1041_v39 = vshrl.u32 %v746_v28, 16  ;;  %v748_v61 = vld [vmem:[#allocation2 + $0x90] sm:$0xf]  ;;  %11297 = vmatpush3.bf16.msra.mxu1 %v12083_v0 }
  0x74   : > { %v1016_v36 = vsel %vm12429_vm5, %v1011_v27, %v1015_v7  ;;  %v1402_v42 = vsel %vm12423_vm4, %v1400_v33, %v1401_v25  ;;  %v1033_v43 = vrot.slane %v1031_v34, 5  ;;  %v1047_v44 = vshll.u32 %v747_v29, 16  ;;  %v749_v62 = vld [vmem:[#allocation2 + $0x94] sm:$0xf]  ;;  %v750_v3 = vld [vmem:[#allocation2 + $0x98] sm:$0x1] }
  0x75   : > { %v1026_v41 = vsel %vm12429_vm5, %v1021_v31, %v1025_v18  ;;  %v10282_v47 = vcombine.low %v1399_v32, %v1402_v42  ;;  %v1039_v48 = vrot.slane %v1037_v38, 5  ;;  %v1043_v49 = vrot.slane %v1041_v39, 4  ;;  %v12084_v6 = vld [vmem:[%s15503_s1 + $0x1c8] sm:$0xff]   ;;  %v1263_v23 = vld [vmem:[#allocation2 + $0x90] sm:$0xe] }
  0x76   : > { %v10250_v45 = vcombine.low %v1016_v36, %v1026_v41  ;;  %v1034_v53 = vor.u32 %v1033_v43, %v1030_v37  ;;  %v1049_v54 = vrot.slane %v1047_v44, 5  ;;  %v10267_v56 = vrot.slane %v1260_v51, 9  ;;  %11298 = vmatprep.subr.bf16.mxu1 %v12084_v6  ;;  %v1264_v24 = vld [vmem:[#allocation2 + $0x94] sm:$0xf]  ;;  %v12076_v25 = vld [vmem:[#allocation2 + $0x84] sm:$0xff]  }
  0x77   : > { %4240 = vmatmul.mubr.bf16.gmra.mrb[36].mxu0 %v12070_v10  ;;  %v1405_v57 = vrot.slane %v1261_v52, 5  ;;  %v1044_v59 = vor.u32 %v1043_v49, %v1039_v48  ;;  %v1408_v60 = vrot.slane %v1262_v55, 5  ;;  %v10861_v63 = vpack.c.bf16 %v266_v35, %v266_v35  ;;  %v1265_v27 = vld [vmem:[#allocation2 + $0x98] sm:$0x1]  ;;  %v12085_v33 = vld [vmem:[%s15503_s1 + $0x188] sm:$0xff]   ;;  %v268_v51 = vld [vmem:[%s12395_s10 + $0x150] sm:$0xff] }
  0x78   : > { %4401 = vmatmul.mubr.bf16.gmra.mrb[36].mxu1 %v10281_v16  ;;  %4247 = vmatprep.mubr.bf16.mxu0 %v10250_v45  ;;  %v1035_v1 = vrot.slane %v1034_v53, 4  ;;  %v1052_v5 = vshrl.u32 %v748_v61, 16  ;;  %v1055_v8 = vshll.u32 %v748_v61, 16  ;;  %v1061_v9 = vshll.u32 %v749_v62, 16  ;;  %v267_v40 = vld [vmem:[%s12395_s10 + $0x148] sm:$0x3] }
  0x79   : > { %4408 = vmatprep.mubr.bf16.mxu1 %v12074_v19  ;;  %v1407_v2 = vrot.slane %v1405_v57, 4  ;;  %v1045_v7 = vrot.slane %v1044_v59, 4  ;;  %v1065_v10 = vshrl.u32 %v749_v62, 16  ;;  %554 = vst [vmem:[#allocation2 + $0xa0] sm:$0xf] %v10861_v63  ;;  %v1406_v12 = vsel %vm12423_vm4, %v10267_v56, %v1405_v57  ;;  %11299 = vmatpush3.bf16.msra.mxu1 %v12085_v33  ;;  %v269_v53 = vld [vmem:[%s12395_s10 + $0x158] sm:$0xff] }
  0x7a   : > { %v1040_v11 = vsel %vm12429_vm5, %v1035_v1, %v1039_v48  ;;  %v1054_v13 = vrot.slane %v1052_v5, 4  ;;  %v1071_v15 = vshll.u32 %v750_v3, 16  ;;  %v1057_v18 = vrot.slane %v1055_v8, 5  ;;  %v751_v41 = vld [vmem:[#allocation2 + $0x9c] sm:$0xf]  ;;  %v12078_v61 = vld [vmem:[#allocation2 + $0x90] sm:$0xff]  }
  0x7b   : > { %v1050_v16 = vsel %vm12429_vm5, %v1045_v7, %v1049_v54  ;;  %v1409_v17 = vsel %vm12423_vm4, %v1407_v2, %v1408_v60  ;;  %v1063_v19 = vrot.slane %v1061_v9, 5  ;;  %v1067_v21 = vrot.slane %v1065_v10, 4  ;;  %v1266_v54 = vld [vmem:[#allocation2 + $0x9c] sm:$0xe]  ;;  %v12088_v60 = vld [vmem:[%s15503_s1 + $0x1d0] sm:$0xff]  }
  0x7c   : > { %v10251_v20 = vcombine.low %v1040_v11, %v1050_v16  ;;  %v1073_v22 = vrot.slane %v1071_v15, 5  ;;  %v1058_v26 = vor.u32 %v1057_v18, %v1054_v13  ;;  %v10268_v28 = vrot.slane %v1263_v23, 9  ;;  %11300 = vmatprep.subr.bf16.mxu1 %v12088_v60  ;;  %v12089_v1 = vld [vmem:[%s15503_s1 + $0x190] sm:$0xff]   ;;  %v12090_v5 = vld [vmem:[%s15503_s1 + $0x1d8] sm:$0xff]   ;;  %v270_v7 = vld [vmem:[%s12395_s10 + $0x160] sm:$0x3] }
  0x7d   : > { %v1412_v29 = vrot.slane %v1264_v24, 5  ;;  %v10283_v30 = vcombine.low %v1406_v12, %v1409_v17  ;;  %v1068_v31 = vor.u32 %v1067_v21, %v1063_v19  ;;  %v1415_v32 = vrot.slane %v1265_v27, 5  ;;  %11301 = vmatpush3.bf16.msra.mxu1 %v12089_v1  ;;  %v12091_v10 = vld [vmem:[%s15503_s1 + $0x198] sm:$0xff]  }
  0x7e   : > { %v1059_v34 = vrot.slane %v1058_v26, 4  ;;  %v10862_v45 = vpack.c.bf16 %v267_v40, %v267_v40  ;;  %v1079_v48 = vshll.u32 %v751_v41, 16  ;;  %v10945_v58 = vpack.c.bf16 %v269_v53, %v268_v51  ;;  %11302 = vmatprep.subr.bf16.mxu1 %v12090_v5  ;;  %v12093_v18 = vld [vmem:[%s15503_s1 + $0x178] sm:$0xff]   ;;  %v12096_v40 = vld [vmem:[%s15503_s1 + $0x1e0] sm:$0xff]  }
  0x7f   : > { %4248 = vmatmul.mubr.bf16.gmra.mrb[40].mxu0 %v12072_v46  ;;  %v1414_v35 = vrot.slane %v1412_v29, 4  ;;  %v1069_v36 = vrot.slane %v1068_v31, 4  ;;  %v1413_v39 = vsel %vm12423_vm4, %v10268_v28, %v1412_v29  ;;  %v1076_v46 = vshrl.u32 %v751_v41, 16  ;;  %v12095_v23 = vld [vmem:[%s15503_s1 + $0x138] sm:$0xff]   ;;  %11198 = vmatprep.subr.bf16.mxu0 %v12093_v18 }
  0x80   : > { %4409 = vmatmul.mubr.bf16.gmra.mrb[40].mxu1 %v10282_v47  ;;  %4255 = vmatprep.mubr.bf16.mxu0 %v10251_v20  ;;  %v12080_v37 = vld [vmem:[#allocation2 + $0x9c] sm:$0xff]   ;;  %v1064_v38 = vsel %vm12429_vm5, %v1059_v34, %v1063_v19  ;;  %555 = vst [vmem:[#allocation2 + $0xa4] sm:$0x1] %v10862_v45  ;;  %v1081_v55 = vrot.slane %v1079_v48, 5  ;;  %10958 = vst [vmem:[#allocation2 + $0xa8] sm:$0xff] %v10945_v58   ;;  %v10269_v3 = vrot.slane %v1266_v54, 9 }
  0x81   : > { %4416 = vmatprep.mubr.bf16.mxu1 %v12077_v50  ;;  %v752_v42 = vld [vmem:[#allocation2 + $0xa0] sm:$0xf]  ;;  %v1074_v43 = vsel %vm12429_vm5, %v1069_v36, %v1073_v22  ;;  %v1416_v44 = vsel %vm12423_vm4, %v1414_v35, %v1415_v32  ;;  %v1078_v52 = vrot.slane %v1076_v46, 4  ;;  %v10865_v9 = vpack.c.bf16 %v270_v7, %v270_v7  ;;  %v271_v19 = vld [vmem:[%s12395_s10 + $0x168] sm:$0xff]  ;;  %v272_v20 = vld [vmem:[%s12395_s10 + $0x170] sm:$0xff]  ;;  %11303 = vmatpush3.bf16.msra.mxu1 %v12091_v10 }
  0x82   : > { %v10252_v47 = vcombine.low %v1064_v38, %v1074_v43  ;;  %v1085_v49 = vshll.u32 %v752_v42, 16  ;;  %v1089_v50 = vshrl.u32 %v752_v42, 16  ;;  %v1267_v59 = vld [vmem:[#allocation2 + $0xa0] sm:$0xf]  ;;  %v10284_v62 = vcombine.low %v1413_v39, %v1416_v44  ;;  %11199 = vmatpush3.bf16.msra.mxu0 %v12095_v23  ;;  %11304 = vmatprep.subr.bf16.mxu1 %v12096_v40  ;;  %v273_v1 = vld [vmem:[%s12395_s10 + $0x178] sm:$0x3] }
  0x83   : > { %v1419_v63 = vrot.slane %v1267_v59, 5  ;;  %v1082_v0 = vor.u32 %v1081_v55, %v1078_v52  ;;  %558 = vst [vmem:[#allocation2 + $0xb0] sm:$0x1] %v10865_v9  ;;  %v10866_v21 = vpack.c.bf16 %v271_v19, %v271_v19  ;;  %v10867_v22 = vpack.c.bf16 %v272_v20, %v272_v20  ;;  %v12086_v32 = vld [vmem:[#allocation2 + $0x9c] sm:$0xff]  }
  0x84   : > { %v1087_v56 = vrot.slane %v1085_v49, 5  ;;  %v1091_v57 = vrot.slane %v1089_v50, 4  ;;  %v12097_v55 = vld [vmem:[%s15503_s1 + $0x1a0] sm:$0xff]  }
  0x85   : > { %v1421_v6 = vrot.slane %v1419_v63, 4  ;;  %v1083_v8 = vrot.slane %v1082_v0, 4  ;;  %v1420_v16 = vsel %vm12423_vm4, %v10269_v3, %v1419_v63  ;;  %559 = vst [vmem:[#allocation2 + $0xb4] sm:$0xf] %v10866_v21  ;;  %560 = vst [vmem:[#allocation2 + $0xb8] sm:$0xf] %v10867_v22  ;;  %11305 = vmatpush3.bf16.msra.mxu1 %v12097_v55 }
  0x86   : > { %v1092_v2 = vor.u32 %v1091_v57, %v1087_v56 }
  0x87   : > { %4256 = vmatmul.mubr.bf16.gmra.mrb[44].mxu0 %v12076_v25  ;;  %v753_v11 = vld [vmem:[#allocation2 + $0xa4] sm:$0x1]  ;;  %v1088_v24 = vsel %vm12429_vm5, %v1083_v8, %v1087_v56  ;;  %v12087_v26 = vld [vmem:[#allocation2 + $0xa8] sm:$0xff]  }
  0x88   : > { %4417 = vmatmul.mubr.bf16.gmra.mrb[44].mxu1 %v10283_v30  ;;  %4263 = vmatprep.mubr.bf16.mxu0 %v10252_v47  ;;  %v1268_v12 = vld [vmem:[#allocation2 + $0xa4] sm:$0x1]  ;;  %v1093_v13 = vrot.slane %v1092_v2, 4  ;;  %v1095_v15 = vshll.u32 %v753_v11, 16  ;;  %v754_v29 = vld [vmem:[#allocation2 + $0xa8] sm:$0xf] }
  0x89   : > { %4424 = vmatprep.mubr.bf16.mxu1 %v12080_v37  ;;  %v1422_v17 = vrot.slane %v1268_v12, 5  ;;  %v755_v30 = vld [vmem:[#allocation2 + $0xac] sm:$0xf]  ;;  %v1100_v33 = vshrl.u32 %v754_v29, 16  ;;  %v1103_v34 = vshll.u32 %v754_v29, 16 }
  0x8a   : > { %v1097_v25 = vrot.slane %v1095_v15, 5  ;;  %v1109_v35 = vshll.u32 %v755_v30, 16  ;;  %v1113_v37 = vshrl.u32 %v755_v30, 16  ;;  %v1269_v38 = vld [vmem:[#allocation2 + $0xa8] sm:$0xe]  ;;  %v12103_v30 = vld [vmem:[%s15503_s1 + $0x1b0] sm:$0xff]  }
  0x8b   : > { %v1423_v27 = vsel %vm12423_vm4, %v1421_v6, %v1422_v17  ;;  %v1270_v39 = vld [vmem:[#allocation2 + $0xac] sm:$0xf]  ;;  %v1102_v41 = vrot.slane %v1100_v33, 4  ;;  %v1105_v42 = vrot.slane %v1103_v34, 5  ;;  %v10270_v44 = vrot.slane %v1269_v38, 9  ;;  %v12105_v34 = vld [vmem:[%s15503_s1 + $0x1b8] sm:$0xff]  }
  0x8c   : > { %v10285_v28 = vcombine.low %v1420_v16, %v1423_v27  ;;  %v1098_v31 = vsel %vm12429_vm5, %v1093_v13, %v1097_v25  ;;  %v1111_v43 = vrot.slane %v1109_v35, 5  ;;  %v756_v45 = vld [vmem:[#allocation2 + $0xb0] sm:$0x1]  ;;  %v1115_v46 = vrot.slane %v1113_v37, 4  ;;  %v12092_v59 = vld [vmem:[#allocation2 + $0xa8] sm:$0xff]   ;;  %v12094_v60 = vld [vmem:[#allocation2 + $0xb4] sm:$0xff]  }
  0x8d   : > { %v10253_v36 = vcombine.low %v1088_v24, %v1098_v31  ;;  %v1271_v47 = vld [vmem:[#allocation2 + $0xb0] sm:$0x1]  ;;  %v1426_v48 = vrot.slane %v1270_v39, 5  ;;  %v1106_v49 = vor.u32 %v1105_v42, %v1102_v41  ;;  %v1119_v50 = vshll.u32 %v756_v45, 16  ;;  %v757_v2 = vld [vmem:[#allocation2 + $0xb4] sm:$0xf] }
  0x8e   : > { %v1429_v51 = vrot.slane %v1271_v47, 5  ;;  %v1116_v52 = vor.u32 %v1115_v46, %v1111_v43  ;;  %v758_v3 = vld [vmem:[#allocation2 + $0xb8] sm:$0xf]  ;;  %v10868_v6 = vpack.c.bf16 %v273_v1, %v273_v1  ;;  %v1124_v7 = vshrl.u32 %v757_v2, 16  ;;  %v12099_v12 = vld [vmem:[%s15503_s1 + $0x1a8] sm:$0xff]   ;;  %v274_v16 = vld [vmem:[%s12395_s10 + $0x180] sm:$0xff] }
  0x8f   : > { %4264 = vmatmul.mubr.bf16.gmra.mrb[48].mxu0 %v12078_v61  ;;  %v1427_v53 = vsel %vm12423_vm4, %v10270_v44, %v1426_v48  ;;  %v1428_v54 = vrot.slane %v1426_v48, 4  ;;  %v1107_v56 = vrot.slane %v1106_v49, 4  ;;  %v1121_v57 = vrot.slane %v1119_v50, 5  ;;  %v275_v17 = vld [vmem:[%s12395_s10 + $0x188] sm:$0xff]  ;;  %v1272_v21 = vld [vmem:[#allocation2 + $0xb4] sm:$0xe] }
  0x90   : > { %4425 = vmatmul.mubr.bf16.gmra.mrb[48].mxu1 %v10284_v62  ;;  %4271 = vmatprep.mubr.bf16.mxu0 %v10253_v36  ;;  %v1117_v58 = vrot.slane %v1116_v52, 4  ;;  %v12098_v62 = vld [vmem:[%s15503_s1 + $0x1e8] sm:$0xff]   ;;  %v1127_v8 = vshll.u32 %v757_v2, 16  ;;  %v1133_v10 = vshll.u32 %v758_v3, 16  ;;  %v1137_v11 = vshrl.u32 %v758_v3, 16  ;;  %v12102_v27 = vld [vmem:[%s15503_s1 + $0x1f0] sm:$0xff]  }
  0x91   : > { %4432 = vmatprep.mubr.bf16.mxu1 %v12087_v26  ;;  %v1430_v61 = vsel %vm12423_vm4, %v1428_v54, %v1429_v51  ;;  %v1112_v63 = vsel %vm12429_vm5, %v1107_v56, %v1111_v43  ;;  %11306 = vmatprep.subr.bf16.mxu1 %v12098_v62  ;;  %561 = vst [vmem:[#allocation2 + $0xbc] sm:$0x1] %v10868_v6  ;;  %v1126_v13 = vrot.slane %v1124_v7, 4  ;;  %v1273_v22 = vld [vmem:[#allocation2 + $0xb8] sm:$0xf]  ;;  %v10271_v26 = vrot.slane %v1272_v21, 9 }
  0x92   : > { %v10286_v0 = vcombine.low %v1427_v53, %v1430_v61  ;;  %v1122_v5 = vsel %vm12429_vm5, %v1117_v58, %v1121_v57  ;;  %v1129_v15 = vrot.slane %v1127_v8, 5  ;;  %v1135_v18 = vrot.slane %v1133_v10, 5  ;;  %11307 = vmatpush3.bf16.msra.mxu1 %v12099_v12  ;;  %v12104_v31 = vld [vmem:[%s15503_s1 + $0x1f8] sm:$0xff]   ;;  %v2175_v33 = vld [vmem:[#allocation2 + $0xc] sm:$0xe]  ;;  %v12690_v38 = vld [vmem:[%s15503_s1 + $0x200] sm:$0xff]  }
  0x93   : > { %v10254_v9 = vcombine.low %v1112_v63, %v1122_v5  ;;  %v1139_v19 = vrot.slane %v1137_v11, 4  ;;  %v10950_v20 = vpack.c.bf16 %v275_v17, %v274_v16  ;;  %v1433_v24 = vrot.slane %v1273_v22, 5  ;;  %11308 = vmatprep.subr.bf16.mxu1 %v12102_v27  ;;  %v2176_v35 = vld [vmem:[#allocation2 + $0x10] sm:$0xf]  ;;  %v2177_v36 = vld [vmem:[#allocation2 + $0x14] sm:$0x1]  ;;  %11904 = vmatprep.subr.bf16.mxu0 %v12690_v38 }
  0x94   : > { %v1130_v23 = vor.u32 %v1129_v15, %v1126_v13  ;;  %v10320_v37 = vrot.slane %v2175_v33, 9  ;;  %v2273_v41 = vrot.slane %v2176_v35, 5  ;;  %v2276_v42 = vrot.slane %v2177_v36, 5  ;;  %v1663_v48 = vld [vmem:[#allocation2 + $0xc] sm:$0xf]  ;;  %v12100_v52 = vld [vmem:[#allocation2 + $0xb4] sm:$0xff]  }
  0x95   : > { %v1140_v25 = vor.u32 %v1139_v19, %v1135_v18  ;;  %10959 = vst [vmem:[#allocation2 + $0xc0] sm:$0xff] %v10950_v20   ;;  %v1435_v29 = vrot.slane %v1433_v24, 4  ;;  %v1434_v44 = vsel %vm12423_vm4, %v10271_v26, %v1433_v24  ;;  %v1664_v49 = vld [vmem:[#allocation2 + $0x10] sm:$0xf]  ;;  %v1665_v57 = vld [vmem:[#allocation2 + $0x14] sm:$0x1] }
  0x96   : > { %11309 = vmatpush3.bf16.msra.mxu1 %v12103_v30  ;;  %v2274_v46 = vsel %vm12423_vm4, %v10320_v37, %v2273_v41  ;;  %v2275_v47 = vrot.slane %v2273_v41, 4  ;;  %v1712_v58 = vshrl.u32 %v1663_v48, 16  ;;  %v1721_v62 = vshll.u32 %v1664_v49, 16  ;;  %v2609_v6 = vld [vmem:[#allocation2 + $0x1c] sm:$0xf] }
  0x97   : > { %4272 = vmatmul.mubr.bf16.gmra.mrb[52].mxu0 %v12086_v32  ;;  %v1141_v32 = vrot.slane %v1140_v25, 4  ;;  %11310 = vmatprep.subr.bf16.mxu1 %v12104_v31  ;;  %v1725_v63 = vshrl.u32 %v1664_v49, 16  ;;  %v1731_v5 = vshll.u32 %v1665_v57, 16  ;;  %v2666_v15 = vshll.u32 %v2609_v6, 16  ;;  %v2178_v24 = vld [vmem:[#allocation2 + $0x18] sm:$0xe] }
  0x98   : > { %4433 = vmatmul.mubr.bf16.gmra.mrb[52].mxu1 %v10285_v28  ;;  %4279 = vmatprep.mubr.bf16.mxu0 %v10254_v9  ;;  %v1131_v28 = vrot.slane %v1130_v23, 4  ;;  %v759_v39 = vld [vmem:[#allocation2 + $0xbc] sm:$0x1]  ;;  %v2277_v56 = vsel %vm12423_vm4, %v2275_v47, %v2276_v42  ;;  %v1714_v2 = vrot.slane %v1712_v58, 4  ;;  %v1723_v7 = vrot.slane %v1721_v62, 5 }
  0x99   : > { %4440 = vmatprep.mubr.bf16.mxu1 %v12094_v60  ;;  %v1274_v40 = vld [vmem:[#allocation2 + $0xbc] sm:$0x1]  ;;  %v1143_v43 = vshll.u32 %v759_v39, 16  ;;  %v10336_v61 = vcombine.low %v2274_v46, %v2277_v56  ;;  %v1727_v8 = vrot.slane %v1725_v63, 4  ;;  %v2610_v9 = vld [vmem:[#allocation2 + $0x20] sm:$0x1] }
  0x9a   : > { %v1436_v45 = vrot.slane %v1274_v40, 5  ;;  %v1136_v50 = vsel %vm12429_vm5, %v1131_v28, %v1135_v18  ;;  %11311 = vmatpush3.bf16.msra.mxu1 %v12105_v34  ;;  %v1733_v13 = vrot.slane %v1731_v5, 5  ;;  %v2670_v16 = vshrl.u32 %v2609_v6, 16  ;;  %v2179_v28 = vld [vmem:[#allocation2 + $0x1c] sm:$0xf] }
  0x9b   : > { %v1145_v51 = vrot.slane %v1143_v43, 5  ;;  %v1728_v17 = vor.u32 %v1727_v8, %v1723_v7  ;;  %v2676_v20 = vshll.u32 %v2610_v9, 16  ;;  %v2668_v22 = vrot.slane %v2666_v15, 5  ;;  %v1666_v34 = vld [vmem:[#allocation2 + $0x18] sm:$0xf] }
  0x9c   : > { %v12101_v53 = vld [vmem:[#allocation2 + $0xc0] sm:$0xff]   ;;  %v1437_v54 = vsel %vm12423_vm4, %v1435_v29, %v1436_v45  ;;  %v2672_v23 = vrot.slane %v2670_v16, 4  ;;  %v2280_v33 = vrot.slane %v2179_v28, 5  ;;  %v1667_v35 = vld [vmem:[#allocation2 + $0x1c] sm:$0xf]  ;;  %v1736_v41 = vshrl.u32 %v1666_v34, 16 }
  0x9d   : > { %v10287_v55 = vcombine.low %v1434_v44, %v1437_v54  ;;  %v1146_v60 = vsel %vm12429_vm5, %v1141_v32, %v1145_v51  ;;  %v1729_v25 = vrot.slane %v1728_v17, 4  ;;  %v2678_v27 = vrot.slane %v2676_v20, 5  ;;  %v2180_v29 = vld [vmem:[#allocation2 + $0x20] sm:$0x1]  ;;  %v12107_v44 = vld [vmem:[#allocation2 + $0x18] sm:$0xff]   ;;  %v12109_v54 = vld [vmem:[%s15503_s1 + $0x208] sm:$0xff]  }
  0x9e   : > { %v10255_v1 = vcombine.low %v1136_v50, %v1146_v60  ;;  %v2673_v31 = vor.u32 %v2672_v23, %v2668_v22  ;;  %v10321_v32 = vrot.slane %v2178_v24, 9  ;;  %v2283_v39 = vrot.slane %v2180_v29, 5  ;;  %v1668_v40 = vld [vmem:[#allocation2 + $0x20] sm:$0x1]  ;;  %v2611_v47 = vld [vmem:[#allocation2 + $0x24] sm:$0xf] }
  0x9f   : > { %4280 = vmatmul.mubr.bf16.gmra.mrb[56].mxu0 %v12092_v59  ;;  %v1715_v59 = vshll.u32 %v1663_v48, 16  ;;  %v1734_v36 = vsel %vm12429_vm5, %v1729_v25, %v1733_v13  ;;  %v2282_v46 = vrot.slane %v2280_v33, 4  ;;  %v2612_v48 = vld [vmem:[#allocation2 + $0x28] sm:$0xf]  ;;  %v1738_v50 = vrot.slane %v1736_v41, 4 }
  0xa0   : > { %4441 = vmatmul.mubr.bf16.gmra.mrb[56].mxu1 %v10286_v0  ;;  %v2608_v0 = vld [vmem:[#allocation2 + $0x18] sm:$0xf]  ;;  %4287 = vmatprep.mubr.bf16.mxu0 %v10255_v1  ;;  %v2674_v43 = vrot.slane %v2673_v31, 4  ;;  %v2281_v45 = vsel %vm12423_vm4, %v10321_v32, %v2280_v33  ;;  %v1739_v51 = vshll.u32 %v1666_v34, 16  ;;  %v1749_v57 = vshrl.u32 %v1667_v35, 16 }
  0xa1   : > { %4448 = vmatprep.mubr.bf16.mxu1 %v12101_v53  ;;  %v1717_v3 = vrot.slane %v1715_v59, 5  ;;  %v2657_v10 = vshrl.u32 %v2608_v0, 16  ;;  %v2660_v11 = vshll.u32 %v2608_v0, 16  ;;  %v2613_v53 = vld [vmem:[#allocation2 + $0x2c] sm:$0x1]  ;;  %v2284_v56 = vsel %vm12423_vm4, %v2282_v46, %v2283_v39 }
  0xa2   : > { %v1755_v58 = vshll.u32 %v1668_v40, 16  ;;  %v10337_v60 = vcombine.low %v2281_v45, %v2284_v56  ;;  %v2181_v63 = vld [vmem:[#allocation2 + $0x24] sm:$0xe]  ;;  %v1751_v0 = vrot.slane %v1749_v57, 4  ;;  %v2182_v5 = vld [vmem:[#allocation2 + $0x28] sm:$0xf] }
  0xa3   : > { %v1718_v12 = vor.u32 %v1717_v3, %v1714_v2  ;;  %v2659_v18 = vrot.slane %v2657_v10, 4  ;;  %v2662_v19 = vrot.slane %v2660_v11, 5  ;;  %v2681_v2 = vshrl.u32 %v2611_v47, 16  ;;  %v2183_v10 = vld [vmem:[#allocation2 + $0x2c] sm:$0x1]  ;;  %v12112_v11 = vld [vmem:[%s15503_s1 + $0x210] sm:$0xff]  }
  0xa4   : > { %v1757_v1 = vrot.slane %v1755_v58, 5  ;;  %v2684_v3 = vshll.u32 %v2611_v47, 16  ;;  %v2694_v8 = vshrl.u32 %v2612_v48, 16  ;;  %v2700_v9 = vshll.u32 %v2613_v53, 16  ;;  %v1669_v16 = vld [vmem:[#allocation2 + $0x24] sm:$0xf] }
  0xa5   : > { %v1719_v21 = vrot.slane %v1718_v12, 4  ;;  %v2663_v26 = vor.u32 %v2662_v19, %v2659_v18  ;;  %v2683_v13 = vrot.slane %v2681_v2, 4  ;;  %v10322_v15 = vrot.slane %v2181_v63, 9  ;;  %v12108_v40 = vld [vmem:[#allocation2 + $0x24] sm:$0xff]   ;;  %v2615_v47 = vld [vmem:[#allocation2 + $0x34] sm:$0xf] }
  0xa6   : > { %v2696_v19 = vrot.slane %v2694_v8, 4  ;;  %v2702_v20 = vrot.slane %v2700_v9, 5  ;;  %v2287_v24 = vrot.slane %v2182_v5, 5  ;;  %v2290_v25 = vrot.slane %v2183_v10, 5  ;;  %v2184_v53 = vld [vmem:[#allocation2 + $0x30] sm:$0xe] }
  0xa7   : > { %4288 = vmatmul.mubr.bf16.gmra.mrb[60].mxu0 %v12100_v52  ;;  %v1724_v30 = vsel %vm12429_vm5, %v1719_v21, %v1723_v7  ;;  %v2664_v37 = vrot.slane %v2663_v26, 4  ;;  %v1745_v52 = vshll.u32 %v1667_v35, 16  ;;  %v2690_v7 = vshll.u32 %v2612_v48, 16  ;;  %v1670_v21 = vld [vmem:[#allocation2 + $0x28] sm:$0xf] }
  0xa8   : > { %4449 = vmatmul.mubr.bf16.gmra.mrb[60].mxu1 %v10287_v55  ;;  %4489 = vmatprep.mubr.bf16.mxu0 %v10336_v61  ;;  %v10304_v42 = vcombine.low %v1724_v30, %v1734_v36  ;;  %v2679_v55 = vsel %vm12429_vm5, %v2674_v43, %v2678_v27  ;;  %v1741_v61 = vrot.slane %v1739_v51, 5  ;;  %v1760_v28 = vshrl.u32 %v1669_v16, 16  ;;  %v12115_v30 = vld [vmem:[%s15503_s1 + $0x218] sm:$0xff]   ;;  %v1671_v35 = vld [vmem:[#allocation2 + $0x2c] sm:$0x1] }
  0xa9   : > { %v2669_v49 = vsel %vm12429_vm5, %v2664_v37, %v2668_v22  ;;  %v1747_v62 = vrot.slane %v1745_v52, 5  ;;  %v2692_v18 = vrot.slane %v2690_v7, 5  ;;  %v1763_v29 = vshll.u32 %v1669_v16, 16  ;;  %v2614_v36 = vld [vmem:[#allocation2 + $0x30] sm:$0xf] }
  0xaa   : > { %v10368_v59 = vcombine.low %v2669_v49, %v2679_v55  ;;  %v1742_v6 = vor.u32 %v1741_v61, %v1738_v50  ;;  %v2288_v33 = vsel %vm12423_vm4, %v10322_v15, %v2287_v24  ;;  %v2289_v34 = vrot.slane %v2287_v24, 4  ;;  %v2616_v52 = vld [vmem:[#allocation2 + $0x38] sm:$0x1] }
  0xab   : > { %v1752_v12 = vor.u32 %v1751_v0, %v1747_v62  ;;  %v2697_v27 = vor.u32 %v2696_v19, %v2692_v18  ;;  %v1762_v41 = vrot.slane %v1760_v28, 4  ;;  %v1769_v45 = vshll.u32 %v1670_v21, 16  ;;  %v2186_v0 = vld [vmem:[#allocation2 + $0x38] sm:$0x1] }
  0xac   : > { %4650 = vmatprep.mubr.bf16.mxu1 %v10368_v59  ;;  %v1743_v17 = vrot.slane %v1742_v6, 4  ;;  %v1773_v46 = vshrl.u32 %v1670_v21, 16  ;;  %v1779_v51 = vshll.u32 %v1671_v35, 16  ;;  %v2705_v58 = vshrl.u32 %v2614_v36, 16  ;;  %v2185_v59 = vld [vmem:[#allocation2 + $0x34] sm:$0xf] }
  0xad   : > { %v1753_v22 = vrot.slane %v1752_v12, 4  ;;  %v2698_v39 = vrot.slane %v2697_v27, 4  ;;  %v1771_v56 = vrot.slane %v1769_v45, 5  ;;  %v2714_v63 = vshll.u32 %v2615_v47, 16  ;;  %v1672_v6 = vld [vmem:[#allocation2 + $0x30] sm:$0xf] }
  0xae   : > { %v1748_v26 = vsel %vm12429_vm5, %v1743_v17, %v1747_v62  ;;  %v1775_v57 = vrot.slane %v1773_v46, 4  ;;  %v1781_v61 = vrot.slane %v1779_v51, 5  ;;  %v2708_v62 = vshll.u32 %v2614_v36, 16  ;;  %v12121_v12 = vld [vmem:[%s15503_s1 + $0x228] sm:$0xff]   ;;  %v1674_v17 = vld [vmem:[#allocation2 + $0x38] sm:$0x1] }
  0xaf   : > { %4490 = vmatmul.mubr.bf16.vlgmr.msra.gmra.mrb[64].mxu0 %v10304_v42  ;;  %v1758_v31 = vsel %vm12429_vm5, %v1753_v22, %v1757_v1  ;;  %v1765_v42 = vrot.slane %v1763_v29, 5  ;;  %v2703_v48 = vsel %vm12429_vm5, %v2698_v39, %v2702_v20  ;;  %v2707_v2 = vrot.slane %v2705_v58, 4  ;;  %v2617_v22 = vld [vmem:[#allocation2 + $0x3c] sm:$0xf]  ;;  %v12110_v46 = vld [vmem:[#allocation2 + $0x30] sm:$0xff]  }
  0xb0   : > { %11905 = vmatpush3.bf16.msra.mxu0 %v12690_v38  ;;  %4497 = vmatprep.mubr.bf16.mxu0 %v10337_v60  ;;  %v2686_v38 = vrot.slane %v2684_v3, 5  ;;  %v10305_v37 = vcombine.low %v1748_v26, %v1758_v31  ;;  %v1776_v1 = vor.u32 %v1775_v57, %v1771_v56  ;;  %v2718_v3 = vshrl.u32 %v2615_v47, 16  ;;  %v2618_v31 = vld [vmem:[#allocation2 + $0x40] sm:$0xf] }
  0xb1   : > { %4651 = vmatmul.mubr.bf16.vlgmr.msra.gmra.mrb[64].mxu1 %v12107_v44  ;;  %11906 = vmatprep.subr.bf16.mxu0 %v12109_v54  ;;  %v2291_v44 = vsel %vm12423_vm4, %v2289_v34, %v2290_v25  ;;  %v1766_v50 = vor.u32 %v1765_v42, %v1762_v41  ;;  %v2724_v5 = vshll.u32 %v2616_v52, 16  ;;  %v2710_v8 = vrot.slane %v2708_v62, 5 }
  0xb2   : > { %v2687_v23 = vor.u32 %v2686_v38, %v2683_v13  ;;  %v10338_v49 = vcombine.low %v2288_v33, %v2291_v44  ;;  %v2716_v9 = vrot.slane %v2714_v63, 5  ;;  %v10323_v10 = vrot.slane %v2184_v53, 9  ;;  %v2188_v44 = vld [vmem:[#allocation2 + $0x40] sm:$0xf] }
  0xb3   : > { %v1767_v60 = vrot.slane %v1766_v50, 4  ;;  %v1777_v13 = vrot.slane %v1776_v1, 4  ;;  %v2720_v38 = vrot.slane %v2718_v3, 4  ;;  %v2726_v15 = vrot.slane %v2724_v5, 5  ;;  %v2189_v50 = vld [vmem:[#allocation2 + $0x44] sm:$0x1] }
  0xb4   : > { %11907 = vmatpush3.bf16.msra.mxu0 %v12109_v54  ;;  %v2688_v32 = vrot.slane %v2687_v23, 4  ;;  %v12118_v54 = vld [vmem:[%s15503_s1 + $0x220] sm:$0xff]   ;;  %v2294_v16 = vrot.slane %v2185_v59, 5  ;;  %v2297_v19 = vrot.slane %v2186_v0, 5  ;;  %v1784_v20 = vshrl.u32 %v1672_v6, 16 }
  0xb5   : > { %11908 = vmatprep.subr.bf16.mxu0 %v12112_v11  ;;  %v1772_v7 = vsel %vm12429_vm5, %v1767_v60, %v1771_v56  ;;  %v1787_v21 = vshll.u32 %v1672_v6, 16  ;;  %v1782_v23 = vsel %vm12429_vm5, %v1777_v13, %v1781_v61  ;;  %v2721_v24 = vor.u32 %v2720_v38, %v2716_v9  ;;  %v12127_v56 = vld [vmem:[%s15503_s1 + $0x238] sm:$0xff]   ;;  %v1676_v6 = vld [vmem:[#allocation2 + $0x40] sm:$0xf] }
  0xb6   : > { %v2693_v43 = vsel %vm12429_vm5, %v2688_v32, %v2692_v18  ;;  %v2711_v18 = vor.u32 %v2710_v8, %v2707_v2  ;;  %v2295_v25 = vsel %vm12423_vm4, %v10323_v10, %v2294_v16  ;;  %v2296_v26 = vrot.slane %v2294_v16, 4  ;;  %v12124_v32 = vld [vmem:[%s15503_s1 + $0x230] sm:$0xff]   ;;  %v1677_v10 = vld [vmem:[#allocation2 + $0x44] sm:$0x1]  ;;  %v2620_v16 = vld [vmem:[#allocation2 + $0x48] sm:$0xf] }
  0xb7   : > { %4498 = vmatmul.mubr.bf16.gmra.mrb[68].mxu0 %v10305_v37  ;;  %v10369_v55 = vcombine.low %v2693_v43, %v2703_v48  ;;  %v10306_v27 = vcombine.low %v1772_v7, %v1782_v23  ;;  %v1786_v29 = vrot.slane %v1784_v20, 4  ;;  %v2722_v33 = vrot.slane %v2721_v24, 4  ;;  %v2619_v37 = vld [vmem:[#allocation2 + $0x44] sm:$0x1]  ;;  %v2187_v43 = vld [vmem:[#allocation2 + $0x3c] sm:$0xe] }
  0xb8   : > { %11909 = vmatpush3.bf16.msra.mxu0 %v12112_v11  ;;  %4505 = vmatprep.mubr.bf16.mxu0 %v10338_v49  ;;  %v1673_v11 = vld [vmem:[#allocation2 + $0x34] sm:$0xf]  ;;  %v2712_v28 = vrot.slane %v2711_v18, 4  ;;  %v2298_v34 = vsel %vm12423_vm4, %v2296_v26, %v2297_v19  ;;  %v1803_v42 = vshll.u32 %v1674_v17, 16  ;;  %v2729_v49 = vshrl.u32 %v2617_v22, 16 }
  0xb9   : > { %11910 = vmatprep.subr.bf16.mxu0 %v12115_v30  ;;  %4658 = vmatprep.mubr.bf16.mxu1 %v10369_v55  ;;  %v1793_v35 = vshll.u32 %v1673_v11, 16  ;;  %v1797_v36 = vshrl.u32 %v1673_v11, 16  ;;  %v2727_v45 = vsel %vm12429_vm5, %v2722_v33, %v2726_v15  ;;  %v1675_v55 = vld [vmem:[#allocation2 + $0x3c] sm:$0xf]  ;;  %v2738_v59 = vshll.u32 %v2618_v31, 16 }
  0xba   : > { %4659 = vmatmul.mubr.bf16.gmra.mrb[68].mxu1 %v12108_v40  ;;  %v2717_v39 = vsel %vm12429_vm5, %v2712_v28, %v2716_v9  ;;  %v10339_v40 = vcombine.low %v2295_v25, %v2298_v34  ;;  %v1805_v53 = vrot.slane %v1803_v42, 5  ;;  %v2731_v58 = vrot.slane %v2729_v49, 4  ;;  %v2191_v42 = vld [vmem:[#allocation2 + $0x4c] sm:$0xf] }
  0xbb   : > { %v1795_v47 = vrot.slane %v1793_v35, 5  ;;  %v1799_v48 = vrot.slane %v1797_v36, 4  ;;  %v10370_v51 = vcombine.low %v2717_v39, %v2727_v45  ;;  %v2742_v60 = vshrl.u32 %v2618_v31, 16  ;;  %v2190_v36 = vld [vmem:[#allocation2 + $0x48] sm:$0xe] }
  0xbc   : > { %11911 = vmatpush3.bf16.msra.mxu0 %v12115_v30  ;;  %v1789_v30 = vrot.slane %v1787_v21, 5  ;;  %v2748_v63 = vshll.u32 %v2619_v37, 16  ;;  %v10324_v0 = vrot.slane %v2187_v43, 9  ;;  %v2740_v2 = vrot.slane %v2738_v59, 5 }
  0xbd   : > { %11912 = vmatprep.subr.bf16.mxu0 %v12118_v54  ;;  %v1800_v57 = vor.u32 %v1799_v48, %v1795_v47  ;;  %4666 = vmatprep.mubr.bf16.mxu1 %v10370_v51  ;;  %v2744_v3 = vrot.slane %v2742_v60, 4  ;;  %v2301_v5 = vrot.slane %v2188_v44, 5  ;;  %v2304_v9 = vrot.slane %v2189_v50, 5 }
  0xbe   : > { %v1790_v41 = vor.u32 %v1789_v30, %v1786_v29  ;;  %v2750_v8 = vrot.slane %v2748_v63, 5  ;;  %v1808_v11 = vshrl.u32 %v1675_v55, 16  ;;  %v1811_v20 = vshll.u32 %v1675_v55, 16  ;;  %v2621_v29 = vld [vmem:[#allocation2 + $0x4c] sm:$0xf] }
  0xbf   : > { %4506 = vmatmul.mubr.bf16.gmra.mrb[72].mxu0 %v10306_v27  ;;  %v1801_v1 = vrot.slane %v1800_v57, 4  ;;  %v2745_v13 = vor.u32 %v2744_v3, %v2740_v2  ;;  %v2302_v38 = vsel %vm12423_vm4, %v10324_v0, %v2301_v5  ;;  %v2303_v15 = vrot.slane %v2301_v5, 4  ;;  %v2622_v30 = vld [vmem:[#allocation2 + $0x50] sm:$0x1]  ;;  %v1679_v57 = vld [vmem:[#allocation2 + $0x4c] sm:$0xf] }
  0xc0   : > { %11913 = vmatpush3.bf16.msra.mxu0 %v12118_v54  ;;  %4513 = vmatprep.mubr.bf16.mxu0 %v10339_v40  ;;  %v1791_v52 = vrot.slane %v1790_v41, 4  ;;  %v2732_v54 = vshll.u32 %v2617_v22, 16  ;;  %v1810_v19 = vrot.slane %v1808_v11, 4  ;;  %v1817_v23 = vshll.u32 %v1676_v6, 16 }
  0xc1   : > { %11914 = vmatprep.subr.bf16.mxu0 %v12121_v12  ;;  %v2746_v21 = vrot.slane %v2745_v13, 4  ;;  %v2305_v22 = vsel %vm12423_vm4, %v2303_v15, %v2304_v9  ;;  %v1821_v24 = vshrl.u32 %v1676_v6, 16  ;;  %v1813_v27 = vrot.slane %v1811_v20, 5  ;;  %v2624_v13 = vld [vmem:[#allocation2 + $0x58] sm:$0xf] }
  0xc2   : > { %v1796_v61 = vsel %vm12429_vm5, %v1791_v52, %v1795_v47  ;;  %v2734_v62 = vrot.slane %v2732_v54, 5  ;;  %4667 = vmatmul.mubr.bf16.gmra.mrb[72].mxu1 %v12110_v46  ;;  %v10340_v26 = vcombine.low %v2302_v38, %v2305_v22  ;;  %v1827_v28 = vshll.u32 %v1677_v10, 16  ;;  %v2192_v47 = vld [vmem:[#allocation2 + $0x50] sm:$0x1]  ;;  %v1678_v52 = vld [vmem:[#allocation2 + $0x48] sm:$0xf] }
  0xc3   : > { %v2751_v31 = vsel %vm12429_vm5, %v2746_v21, %v2750_v8  ;;  %v1819_v33 = vrot.slane %v1817_v23, 5  ;;  %v1823_v34 = vrot.slane %v1821_v24, 4  ;;  %v2753_v35 = vshrl.u32 %v2620_v16, 16  ;;  %v2623_v8 = vld [vmem:[#allocation2 + $0x54] sm:$0xf]  ;;  %v12113_v21 = vld [vmem:[#allocation2 + $0x48] sm:$0xff]  }
  0xc4   : > { %11915 = vmatpush3.bf16.msra.mxu0 %v12121_v12  ;;  %v2735_v7 = vor.u32 %v2734_v62, %v2731_v58  ;;  %v1806_v12 = vsel %vm12429_vm5, %v1801_v1, %v1805_v53  ;;  %v1814_v39 = vor.u32 %v1813_v27, %v1810_v19  ;;  %v1829_v40 = vrot.slane %v1827_v28, 5  ;;  %v2193_v19 = vld [vmem:[#allocation2 + $0x54] sm:$0xe] }
  0xc5   : > { %11916 = vmatprep.subr.bf16.mxu0 %v12124_v32  ;;  %v10307_v17 = vcombine.low %v1796_v61, %v1806_v12  ;;  %v2756_v41 = vshll.u32 %v2620_v16, 16  ;;  %v1824_v43 = vor.u32 %v1823_v34, %v1819_v33  ;;  %v2755_v44 = vrot.slane %v2753_v35, 4  ;;  %v2195_v34 = vld [vmem:[#allocation2 + $0x5c] sm:$0x1] }
  0xc6   : > { %v2736_v18 = vrot.slane %v2735_v7, 4  ;;  %v2762_v45 = vshll.u32 %v2621_v29, 16  ;;  %v2766_v46 = vshrl.u32 %v2621_v29, 16  ;;  %v1815_v48 = vrot.slane %v1814_v39, 4  ;;  %v2194_v29 = vld [vmem:[#allocation2 + $0x58] sm:$0xf] }
  0xc7   : > { %4514 = vmatmul.mubr.bf16.gmra.mrb[76].mxu0 %v10307_v17  ;;  %v2758_v49 = vrot.slane %v2756_v41, 5  ;;  %v2772_v50 = vshll.u32 %v2622_v30, 16  ;;  %v10325_v51 = vrot.slane %v2190_v36, 9  ;;  %v1825_v53 = vrot.slane %v1824_v43, 4 }
  0xc8   : > { %11917 = vmatpush3.bf16.msra.mxu0 %v12124_v32  ;;  %v2741_v25 = vsel %vm12429_vm5, %v2736_v18, %v2740_v2  ;;  %v12111_v32 = vld [vmem:[#allocation2 + $0x3c] sm:$0xff]   ;;  %4521 = vmatprep.mubr.bf16.mxu0 %v10340_v26  ;;  %v2764_v54 = vrot.slane %v2762_v45, 5  ;;  %v2768_v55 = vrot.slane %v2766_v46, 4  ;;  %v1820_v58 = vsel %vm12429_vm5, %v1815_v48, %v1819_v33  ;;  %v1680_v2 = vld [vmem:[#allocation2 + $0x50] sm:$0x1] }
  0xc9   : > { %11918 = vmatprep.subr.bf16.mxu0 %v12127_v56  ;;  %v10371_v37 = vcombine.low %v2741_v25, %v2751_v31  ;;  %v2759_v59 = vor.u32 %v2758_v49, %v2755_v44  ;;  %v2774_v60 = vrot.slane %v2772_v50, 5  ;;  %v2311_v61 = vrot.slane %v2192_v47, 5  ;;  %v2625_v18 = vld [vmem:[#allocation2 + $0x5c] sm:$0x1]  ;;  %v1682_v49 = vld [vmem:[#allocation2 + $0x58] sm:$0xf] }
  0xca   : > { %v1830_v62 = vsel %vm12429_vm5, %v1825_v53, %v1829_v40  ;;  %v2769_v63 = vor.u32 %v2768_v55, %v2764_v54  ;;  %v1832_v6 = vshrl.u32 %v1678_v52, 16  ;;  %v1835_v7 = vshll.u32 %v1678_v52, 16  ;;  %v1681_v40 = vld [vmem:[#allocation2 + $0x54] sm:$0xf]  ;;  %v1683_v53 = vld [vmem:[#allocation2 + $0x5c] sm:$0x1] }
  0xcb   : > { %4674 = vmatprep.mubr.bf16.mxu1 %v10371_v37  ;;  %v10308_v3 = vcombine.low %v1820_v58, %v1830_v62  ;;  %v2760_v5 = vrot.slane %v2759_v59, 4  ;;  %v1841_v11 = vshll.u32 %v1679_v57, 16  ;;  %v1845_v12 = vshrl.u32 %v1679_v57, 16  ;;  %v2626_v59 = vld [vmem:[#allocation2 + $0x60] sm:$0xf] }
  0xcc   : > { %11919 = vmatpush3.bf16.msra.mxu0 %v12127_v56  ;;  %4675 = vmatmul.mubr.bf16.gmra.mrb[76].mxu1 %v12111_v32  ;;  %v2308_v56 = vrot.slane %v2191_v42, 5  ;;  %v2770_v9 = vrot.slane %v2769_v63, 4  ;;  %v1834_v16 = vrot.slane %v1832_v6, 4  ;;  %v1837_v17 = vrot.slane %v1835_v7, 5  ;;  %v2628_v7 = vld [vmem:[#allocation2 + $0x68] sm:$0x1] }
  0xcd   : > { %v2765_v38 = vsel %vm12429_vm5, %v2760_v5, %v2764_v54  ;;  %v1843_v22 = vrot.slane %v1841_v11, 5  ;;  %v1847_v23 = vrot.slane %v1845_v12, 4  ;;  %v1851_v24 = vshll.u32 %v1680_v2, 16 }
  0xce   : > { %v2309_v0 = vsel %vm12423_vm4, %v10325_v51, %v2308_v56  ;;  %v2310_v1 = vrot.slane %v2308_v56, 4  ;;  %v2775_v20 = vsel %vm12429_vm5, %v2770_v9, %v2774_v60  ;;  %v1838_v26 = vor.u32 %v1837_v17, %v1834_v16 }
  0xcf   : > { %4522 = vmatmul.mubr.bf16.gmra.mrb[80].mxu0 %v10308_v3  ;;  %v10372_v25 = vcombine.low %v2765_v38, %v2775_v20  ;;  %v2777_v27 = vshrl.u32 %v2623_v8, 16  ;;  %v2780_v28 = vshll.u32 %v2623_v8, 16  ;;  %v1848_v30 = vor.u32 %v1847_v23, %v1843_v22  ;;  %v2196_v8 = vld [vmem:[#allocation2 + $0x60] sm:$0xe] }
  0xd0   : > { %v2312_v10 = vsel %vm12423_vm4, %v2310_v1, %v2311_v61  ;;  %v1853_v31 = vrot.slane %v1851_v24, 5  ;;  %v2786_v32 = vshll.u32 %v2624_v13, 16  ;;  %v2790_v33 = vshrl.u32 %v2624_v13, 16  ;;  %v12114_v61 = vld [vmem:[#allocation2 + $0x54] sm:$0xff]   ;;  %v2627_v1 = vld [vmem:[#allocation2 + $0x64] sm:$0xf] }
  0xd1   : > { %v10341_v15 = vcombine.low %v2309_v0, %v2312_v10  ;;  %4682 = vmatprep.mubr.bf16.mxu1 %v10372_v25  ;;  %v1839_v35 = vrot.slane %v1838_v26, 4  ;;  %v2779_v36 = vrot.slane %v2777_v27, 4  ;;  %v2782_v37 = vrot.slane %v2780_v28, 5  ;;  %v2197_v13 = vld [vmem:[#allocation2 + $0x64] sm:$0xf] }
  0xd2   : > { %v2796_v39 = vshll.u32 %v2625_v18, 16  ;;  %v1849_v41 = vrot.slane %v1848_v30, 4  ;;  %v2788_v42 = vrot.slane %v2786_v32, 5  ;;  %v2792_v43 = vrot.slane %v2790_v33, 4  ;;  %v1684_v27 = vld [vmem:[#allocation2 + $0x60] sm:$0xf] }
  0xd3   : > { %4529 = vmatprep.mubr.bf16.mxu0 %v10341_v15  ;;  %v10326_v44 = vrot.slane %v2193_v19, 9  ;;  %v1844_v45 = vsel %vm12429_vm5, %v1839_v35, %v1843_v22  ;;  %v2783_v46 = vor.u32 %v2782_v37, %v2779_v36  ;;  %v2315_v48 = vrot.slane %v2194_v29, 5  ;;  %v2198_v22 = vld [vmem:[#allocation2 + $0x68] sm:$0x1] }
  0xd4   : > { %4683 = vmatmul.mubr.bf16.gmra.mrb[80].mxu1 %v12113_v21  ;;  %v2798_v47 = vrot.slane %v2796_v39, 5  ;;  %v1854_v50 = vsel %vm12429_vm5, %v1849_v41, %v1853_v31  ;;  %v2793_v51 = vor.u32 %v2792_v43, %v2788_v42  ;;  %v2318_v52 = vrot.slane %v2195_v34, 5  ;;  %v1686_v41 = vld [vmem:[#allocation2 + $0x68] sm:$0x1] }
  0xd5   : > { %v1856_v54 = vshrl.u32 %v1681_v40, 16  ;;  %v10309_v55 = vcombine.low %v1844_v45, %v1854_v50  ;;  %v2784_v56 = vrot.slane %v2783_v46, 4  ;;  %v2316_v57 = vsel %vm12423_vm4, %v10326_v44, %v2315_v48 }
  0xd6   : > { %v2317_v58 = vrot.slane %v2315_v48, 4  ;;  %v2794_v60 = vrot.slane %v2793_v51, 4  ;;  %v1859_v63 = vshll.u32 %v1681_v40, 16  ;;  %v1865_v0 = vshll.u32 %v1682_v49, 16  ;;  %v1685_v40 = vld [vmem:[#allocation2 + $0x64] sm:$0xf] }
  0xd7   : > { %v1858_v62 = vrot.slane %v1856_v54, 4  ;;  %4530 = vmatmul.mubr.bf16.gmra.mrb[84].mxu0 %v10309_v55  ;;  %v2789_v2 = vsel %vm12429_vm5, %v2784_v56, %v2788_v42  ;;  %v1869_v5 = vshrl.u32 %v1682_v49, 16  ;;  %v1875_v6 = vshll.u32 %v1683_v53, 16 }
  0xd8   : > { %v2319_v3 = vsel %vm12423_vm4, %v2317_v58, %v2318_v52  ;;  %v2799_v9 = vsel %vm12429_vm5, %v2794_v60, %v2798_v47  ;;  %v1861_v11 = vrot.slane %v1859_v63, 5  ;;  %v1867_v12 = vrot.slane %v1865_v0, 5  ;;  %v2629_v47 = vld [vmem:[#allocation2 + $0x6c] sm:$0xf]  ;;  %v2630_v52 = vld [vmem:[#allocation2 + $0x70] sm:$0xf] }
  0xd9   : > { %v10342_v10 = vcombine.low %v2316_v57, %v2319_v3  ;;  %v10373_v38 = vcombine.low %v2789_v2, %v2799_v9  ;;  %v1871_v15 = vrot.slane %v1869_v5, 4  ;;  %v1877_v16 = vrot.slane %v1875_v6, 5  ;;  %v2631_v57 = vld [vmem:[#allocation2 + $0x74] sm:$0x1]  ;;  %v12116_v60 = vld [vmem:[#allocation2 + $0x60] sm:$0xff]  }
  0xda   : > { %v2801_v17 = vshrl.u32 %v2626_v59, 16  ;;  %v1862_v18 = vor.u32 %v1861_v11, %v1858_v62  ;;  %v2804_v19 = vshll.u32 %v2626_v59, 16  ;;  %v2810_v20 = vshll.u32 %v2627_v1, 16  ;;  %v2199_v63 = vld [vmem:[#allocation2 + $0x6c] sm:$0xe] }
  0xdb   : > { %4537 = vmatprep.mubr.bf16.mxu0 %v10342_v10  ;;  %v2814_v21 = vshrl.u32 %v2627_v1, 16  ;;  %4690 = vmatprep.mubr.bf16.mxu1 %v10373_v38  ;;  %v1872_v23 = vor.u32 %v1871_v15, %v1867_v12  ;;  %v2820_v25 = vshll.u32 %v2628_v7, 16  ;;  %v10327_v26 = vrot.slane %v2196_v8, 9  ;;  %v2200_v5 = vld [vmem:[#allocation2 + $0x70] sm:$0xf] }
  0xdc   : > { %v2803_v24 = vrot.slane %v2801_v17, 4  ;;  %4691 = vmatmul.mubr.bf16.gmra.mrb[84].mxu1 %v12114_v61  ;;  %v1863_v28 = vrot.slane %v1862_v18, 4  ;;  %v2806_v29 = vrot.slane %v2804_v19, 5  ;;  %v2812_v30 = vrot.slane %v2810_v20, 5  ;;  %v2201_v10 = vld [vmem:[#allocation2 + $0x74] sm:$0x1] }
  0xdd   : > { %v2816_v31 = vrot.slane %v2814_v21, 4  ;;  %v1873_v32 = vrot.slane %v1872_v23, 4  ;;  %v2822_v33 = vrot.slane %v2820_v25, 5  ;;  %v2322_v34 = vrot.slane %v2197_v13, 5  ;;  %v1687_v15 = vld [vmem:[#allocation2 + $0x6c] sm:$0xf] }
  0xde   : > { %v2325_v35 = vrot.slane %v2198_v22, 5  ;;  %v1868_v36 = vsel %vm12429_vm5, %v1863_v28, %v1867_v12  ;;  %v2807_v37 = vor.u32 %v2806_v29, %v2803_v24  ;;  %v1880_v42 = vshrl.u32 %v1684_v27, 16  ;;  %v1688_v20 = vld [vmem:[#allocation2 + $0x70] sm:$0xf] }
  0xdf   : > { %v2817_v39 = vor.u32 %v2816_v31, %v2812_v30  ;;  %v1878_v43 = vsel %vm12429_vm5, %v1873_v32, %v1877_v16  ;;  %v2323_v44 = vsel %vm12423_vm4, %v10327_v26, %v2322_v34  ;;  %v2324_v45 = vrot.slane %v2322_v34, 4  ;;  %v1689_v31 = vld [vmem:[#allocation2 + $0x74] sm:$0x1]  ;;  %v2632_v34 = vld [vmem:[#allocation2 + $0x78] sm:$0xf] }
  0xe0   : > { %v1883_v46 = vshll.u32 %v1684_v27, 16  ;;  %v10310_v48 = vcombine.low %v1868_v36, %v1878_v43  ;;  %v2808_v49 = vrot.slane %v2807_v37, 4  ;;  %v1882_v51 = vrot.slane %v1880_v42, 4  ;;  %v12117_v42 = vld [vmem:[#allocation2 + $0x6c] sm:$0xff]  }
  0xe1   : > { %v2818_v50 = vrot.slane %v2817_v39, 4  ;;  %v2326_v53 = vsel %vm12423_vm4, %v2324_v45, %v2325_v35  ;;  %v1889_v55 = vshll.u32 %v1685_v40, 16  ;;  %v1893_v56 = vshrl.u32 %v1685_v40, 16  ;;  %v2633_v40 = vld [vmem:[#allocation2 + $0x7c] sm:$0xf] }
  0xe2   : > { %v1885_v54 = vrot.slane %v1883_v46, 5  ;;  %4538 = vmatmul.mubr.bf16.gmra.mrb[88].mxu0 %v10310_v48  ;;  %v2813_v58 = vsel %vm12429_vm5, %v2808_v49, %v2812_v30  ;;  %v10343_v61 = vcombine.low %v2323_v44, %v2326_v53  ;;  %v1899_v62 = vshll.u32 %v1686_v41, 16 }
  0xe3   : > { %v2823_v59 = vsel %vm12429_vm5, %v2818_v50, %v2822_v33  ;;  %v1891_v2 = vrot.slane %v1889_v55, 5  ;;  %v1895_v3 = vrot.slane %v1893_v56, 4  ;;  %v2825_v7 = vshrl.u32 %v2629_v47, 16  ;;  %v2634_v50 = vld [vmem:[#allocation2 + $0x80] sm:$0x1] }
  0xe4   : > { %v10374_v0 = vcombine.low %v2813_v58, %v2823_v59  ;;  %v1886_v1 = vor.u32 %v1885_v54, %v1882_v51  ;;  %4545 = vmatprep.mubr.bf16.mxu0 %v10343_v61  ;;  %v1901_v6 = vrot.slane %v1899_v62, 5  ;;  %v2828_v8 = vshll.u32 %v2629_v47, 16  ;;  %v2202_v51 = vld [vmem:[#allocation2 + $0x78] sm:$0xe]  ;;  %v2203_v56 = vld [vmem:[#allocation2 + $0x7c] sm:$0xf] }
  0xe5   : > { %v2834_v9 = vshll.u32 %v2630_v52, 16  ;;  %v1896_v12 = vor.u32 %v1895_v3, %v1891_v2  ;;  %v2838_v13 = vshrl.u32 %v2630_v52, 16  ;;  %v2844_v38 = vshll.u32 %v2631_v57, 16  ;;  %v2204_v57 = vld [vmem:[#allocation2 + $0x80] sm:$0x1] }
  0xe6   : > { %4698 = vmatprep.mubr.bf16.mxu1 %v10374_v0  ;;  %v1887_v11 = vrot.slane %v1886_v1, 4  ;;  %v2827_v16 = vrot.slane %v2825_v7, 4  ;;  %v2830_v17 = vrot.slane %v2828_v8, 5  ;;  %v10328_v19 = vrot.slane %v2199_v63, 9  ;;  %v1690_v63 = vld [vmem:[#allocation2 + $0x78] sm:$0xf] }
  0xe7   : > { %4699 = vmatmul.mubr.bf16.gmra.mrb[88].mxu1 %v12116_v60  ;;  %v2836_v18 = vrot.slane %v2834_v9, 5  ;;  %v1897_v22 = vrot.slane %v1896_v12, 4  ;;  %v2840_v23 = vrot.slane %v2838_v13, 4  ;;  %v2846_v24 = vrot.slane %v2844_v38, 5 }
  0xe8   : > { %v1892_v21 = vsel %vm12429_vm5, %v1887_v11, %v1891_v2  ;;  %v2831_v25 = vor.u32 %v2830_v17, %v2827_v16  ;;  %v2329_v26 = vrot.slane %v2200_v5, 5  ;;  %v2332_v27 = vrot.slane %v2201_v10, 5 }
  0xe9   : > { %v1904_v28 = vshrl.u32 %v1687_v15, 16  ;;  %v1902_v29 = vsel %vm12429_vm5, %v1897_v22, %v1901_v6  ;;  %v2841_v30 = vor.u32 %v2840_v23, %v2836_v18  ;;  %v1907_v32 = vshll.u32 %v1687_v15, 16  ;;  %v1691_v6 = vld [vmem:[#allocation2 + $0x7c] sm:$0xf] }
  0xea   : > { %v1913_v33 = vshll.u32 %v1688_v20, 16  ;;  %v10311_v35 = vcombine.low %v1892_v21, %v1902_v29  ;;  %v2832_v36 = vrot.slane %v2831_v25, 4  ;;  %v2330_v37 = vsel %vm12423_vm4, %v10328_v19, %v2329_v26  ;;  %v1692_v25 = vld [vmem:[#allocation2 + $0x80] sm:$0x1] }
  0xeb   : > { %v2331_v39 = vrot.slane %v2329_v26, 4  ;;  %v2842_v41 = vrot.slane %v2841_v30, 4  ;;  %v1906_v43 = vrot.slane %v1904_v28, 4  ;;  %v1909_v44 = vrot.slane %v1907_v32, 5 }
  0xec   : > { %v1915_v45 = vrot.slane %v1913_v33, 5  ;;  %4546 = vmatmul.mubr.bf16.gmra.mrb[92].mxu0 %v10311_v35  ;;  %v2837_v46 = vsel %vm12429_vm5, %v2832_v36, %v2836_v18  ;;  %v1917_v48 = vshrl.u32 %v1688_v20, 16  ;;  %v1923_v49 = vshll.u32 %v1689_v31, 16 }
  0xed   : > { %v2333_v47 = vsel %vm12423_vm4, %v2331_v39, %v2332_v27  ;;  %v2847_v52 = vsel %vm12429_vm5, %v2842_v41, %v2846_v24  ;;  %v1910_v54 = vor.u32 %v1909_v44, %v1906_v43  ;;  %v2849_v55 = vshrl.u32 %v2632_v34, 16  ;;  %v2635_v27 = vld [vmem:[#allocation2 + $0x84] sm:$0xf] }
  0xee   : > { %v10344_v53 = vcombine.low %v2330_v37, %v2333_v47  ;;  %v10375_v59 = vcombine.low %v2837_v46, %v2847_v52  ;;  %v1919_v60 = vrot.slane %v1917_v48, 4  ;;  %v1925_v61 = vrot.slane %v1923_v49, 5  ;;  %v2636_v37 = vld [vmem:[#allocation2 + $0x88] sm:$0xf]  ;;  %v2637_v49 = vld [vmem:[#allocation2 + $0x8c] sm:$0x1] }
  0xef   : > { %v2852_v62 = vshll.u32 %v2632_v34, 16  ;;  %v1911_v1 = vrot.slane %v1910_v54, 4  ;;  %v2851_v2 = vrot.slane %v2849_v55, 4  ;;  %v2858_v3 = vshll.u32 %v2633_v40, 16 }
  0xf0   : > { %4553 = vmatprep.mubr.bf16.mxu0 %v10344_v53  ;;  %v2862_v5 = vshrl.u32 %v2633_v40, 16  ;;  %4706 = vmatprep.mubr.bf16.mxu1 %v10375_v59  ;;  %v1920_v7 = vor.u32 %v1919_v60, %v1915_v45  ;;  %v2868_v9 = vshll.u32 %v2634_v50, 16  ;;  %v10329_v10 = vrot.slane %v2202_v51, 9  ;;  %v12119_v40 = vld [vmem:[#allocation2 + $0x78] sm:$0xff]  }
  0xf1   : > { %v2854_v8 = vrot.slane %v2852_v62, 5  ;;  %4707 = vmatmul.mubr.bf16.gmra.mrb[92].mxu1 %v12117_v42  ;;  %v1916_v12 = vsel %vm12429_vm5, %v1911_v1, %v1915_v45  ;;  %v2860_v13 = vrot.slane %v2858_v3, 5  ;;  %v2336_v15 = vrot.slane %v2203_v56, 5  ;;  %v2205_v56 = vld [vmem:[#allocation2 + $0x84] sm:$0xe] }
  0xf2   : > { %v2864_v38 = vrot.slane %v2862_v5, 4  ;;  %v1921_v17 = vrot.slane %v1920_v7, 4  ;;  %v2870_v19 = vrot.slane %v2868_v9, 5  ;;  %v2339_v20 = vrot.slane %v2204_v57, 5  ;;  %v2206_v57 = vld [vmem:[#allocation2 + $0x88] sm:$0xf] }
  0xf3   : > { %v2855_v18 = vor.u32 %v2854_v8, %v2851_v2  ;;  %v2337_v23 = vsel %vm12423_vm4, %v10329_v10, %v2336_v15  ;;  %v2338_v24 = vrot.slane %v2336_v15, 4  ;;  %v1928_v26 = vshrl.u32 %v1690_v63, 16 }
  0xf4   : > { %v2865_v22 = vor.u32 %v2864_v38, %v2860_v13  ;;  %v1926_v28 = vsel %vm12429_vm5, %v1921_v17, %v1925_v61  ;;  %v1931_v30 = vshll.u32 %v1690_v63, 16  ;;  %v1937_v31 = vshll.u32 %v1691_v6, 16  ;;  %v2207_v63 = vld [vmem:[#allocation2 + $0x8c] sm:$0x1] }
  0xf5   : > { %v2856_v29 = vrot.slane %v2855_v18, 4  ;;  %v10312_v33 = vcombine.low %v1916_v12, %v1926_v28  ;;  %v2340_v35 = vsel %vm12423_vm4, %v2338_v24, %v2339_v20  ;;  %v1930_v36 = vrot.slane %v1928_v26, 4  ;;  %v1694_v12 = vld [vmem:[#allocation2 + $0x88] sm:$0xf]  ;;  %v1695_v24 = vld [vmem:[#allocation2 + $0x8c] sm:$0x1] }
  0xf6   : > { %v2866_v34 = vrot.slane %v2865_v22, 4  ;;  %v10345_v41 = vcombine.low %v2337_v23, %v2340_v35  ;;  %v1933_v42 = vrot.slane %v1931_v30, 5  ;;  %v1939_v43 = vrot.slane %v1937_v31, 5 }
  0xf7   : > { %v2861_v39 = vsel %vm12429_vm5, %v2856_v29, %v2860_v13  ;;  %4554 = vmatmul.mubr.bf16.gmra.mrb[96].mxu0 %v10312_v33  ;;  %v1941_v47 = vshrl.u32 %v1691_v6, 16  ;;  %v1947_v48 = vshll.u32 %v1692_v25, 16  ;;  %v2873_v50 = vshrl.u32 %v2635_v27, 16  ;;  %v1693_v6 = vld [vmem:[#allocation2 + $0x84] sm:$0xf] }
  0xf8   : > { %v2871_v46 = vsel %vm12429_vm5, %v2866_v34, %v2870_v19  ;;  %4561 = vmatprep.mubr.bf16.mxu0 %v10345_v41  ;;  %v1934_v53 = vor.u32 %v1933_v42, %v1930_v36  ;;  %v2876_v54 = vshll.u32 %v2635_v27, 16  ;;  %v2882_v55 = vshll.u32 %v2636_v37, 16  ;;  %v2638_v36 = vld [vmem:[#allocation2 + $0x90] sm:$0xf]  ;;  %v12120_v42 = vld [vmem:[#allocation2 + $0x84] sm:$0xff]  }
  0xf9   : > { %v10376_v52 = vcombine.low %v2861_v39, %v2871_v46  ;;  %v1943_v59 = vrot.slane %v1941_v47, 4  ;;  %v1949_v60 = vrot.slane %v1947_v48, 5  ;;  %v2875_v61 = vrot.slane %v2873_v50, 4  ;;  %v2639_v47 = vld [vmem:[#allocation2 + $0x94] sm:$0xf] }
  0xfa   : > { %v2886_v62 = vshrl.u32 %v2636_v37, 16  ;;  %v1935_v1 = vrot.slane %v1934_v53, 4  ;;  %v2878_v2 = vrot.slane %v2876_v54, 5  ;;  %v2884_v3 = vrot.slane %v2882_v55, 5  ;;  %v2640_v54 = vld [vmem:[#allocation2 + $0x98] sm:$0x1] }
  0xfb   : > { %4714 = vmatprep.mubr.bf16.mxu1 %v10376_v52  ;;  %v2892_v5 = vshll.u32 %v2637_v49, 16  ;;  %v1944_v7 = vor.u32 %v1943_v59, %v1939_v43  ;;  %v10330_v9 = vrot.slane %v2205_v56, 9  ;;  %v2343_v10 = vrot.slane %v2206_v57, 5 }
  0xfc   : > { %4715 = vmatmul.mubr.bf16.gmra.mrb[96].mxu1 %v12119_v40  ;;  %v2888_v8 = vrot.slane %v2886_v62, 4  ;;  %v1940_v38 = vsel %vm12429_vm5, %v1935_v1, %v1939_v43  ;;  %v2879_v15 = vor.u32 %v2878_v2, %v2875_v61  ;;  %v2346_v18 = vrot.slane %v2207_v63, 5 }
  0xfd   : > { %v2894_v17 = vrot.slane %v2892_v5, 5  ;;  %v1945_v19 = vrot.slane %v1944_v7, 4  ;;  %v2344_v22 = vsel %vm12423_vm4, %v10330_v9, %v2343_v10  ;;  %v2345_v23 = vrot.slane %v2343_v10, 4 }
  0xfe   : > { %v2889_v20 = vor.u32 %v2888_v8, %v2884_v3  ;;  %v2880_v25 = vrot.slane %v2879_v15, 4  ;;  %v1952_v26 = vshrl.u32 %v1693_v6, 16  ;;  %v1955_v27 = vshll.u32 %v1693_v6, 16  ;;  %v2208_v8 = vld [vmem:[#allocation2 + $0x90] sm:$0xe] }
  0xff   : > { %v1961_v28 = vshll.u32 %v1694_v12, 16  ;;  %v1950_v31 = vsel %vm12429_vm5, %v1945_v19, %v1949_v60  ;;  %v2347_v34 = vsel %vm12423_vm4, %v2345_v23, %v2346_v18  ;;  %v1965_v35 = vshrl.u32 %v1694_v12, 16  ;;  %v2209_v15 = vld [vmem:[#allocation2 + $0x94] sm:$0xf]  ;;  %v1696_v23 = vld [vmem:[#allocation2 + $0x90] sm:$0xf] }
 0x100   : > { %v2890_v33 = vrot.slane %v2889_v20, 4  ;;  %v10313_v40 = vcombine.low %v1940_v38, %v1950_v31  ;;  %v2885_v41 = vsel %vm12429_vm5, %v2880_v25, %v2884_v3  ;;  %v10346_v43 = vcombine.low %v2344_v22, %v2347_v34  ;;  %v2210_v22 = vld [vmem:[#allocation2 + $0x98] sm:$0x1]  ;;  %v1697_v31 = vld [vmem:[#allocation2 + $0x94] sm:$0xf] }
 0x101   : > { %v1954_v46 = vrot.slane %v1952_v26, 4  ;;  %v1957_v50 = vrot.slane %v1955_v27, 5  ;;  %v1963_v52 = vrot.slane %v1961_v28, 5  ;;  %v1967_v53 = vrot.slane %v1965_v35, 4 }
 0x102   : > { %v12825_v0 = vpop.f32.mrb[0].mxu0  ;;  %v2895_v49 = vsel %vm12429_vm5, %v2890_v33, %v2894_v17  ;;  %4562 = vmatmul.mubr.bf16.gmra.mrb[100].mxu0 %v10313_v40  ;;  %v1971_v57 = vshll.u32 %v1695_v24, 16  ;;  %v2897_v59 = vshrl.u32 %v2638_v36, 16  ;;  %v2900_v60 = vshll.u32 %v2638_v36, 16 }
 0x103   : > { %v12823_v58 = vpop.f32.mrb[0].mxu1  ;;  %v12827_v11 = vpop.f32.mrb[1].mxu0  ;;  %v10377_v56 = vcombine.low %v2885_v41, %v2895_v49  ;;  %4569 = vmatprep.mubr.bf16.mxu0 %v10346_v43  ;;  %v1958_v62 = vor.u32 %v1957_v50, %v1954_v46  ;;  %v1968_v63 = vor.u32 %v1967_v53, %v1963_v52  ;;  %v2906_v1 = vshll.u32 %v2639_v47, 16  ;;  %v1698_v46 = vld [vmem:[#allocation2 + $0x98] sm:$0x1]  ;;  %v12122_v53 = vld [vmem:[#allocation2 + $0x90] sm:$0xff]  }
 0x104   : > { %v12831_v16 = vpop.f32.mrb[2].mxu0  ;;  %v12839_v32 = vpop.f32.mrb[1].mxu1  ;;  %v2910_v2 = vshrl.u32 %v2639_v47, 16  ;;  %v1973_v3 = vrot.slane %v1971_v57, 5  ;;  %v2899_v5 = vrot.slane %v2897_v59, 4  ;;  %v2902_v6 = vrot.slane %v2900_v60, 5 }
 0x105   : > { %v12833_v21 = vpop.f32.mrb[3].mxu0  ;;  %v12845_v44 = vpop.f32.mrb[2].mxu1  ;;  %4722 = vmatprep.mubr.bf16.mxu1 %v10377_v56  ;;  %v2916_v7 = vshll.u32 %v2640_v54, 16  ;;  %v1959_v9 = vrot.slane %v1958_v62, 4  ;;  %v1969_v10 = vrot.slane %v1968_v63, 4  ;;  %v2908_v12 = vrot.slane %v2906_v1, 5 }
 0x106   : > { %v12851_v51 = vpop.f32.mrb[3].mxu1  ;;  %4723 = vmatmul.mubr.bf16.gmra.mrb[100].mxu1 %v12120_v42  ;;  %v2912_v38 = vrot.slane %v2910_v2, 4  ;;  %v2903_v17 = vor.u32 %v2902_v6, %v2899_v5  ;;  %v12883_v19 = vadd.f32 %v12827_v11, %v12825_v0  ;;  %v12887_v20 = vadd.f32 %v12833_v21, %v12831_v16  ;;  %v2641_v50 = vld [vmem:[#allocation2 + $0x9c] sm:$0xf]  ;;  %v2642_v1 = vld [vmem:[#allocation2 + $0xa0] sm:$0xf] }
 0x107   : > { %v2918_v18 = vrot.slane %v2916_v7, 5  ;;  %v1964_v25 = vsel %vm12429_vm5, %v1959_v9, %v1963_v52  ;;  %v1974_v26 = vsel %vm12429_vm5, %v1969_v10, %v1973_v3  ;;  %v12897_v28 = vadd.f32 %v12839_v32, %v12823_v58  ;;  %v2643_v7 = vld [vmem:[#allocation2 + $0xa4] sm:$0x1] }
 0x108   : > { %v2913_v27 = vor.u32 %v2912_v38, %v2908_v12  ;;  %v10314_v16 = vcombine.low %v1964_v25, %v1974_v26  ;;  %v2904_v21 = vrot.slane %v2903_v17, 4  ;;  %v10331_v36 = vrot.slane %v2208_v8, 9  ;;  %v2211_v25 = vld [vmem:[#allocation2 + $0x9c] sm:$0xe]  ;;  %v2212_v26 = vld [vmem:[#allocation2 + $0xa0] sm:$0xf] }
 0x109   : > { %15515 = vst [vmem:[#allocation6_spill] sm:$0xff] %v12897_v28  ;;  %v2350_v40 = vrot.slane %v2209_v15, 5  ;;  %v2353_v41 = vrot.slane %v2210_v22, 5  ;;  %v12915_v32 = vadd.f32 %v12851_v51, %v12845_v44  ;;  %v1976_v47 = vshrl.u32 %v1696_v23, 16 }
 0x10a   : > { %v12847_v45 = vpop.f32.mrb[4].mxu0  ;;  %v2914_v35 = vrot.slane %v2913_v27, 4  ;;  %4570 = vmatmul.mubr.bf16.gmra.mrb[104].mxu0 %v10314_v16  ;;  %v2909_v58 = vsel %vm12429_vm5, %v2904_v21, %v2908_v12  ;;  %v1979_v49 = vshll.u32 %v1696_v23, 16  ;;  %v1985_v57 = vshll.u32 %v1697_v31, 16 }
 0x10b   : > { %v12853_v13 = vpop.f32.mrb[5].mxu0  ;;  %v12861_v30 = vpop.f32.mrb[4].mxu1  ;;  %15516 = vst [vmem:[#allocation7_spill] sm:$0xff] %v12915_v32  ;;  %v2351_v54 = vsel %vm12423_vm4, %v10331_v36, %v2350_v40  ;;  %v2352_v56 = vrot.slane %v2350_v40, 4  ;;  %v1978_v44 = vrot.slane %v1976_v47, 4  ;;  %v1989_v63 = vshrl.u32 %v1697_v31, 16 }
 0x10c   : > { %v12859_v29 = vpop.f32.mrb[6].mxu0  ;;  %v12869_v39 = vpop.f32.mrb[5].mxu1  ;;  %v2919_v52 = vsel %vm12429_vm5, %v2914_v35, %v2918_v18  ;;  %v1981_v51 = vrot.slane %v1979_v49, 5  ;;  %v1987_v5 = vrot.slane %v1985_v57, 5  ;;  %v1995_v6 = vshll.u32 %v1698_v46, 16 }
 0x10d   : > { %v12867_v37 = vpop.f32.mrb[7].mxu0  ;;  %v12873_v48 = vpop.f32.mrb[6].mxu1  ;;  %v10378_v62 = vcombine.low %v2909_v58, %v2919_v52  ;;  %v2354_v3 = vsel %vm12423_vm4, %v2352_v56, %v2353_v41  ;;  %v2921_v8 = vshrl.u32 %v2641_v50, 16  ;;  %v1991_v38 = vrot.slane %v1989_v63, 4 }
 0x10e   : > { %v12877_v55 = vpop.f32.mrb[7].mxu1  ;;  %v10347_v10 = vcombine.low %v2351_v54, %v2354_v3  ;;  %v1982_v12 = vor.u32 %v1981_v51, %v1978_v44  ;;  %v2924_v15 = vshll.u32 %v2641_v50, 16  ;;  %v1997_v17 = vrot.slane %v1995_v6, 5  ;;  %v1700_v3 = vld [vmem:[#allocation2 + $0xa0] sm:$0xf] }
 0x10f   : > { %4730 = vmatprep.mubr.bf16.mxu1 %v10378_v62  ;;  %v2923_v18 = vrot.slane %v2921_v8, 4  ;;  %v2930_v22 = vshll.u32 %v2642_v1, 16  ;;  %v2934_v23 = vshrl.u32 %v2642_v1, 16  ;;  %v1992_v16 = vor.u32 %v1991_v38, %v1987_v5  ;;  %v12123_v8 = vld [vmem:[#allocation2 + $0x9c] sm:$0xff]  }
 0x110   : > { %4731 = vmatmul.mubr.bf16.gmra.mrb[104].mxu1 %v12122_v53  ;;  %4577 = vmatprep.mubr.bf16.mxu0 %v10347_v10  ;;  %v1983_v27 = vrot.slane %v1982_v12, 4  ;;  %v2926_v21 = vrot.slane %v2924_v15, 5  ;;  %v2940_v31 = vshll.u32 %v2643_v7, 16  ;;  %v12935_v41 = vadd.f32 %v12853_v13, %v12847_v45  ;;  %v2213_v53 = vld [vmem:[#allocation2 + $0xa4] sm:$0x1] }
 0x111   : > { %v2932_v36 = vrot.slane %v2930_v22, 5  ;;  %v2936_v40 = vrot.slane %v2934_v23, 4  ;;  %v12939_v58 = vadd.f32 %v12867_v37, %v12859_v29  ;;  %v1993_v50 = vrot.slane %v1992_v16, 4  ;;  %v1699_v37 = vld [vmem:[#allocation2 + $0x9c] sm:$0xf] }
 0x112   : > { %v12879_v61 = vpop.f32.mrb[8].mxu0  ;;  %v1988_v49 = vsel %vm12429_vm5, %v1983_v27, %v1987_v5  ;;  %v2927_v52 = vor.u32 %v2926_v21, %v2923_v18  ;;  %v2942_v13 = vrot.slane %v2940_v31, 5  ;;  %v12953_v29 = vadd.f32 %v12869_v39, %v12861_v30  ;;  %v1701_v39 = vld [vmem:[#allocation2 + $0xa4] sm:$0x1]  ;;  %v2644_v12 = vld [vmem:[#allocation2 + $0xa8] sm:$0xf] }
 0x113   : > { %v12889_v24 = vpop.f32.mrb[9].mxu0  ;;  %v12901_v11 = vpop.f32.mrb[8].mxu1  ;;  %v2937_v45 = vor.u32 %v2936_v40, %v2932_v36  ;;  %v1998_v44 = vsel %vm12429_vm5, %v1993_v50, %v1997_v17  ;;  %v10332_v63 = vrot.slane %v2211_v25, 9  ;;  %v2357_v1 = vrot.slane %v2212_v26, 5  ;;  %v2645_v27 = vld [vmem:[#allocation2 + $0xac] sm:$0xf] }
 0x114   : > { %v12899_v0 = vpop.f32.mrb[10].mxu0  ;;  %v12905_v34 = vpop.f32.mrb[9].mxu1  ;;  %15517 = vst [vmem:[#allocation8_spill] sm:$0xff] %v12953_v29  ;;  %v2928_v51 = vrot.slane %v2927_v52, 4  ;;  %v10315_v6 = vcombine.low %v1988_v49, %v1998_v44  ;;  %v2360_v10 = vrot.slane %v2213_v53, 5  ;;  %v12965_v30 = vadd.f32 %v12877_v55, %v12873_v48 }
 0x115   : > { %v12903_v33 = vpop.f32.mrb[11].mxu0  ;;  %v12907_v42 = vpop.f32.mrb[10].mxu1  ;;  %v2938_v7 = vrot.slane %v2937_v45, 4  ;;  %v2358_v15 = vsel %vm12423_vm4, %v10332_v63, %v2357_v1  ;;  %v2359_v17 = vrot.slane %v2357_v1, 4  ;;  %v2000_v18 = vshrl.u32 %v1699_v37, 16 }
 0x116   : > { %v12921_v59 = vpop.f32.mrb[11].mxu1  ;;  %15518 = vst [vmem:[#allocation9_spill] sm:$0xff] %v12965_v30  ;;  %v2933_v38 = vsel %vm12429_vm5, %v2928_v51, %v2932_v36  ;;  %4578 = vmatmul.mubr.bf16.gmra.mrb[108].mxu0 %v10315_v6  ;;  %v2003_v23 = vshll.u32 %v1699_v37, 16  ;;  %v2009_v25 = vshll.u32 %v1700_v3, 16  ;;  %v2013_v26 = vshrl.u32 %v1700_v3, 16 }
 0x117   : > { %v2943_v22 = vsel %vm12429_vm5, %v2938_v7, %v2942_v13  ;;  %v2361_v16 = vsel %vm12423_vm4, %v2359_v17, %v2360_v10  ;;  %v2002_v21 = vrot.slane %v2000_v18, 4  ;;  %v2019_v31 = vshll.u32 %v1701_v39, 16  ;;  %v2646_v36 = vld [vmem:[#allocation2 + $0xb0] sm:$0x1]  ;;  %v2214_v6 = vld [vmem:[#allocation2 + $0xa8] sm:$0xe] }
 0x118   : > { %v10379_v55 = vcombine.low %v2933_v38, %v2943_v22  ;;  %v10348_v40 = vcombine.low %v2358_v15, %v2361_v16  ;;  %v2005_v49 = vrot.slane %v2003_v23, 5  ;;  %v2011_v50 = vrot.slane %v2009_v25, 5  ;;  %v2216_v25 = vld [vmem:[#allocation2 + $0xb0] sm:$0x1]  ;;  %v2217_v30 = vld [vmem:[#allocation2 + $0xb4] sm:$0xe] }
 0x119   : > { %v2015_v52 = vrot.slane %v2013_v26, 4  ;;  %v2021_v45 = vrot.slane %v2019_v31, 5  ;;  %v2945_v13 = vshrl.u32 %v2644_v12, 16  ;;  %v2948_v37 = vshll.u32 %v2644_v12, 16  ;;  %v2215_v12 = vld [vmem:[#allocation2 + $0xac] sm:$0xf] }
 0x11a   : > { %v12909_v43 = vpop.f32.mrb[12].mxu0  ;;  %4738 = vmatprep.mubr.bf16.mxu1 %v10379_v55  ;;  %v2954_v44 = vshll.u32 %v2645_v27, 16  ;;  %4585 = vmatprep.mubr.bf16.mxu0 %v10348_v40  ;;  %v2006_v51 = vor.u32 %v2005_v49, %v2002_v21  ;;  %v2958_v1 = vshrl.u32 %v2645_v27, 16  ;;  %v2964_v3 = vshll.u32 %v2646_v36, 16  ;;  %v1702_v21 = vld [vmem:[#allocation2 + $0xa8] sm:$0xf] }
 0x11b   : > { %v12923_v60 = vpop.f32.mrb[13].mxu0  ;;  %v12929_v9 = vpop.f32.mrb[12].mxu1  ;;  %4739 = vmatmul.mubr.bf16.gmra.mrb[108].mxu1 %v12123_v8  ;;  %v2016_v63 = vor.u32 %v2015_v52, %v2011_v50  ;;  %v2947_v39 = vrot.slane %v2945_v13, 4  ;;  %v2950_v38 = vrot.slane %v2948_v37, 5  ;;  %v12985_v17 = vadd.f32 %v12889_v24, %v12879_v61  ;;  %v1703_v37 = vld [vmem:[#allocation2 + $0xac] sm:$0xf] }
 0x11c   : > { %v12925_v2 = vpop.f32.mrb[14].mxu0  ;;  %v12941_v46 = vpop.f32.mrb[13].mxu1  ;;  %v2956_v15 = vrot.slane %v2954_v44, 5  ;;  %v2007_v8 = vrot.slane %v2006_v51, 4  ;;  %v2960_v23 = vrot.slane %v2958_v1, 4  ;;  %v2966_v27 = vrot.slane %v2964_v3, 5 }
 0x11d   : > { %v12931_v35 = vpop.f32.mrb[15].mxu0  ;;  %v12947_v54 = vpop.f32.mrb[14].mxu1  ;;  %v2017_v22 = vrot.slane %v2016_v63, 4  ;;  %v2951_v26 = vor.u32 %v2950_v38, %v2947_v39  ;;  %v12991_v55 = vadd.f32 %v12903_v33, %v12899_v0  ;;  %v12995_v16 = vadd.f32 %v12905_v34, %v12901_v11  ;;  %v12130_v11 = vld [vmem:[%s15504_s2 + $0x40] sm:$0xff]   ;;  %v1704_v1 = vld [vmem:[#allocation2 + $0xb0] sm:$0x1] }
 0x11e   : > { %v12955_v57 = vpop.f32.mrb[15].mxu1  ;;  %v2012_v31 = vsel %vm12429_vm5, %v2007_v8, %v2011_v50  ;;  %v2961_v40 = vor.u32 %v2960_v23, %v2956_v15  ;;  %v10333_v49 = vrot.slane %v2214_v6, 9  ;;  %v2364_v13 = vrot.slane %v2215_v12, 5  ;;  %11432 = vmatprep.subr.bf16.mxu1 %v12130_v11  ;;  %v12125_v38 = vld [vmem:[#allocation2 + $0xa8] sm:$0xff]   ;;  %v2647_v23 = vld [vmem:[#allocation2 + $0xb4] sm:$0xf] }
 0x11f   : > { %15519 = vst [vmem:[#allocation10_spill] sm:$0xff] %v12991_v55  ;;  %15520 = vst [vmem:[#allocation11_spill] sm:$0xff] %v12995_v16  ;;  %v2022_v36 = vsel %vm12429_vm5, %v2017_v22, %v2021_v45  ;;  %v2952_v34 = vrot.slane %v2951_v26, 4  ;;  %v2367_v45 = vrot.slane %v2216_v25, 5  ;;  %v13018_v63 = vadd.f32 %v12921_v59, %v12907_v42 }
 0x120   : > { %v10316_v33 = vcombine.low %v2012_v31, %v2022_v36  ;;  %v2962_v51 = vrot.slane %v2961_v40, 4  ;;  %v2024_v3 = vshrl.u32 %v1702_v21, 16  ;;  %v2365_v12 = vsel %vm12423_vm4, %v10333_v49, %v2364_v13  ;;  %v2648_v31 = vld [vmem:[#allocation2 + $0xb8] sm:$0xf] }
 0x121   : > { %15521 = vst [vmem:[#allocation12_spill] sm:$0xff] %v13018_v63  ;;  %v2957_v39 = vsel %vm12429_vm5, %v2952_v34, %v2956_v15  ;;  %v2366_v8 = vrot.slane %v2364_v13, 4  ;;  %v2027_v22 = vshll.u32 %v1702_v21, 16  ;;  %v2033_v25 = vshll.u32 %v1703_v37, 16  ;;  %v2649_v34 = vld [vmem:[#allocation2 + $0xbc] sm:$0x1] }
 0x122   : > { %v12943_v47 = vpop.f32.mrb[16].mxu0  ;;  %4586 = vmatmul.mubr.bf16.gmra.mrb[112].mxu0 %v10316_v33  ;;  %v2967_v42 = vsel %vm12429_vm5, %v2962_v51, %v2966_v27  ;;  %v2026_v59 = vrot.slane %v2024_v3, 4  ;;  %v2037_v26 = vshrl.u32 %v1703_v37, 16  ;;  %v2043_v33 = vshll.u32 %v1704_v1, 16 }
 0x123   : > { %v12949_v56 = vpop.f32.mrb[17].mxu0  ;;  %v12961_v5 = vpop.f32.mrb[16].mxu1  ;;  %v10380_v40 = vcombine.low %v2957_v39, %v2967_v42  ;;  %v2368_v15 = vsel %vm12423_vm4, %v2366_v8, %v2367_v45  ;;  %v2029_v11 = vrot.slane %v2027_v22, 5  ;;  %v2035_v63 = vrot.slane %v2033_v25, 5  ;;  %v12131_v39 = vld [vmem:[%s15504_s2] sm:$0xff]  }
 0x124   : > { %v12957_v62 = vpop.f32.mrb[18].mxu0  ;;  %v12977_v53 = vpop.f32.mrb[17].mxu1  ;;  %v10349_v13 = vcombine.low %v2365_v12, %v2368_v15  ;;  %v2039_v27 = vrot.slane %v2037_v26, 4  ;;  %v2969_v51 = vshrl.u32 %v2647_v23, 16  ;;  %v2045_v1 = vrot.slane %v2043_v33, 5  ;;  %11433 = vmatpush3.bf16.msra.mxu1 %v12131_v39 }
 0x125   : > { %v12973_v48 = vpop.f32.mrb[19].mxu0  ;;  %v12979_v7 = vpop.f32.mrb[18].mxu1  ;;  %4746 = vmatprep.mubr.bf16.mxu1 %v10380_v40  ;;  %v2030_v45 = vor.u32 %v2029_v11, %v2026_v59  ;;  %v2972_v8 = vshll.u32 %v2647_v23, 16  ;;  %v2978_v22 = vshll.u32 %v2648_v31, 16  ;;  %v2982_v26 = vshrl.u32 %v2648_v31, 16 }
 0x126   : > { %v12987_v18 = vpop.f32.mrb[19].mxu1  ;;  %4747 = vmatmul.mubr.bf16.gmra.mrb[112].mxu1 %v12125_v38  ;;  %4593 = vmatprep.mubr.bf16.mxu0 %v10349_v13  ;;  %v2040_v12 = vor.u32 %v2039_v27, %v2035_v63  ;;  %v2971_v25 = vrot.slane %v2969_v51, 4  ;;  %v2988_v15 = vshll.u32 %v2649_v34, 16  ;;  %v13051_v23 = vadd.f32 %v12923_v60, %v12909_v43  ;;  %v2218_v59 = vld [vmem:[#allocation2 + $0xb8] sm:$0xf] }
 0x127   : > { %v2031_v32 = vrot.slane %v2030_v45, 4  ;;  %v2974_v28 = vrot.slane %v2972_v8, 5  ;;  %v2980_v40 = vrot.slane %v2978_v22, 5  ;;  %v2984_v33 = vrot.slane %v2982_v26, 4  ;;  %v2219_v34 = vld [vmem:[#allocation2 + $0xbc] sm:$0x1] }
 0x128   : > { %15522 = vst [vmem:[#allocation13_spill] sm:$0xff] %v13051_v23  ;;  %v2041_v38 = vrot.slane %v2040_v12, 4  ;;  %v13057_v31 = vadd.f32 %v12931_v35, %v12925_v2  ;;  %v13065_v43 = vadd.f32 %v12941_v46, %v12929_v9  ;;  %v1705_v60 = vld [vmem:[#allocation2 + $0xb4] sm:$0xf]  ;;  %v2990_v8 = vrot.slane %v2988_v15, 5 }
 0x129   : > { %v2036_v27 = vsel %vm12429_vm5, %v2031_v32, %v2035_v63  ;;  %v2975_v51 = vor.u32 %v2974_v28, %v2971_v25  ;;  %v2985_v35 = vor.u32 %v2984_v33, %v2980_v40  ;;  %v10334_v22 = vrot.slane %v2217_v30, 9  ;;  %v1706_v12 = vld [vmem:[#allocation2 + $0xb8] sm:$0xf]  ;;  %v1707_v15 = vld [vmem:[#allocation2 + $0xbc] sm:$0x1] }
 0x12a   : > { %v12981_v10 = vpop.f32.mrb[20].mxu0  ;;  %15523 = vst [vmem:[#allocation14_spill] sm:$0xff] %v13057_v31  ;;  %15524 = vst [vmem:[#allocation15_spill] sm:$0xff] %v13065_v43  ;;  %v2046_v2 = vsel %vm12429_vm5, %v2041_v38, %v2045_v1  ;;  %v2371_v9 = vrot.slane %v2218_v59, 5  ;;  %v2374_v46 = vrot.slane %v2219_v34, 5  ;;  %v12126_v31 = vld [vmem:[#allocation2 + $0xb4] sm:$0xff]   ;;  %v13081_v1 = vadd.f32 %v12955_v57, %v12947_v54 }
 0x12b   : > { %v12997_v61 = vpop.f32.mrb[21].mxu0  ;;  %v12999_v24 = vpop.f32.mrb[20].mxu1  ;;  %v10317_v28 = vcombine.low %v2036_v27, %v2046_v2  ;;  %v2976_v63 = vrot.slane %v2975_v51, 4  ;;  %v2986_v43 = vrot.slane %v2985_v35, 4  ;;  %v2048_v30 = vshrl.u32 %v1705_v60, 16 }
 0x12c   : > { %v13005_v52 = vpop.f32.mrb[22].mxu0  ;;  %v13007_v0 = vpop.f32.mrb[21].mxu1  ;;  %15528 = vst [vmem:[#allocation19_spill] sm:$0xff] %v13081_v1  ;;  %v2051_v38 = vshll.u32 %v1705_v60, 16  ;;  %v2372_v59 = vsel %vm12423_vm4, %v10334_v22, %v2371_v9  ;;  %v2373_v34 = vrot.slane %v2371_v9, 4  ;;  %v2057_v51 = vshll.u32 %v1706_v12, 16 }
 0x12d   : > { %v13012_v44 = vpop.f32.mrb[23].mxu0  ;;  %v13014_v50 = vpop.f32.mrb[22].mxu1  ;;  %4594 = vmatmul.mubr.bf16.gmra.mrb[116].mxu0 %v10317_v28  ;;  %v2981_v27 = vsel %vm12429_vm5, %v2976_v63, %v2980_v40  ;;  %v276_v2 = vld [vmem:[%s12395_s10 + $0x190] sm:$0x3]  ;;  %v2650_v35 = vld [vmem:[#allocation2 + $0xc0] sm:$0xf]  ;;  %v2991_v54 = vsel %vm12429_vm5, %v2986_v43, %v2990_v8 }
 0x12e   : > { %v13020_v6 = vpop.f32.mrb[23].mxu1  ;;  %v2050_v57 = vrot.slane %v2048_v30, 4  ;;  %v2053_v1 = vrot.slane %v2051_v38, 5  ;;  %v2651_v60 = vld [vmem:[#allocation2 + $0xc4] sm:$0xf]  ;;  %v10381_v28 = vcombine.low %v2981_v27, %v2991_v54  ;;  %v2375_v40 = vsel %vm12423_vm4, %v2373_v34, %v2374_v46 }
 0x12f   : > { %v2059_v63 = vrot.slane %v2057_v51, 5  ;;  %v10871_v43 = vpack.c.bf16 %v276_v2, %v276_v2  ;;  %v2993_v38 = vshrl.u32 %v2650_v35, 16  ;;  %v2996_v27 = vshll.u32 %v2650_v35, 16  ;;  %v2220_v51 = vld [vmem:[#allocation2 + $0xc0] sm:$0xe] }
 0x130   : > { %4754 = vmatprep.mubr.bf16.mxu1 %v10381_v28  ;;  %v3002_v54 = vshll.u32 %v2651_v60, 16 }
 0x131   : > { %4755 = vmatmul.mubr.bf16.gmra.mrb[116].mxu1 %v12126_v31  ;;  %564 = vst [vmem:[#allocation2 + $0xc8] sm:$0x1] %v10871_v43  ;;  %v2995_v35 = vrot.slane %v2993_v38, 4  ;;  %v2221_v31 = vld [vmem:[#allocation2 + $0xc4] sm:$0xf] }
 0x132   : > { %v13028_v36 = vpop.f32.mrb[24].mxu0  ;;  %v13117_v28 = vrot.slane %v3002_v54, 5  ;;  %v1709_v43 = vld [vmem:[#allocation2 + $0xc4] sm:$0xf]  ;;  %v2378_v54 = vrot.slane %v2221_v31, 5 }
 0x133   : > { %v13032_v49 = vpop.f32.mrb[25].mxu0  ;;  %v13034_v21 = vpop.f32.mrb[24].mxu1 }
 0x134   : > { %v13036_v3 = vpop.f32.mrb[26].mxu0  ;;  %v13038_v37 = vpop.f32.mrb[25].mxu1  ;;  %v2380_v31 = vrot.slane %v2378_v54, 4 }
 0x135   : > { %v13043_v42 = vpop.f32.mrb[27].mxu0  ;;  %v13045_v16 = vpop.f32.mrb[26].mxu1 }
 0x136   : > { %v13047_v29 = vpop.f32.mrb[27].mxu1 }
 0x13a   : > { %v13053_v11 = vpop.f32.mrb[28].mxu0 }
 0x13b   : > { %v13059_v13 = vpop.f32.mrb[29].mxu0  ;;  %v13069_v39 = vpop.f32.mrb[28].mxu1 }
 0x13c   : > { %v13067_v45 = vpop.f32.mrb[30].mxu0  ;;  %15525 = vst [vmem:[#allocation16_spill] sm:$0xff] %v13069_v39  ;;  %v13075_v32 = vpop.f32.mrb[29].mxu1  ;;  %v2054_v39 = vor.u32 %v2053_v1, %v2050_v57  ;;  %v13110_v1 = vadd.f32 %v12949_v56, %v12943_v47  ;;  %v2998_v57 = vrot.slane %v2996_v27, 5  ;;  %v12133_v47 = vld [vmem:[%s15504_s2 + $0x8] sm:$0xff]  }
 0x13d   : > { %v13073_v26 = vpop.f32.mrb[31].mxu0  ;;  %15526 = vst [vmem:[#allocation17_spill] sm:$0xff] %v13075_v32  ;;  %v13077_v25 = vpop.f32.mrb[30].mxu1  ;;  %v10350_v32 = vcombine.low %v2372_v59, %v2375_v40 }
 0x13e   : > { %15527 = vst [vmem:[#allocation18_spill] sm:$0xff] %v13077_v25  ;;  %v13083_v33 = vpop.f32.mrb[31].mxu1  ;;  %v2061_v25 = vshrl.u32 %v1706_v12, 16  ;;  %v2055_v34 = vrot.slane %v2054_v39, 4  ;;  %v2999_v40 = vor.u32 %v2998_v57, %v2995_v35 }
 0x13f   : > { %15529 = vst [vmem:[#allocation20_spill] sm:$0xff] %v13083_v33  ;;  %v2067_v33 = vshll.u32 %v1707_v15, 16  ;;  %4601 = vmatprep.mubr.bf16.mxu0 %v10350_v32 }
 0x140   : > { %v2063_v55 = vrot.slane %v2061_v25, 4  ;;  %v3006_v25 = vshrl.u32 %v2651_v60, 16  ;;  %v2060_v56 = vsel %vm12429_vm5, %v2055_v34, %v2059_v63  ;;  %v1708_v60 = vld [vmem:[#allocation2 + $0xc0] sm:$0xf]  ;;  %v277_v34 = vld [vmem:[%s12395_s10 + $0x198] sm:$0xff] }
 0x141   : > { %v2069_v30 = vrot.slane %v2067_v33, 5  ;;  %v12132_v33 = vld [vmem:[%s15504_s2 + $0x48] sm:$0xff]   ;;  %v2075_v35 = vshll.u32 %v1708_v60, 16 }
 0x142   : > { %v13096_v22 = vpop.f32.mrb[32].mxu0  ;;  %v2064_v59 = vor.u32 %v2063_v55, %v2059_v63  ;;  %v13121_v55 = vadd.f32 %v12973_v48, %v12957_v62  ;;  %v3008_v32 = vrot.slane %v3006_v25, 4  ;;  %11434 = vmatprep.subr.bf16.mxu1 %v12132_v33  ;;  %v13130_v62 = vadd.f32 %v12977_v53, %v12961_v5  ;;  %v279_v25 = vld [vmem:[%s12395_s10 + $0x1a8] sm:$0x3] }
 0x143   : > { %v13092_v23 = vpop.f32.mrb[32].mxu1  ;;  %v13100_v8 = vpop.f32.mrb[33].mxu0  ;;  %v10335_v48 = vrot.slane %v2220_v51, 9  ;;  %11435 = vmatpush3.bf16.msra.mxu1 %v12133_v47  ;;  %v13137_v63 = vadd.f32 %v12987_v18, %v12979_v7  ;;  %v3000_v53 = vrot.slane %v2999_v40, 4  ;;  %v2072_v51 = vshrl.u32 %v1708_v60, 16 }
 0x144   : > { %v13098_v9 = vpop.f32.mrb[33].mxu1  ;;  %v13104_v46 = vpop.f32.mrb[34].mxu0  ;;  %15531 = vst [vmem:[#allocation22_spill] sm:$0xff] %v13121_v55  ;;  %v2065_v39 = vrot.slane %v2064_v59, 4  ;;  %15532 = vst [vmem:[#allocation23_spill] sm:$0xff] %v13130_v62  ;;  %v3009_v27 = vor.u32 %v3008_v32, %v13117_v28  ;;  %v278_v59 = vld [vmem:[%s12395_s10 + $0x1a0] sm:$0xff]  ;;  %v10872_v62 = vpack.c.bf16 %v277_v34, %v277_v34 }
 0x145   : > { %v13102_v12 = vpop.f32.mrb[34].mxu1  ;;  %v13112_v2 = vpop.f32.mrb[35].mxu0  ;;  %15533 = vst [vmem:[#allocation24_spill] sm:$0xff] %v13137_v63  ;;  %v2379_v18 = vsel %vm12423_vm4, %v10335_v48, %v2378_v54  ;;  %v2652_v60 = vld [vmem:[#allocation2 + $0xc8] sm:$0x1]  ;;  %v3005_v40 = vsel %vm12429_vm5, %v3000_v53, %v13117_v28  ;;  %v2074_v48 = vrot.slane %v2072_v51, 4  ;;  %v13170_v28 = vadd.f32 %v12997_v61, %v12981_v10 }
 0x146   : > { %v13106_v15 = vpop.f32.mrb[35].mxu1  ;;  %v2070_v38 = vsel %vm12429_vm5, %v2065_v39, %v2069_v30  ;;  %v13151_v30 = vld [vmem:[%s15505_s3] ss:$0 sm:$0xff]  ;;  %v3010_v7 = vrot.slane %v3009_v27, 4  ;;  %v2081_v39 = vshll.u32 %v1709_v43, 16  ;;  %v10874_v27 = vpack.c.bf16 %v279_v25, %v279_v25  ;;  %v15551_v14 = vld [vmem:[#allocation17_spill] sm:$0xff] }
 0x147   : > { %15530 = vst [vmem:[#allocation21_spill] sm:$0xff] %v13106_v15  ;;  %v10318_v5 = vcombine.low %v2060_v56, %v2070_v38  ;;  %v2222_v38 = vld [vmem:[#allocation2 + $0xc8] sm:$0x1]  ;;  %v2077_v54 = vrot.slane %v2075_v35, 5  ;;  %565 = vst [vmem:[#allocation2 + $0xcc] sm:$0xf] %v10872_v62  ;;  %v13178_v51 = vadd.f32 %v13012_v44, %v13005_v52  ;;  %v13182_v62 = vadd.f32 %v12883_v19, %v13151_v30 }
 0x148   : > { %v1710_v63 = vld [vmem:[#allocation2 + $0xc8] sm:$0x1]  ;;  %567 = vst [vmem:[#allocation2 + $0xd4] sm:$0x1] %v10874_v27  ;;  %v13186_v10 = vadd.f32 %v12887_v20, %v13151_v30  ;;  %v3122_v35 = vld [vmem:[#allocation2 + $0x20] sm:$0x1] }
 0x149   : > { %4602 = vmatmul.mubr.bf16.gmra.mrb[120].mxu0 %v10318_v5  ;;  %v2085_v5 = vshrl.u32 %v1709_v43, 16  ;;  %v2091_v15 = vshll.u32 %v1710_v63, 16  ;;  %v2078_v53 = vor.u32 %v2077_v54, %v2074_v48  ;;  %v3120_v43 = vld [vmem:[#allocation2 + $0x18] sm:$0xe]  ;;  %v3121_v63 = vld [vmem:[#allocation2 + $0x1c] sm:$0xf] }
 0x14a   : > { %v13144_v57 = vpop.f32.mrb[36].mxu0  ;;  %15539 = vst [vmem:[#allocation30_spill] sm:$0xff] %v13182_v62  ;;  %15540 = vst [vmem:[#allocation31_spill] sm:$0xff] %v13186_v10  ;;  %v12128_v52 = vld [vmem:[#allocation2 + $0xc0] sm:$0xff]   ;;  %v3124_v19 = vld [vmem:[#allocation2 + $0x28] sm:$0xf] }
 0x14b   : > { %v13142_v33 = vpop.f32.mrb[36].mxu1  ;;  %15535 = vst [vmem:[#allocation26_spill] sm:$0xff] %v13144_v57  ;;  %v13155_v32 = vpop.f32.mrb[37].mxu0  ;;  %v2381_v57 = vrot.slane %v2222_v38, 5  ;;  %v2079_v44 = vrot.slane %v2078_v53, 4  ;;  %v10384_v38 = vrot.slane %v3120_v43, 9 }
 0x14c   : > { %15534 = vst [vmem:[#allocation25_spill] sm:$0xff] %v13142_v33  ;;  %v13146_v47 = vpop.f32.mrb[37].mxu1  ;;  %15537 = vst [vmem:[#allocation28_spill] sm:$0xff] %v13155_v32  ;;  %v3012_v33 = vshll.u32 %v2652_v60, 16  ;;  %v13162_v55 = vpop.f32.mrb[38].mxu0  ;;  %v3218_v27 = vrot.slane %v3121_v63, 5 }
 0x14d   : > { %15536 = vst [vmem:[#allocation27_spill] sm:$0xff] %v13146_v47  ;;  %v13157_v56 = vpop.f32.mrb[38].mxu1  ;;  %v10873_v47 = vpack.c.bf16 %v278_v59, %v278_v59  ;;  %v13172_v34 = vpop.f32.mrb[39].mxu0  ;;  %v2382_v25 = vsel %vm12423_vm4, %v2380_v31, %v2381_v57  ;;  %v2093_v31 = vrot.slane %v2091_v15, 5  ;;  %v3225_v43 = vrot.slane %v3124_v19, 5  ;;  %v15563_v62 = vld [vmem:[#allocation22_spill] sm:$0xff] }
 0x14e   : > { %15538 = vst [vmem:[#allocation29_spill] sm:$0xff] %v13157_v56  ;;  %v13164_v32 = vpop.f32.mrb[39].mxu1  ;;  %v13166_v56 = vrot.slane %v2081_v39, 5  ;;  %v3014_v59 = vrot.slane %v3012_v33, 5  ;;  %v10351_v61 = vcombine.low %v2379_v18, %v2382_v25  ;;  %v2087_v33 = vrot.slane %v2085_v5, 4 }
 0x14f   : > { %566 = vst [vmem:[#allocation2 + $0xd0] sm:$0xf] %v10873_v47  ;;  %v13188_v47 = vld [vmem:[#allocation2 + $0x24] sm:$0xe]  ;;  %v13194_v39 = vadd.f32 %v13007_v0, %v12999_v24  ;;  %v13208_v24 = vadd.f32 %v13020_v6, %v13014_v50  ;;  %v3219_v25 = vsel %vm12423_vm4, %v10384_v38, %v3218_v27  ;;  %v3220_v53 = vrot.slane %v3218_v27, 4 }
 0x150   : > { %v3015_v57 = vsel %vm12429_vm5, %v3010_v7, %v3014_v59  ;;  %4609 = vmatprep.mubr.bf16.mxu0 %v10351_v61  ;;  %v2088_v18 = vor.u32 %v2087_v33, %v13166_v56  ;;  %v2084_v15 = vsel %vm12429_vm5, %v2079_v44, %v13166_v56  ;;  %v3221_v7 = vrot.slane %v3122_v35, 5  ;;  %v2653_v50 = vld [vmem:[#allocation2 + $0xcc] sm:$0xf]  ;;  %v2655_v61 = vld [vmem:[#allocation2 + $0xd4] sm:$0x1] }
 0x151   : > { %15541 = vst [vmem:[#allocation32_spill] sm:$0xff] %v13194_v39  ;;  %v10382_v20 = vcombine.low %v3005_v40, %v3015_v57  ;;  %15542 = vst [vmem:[#allocation33_spill] sm:$0xff] %v13208_v24  ;;  %v10385_v0 = vrot.slane %v13188_v47, 9  ;;  %v3125_v33 = vld [vmem:[#allocation2 + $0x2c] sm:$0x1]  ;;  %v13223_v35 = vadd.f32 %v13032_v49, %v13028_v36  ;;  %v13227_v47 = vadd.f32 %v13043_v42, %v13036_v3 }
 0x152   : > { %v13199_v48 = vpop.f32.mrb[40].mxu0  ;;  %v2089_v59 = vrot.slane %v2088_v18, 4  ;;  %v13231_v57 = vadd.f32 %v13038_v37, %v13034_v21  ;;  %v13235_v44 = vadd.f32 %v13047_v29, %v13045_v16  ;;  %v3017_v19 = vshrl.u32 %v2653_v50, 16  ;;  %v3126_v36 = vld [vmem:[#allocation2 + $0x30] sm:$0xe] }
 0x153   : > { %v13196_v60 = vpop.f32.mrb[40].mxu1  ;;  %v13211_v40 = vpop.f32.mrb[41].mxu0  ;;  %4762 = vmatprep.mubr.bf16.mxu1 %v10382_v20  ;;  %v3020_v20 = vshll.u32 %v2653_v50, 16  ;;  %v3127_v49 = vld [vmem:[#allocation2 + $0x34] sm:$0xf]  ;;  %v3036_v42 = vshll.u32 %v2655_v61, 16  ;;  %v3222_v21 = vsel %vm12423_vm4, %v3220_v53, %v3221_v7  ;;  %v13247_v50 = vadd.f32 %v12935_v41, %v13151_v30 }
 0x154   : > { %v13201_v54 = vpop.f32.mrb[41].mxu1  ;;  %v13217_v63 = vpop.f32.mrb[42].mxu0  ;;  %4763 = vmatmul.mubr.bf16.gmra.mrb[120].mxu1 %v12128_v52  ;;  %15543 = vst [vmem:[#allocation34_spill] sm:$0xff] %v13231_v57  ;;  %15544 = vst [vmem:[#allocation35_spill] sm:$0xff] %v13235_v44  ;;  %v2094_v52 = vsel %vm12429_vm5, %v2089_v59, %v2093_v31  ;;  %v3128_v38 = vld [vmem:[#allocation2 + $0x38] sm:$0x1]  ;;  %v10400_v31 = vcombine.low %v3219_v25, %v3222_v21  ;;  %v3226_v25 = vsel %vm12423_vm4, %v10385_v0, %v3225_v43 }
 0x155   : > { %v13213_v5 = vpop.f32.mrb[42].mxu1  ;;  %v10319_v27 = vcombine.low %v2084_v15, %v2094_v52  ;;  %v13241_v37 = vld [vmem:[#allocation2 + $0x3c] sm:$0xe]  ;;  %v13243_v57 = vpop.f32.mrb[43].mxu0  ;;  %v3019_v29 = vrot.slane %v3017_v19, 4  ;;  %v3022_v16 = vrot.slane %v3020_v20, 5  ;;  %v13251_v15 = vadd.f32 %v12939_v58, %v13151_v30 }
 0x156   : > { %v13219_v56 = vpop.f32.mrb[43].mxu1  ;;  %v2654_v6 = vld [vmem:[#allocation2 + $0xd0] sm:$0xf]  ;;  %v3130_v59 = vld [vmem:[#allocation2 + $0x40] sm:$0xf]  ;;  %15545 = vst [vmem:[#allocation36_spill] sm:$0xff] %v13247_v50 }
 0x157   : > { %v3026_v18 = vshll.u32 %v2654_v6, 16  ;;  %v3030_v3 = vshrl.u32 %v2654_v6, 16  ;;  %15546 = vst [vmem:[#allocation37_spill] sm:$0xff] %v13251_v15  ;;  %4610 = vmatmul.mubr.bf16.gmra.mrb[124].mxu0 %v10319_v27  ;;  %v3227_v7 = vrot.slane %v3225_v43, 4  ;;  %v3131_v53 = vld [vmem:[#allocation2 + $0x44] sm:$0x1]  ;;  %v3023_v52 = vor.u32 %v3022_v16, %v3019_v29 }
 0x158   : > { %v3038_v19 = vrot.slane %v3036_v42, 5  ;;  %11920 = vmatprep.mubr.bf16.mxu0 %v10400_v31  ;;  %v3228_v20 = vrot.slane %v3125_v33, 5  ;;  %v12134_v58 = vld [vmem:[%s15504_s2 + $0x50] sm:$0xff]   ;;  %v3232_v21 = vrot.slane %v3127_v49, 5  ;;  %v3235_v24 = vrot.slane %v3128_v38, 5 }
 0x159   : > { %v3028_v44 = vrot.slane %v3026_v18, 5  ;;  %v3032_v6 = vrot.slane %v3030_v3, 4  ;;  %v10386_v3 = vrot.slane %v3126_v36, 9  ;;  %v12135_v0 = vld [vmem:[%s15504_s2 + $0x10] sm:$0xff]   ;;  %v3024_v43 = vrot.slane %v3023_v52, 4  ;;  %11436 = vmatprep.subr.bf16.mxu1 %v12134_v58 }
 0x15a   : > { %v13257_v18 = vpop.f32.mrb[44].mxu0  ;;  %v3229_v33 = vsel %vm12423_vm4, %v3227_v7, %v3228_v20  ;;  %v10387_v29 = vrot.slane %v13241_v37, 9  ;;  %v3239_v16 = vrot.slane %v3130_v59, 5  ;;  %v3234_v15 = vrot.slane %v3232_v21, 4  ;;  %11437 = vmatpush3.bf16.msra.mxu1 %v12135_v0  ;;  %v3132_v20 = vld [vmem:[#allocation2 + $0x48] sm:$0xe] }
 0x15b   : > { %v13253_v61 = vpop.f32.mrb[44].mxu1  ;;  %v3033_v27 = vor.u32 %v3032_v6, %v3028_v44  ;;  %v13264_v39 = vpop.f32.mrb[45].mxu0  ;;  %v10401_v38 = vcombine.low %v3226_v25, %v3229_v33  ;;  %v3233_v6 = vsel %vm12423_vm4, %v10386_v3, %v3232_v21  ;;  %v13284_v7 = vadd.f32 %v12985_v17, %v13151_v30  ;;  %v3133_v58 = vld [vmem:[#allocation2 + $0x4c] sm:$0xf]  ;;  %v13300_v0 = vld [vmem:[#allocation2 + $0x54] sm:$0xe] }
 0x15c   : > { %v13259_v41 = vpop.f32.mrb[45].mxu1  ;;  %v13274_v31 = vpop.f32.mrb[46].mxu0  ;;  %v3029_v37 = vsel %vm12429_vm5, %v3024_v43, %v3028_v44  ;;  %v3241_v59 = vrot.slane %v3239_v16, 4  ;;  %v3242_v52 = vrot.slane %v3131_v53, 5  ;;  %v3236_v3 = vsel %vm12423_vm4, %v3234_v15, %v3235_v24  ;;  %v3134_v44 = vld [vmem:[#allocation2 + $0x50] sm:$0x1] }
 0x15d   : > { %v13266_v42 = vpop.f32.mrb[46].mxu1  ;;  %v3034_v49 = vrot.slane %v3033_v27, 4  ;;  %v13280_v50 = vpop.f32.mrb[47].mxu0  ;;  %15547 = vst [vmem:[#allocation38_spill] sm:$0xff] %v13284_v7  ;;  %v12129_v27 = vld [vmem:[#allocation2 + $0xcc] sm:$0xff]   ;;  %v13294_v21 = vadd.f32 %v13059_v13, %v13053_v11  ;;  %v13298_v17 = vadd.f32 %v13073_v26, %v13067_v45  ;;  %v15548_v53 = vld [vmem:[#allocation10_spill] sm:$0xff]  ;;  %v10402_v33 = vcombine.low %v3233_v6, %v3236_v3 }
 0x15e   : > { %v13276_v36 = vpop.f32.mrb[47].mxu1  ;;  %v13304_v43 = vadd.f32 %v15548_v53, %v13151_v30  ;;  %v13310_v15 = vld [vmem:[#allocation2 + $0x58] sm:$0xf]  ;;  %v13312_v11 = vld [vmem:[#allocation2 + $0x5c] sm:$0x1]  ;;  %v15553_v13 = vld [vmem:[#allocation13_spill] sm:$0xff]  ;;  %v3240_v6 = vsel %vm12423_vm4, %v10387_v29, %v3239_v16  ;;  %v3243_v3 = vsel %vm12423_vm4, %v3241_v59, %v3242_v52  ;;  %v13340_v16 = vadd.f32 %v13110_v1, %v13151_v30 }
 0x15f   : > { %v3039_v25 = vsel %vm12429_vm5, %v3034_v49, %v3038_v19  ;;  %v15550_v49 = vld [vmem:[#allocation16_spill] sm:$0xff]  ;;  %v13316_v45 = vadd.f32 %v15553_v13, %v13151_v30  ;;  %v15555_v26 = vld [vmem:[#allocation14_spill] sm:$0xff]  ;;  %11921 = vmatmul.mubr.bf16.vlgmr.msra.gmra.mrb[128].mxu0 %v10401_v38  ;;  %v3246_v53 = vrot.slane %v3133_v58, 5  ;;  %v3138_v38 = vld [vmem:[#allocation2 + $0x60] sm:$0xe]  ;;  %v11026_v59 = vadd.f32 %v13100_v8, %v13096_v22 }
 0x160   : > { %15549 = vst [vmem:[#allocation10_spill] sm:$0xff] %v13304_v43  ;;  %v10383_v19 = vcombine.low %v3029_v37, %v3039_v25  ;;  %v13308_v24 = vadd.f32 %v15551_v14, %v15550_v49  ;;  %v13320_v7 = vadd.f32 %v15555_v26, %v13151_v30  ;;  %v10388_v37 = vrot.slane %v3132_v20, 9  ;;  %v13324_v25 = vld [vmem:[#allocation2 + $0x64] sm:$0xf]  ;;  %11924 = vmatprep.mubr.bf16.mxu0 %v10402_v33  ;;  %v15557_v13 = vld [vmem:[#allocation18_spill] sm:$0xff] }
 0x161   : > { %15554 = vst [vmem:[#allocation17_spill] sm:$0xff] %v13316_v45  ;;  %v3249_v49 = vrot.slane %v3134_v44, 5  ;;  %15560 = vst [vmem:[#allocation18_spill] sm:$0xff] %v13340_v16  ;;  %v3253_v20 = vrot.slane %v13310_v15, 5  ;;  %v11029_v52 = vadd.f32 %v13112_v2, %v13104_v46  ;;  %v3248_v33 = vrot.slane %v3246_v53, 4 }
 0x162   : > { %15552 = vst [vmem:[#allocation16_spill] sm:$0xff] %v13308_v24  ;;  %15556 = vst [vmem:[#allocation13_spill] sm:$0xff] %v13320_v7  ;;  %4770 = vmatprep.mubr.bf16.mxu1 %v10383_v19  ;;  %v15558_v24 = vld [vmem:[#allocation20_spill] sm:$0xff]  ;;  %v13334_v45 = vpop.f32.mrb[48].mxu0  ;;  %v3247_v19 = vsel %vm12423_vm4, %v10388_v37, %v3246_v53  ;;  %v10389_v1 = vrot.slane %v13300_v0, 9  ;;  %v10403_v8 = vcombine.low %v3240_v6, %v3243_v3  ;;  %v3256_v46 = vrot.slane %v13312_v11, 5 }
 0x163   : > { %v13326_v14 = vpop.f32.mrb[48].mxu1  ;;  %v13332_v26 = vadd.f32 %v15558_v24, %v15557_v13  ;;  %v3140_v7 = vld [vmem:[#allocation2 + $0x68] sm:$0x1]  ;;  %4771 = vmatmul.mubr.bf16.gmra.mrb[124].mxu1 %v12129_v27  ;;  %v13347_v58 = vpop.f32.mrb[49].mxu0  ;;  %v11138_v27 = vadd.f32 %v13098_v9, %v13092_v23  ;;  %v13356_v24 = vld [vmem:[#allocation2 + $0x70] sm:$0xf]  ;;  %v4234_v2 = vadd.f32 %v11026_v59, %v13151_v30  ;;  %v4237_v13 = vadd.f32 %v11029_v52, %v13151_v30 }
 0x164   : > { %v13336_v29 = vpop.f32.mrb[49].mxu1  ;;  %v13358_v15 = vpop.f32.mrb[50].mxu0  ;;  %v13365_v37 = vld [vmem:[#allocation2 + $0x7c] sm:$0xf]  ;;  %v3250_v23 = vsel %vm12423_vm4, %v3248_v33, %v3249_v49  ;;  %v3255_v9 = vrot.slane %v3253_v20, 4  ;;  %v3260_v0 = vrot.slane %v13324_v25, 5  ;;  %v13384_v49 = vadd.f32 %v15563_v62, %v13151_v30 }
 0x165   : > { %15559 = vst [vmem:[#allocation14_spill] sm:$0xff] %v13332_v26  ;;  %v13349_v44 = vpop.f32.mrb[50].mxu1  ;;  %v13367_v53 = vpop.f32.mrb[51].mxu0  ;;  %v15561_v26 = vld [vmem:[#allocation21_spill] sm:$0xff]  ;;  %v13374_v6 = vld [vmem:[#allocation2 + $0x6c] sm:$0xe]  ;;  %v10404_v11 = vcombine.low %v3247_v19, %v3250_v23  ;;  %v13376_v3 = vadd.f32 %v11138_v27, %v4234_v2  ;;  %v13388_v25 = vadd.f32 %v13170_v28, %v13151_v30  ;;  %v13394_v19 = vadd.f32 %v13178_v51, %v13151_v30 }
 0x166   : > { %v13360_v22 = vpop.f32.mrb[51].mxu1  ;;  %v11141_v16 = vadd.f32 %v15561_v26, %v13102_v12  ;;  %v10390_v59 = vrot.slane %v3138_v38, 9  ;;  %v3263_v52 = vrot.slane %v3140_v7, 5  ;;  %v13378_v43 = vld [vmem:[#allocation2 + $0x74] sm:$0x1]  ;;  %v3262_v12 = vrot.slane %v3260_v0, 4 }
 0x167   : > { %15562 = vst [vmem:[#allocation20_spill] sm:$0xff] %v13376_v3  ;;  %v13380_v10 = vld [vmem:[#allocation2 + $0x78] sm:$0xe]  ;;  %15564 = vst [vmem:[#allocation21_spill] sm:$0xff] %v13388_v25  ;;  %11925 = vmatmul.mubr.bf16.gmra.mrb[132].mxu0 %v10403_v8  ;;  %v3267_v7 = vrot.slane %v13356_v24, 5  ;;  %v15568_v33 = vld [vmem:[#allocation28_spill] sm:$0xff]  ;;  %v11035_v62 = vadd.f32 %v13172_v34, %v13162_v55  ;;  %v3257_v51 = vsel %vm12423_vm4, %v3255_v9, %v3256_v46 }
 0x168   : > { %v13390_v26 = vadd.f32 %v11141_v16, %v4237_v13  ;;  %15566 = vst [vmem:[#allocation39_spill] sm:$0xff] %v13394_v19  ;;  %v15567_v38 = vld [vmem:[#allocation26_spill] sm:$0xff]  ;;  %v13401_v2 = vld [vmem:[#allocation2 + $0x80] sm:$0x1]  ;;  %11928 = vmatprep.mubr.bf16.mxu0 %v10404_v11  ;;  %v3254_v16 = vsel %vm12423_vm4, %v10389_v1, %v3253_v20  ;;  %v15569_v8 = vld [vmem:[#allocation25_spill] sm:$0xff]  ;;  %v3274_v23 = vrot.slane %v13365_v37, 5  ;;  %v3261_v55 = vsel %vm12423_vm4, %v10390_v59, %v3260_v0 }
 0x169   : > { %v11032_v27 = vadd.f32 %v15568_v33, %v15567_v38  ;;  %v15570_v13 = vld [vmem:[#allocation27_spill] sm:$0xff]  ;;  %v13412_v38 = vld [vmem:[#allocation2 + $0x88] sm:$0xf]  ;;  %v3264_v34 = vsel %vm12423_vm4, %v3262_v12, %v3263_v52  ;;  %v10391_v20 = vrot.slane %v13374_v6, 9  ;;  %v13428_v37 = vadd.f32 %v13223_v35, %v13151_v30  ;;  %v13443_v3 = vld [vmem:[#allocation2 + $0x8c] sm:$0x1] }
 0x16a   : > { %15565 = vst [vmem:[#allocation22_spill] sm:$0xff] %v13390_v26  ;;  %v11144_v24 = vadd.f32 %v15570_v13, %v15569_v8  ;;  %v13422_v46 = vpop.f32.mrb[52].mxu0  ;;  %v3270_v11 = vrot.slane %v13378_v43, 5  ;;  %v4245_v8 = vadd.f32 %v11035_v62, %v13151_v30  ;;  %v10392_v0 = vrot.slane %v13380_v10, 9  ;;  %v13433_v59 = vld [vmem:[#allocation2 + $0x84] sm:$0xe] }
 0x16b   : > { %v13403_v28 = vpop.f32.mrb[52].mxu1  ;;  %v4242_v1 = vadd.f32 %v11032_v27, %v13151_v30  ;;  %15571 = vst [vmem:[#allocation26_spill] sm:$0xff] %v13428_v37  ;;  %v13435_v52 = vpop.f32.mrb[53].mxu0  ;;  %v10405_v12 = vcombine.low %v3254_v16, %v3257_v51  ;;  %v3269_v27 = vrot.slane %v3267_v7, 4  ;;  %v15573_v26 = vld [vmem:[#allocation29_spill] sm:$0xff]  ;;  %v10406_v37 = vcombine.low %v3261_v55, %v3264_v34 }
 0x16c   : > { %v13414_v33 = vpop.f32.mrb[53].mxu1  ;;  %v11147_v35 = vadd.f32 %v13164_v32, %v15573_v26  ;;  %v13445_v43 = vld [vmem:[#allocation2 + $0x94] sm:$0xf]  ;;  %v13447_v62 = vld [vmem:[#allocation2 + $0xa0] sm:$0xf]  ;;  %v13449_v10 = vpop.f32.mrb[54].mxu0 }
 0x16d   : > { %v13424_v9 = vpop.f32.mrb[54].mxu1  ;;  %v13439_v13 = vadd.f32 %v11144_v24, %v4242_v1  ;;  %v3276_v19 = vrot.slane %v3274_v23, 4  ;;  %v3277_v25 = vrot.slane %v13401_v2, 5  ;;  %v3281_v16 = vrot.slane %v13412_v38, 5  ;;  %v13453_v51 = vpop.f32.mrb[55].mxu0  ;;  %v12136_v32 = vld [vmem:[%s15504_s2 + $0x58] sm:$0xff]  }
 0x16e   : > { %v13437_v6 = vpop.f32.mrb[55].mxu1  ;;  %v12137_v26 = vld [vmem:[%s15504_s2 + $0x18] sm:$0xff]   ;;  %v13463_v24 = vadd.f32 %v13227_v47, %v13151_v30  ;;  %v13465_v55 = vadd.f32 %v11147_v35, %v4245_v8  ;;  %v11038_v2 = vadd.f32 %v13211_v40, %v13199_v48  ;;  %v11041_v38 = vadd.f32 %v13243_v57, %v13217_v63  ;;  %v13471_v34 = vld [vmem:[#allocation2 + $0x90] sm:$0xe]  ;;  %11438 = vmatprep.subr.bf16.mxu1 %v12136_v32  ;;  %v13494_v35 = vld [vmem:[#allocation2 + $0xac] sm:$0xf] }
 0x16f   : > { %15572 = vst [vmem:[#allocation28_spill] sm:$0xff] %v13439_v13  ;;  %v13473_v1 = vld [vmem:[#allocation2 + $0x98] sm:$0x1]  ;;  %v13477_v13 = vadd.f32 %v13294_v21, %v13151_v30  ;;  %v13481_v47 = vadd.f32 %v13298_v17, %v13151_v30  ;;  %v3268_v8 = vsel %vm12423_vm4, %v10391_v20, %v3267_v7  ;;  %v11150_v48 = vadd.f32 %v13201_v54, %v13196_v60  ;;  %v13487_v40 = vld [vmem:[#allocation2 + $0x9c] sm:$0xe] }
 0x170   : > { %15574 = vst [vmem:[#allocation25_spill] sm:$0xff] %v13465_v55  ;;  %11929 = vmatmul.mubr.bf16.gmra.mrb[136].mxu0 %v10405_v12  ;;  %v3271_v63 = vsel %vm12423_vm4, %v3269_v27, %v3270_v11  ;;  %v10393_v57 = vrot.slane %v13433_v59, 9  ;;  %v4250_v21 = vadd.f32 %v11038_v2, %v13151_v30  ;;  %v4253_v17 = vadd.f32 %v11041_v38, %v13151_v30  ;;  %v3155_v20 = vld [vmem:[#allocation2 + $0xa4] sm:$0x1]  ;;  %v3160_v38 = vld [vmem:[#allocation2 + $0xb8] sm:$0xf] }
 0x171   : > { %15575 = vst [vmem:[#allocation27_spill] sm:$0xff] %v13481_v47  ;;  %11439 = vmatpush3.bf16.msra.mxu1 %v12137_v26  ;;  %11932 = vmatprep.mubr.bf16.mxu0 %v10406_v37  ;;  %v3284_v60 = vrot.slane %v13443_v3, 5  ;;  %v3288_v54 = vrot.slane %v13445_v43, 5  ;;  %v11153_v7 = vadd.f32 %v13219_v56, %v13213_v5  ;;  %v3295_v11 = vrot.slane %v13447_v62, 5  ;;  %v3156_v3 = vld [vmem:[#allocation2 + $0xa8] sm:$0xe] }
 0x172   : > { %v3275_v12 = vsel %vm12423_vm4, %v10392_v0, %v3274_v23  ;;  %v3278_v27 = vsel %vm12423_vm4, %v3276_v19, %v3277_v25  ;;  %v3283_v32 = vrot.slane %v3281_v16, 4  ;;  %v13509_v37 = vadd.f32 %v11150_v48, %v4250_v21  ;;  %v3158_v26 = vld [vmem:[#allocation2 + $0xb0] sm:$0x1]  ;;  %v13517_v47 = vpop.f32.mrb[56].mxu0 }
 0x173   : > { %v13496_v55 = vpop.f32.mrb[56].mxu1  ;;  %v10407_v2 = vcombine.low %v3268_v8, %v3271_v63  ;;  %v10394_v5 = vrot.slane %v13471_v34, 9  ;;  %v3291_v56 = vrot.slane %v13473_v1, 5  ;;  %v13515_v62 = vadd.f32 %v11153_v7, %v4253_v17  ;;  %v13528_v8 = vpop.f32.mrb[57].mxu0 }
 0x174   : > { %v13503_v59 = vpop.f32.mrb[57].mxu1  ;;  %v10395_v25 = vrot.slane %v13487_v40, 9  ;;  %v11044_v19 = vadd.f32 %v13264_v39, %v13257_v18  ;;  %v11047_v0 = vadd.f32 %v13280_v50, %v13274_v31  ;;  %v11156_v34 = vadd.f32 %v13259_v41, %v13253_v61  ;;  %v11063_v17 = vpop.f32.mrb[58].mxu0  ;;  %v3159_v50 = vld [vmem:[#allocation2 + $0xb4] sm:$0xe] }
 0x175   : > { %v13511_v43 = vpop.f32.mrb[58].mxu1  ;;  %15576 = vst [vmem:[#allocation29_spill] sm:$0xff] %v13515_v62  ;;  %v10408_v1 = vcombine.low %v3275_v12, %v3278_v27  ;;  %v3290_v48 = vrot.slane %v3288_v54, 4  ;;  %v3297_v63 = vrot.slane %v3295_v11, 4  ;;  %v3302_v21 = vrot.slane %v13494_v35, 5  ;;  %v11064_v31 = vpop.f32.mrb[59].mxu0 }
 0x176   : > { %v13519_v23 = vpop.f32.mrb[59].mxu1  ;;  %v3282_v40 = vsel %vm12423_vm4, %v10393_v57, %v3281_v16  ;;  %v3298_v7 = vrot.slane %v3155_v20, 5  ;;  %v4258_v39 = vadd.f32 %v11044_v19, %v13151_v30  ;;  %v4261_v18 = vadd.f32 %v11047_v0, %v13151_v30  ;;  %v13539_v35 = vld [vmem:[#allocation2 + $0xc4] sm:$0xf]  ;;  %v3161_v57 = vld [vmem:[#allocation2 + $0xbc] sm:$0x1] }
 0x177   : > { %v3285_v61 = vsel %vm12423_vm4, %v3283_v32, %v3284_v60  ;;  %v10396_v41 = vrot.slane %v3156_v3, 9  ;;  %v3305_v12 = vrot.slane %v3158_v26, 5  ;;  %v11159_v27 = vadd.f32 %v13276_v36, %v13266_v42 }
 0x178   : > { %11933 = vmatmul.mubr.bf16.gmra.mrb[140].mxu0 %v10407_v2  ;;  %v13541_v62 = vadd.f32 %v11156_v34, %v4258_v39  ;;  %v3304_v16 = vrot.slane %v3302_v21, 4  ;;  %v3309_v20 = vrot.slane %v3160_v38, 5  ;;  %v11050_v19 = vadd.f32 %v13347_v58, %v13334_v45 }
 0x179   : > { %11936 = vmatprep.mubr.bf16.mxu0 %v10408_v1  ;;  %v3289_v60 = vsel %vm12423_vm4, %v10394_v5, %v3288_v54  ;;  %v13547_v32 = vadd.f32 %v11159_v27, %v4261_v18  ;;  %v11053_v42 = vadd.f32 %v13367_v53, %v13358_v15  ;;  %v11162_v36 = vadd.f32 %v13336_v29, %v13326_v14  ;;  %v13564_v54 = vld [vmem:[#allocation2 + $0xc0] sm:$0xe]  ;;  %v13571_v53 = vld [vmem:[#allocation2 + $0xc8] sm:$0x1] }
 0x17a   : > { %v3292_v3 = vsel %vm12423_vm4, %v3290_v48, %v3291_v56  ;;  %v13557_v26 = vsel %vm12423_vm4, %v10395_v25, %v3295_v11  ;;  %v13561_v45 = vsel %vm12423_vm4, %v3297_v63, %v3298_v7  ;;  %v4266_v58 = vadd.f32 %v11050_v19, %v13151_v30  ;;  %v13584_v48 = vld [vmem:[#allocation2 + $0xd0] sm:$0xf] }
 0x17b   : > { %v10409_v2 = vcombine.low %v3282_v40, %v3285_v61  ;;  %v13568_v15 = vsel %vm12423_vm4, %v10396_v41, %v3302_v21  ;;  %v10397_v14 = vrot.slane %v3159_v50, 9  ;;  %v4269_v29 = vadd.f32 %v11053_v42, %v13151_v30  ;;  %v11178_v39 = vpop.f32.mrb[60].mxu1 }
 0x17c   : > { %v13575_v11 = vsel %vm12423_vm4, %v3304_v16, %v3305_v12  ;;  %v13577_v5 = vadd.f32 %v11162_v36, %v4266_v58  ;;  %v3316_v56 = vrot.slane %v13539_v35, 5  ;;  %v11165_v38 = vadd.f32 %v13360_v22, %v13349_v44  ;;  %v11179_v61 = vpop.f32.mrb[61].mxu1  ;;  %v11066_v16 = vpop.f32.mrb[60].mxu0  ;;  %v15580_v58 = vld [vmem:[#allocation7_spill] sm:$0xff] }
 0x17d   : > { %v10410_v25 = vcombine.low %v3289_v60, %v3292_v3  ;;  %v10411_v0 = vcombine.low %v13557_v26, %v13561_v45  ;;  %v3311_v34 = vrot.slane %v3309_v20, 4  ;;  %v3312_v1 = vrot.slane %v3161_v57, 5  ;;  %v11181_v41 = vpop.f32.mrb[62].mxu1  ;;  %v11067_v60 = vpop.f32.mrb[61].mxu0  ;;  %v15577_v26 = vld [vmem:[#allocation30_spill] sm:$0xff]  ;;  %v15579_v45 = vld [vmem:[#allocation31_spill] sm:$0xff] }
 0x17e   : > { %v10398_v63 = vrot.slane %v13564_v54, 9  ;;  %v13587_v21 = vadd.f32 %v11165_v38, %v4269_v29  ;;  %v11056_v40 = vadd.f32 %v13435_v52, %v13422_v46  ;;  %v11059_v7 = vadd.f32 %v13453_v51, %v13449_v10  ;;  %v11182_v57 = vpop.f32.mrb[63].mxu1 }
 0x17f   : > { %v10412_v44 = vcombine.low %v13568_v15, %v13575_v11  ;;  %v13597_v22 = vsel %vm12423_vm4, %v10397_v14, %v3309_v20  ;;  %v3319_v18 = vrot.slane %v13571_v53, 5  ;;  %v11168_v50 = vadd.f32 %v13414_v33, %v13403_v28  ;;  %v15581_v15 = vld [vmem:[#allocation36_spill] sm:$0xff] }
 0x180   : > { %11937 = vmatmul.mubr.bf16.gmra.mrb[144].mxu0 %v10409_v2  ;;  %v3318_v46 = vrot.slane %v3316_v56, 4  ;;  %v4274_v52 = vadd.f32 %v11056_v40, %v13151_v30  ;;  %v4277_v10 = vadd.f32 %v11059_v7, %v13151_v30  ;;  %v11171_v51 = vadd.f32 %v13437_v6, %v13424_v9  ;;  %v15582_v14 = vld [vmem:[#allocation8_spill] sm:$0xff]  ;;  %v15583_v40 = vld [vmem:[#allocation37_spill] sm:$0xff] }
 0x181   : > { %11940 = vmatprep.mubr.bf16.mxu0 %v10410_v25  ;;  %v13610_v12 = vsel %vm12423_vm4, %v3311_v34, %v3312_v1  ;;  %v11062_v28 = vadd.f32 %v13528_v8, %v13517_v47  ;;  %v11065_v33 = vadd.f32 %v11064_v31, %v11063_v17  ;;  %v11174_v27 = vadd.f32 %v13503_v59, %v13496_v55  ;;  %v11069_v17 = vpop.f32.mrb[62].mxu0  ;;  %v12138_v55 = vld [vmem:[%s15504_s2 + $0x60] sm:$0xff]   ;;  %v3165_v53 = vld [vmem:[#allocation2 + $0xcc] sm:$0xe]  ;;  %v3167_v1 = vld [vmem:[#allocation2 + $0xd4] sm:$0x1] }
 0x182   : > { %v3323_v20 = vrot.slane %v13584_v48, 5  ;;  %v13617_v19 = vadd.f32 %v11168_v50, %v4274_v52  ;;  %v13619_v9 = vadd.f32 %v11171_v51, %v4277_v10  ;;  %v11177_v6 = vadd.f32 %v13519_v23, %v13511_v43  ;;  %v12139_v59 = vld [vmem:[%s15504_s2 + $0x20] sm:$0xff]   ;;  %v11070_v36 = vpop.f32.mrb[63].mxu0  ;;  %v15578_v43 = vld [vmem:[#allocation6_spill] sm:$0xff]  ;;  %11440 = vmatprep.subr.bf16.mxu1 %v12138_v55  ;;  %v15584_v7 = vld [vmem:[#allocation9_spill] sm:$0xff] }
 0x183   : > { %v4282_v42 = vadd.f32 %v11062_v28, %v13151_v30  ;;  %v4285_v47 = vadd.f32 %v11065_v33, %v13151_v30  ;;  %v11068_v8 = vadd.f32 %v11067_v60, %v11066_v16  ;;  %v11180_v31 = vadd.f32 %v11179_v61, %v11178_v39  ;;  %v15585_v50 = vld [vmem:[#allocation38_spill] sm:$0xff]  ;;  %v15586_v61 = vld [vmem:[#allocation11_spill] sm:$0xff]  ;;  %v15588_v51 = vld [vmem:[#allocation12_spill] sm:$0xff]  ;;  %11441 = vmatpush3.bf16.msra.mxu1 %v12139_v59 }
 0x184   : > { %v11183_v3 = vadd.f32 %v11182_v57, %v11181_v41  ;;  %v4331_v23 = vadd.f32 %v15578_v43, %v15577_v26  ;;  %v4334_v2 = vadd.f32 %v15580_v58, %v15579_v45  ;;  %v4339_v29 = vadd.f32 %v15582_v14, %v15581_v15  ;;  %v15587_v10 = vld [vmem:[#allocation10_spill] sm:$0xff]  ;;  %v15589_v28 = vld [vmem:[#allocation17_spill] sm:$0xff]  ;;  %v15590_v33 = vld [vmem:[#allocation15_spill] sm:$0xff] }
 0x185   : > { %v13637_v11 = vadd.f32 %v11174_v27, %v4282_v42  ;;  %v13639_v38 = vadd.f32 %v11177_v6, %v4285_v47  ;;  %v4290_v25 = vadd.f32 %v11068_v8, %v13151_v30  ;;  %v11071_v34 = vadd.f32 %v11070_v36, %v11069_v17  ;;  %v15591_v6 = vld [vmem:[#allocation13_spill] sm:$0xff]  ;;  %v15592_v60 = vld [vmem:[#allocation19_spill] sm:$0xff]  ;;  %v15593_v47 = vld [vmem:[#allocation18_spill] sm:$0xff] }
 0x186   : > { %v4342_v39 = vadd.f32 %v15584_v7, %v15583_v40  ;;  %v13646_v52 = vadd.f32 %v15586_v61, %v15585_v50  ;;  %v13650_v41 = vadd.f32 %v15588_v51, %v15587_v10  ;;  %v13654_v27 = vadd.f32 %v15590_v33, %v15589_v28  ;;  %v15594_v8 = vld [vmem:[#allocation23_spill] sm:$0xff]  ;;  %v15595_v55 = vld [vmem:[#allocation24_spill] sm:$0xff]  ;;  %v15596_v26 = vld [vmem:[#allocation21_spill] sm:$0xff] }
 0x187   : > { %v4293_v16 = vadd.f32 %v11071_v34, %v13151_v30  ;;  %v13657_v57 = vadd.f32 %v11180_v31, %v4290_v25  ;;  %v13661_v42 = vadd.f32 %v15592_v60, %v15591_v6  ;;  %v13665_v17 = vadd.f32 %v15594_v8, %v15593_v47  ;;  %v15597_v43 = vld [vmem:[#allocation32_spill] sm:$0xff]  ;;  %v15598_v30 = vld [vmem:[#allocation39_spill] sm:$0xff]  ;;  %v15599_v31 = vld [vmem:[#allocation33_spill] sm:$0xff]  ;;  %v11312_v6 = vpop.f32.mrb[64].mxu1 }
 0x188   : > { %11941 = vmatmul.mubr.bf16.gmra.mrb[148].mxu0 %v10411_v0  ;;  %v13669_v36 = vadd.f32 %v15595_v55, %v13384_v49  ;;  %v13673_v59 = vadd.f32 %v15597_v43, %v15596_v26  ;;  %v13677_v45 = vadd.f32 %v15599_v31, %v15598_v30  ;;  %v15600_v58 = vld [vmem:[#allocation26_spill] sm:$0xff]  ;;  %v11200_v0 = vpop.f32.mrb[64].mxu0  ;;  %v15602_v34 = vld [vmem:[#allocation35_spill] sm:$0xff]  ;;  %v15603_v40 = vld [vmem:[#allocation16_spill] sm:$0xff]  ;;  %v3326_v28 = vrot.slane %v3167_v1, 5 }
 0x189   : > { %v15601_v15 = vld [vmem:[#allocation34_spill] sm:$0xff]  ;;  %11944 = vmatprep.mubr.bf16.mxu0 %v10412_v44  ;;  %v13683_v25 = vadd.f32 %v11183_v3, %v4293_v16  ;;  %v13687_v49 = vadd.f32 %v15602_v34, %v13463_v24  ;;  %v13691_v7 = vadd.f32 %v15603_v40, %v13477_v13  ;;  %v15604_v50 = vld [vmem:[#allocation27_spill] sm:$0xff]  ;;  %v3317_v44 = vsel %vm12423_vm4, %v10398_v63, %v3316_v56  ;;  %v11201_v51 = vpop.f32.mrb[65].mxu0  ;;  %v11313_v56 = vpop.f32.mrb[65].mxu1 }
 0x18a   : > { %v13681_v14 = vadd.f32 %v15601_v15, %v15600_v58  ;;  %v15605_v61 = vld [vmem:[#allocation14_spill] sm:$0xff]  ;;  %v3320_v3 = vsel %vm12423_vm4, %v3318_v46, %v3319_v18  ;;  %v10399_v24 = vrot.slane %v3165_v53, 9  ;;  %v11202_v33 = vadd.f32 %v11201_v51, %v11200_v0  ;;  %v11203_v13 = vpop.f32.mrb[66].mxu0  ;;  %v11315_v55 = vpop.f32.mrb[66].mxu1 }
 0x18b   : > { %v13695_v10 = vadd.f32 %v15605_v61, %v15604_v50  ;;  %v10413_v16 = vcombine.low %v13597_v22, %v13610_v12  ;;  %v11204_v60 = vpop.f32.mrb[67].mxu0  ;;  %v10414_v47 = vcombine.low %v3317_v44, %v3320_v3  ;;  %v3325_v35 = vrot.slane %v3323_v20, 4  ;;  %v11316_v46 = vpop.f32.mrb[67].mxu1  ;;  %v12140_v3 = vld [vmem:[%s15504_s2 + $0x68] sm:$0xff]  }
 0x18c   : > { %v4492_v54 = vadd.f32 %v11202_v33, %v4331_v23  ;;  %v11205_v8 = vadd.f32 %v11204_v60, %v11203_v13  ;;  %v11314_v63 = vadd.f32 %v11313_v56, %v11312_v6  ;;  %v11317_v53 = vadd.f32 %v11316_v46, %v11315_v55  ;;  %v11206_v26 = vpop.f32.mrb[68].mxu0  ;;  %11442 = vmatprep.subr.bf16.mxu1 %v12140_v3 }
 0x18d   : > { %v3324_v22 = vsel %vm12423_vm4, %v10399_v24, %v3323_v20  ;;  %v3327_v12 = vsel %vm12423_vm4, %v3325_v35, %v3326_v28  ;;  %v11207_v30 = vpop.f32.mrb[69].mxu0  ;;  %v11318_v0 = vpop.f32.mrb[68].mxu1  ;;  %v12141_v24 = vld [vmem:[%s15504_s2 + $0x28] sm:$0xff]  }
 0x18e   : > { %v4495_v18 = vadd.f32 %v11205_v8, %v4334_v2  ;;  %v13709_v1 = vadd.f32 %v11314_v63, %v4492_v54  ;;  %v10415_v43 = vcombine.low %v3324_v22, %v3327_v12  ;;  %v11208_v2 = vadd.f32 %v11207_v30, %v11206_v26  ;;  %v11209_v31 = vpop.f32.mrb[70].mxu0  ;;  %v11319_v40 = vpop.f32.mrb[69].mxu1  ;;  %11443 = vmatpush3.bf16.msra.mxu1 %v12141_v24 }
 0x18f   : > { %v11210_v58 = vpop.f32.mrb[71].mxu0  ;;  %v11320_v50 = vadd.f32 %v11319_v40, %v11318_v0  ;;  %v11321_v61 = vpop.f32.mrb[70].mxu1 }
 0x190   : > { %11945 = vmatmul.mubr.bf16.gmra.mrb[152].mxu0 %v10413_v16  ;;  %v13717_v23 = vadd.f32 %v11317_v53, %v4495_v18  ;;  %v4500_v15 = vadd.f32 %v11208_v2, %v4339_v29  ;;  %v11211_v34 = vadd.f32 %v11210_v58, %v11209_v31  ;;  %v11322_v20 = vpop.f32.mrb[71].mxu1 }
 0x191   : > { %11948 = vmatprep.mubr.bf16.mxu0 %v10414_v47  ;;  %v11323_v44 = vadd.f32 %v11322_v20, %v11321_v61 }
 0x192   : > { %v4503_v48 = vadd.f32 %v11211_v34, %v4342_v39  ;;  %v13725_v51 = vadd.f32 %v11320_v50, %v4500_v15  ;;  %v11212_v29 = vpop.f32.mrb[72].mxu0 }
 0x193   : > { %v11213_v33 = vpop.f32.mrb[73].mxu0 }
 0x194   : > { %v13727_v28 = vadd.f32 %v11323_v44, %v4503_v48  ;;  %v11214_v39 = vadd.f32 %v11213_v33, %v11212_v29  ;;  %v11215_v13 = vpop.f32.mrb[74].mxu0 }
 0x195   : > { %v11216_v16 = vpop.f32.mrb[75].mxu0  ;;  %v11324_v47 = vpop.f32.mrb[72].mxu1 }
 0x196   : > { %v4508_v6 = vadd.f32 %v11214_v39, %v13646_v52  ;;  %v11217_v60 = vadd.f32 %v11216_v16, %v11215_v13  ;;  %v11325_v54 = vpop.f32.mrb[73].mxu1  ;;  %v12142_v39 = vld [vmem:[%s15504_s2 + $0xc0] sm:$0xff]  }
 0x197   : > { %v11326_v8 = vadd.f32 %v11325_v54, %v11324_v47  ;;  %v11327_v56 = vpop.f32.mrb[74].mxu1  ;;  %11544 = vmatprep.subr.bf16.mxu0 %v12142_v39 }
 0x198   : > { %11949 = vmatmul.mubr.bf16.gmra.mrb[156].mxu0 %v10415_v43  ;;  %v4511_v35 = vadd.f32 %v11217_v60, %v13650_v41  ;;  %v11328_v63 = vpop.f32.mrb[75].mxu1  ;;  %v12143_v60 = vld [vmem:[%s15504_s2 + $0x70] sm:$0xff]  }
 0x199   : > { %v11329_v55 = vadd.f32 %v11328_v63, %v11327_v56  ;;  %v13731_v18 = vadd.f32 %v11326_v8, %v4508_v6  ;;  %11444 = vmatprep.subr.bf16.mxu1 %v12143_v60 }
 0x19a   : > { %v11218_v46 = vpop.f32.mrb[76].mxu0 }
 0x19b   : > { %v11219_v53 = vpop.f32.mrb[77].mxu0  ;;  %v13733_v22 = vadd.f32 %v11329_v55, %v4511_v35  ;;  %v4986_v35 = vld [vmem:[#allocation4 + $0x18] sm:$0x1] }
 0x19c   : > { %v11220_v12 = vadd.f32 %v11219_v53, %v11218_v46  ;;  %v11221_v26 = vpop.f32.mrb[78].mxu0  ;;  %v4987_v55 = vsel %vm13759_vm8, 0, %v4986_v35  ;;  %v4989_v35 = vld [vmem:[#allocation4 + $0x24] sm:$0x1] }
 0x19d   : > { %v11222_v43 = vpop.f32.mrb[79].mxu0  ;;  %4988 = vst [vmem:[#allocation4 + $0x18] sm:$0x1] %v4987_v55 }
 0x19e   : > { %v4516_v52 = vadd.f32 %v11220_v12, %v13654_v27  ;;  %v11223_v30 = vadd.f32 %v11222_v43, %v11221_v26 }
 0x19f   : > { %v11330_v2 = vpop.f32.mrb[76].mxu1 }
 0x1a0   : > { %v4519_v41 = vadd.f32 %v11223_v30, %v13661_v42  ;;  %v11331_v31 = vpop.f32.mrb[77].mxu1 }
 0x1a1   : > { %v11332_v58 = vadd.f32 %v11331_v31, %v11330_v2  ;;  %v11333_v15 = vpop.f32.mrb[78].mxu1  ;;  %v12178_v2 = vld [vmem:[%s15504_s2 + $0x110] sm:$0xff]  }
 0x1a2   : > { %v11334_v0 = vpop.f32.mrb[79].mxu1  ;;  %v11224_v48 = vpop.f32.mrb[80].mxu0 }
 0x1a3   : > { %v11335_v34 = vadd.f32 %v11334_v0, %v11333_v15  ;;  %v13737_v40 = vadd.f32 %v11332_v58, %v4516_v52  ;;  %v11225_v50 = vpop.f32.mrb[81].mxu0  ;;  %v12146_v58 = vld [vmem:[%s15504_s2 + $0xc8] sm:$0xff]   ;;  %v4983_v15 = vld [vmem:[#allocation4 + $0xc] sm:$0x1] }
 0x1a4   : > { %v11226_v20 = vadd.f32 %v11225_v50, %v11224_v48  ;;  %v11227_v44 = vpop.f32.mrb[82].mxu0  ;;  %v12147_v48 = vld [vmem:[%s15504_s2 + $0x88] sm:$0xff]   ;;  %v5036_v50 = vld [vmem:[#allocation4 + $0x20] sm:$0x1] }
 0x1a5   : > { %v13739_v61 = vadd.f32 %v11335_v34, %v4519_v41  ;;  %v11228_v3 = vpop.f32.mrb[83].mxu0 }
 0x1a6   : > { %v4524_v27 = vadd.f32 %v11226_v20, %v13665_v17  ;;  %v11229_v24 = vadd.f32 %v11228_v3, %v11227_v44  ;;  %v12144_v17 = vld [vmem:[%s15504_s2 + $0x80] sm:$0xff]   ;;  %v5033_v44 = vld [vmem:[#allocation4 + $0x14] sm:$0x1] }
 0x1a7   : > { %v11336_v29 = vpop.f32.mrb[80].mxu1  ;;  %11545 = vmatpush3.bf16.msra.mxu0 %v12144_v17 }
 0x1a8   : > { %v4527_v42 = vadd.f32 %v11229_v24, %v13669_v36  ;;  %v11337_v33 = vpop.f32.mrb[81].mxu1  ;;  %v12145_v36 = vld [vmem:[%s15504_s2 + $0x30] sm:$0xff]   ;;  %11546 = vmatprep.subr.bf16.mxu0 %v12146_v58 }
 0x1a9   : > { %v11338_v13 = vadd.f32 %v11337_v33, %v11336_v29  ;;  %v11339_v16 = vpop.f32.mrb[82].mxu1  ;;  %11445 = vmatpush3.bf16.msra.mxu1 %v12145_v36  ;;  %v12148_v24 = vld [vmem:[%s15504_s2 + $0xd0] sm:$0xff]   ;;  %v4992_v33 = vld [vmem:[#allocation4 + $0x30] sm:$0x1] }
 0x1aa   : > { %v11340_v6 = vpop.f32.mrb[83].mxu1  ;;  %v11230_v8 = vpop.f32.mrb[84].mxu0 }
 0x1ab   : > { %v11341_v47 = vadd.f32 %v11340_v6, %v11339_v16  ;;  %v13755_v54 = vadd.f32 %v11338_v13, %v4524_v27  ;;  %v11231_v63 = vpop.f32.mrb[85].mxu0  ;;  %11547 = vmatpush3.bf16.msra.mxu0 %v12147_v48  ;;  %v5034_v27 = vsel %vm13770_vm10, 0, %v5033_v44  ;;  %v4993_v13 = vsel %vm13759_vm8, 0, %v4992_v33  ;;  %v5039_v48 = vld [vmem:[#allocation4 + $0x2c] sm:$0x1] }
 0x1ac   : > { %v11232_v53 = vadd.f32 %v11231_v63, %v11230_v8  ;;  %v11233_v12 = vpop.f32.mrb[86].mxu0  ;;  %5035 = vst [vmem:[#allocation4 + $0x14] sm:$0x1] %v5034_v27  ;;  %11548 = vmatprep.subr.bf16.mxu0 %v12148_v24  ;;  %4994 = vst [vmem:[#allocation4 + $0x30] sm:$0x1] %v4993_v13 }
 0x1ad   : > { %v13765_v46 = vadd.f32 %v11341_v47, %v4527_v42  ;;  %v11234_v26 = vpop.f32.mrb[87].mxu0  ;;  %v12149_v42 = vld [vmem:[%s15504_s2 + $0x90] sm:$0xff]   ;;  %v12150_v47 = vld [vmem:[%s15504_s2 + $0xd8] sm:$0xff]  }
 0x1ae   : > { %v4532_v43 = vadd.f32 %v11232_v53, %v13673_v59  ;;  %v11235_v52 = vadd.f32 %v11234_v26, %v11233_v12  ;;  %v4984_v59 = vsel %vm13759_vm8, 0, %v4983_v15  ;;  %v4990_v53 = vsel %vm13759_vm8, 0, %v4989_v35  ;;  %v12151_v12 = vld [vmem:[%s15504_s2 + $0x98] sm:$0xff]  }
 0x1af   : > { %v11342_v30 = vpop.f32.mrb[84].mxu1  ;;  %4985 = vst [vmem:[#allocation4 + $0xc] sm:$0x1] %v4984_v59  ;;  %11549 = vmatpush3.bf16.msra.mxu0 %v12149_v42  ;;  %4991 = vst [vmem:[#allocation4 + $0x24] sm:$0x1] %v4990_v53 }
 0x1b0   : > { %v4535_v41 = vadd.f32 %v11235_v52, %v13677_v45  ;;  %v11343_v31 = vpop.f32.mrb[85].mxu1  ;;  %v5037_v45 = vsel %vm13770_vm10, 0, %v5036_v50  ;;  %11550 = vmatprep.subr.bf16.mxu0 %v12150_v47 }
 0x1b1   : > { %v11344_v0 = vadd.f32 %v11343_v31, %v11342_v30  ;;  %v11345_v34 = vpop.f32.mrb[86].mxu1  ;;  %5038 = vst [vmem:[#allocation4 + $0x20] sm:$0x1] %v5037_v45 }
 0x1b2   : > { %v11346_v20 = vpop.f32.mrb[87].mxu1 }
 0x1b3   : > { %v11347_v3 = vadd.f32 %v11346_v20, %v11345_v34  ;;  %v13790_v29 = vadd.f32 %v11344_v0, %v4532_v43  ;;  %v5042_v43 = vld [vmem:[#allocation4 + $0x38] sm:$0x1]  ;;  %11551 = vmatpush3.bf16.msra.mxu0 %v12151_v12 }
 0x1b5   : > { %v11236_v39 = vpop.f32.mrb[88].mxu0  ;;  %v13797_v16 = vadd.f32 %v11347_v3, %v4535_v41 }
 0x1b6   : > { %v11237_v6 = vpop.f32.mrb[89].mxu0 }
 0x1b7   : > { %v11238_v60 = vadd.f32 %v11237_v6, %v11236_v39  ;;  %v11239_v17 = vpop.f32.mrb[90].mxu0 }
 0x1b8   : > { %v11240_v36 = vpop.f32.mrb[91].mxu0 }
 0x1b9   : > { %v4540_v8 = vadd.f32 %v11238_v60, %v13681_v14  ;;  %v11241_v55 = vadd.f32 %v11240_v36, %v11239_v17  ;;  %v5043_v14 = vsel %vm13770_vm10, 0, %v5042_v43  ;;  %v12152_v36 = vld [vmem:[%s15504_s2 + $0xe0] sm:$0xff]   ;;  %v4995_v43 = vld [vmem:[#allocation4 + $0x3c] sm:$0x1] }
 0x1ba   : > { %v11348_v63 = vpop.f32.mrb[88].mxu1  ;;  %5044 = vst [vmem:[#allocation4 + $0x38] sm:$0x1] %v5043_v14  ;;  %11552 = vmatprep.subr.bf16.mxu0 %v12152_v36  ;;  %v5048_v14 = vld [vmem:[#allocation4 + $0x50] sm:$0x1]  ;;  %v12159_v36 = vld [vmem:[%s15504_s2 + $0xb0] sm:$0xff]  }
 0x1bb   : > { %v11349_v26 = vpop.f32.mrb[89].mxu1  ;;  %v4543_v52 = vadd.f32 %v11241_v55, %v13687_v49  ;;  %v5040_v49 = vsel %vm13770_vm10, 0, %v5039_v48  ;;  %v12156_v55 = vld [vmem:[%s15504_s2 + $0xe8] sm:$0xff]  }
 0x1bc   : > { %v11350_v30 = vadd.f32 %v11349_v26, %v11348_v63  ;;  %v11351_v41 = vpop.f32.mrb[90].mxu1  ;;  %5041 = vst [vmem:[#allocation4 + $0x2c] sm:$0x1] %v5040_v49  ;;  %v4998_v63 = vld [vmem:[#allocation4 + $0x48] sm:$0x1]  ;;  %v12158_v49 = vld [vmem:[%s15504_s2 + $0xf0] sm:$0xff]  }
 0x1bd   : > { %v11352_v31 = vpop.f32.mrb[91].mxu1  ;;  %v4999_v26 = vsel %vm13759_vm8, 0, %v4998_v63  ;;  %v12259_v63 = vmov 0  }
 0x1be   : > { %v11353_v58 = vadd.f32 %v11352_v31, %v11351_v41  ;;  %v13811_v15 = vadd.f32 %v11350_v30, %v4540_v8  ;;  %v12155_v8 = vld [vmem:[%s15504_s2 + $0x38] sm:$0xff]   ;;  %5000 = vst [vmem:[#allocation4 + $0x48] sm:$0x1] %v4999_v26  ;;  %v4996_v41 = vsel %vm13759_vm8, 0, %v4995_v43  ;;  %4972 = vst [vmem:[#allocation4] sm:$0xf] %v12259_v63 }
 0x1bf   : > { %v11242_v0 = vpop.f32.mrb[92].mxu0  ;;  %v5045_v31 = vld [vmem:[#allocation4 + $0x44] sm:$0x1]  ;;  %4997 = vst [vmem:[#allocation4 + $0x3c] sm:$0x1] %v4996_v41 }
 0x1c0   : > { %v13813_v34 = vadd.f32 %v11353_v58, %v4543_v52  ;;  %v11243_v59 = vpop.f32.mrb[93].mxu0  ;;  %v12157_v52 = vld [vmem:[%s15504_s2 + $0xa8] sm:$0xff]   ;;  %4973 = vst [vmem:[#allocation4 + $0x4] sm:$0xf] %v12259_v63  ;;  %4974 = vst [vmem:[#allocation4 + $0x8] sm:$0x1] %v12259_v63 }
 0x1c1   : > { %v11244_v50 = vadd.f32 %v11243_v59, %v11242_v0  ;;  %v11245_v20 = vpop.f32.mrb[94].mxu0  ;;  %v15610_v58 = vld [vmem:[#allocation20_spill] sm:$0xff]  ;;  %4976 = vst [vmem:[#allocation4 + $0xcc] sm:$0xf] %v12259_v63  ;;  %4977 = vst [vmem:[#allocation4 + $0xd0] sm:$0xf] %v12259_v63 }
 0x1c2   : > { %v11246_v45 = vpop.f32.mrb[95].mxu0  ;;  %4978 = vst [vmem:[#allocation4 + $0xd4] sm:$0x1] %v12259_v63  ;;  %v12161_v41 = vld [vmem:[%s15504_s2 + $0xb8] sm:$0xff]  }
 0x1c3   : > { %v4548_v44 = vadd.f32 %v11244_v50, %v13691_v7  ;;  %v11247_v3 = vadd.f32 %v11246_v45, %v11245_v20  ;;  %v12153_v7 = vld [vmem:[%s15504_s2 + $0x78] sm:$0xff]   ;;  %v5049_v50 = vsel %vm13770_vm10, 0, %v5048_v14  ;;  %v5046_v20 = vsel %vm13770_vm10, 0, %v5045_v31 }
 0x1c4   : > { %v11354_v27 = vpop.f32.mrb[92].mxu1  ;;  %11446 = vmatprep.subr.bf16.mxu1 %v12153_v7  ;;  %v5004_v45 = vld [vmem:[#allocation4 + $0x60] sm:$0x1]  ;;  %5050 = vst [vmem:[#allocation4 + $0x50] sm:$0x1] %v5049_v50 }
 0x1c5   : > { %v4551_v24 = vadd.f32 %v11247_v3, %v13695_v10  ;;  %v11355_v42 = vpop.f32.mrb[93].mxu1  ;;  %v12154_v10 = vld [vmem:[%s15504_s2 + $0xa0] sm:$0xff]   ;;  %11447 = vmatpush3.bf16.msra.mxu1 %v12155_v8  ;;  %5047 = vst [vmem:[#allocation4 + $0x44] sm:$0x1] %v5046_v20  ;;  %v5005_v3 = vsel %vm13759_vm8, 0, %v5004_v45  ;;  %v12160_v8 = vld [vmem:[%s15504_s2 + $0xf8] sm:$0xff]  }
 0x1c6   : > { %v11356_v33 = vadd.f32 %v11355_v42, %v11354_v27  ;;  %v11357_v39 = vpop.f32.mrb[94].mxu1  ;;  %11553 = vmatpush3.bf16.msra.mxu0 %v12154_v10  ;;  %v5001_v27 = vld [vmem:[#allocation4 + $0x54] sm:$0x1]  ;;  %5006 = vst [vmem:[#allocation4 + $0x60] sm:$0x1] %v5005_v3 }
 0x1c7   : > { %v11358_v13 = vpop.f32.mrb[95].mxu1  ;;  %11554 = vmatprep.subr.bf16.mxu0 %v12156_v55  ;;  %v5051_v10 = vld [vmem:[#allocation4 + $0x5c] sm:$0x1]  ;;  %v15612_v20 = vld [vmem:[#allocation28_spill] sm:$0xff]  ;;  %v5757_v3 = vld [vmem:[#allocation4] sm:$0xf] }
 0x1c8   : > { %v11359_v6 = vadd.f32 %v11358_v13, %v11357_v39  ;;  %v13819_v60 = vadd.f32 %v11356_v33, %v4548_v44  ;;  %v5002_v13 = vsel %vm13759_vm8, 0, %v5001_v27  ;;  %v5052_v55 = vsel %vm13770_vm10, 0, %v5051_v10 }
 0x1c9   : > { %5003 = vst [vmem:[#allocation4 + $0x54] sm:$0x1] %v5002_v13  ;;  %5053 = vst [vmem:[#allocation4 + $0x5c] sm:$0x1] %v5052_v55  ;;  %v15613_v13 = vld [vmem:[#allocation25_spill] sm:$0xff] }
 0x1ca   : > { %v11248_v17 = vpop.f32.mrb[96].mxu0  ;;  %v13830_v47 = vadd.f32 %v11359_v6, %v4551_v24  ;;  %v15611_v24 = vld [vmem:[#allocation22_spill] sm:$0xff]  ;;  %v5054_v6 = vld [vmem:[#allocation4 + $0x68] sm:$0x1]  ;;  %11555 = vmatpush3.bf16.msra.mxu0 %v12157_v52 }
 0x1cb   : > { %v11249_v35 = vpop.f32.mrb[97].mxu0  ;;  %v5055_v7 = vsel %vm13770_vm10, 0, %v5054_v6  ;;  %11556 = vmatprep.subr.bf16.mxu0 %v12158_v49 }
 0x1cc   : > { %v11250_v53 = vadd.f32 %v11249_v35, %v11248_v17  ;;  %v11251_v12 = vpop.f32.mrb[98].mxu0  ;;  %5056 = vst [vmem:[#allocation4 + $0x68] sm:$0x1] %v5055_v7 }
 0x1cd   : > { %v11252_v30 = vpop.f32.mrb[99].mxu0 }
 0x1ce   : > { %v4556_v0 = vadd.f32 %v11250_v53, %v15610_v58  ;;  %v11253_v48 = vadd.f32 %v11252_v30, %v11251_v12  ;;  %v12165_v53 = vld [vmem:[%s15504_s2 + $0x140] sm:$0xff]   ;;  %v5010_v12 = vld [vmem:[#allocation4 + $0x78] sm:$0x1]  ;;  %11557 = vmatpush3.bf16.msra.mxu0 %v12159_v36  ;;  %v5809_v36 = vshll.u32 %v5757_v3, 16 }
 0x1cf   : > { %v11360_v59 = vpop.f32.mrb[96].mxu1  ;;  %v5011_v43 = vsel %vm13759_vm8, 0, %v5010_v12  ;;  %11656 = vmatprep.subr.bf16.mxu1 %v12165_v53  ;;  %11558 = vmatprep.subr.bf16.mxu0 %v12160_v8 }
 0x1d0   : > { %v11361_v44 = vpop.f32.mrb[97].mxu1  ;;  %v4559_v42 = vadd.f32 %v11253_v48, %v15611_v24  ;;  %5012 = vst [vmem:[#allocation4 + $0x78] sm:$0x1] %v5011_v43  ;;  %v5811_v12 = vrot.slane %v5809_v36, 5 }
 0x1d1   : > { %v11362_v33 = vadd.f32 %v11361_v44, %v11360_v59  ;;  %v11363_v39 = vpop.f32.mrb[98].mxu1 }
 0x1d2   : > { %v11364_v17 = vpop.f32.mrb[99].mxu1  ;;  %11559 = vmatpush3.bf16.msra.mxu0 %v12161_v41 }
 0x1d3   : > { %v11365_v35 = vadd.f32 %v11364_v17, %v11363_v39  ;;  %v13871_v26 = vadd.f32 %v11362_v33, %v4556_v0  ;;  %v5007_v0 = vld [vmem:[#allocation4 + $0x6c] sm:$0x1]  ;;  %v5759_v33 = vld [vmem:[#allocation4 + $0x8] sm:$0x1]  ;;  %v5806_v39 = vshrl.u32 %v5757_v3, 16 }
 0x1d4   : > { %v5008_v50 = vsel %vm13759_vm8, 0, %v5007_v0  ;;  %v5825_v63 = vshll.u32 %v5759_v33, 16 }
 0x1d5   : > { %v13875_v52 = vadd.f32 %v11365_v35, %v4559_v42  ;;  %v11254_v30 = vpop.f32.mrb[100].mxu0  ;;  %5009 = vst [vmem:[#allocation4 + $0x6c] sm:$0x1] %v5008_v50  ;;  %v5758_v42 = vld [vmem:[#allocation4 + $0x4] sm:$0xf]  ;;  %v5808_v8 = vrot.slane %v5806_v39, 4 }
 0x1d6   : > { %v11255_v14 = vpop.f32.mrb[101].mxu0  ;;  %v5815_v7 = vshll.u32 %v5758_v42, 16  ;;  %v5819_v10 = vshrl.u32 %v5758_v42, 16  ;;  %v5060_v50 = vld [vmem:[#allocation4 + $0x80] sm:$0x1]  ;;  %v15614_v39 = vld [vmem:[#allocation29_spill] sm:$0xff] }
 0x1d7   : > { %v11256_v31 = vadd.f32 %v11255_v14, %v11254_v30  ;;  %v11257_v58 = vpop.f32.mrb[102].mxu0  ;;  %v5812_v0 = vor.u32 %v5811_v12, %v5808_v8 }
 0x1d8   : > { %v11258_v48 = vpop.f32.mrb[103].mxu0  ;;  %v5817_v43 = vrot.slane %v5815_v7, 5  ;;  %v5821_v30 = vrot.slane %v5819_v10, 4  ;;  %v12162_v10 = vld [vmem:[#allocation4] sm:$0xff]  }
 0x1d9   : > { %v11366_v59 = vpop.f32.mrb[100].mxu1  ;;  %v4564_v49 = vadd.f32 %v11256_v31, %v15612_v20  ;;  %v11259_v45 = vadd.f32 %v11258_v48, %v11257_v58  ;;  %v5827_v48 = vrot.slane %v5825_v63, 5  ;;  %v5813_v3 = vrot.slane %v5812_v0, 4  ;;  %v12166_v63 = vld [vmem:[%s15504_s2 + $0x100] sm:$0xff]  }
 0x1da   : > { %v11367_v44 = vpop.f32.mrb[101].mxu1 }
 0x1db   : > { %v11368_v27 = vadd.f32 %v11367_v44, %v11366_v59  ;;  %v11369_v24 = vpop.f32.mrb[102].mxu1  ;;  %v4567_v6 = vadd.f32 %v11259_v45, %v15613_v13  ;;  %v5822_v59 = vor.u32 %v5821_v30, %v5817_v43  ;;  %v5061_v45 = vsel %vm13770_vm10, 0, %v5060_v50 }
 0x1dc   : > { %v11370_v17 = vpop.f32.mrb[103].mxu1  ;;  %5062 = vst [vmem:[#allocation4 + $0x80] sm:$0x1] %v5061_v45  ;;  %v5818_v36 = vsel %vm12429_vm5, %v5813_v3, %v5817_v43  ;;  %v5016_v43 = vld [vmem:[#allocation4 + $0x90] sm:$0x1] }
 0x1dd   : > { %v11371_v35 = vadd.f32 %v11370_v17, %v11369_v24  ;;  %v13884_v55 = vadd.f32 %v11368_v27, %v4564_v49  ;;  %v11260_v53 = vpop.f32.mrb[104].mxu0  ;;  %v5823_v27 = vrot.slane %v5822_v59, 4  ;;  %v5057_v24 = vld [vmem:[#allocation4 + $0x74] sm:$0x1]  ;;  %v5066_v45 = vld [vmem:[#allocation4 + $0x98] sm:$0x1] }
 0x1de   : > { %v11261_v41 = vpop.f32.mrb[105].mxu0  ;;  %v5058_v33 = vsel %vm13770_vm10, 0, %v5057_v24  ;;  %v5067_v24 = vsel %vm13770_vm10, 0, %v5066_v45 }
 0x1df   : > { %v13886_v14 = vadd.f32 %v11371_v35, %v4567_v6  ;;  %v11262_v31 = vadd.f32 %v11261_v41, %v11260_v53  ;;  %v11263_v58 = vpop.f32.mrb[106].mxu0  ;;  %v5828_v7 = vsel %vm12429_vm5, %v5823_v27, %v5827_v48  ;;  %5059 = vst [vmem:[#allocation4 + $0x74] sm:$0x1] %v5058_v33  ;;  %v12171_v33 = vld [vmem:[%s15504_s2 + $0x148] sm:$0xff]   ;;  %5068 = vst [vmem:[#allocation4 + $0x98] sm:$0x1] %v5067_v24 }
 0x1e0   : > { %v11264_v20 = vpop.f32.mrb[107].mxu0  ;;  %v10537_v8 = vcombine.low %v5818_v36, %v5828_v7 }
 0x1e1   : > { %v4572_v49 = vadd.f32 %v11262_v31, %v13509_v37  ;;  %v11265_v44 = vadd.f32 %v11264_v20, %v11263_v58  ;;  %v5017_v31 = vsel %vm13759_vm8, 0, %v5016_v43  ;;  %v5013_v20 = vld [vmem:[#allocation4 + $0x84] sm:$0x1] }
 0x1e2   : > { %9238 = vmatprep.mubr.bf16.mxu1 %v10537_v8  ;;  %5018 = vst [vmem:[#allocation4 + $0x90] sm:$0x1] %v5017_v31  ;;  %v5014_v27 = vsel %vm13759_vm8, 0, %v5013_v20 }
 0x1e3   : > { %v11372_v42 = vpop.f32.mrb[104].mxu1  ;;  %v4575_v13 = vadd.f32 %v11265_v44, %v15614_v39  ;;  %9239 = vmatmul.mubr.bf16.vlgmr.msra.gmra.mrb[128].mxu1 %v12162_v10  ;;  %5015 = vst [vmem:[#allocation4 + $0x84] sm:$0x1] %v5014_v27 }
 0x1e4   : > { %v11373_v6 = vpop.f32.mrb[105].mxu1  ;;  %11657 = vmatpush3.bf16.msra.mxu1 %v12166_v63 }
 0x1e5   : > { %v11374_v37 = vadd.f32 %v11373_v6, %v11372_v42  ;;  %v11375_v35 = vpop.f32.mrb[106].mxu1  ;;  %v5063_v42 = vld [vmem:[#allocation4 + $0x8c] sm:$0x1]  ;;  %11658 = vmatprep.subr.bf16.mxu1 %v12171_v33 }
 0x1e6   : > { %v11376_v53 = vpop.f32.mrb[107].mxu1 }
 0x1e7   : > { %v11377_v12 = vadd.f32 %v11376_v53, %v11375_v35  ;;  %v13901_v30 = vadd.f32 %v11374_v37, %v4572_v49 }
 0x1e9   : > { %v13903_v41 = vadd.f32 %v11377_v12, %v4575_v13  ;;  %v11266_v58 = vpop.f32.mrb[108].mxu0  ;;  %v5064_v13 = vsel %vm13770_vm10, 0, %v5063_v42  ;;  %v5069_v42 = vld [vmem:[#allocation4 + $0xa4] sm:$0x1] }
 0x1ea   : > { %v11267_v0 = vpop.f32.mrb[109].mxu0  ;;  %5065 = vst [vmem:[#allocation4 + $0x8c] sm:$0x1] %v5064_v13 }
 0x1eb   : > { %v11268_v59 = vadd.f32 %v11267_v0, %v11266_v58  ;;  %v11269_v48 = vpop.f32.mrb[110].mxu0  ;;  %v5022_v0 = vld [vmem:[#allocation4 + $0xa8] sm:$0x1] }
 0x1ec   : > { %v11270_v50 = vpop.f32.mrb[111].mxu0 }
 0x1ed   : > { %v4580_v44 = vadd.f32 %v11268_v59, %v13541_v62  ;;  %v11271_v3 = vadd.f32 %v11270_v50, %v11269_v48  ;;  %v5023_v48 = vsel %vm13759_vm8, 0, %v5022_v0 }
 0x1ee   : > { %v11378_v49 = vpop.f32.mrb[108].mxu1  ;;  %5024 = vst [vmem:[#allocation4 + $0xa8] sm:$0x1] %v5023_v48 }
 0x1ef   : > { %v11379_v39 = vpop.f32.mrb[109].mxu1  ;;  %v4583_v62 = vadd.f32 %v11271_v3, %v13547_v32  ;;  %v12172_v32 = vld [vmem:[%s15504_s2 + $0x108] sm:$0xff]  }
 0x1f0   : > { %v11380_v6 = vadd.f32 %v11379_v39, %v11378_v49  ;;  %v11381_v36 = vpop.f32.mrb[110].mxu1  ;;  %11659 = vmatpush3.bf16.msra.mxu1 %v12172_v32  ;;  %v5019_v49 = vld [vmem:[#allocation4 + $0x9c] sm:$0x1]  ;;  %v5072_v3 = vld [vmem:[#allocation4 + $0xb0] sm:$0x1] }
 0x1f1   : > { %v11382_v7 = vpop.f32.mrb[111].mxu1  ;;  %v5020_v27 = vsel %vm13759_vm8, 0, %v5019_v49  ;;  %v5073_v24 = vsel %vm13770_vm10, 0, %v5072_v3  ;;  %v5028_v32 = vld [vmem:[#allocation4 + $0xc0] sm:$0x1] }
 0x1f2   : > { %v11383_v10 = vadd.f32 %v11382_v7, %v11381_v36  ;;  %v13918_v37 = vadd.f32 %v11380_v6, %v4580_v44  ;;  %5021 = vst [vmem:[#allocation4 + $0x9c] sm:$0x1] %v5020_v27  ;;  %5074 = vst [vmem:[#allocation4 + $0xb0] sm:$0x1] %v5073_v24  ;;  %v5075_v49 = vld [vmem:[#allocation4 + $0xbc] sm:$0x1] }
 0x1f3   : > { %v12177_v24 = vld [vmem:[%s15504_s2 + $0x150] sm:$0xff]  }
 0x1f4   : > { %v13920_v35 = vadd.f32 %v11383_v10, %v4583_v62  ;;  %11660 = vmatprep.subr.bf16.mxu1 %v12177_v24 }
 0x1f5   : > { %v11272_v8 = vpop.f32.mrb[112].mxu0  ;;  %11661 = vmatpush3.bf16.msra.mxu1 %v12178_v2 }
 0x1f6   : > { %v11273_v63 = vpop.f32.mrb[113].mxu0 }
 0x1f7   : > { %v11274_v53 = vadd.f32 %v11273_v63, %v11272_v8  ;;  %v11275_v12 = vpop.f32.mrb[114].mxu0 }
 0x1f8   : > { %v11276_v43 = vpop.f32.mrb[115].mxu0 }
 0x1f9   : > { %v4588_v31 = vadd.f32 %v11274_v53, %v13577_v5  ;;  %v11277_v58 = vadd.f32 %v11276_v43, %v11275_v12  ;;  %v11384_v59 = vpop.f32.mrb[112].mxu1 }
 0x1fa   : > { %v11385_v20 = vpop.f32.mrb[113].mxu1 }
 0x1fb   : > { %v4591_v50 = vadd.f32 %v11277_v58, %v13587_v21  ;;  %v11386_v45 = vadd.f32 %v11385_v20, %v11384_v59  ;;  %v11387_v44 = vpop.f32.mrb[114].mxu1  ;;  %v5070_v21 = vsel %vm13770_vm10, 0, %v5069_v42  ;;  %v5029_v59 = vsel %vm13759_vm8, 0, %v5028_v32  ;;  %v5025_v20 = vld [vmem:[#allocation4 + $0xb4] sm:$0x1] }
 0x1fc   : > { %v11388_v5 = vpop.f32.mrb[115].mxu1  ;;  %5071 = vst [vmem:[#allocation4 + $0xa4] sm:$0x1] %v5070_v21  ;;  %5030 = vst [vmem:[#allocation4 + $0xc0] sm:$0x1] %v5029_v59 }
 0x1fd   : > { %v11389_v33 = vadd.f32 %v11388_v5, %v11387_v44  ;;  %v13933_v39 = vadd.f32 %v11386_v45, %v4588_v31  ;;  %v5078_v45 = vld [vmem:[#allocation4 + $0xc8] sm:$0x1]  ;;  %v5076_v5 = vsel %vm13770_vm10, 0, %v5075_v49  ;;  %v6270_v49 = vld [vmem:[#allocation4 + $0x4] sm:$0xf] }
 0x1fe   : > { %5077 = vst [vmem:[#allocation4 + $0xbc] sm:$0x1] %v5076_v5 }
 0x1ff   : > { %v13937_v13 = vadd.f32 %v11389_v33, %v4591_v50 }
 0x200   : > { %v11278_v62 = vpop.f32.mrb[116].mxu0 }
 0x201   : > { %v11279_v6 = vpop.f32.mrb[117].mxu0 }
 0x202   : > { %v11280_v36 = vadd.f32 %v11279_v6, %v11278_v62  ;;  %v11281_v7 = vpop.f32.mrb[118].mxu0 }
 0x203   : > { %v11282_v10 = vpop.f32.mrb[119].mxu0 }
 0x204   : > { %v4596_v8 = vadd.f32 %v11280_v36, %v13617_v19  ;;  %v11283_v63 = vadd.f32 %v11282_v10, %v11281_v7  ;;  %v11390_v53 = vpop.f32.mrb[116].mxu1  ;;  %v5026_v19 = vsel %vm13759_vm8, 0, %v5025_v20 }
 0x205   : > { %v11391_v43 = vpop.f32.mrb[117].mxu1  ;;  %5027 = vst [vmem:[#allocation4 + $0xb4] sm:$0x1] %v5026_v19  ;;  %v12183_v19 = vld [vmem:[%s15504_s2 + $0x158] sm:$0xff]  }
 0x206   : > { %v4599_v12 = vadd.f32 %v11283_v63, %v13619_v9  ;;  %v11392_v31 = vadd.f32 %v11391_v43, %v11390_v53  ;;  %v11393_v58 = vpop.f32.mrb[118].mxu1  ;;  %v5079_v9 = vsel %vm13770_vm10, 0, %v5078_v45  ;;  %v6269_v45 = vld [vmem:[#allocation4] sm:$0xe]  ;;  %11662 = vmatprep.subr.bf16.mxu1 %v12183_v19 }
 0x207   : > { %v11394_v0 = vpop.f32.mrb[119].mxu1  ;;  %5080 = vst [vmem:[#allocation4 + $0xc8] sm:$0x1] %v5079_v9  ;;  %v10553_v24 = vrot.slane %v6269_v45, 9 }
 0x208   : > { %v11395_v48 = vadd.f32 %v11394_v0, %v11393_v58  ;;  %v13943_v50 = vadd.f32 %v11392_v31, %v4596_v8 }
 0x20a   : > { %v13945_v44 = vadd.f32 %v11395_v48, %v4599_v12 }
 0x21c   : > { %v11284_v3 = vpop.f32.mrb[120].mxu0 }
 0x21d   : > { %v11285_v27 = vpop.f32.mrb[121].mxu0 }
 0x21e   : > { %v11286_v42 = vadd.f32 %v11285_v27, %v11284_v3  ;;  %v11287_v33 = vpop.f32.mrb[122].mxu0  ;;  %v12184_v3 = vld [vmem:[%s15504_s2 + $0x118] sm:$0xff]  }
 0x21f   : > { %v11288_v21 = vpop.f32.mrb[123].mxu0  ;;  %11663 = vmatpush3.bf16.msra.mxu1 %v12184_v3 }
 0x220   : > { %v4604_v62 = vadd.f32 %v11286_v42, %v13637_v11  ;;  %v11289_v6 = vadd.f32 %v11288_v21, %v11287_v33  ;;  %v13975_v33 = vld [vmem:[#allocation4 + $0x8] sm:$0x1] }
 0x222   : > { %v4607_v36 = vadd.f32 %v11289_v6, %v13639_v38 }
 0x227   : > { %v11396_v7 = vpop.f32.mrb[120].mxu1 }
 0x228   : > { %v11397_v10 = vpop.f32.mrb[121].mxu1 }
 0x229   : > { %v11398_v8 = vadd.f32 %v11397_v10, %v11396_v7  ;;  %v11399_v63 = vpop.f32.mrb[122].mxu1  ;;  %v6367_v7 = vrot.slane %v6270_v49, 5 }
 0x22a   : > { %v11400_v53 = vpop.f32.mrb[123].mxu1  ;;  %v11290_v43 = vpop.f32.mrb[124].mxu0 }
 0x22b   : > { %v11401_v12 = vadd.f32 %v11400_v53, %v11399_v63  ;;  %v13961_v31 = vadd.f32 %v11398_v8, %v4604_v62  ;;  %v11291_v58 = vpop.f32.mrb[125].mxu0  ;;  %v6369_v19 = vrot.slane %v6367_v7, 4 }
 0x22c   : > { %v11292_v32 = vadd.f32 %v11291_v58, %v11290_v43  ;;  %v11293_v11 = vpop.f32.mrb[126].mxu0  ;;  %v6370_v43 = vrot.slane %v13975_v33, 5 }
 0x22d   : > { %v13963_v0 = vadd.f32 %v11401_v12, %v4607_v36  ;;  %v11294_v38 = vpop.f32.mrb[127].mxu0  ;;  %v13981_v12 = vsel %vm12423_vm4, %v10553_v24, %v6367_v7 }
 0x22e   : > { %v4612_v59 = vadd.f32 %v11292_v32, %v13657_v57  ;;  %v11295_v48 = vadd.f32 %v11294_v38, %v11293_v11 }
 0x230   : > { %v4615_v20 = vadd.f32 %v11295_v48, %v13683_v25 }
 0x232   : > { %v11922_v9 = vpop.f32.mrb[128].mxu0 }
 0x233   : > { %v4822_v5 = vadd.f32 %v11922_v9, %v13725_v51  ;;  %v4813_v27 = vpop.f32.mrb[129].mxu0 }
 0x234   : > { %v4814_v42 = vadd.f32 %v4813_v27, %v13709_v1  ;;  %v11923_v25 = vpop.f32.mrb[130].mxu0 }
 0x235   : > { %v4942_v62 = vmax.f32 %v4822_v5, 0.0  ;;  %v4825_v6 = vadd.f32 %v11923_v25, %v13727_v28  ;;  %v4816_v36 = vpop.f32.mrb[131].mxu0 }
 0x236   : > { %v11402_v57 = vpop.f32.mrb[124].mxu1  ;;  %v4940_v8 = vmax.f32 %v4814_v42, 0.0  ;;  %v4817_v51 = vadd.f32 %v4816_v36, %v13717_v23  ;;  %v12187_v23 = vld [vmem:[%s15504_s2 + $0x1c0] sm:$0xff]  }
 0x237   : > { %v11403_v21 = vpop.f32.mrb[125].mxu1  ;;  %v10877_v53 = vpack.c.bf16 %v4942_v62, %v4942_v62  ;;  %v4943_v1 = vmax.f32 %v4825_v6, 0.0  ;;  %11768 = vmatprep.subr.bf16.mxu0 %v12187_v23  ;;  %v5505_v23 = vld [vmem:[#allocation4 + $0x14] sm:$0x1] }
 0x238   : > { %v11404_v10 = vadd.f32 %v11403_v21, %v11402_v57  ;;  %v11405_v2 = vpop.f32.mrb[126].mxu1  ;;  %v10875_v32 = vpack.c.bf16 %v4940_v8, %v4940_v8  ;;  %v4941_v28 = vmax.f32 %v4817_v51, 0.0  ;;  %v5508_v21 = vld [vmem:[#allocation4 + $0x18] sm:$0xf]  ;;  %v5501_v8 = vld [vmem:[#allocation4 + $0xc] sm:$0xf] }
 0x239   : > { %v11406_v63 = vpop.f32.mrb[127].mxu1  ;;  %v5197_v38 = vshrl.u32 %v10877_v53, 16  ;;  %v5200_v48 = vshll.u32 %v10877_v53, 16  ;;  %v10878_v45 = vpack.c.bf16 %v4943_v1, %v4943_v1 }
 0x23a   : > { %v11407_v58 = vadd.f32 %v11406_v63, %v11405_v2  ;;  %v13984_v11 = vadd.f32 %v11404_v10, %v4612_v59  ;;  %v5180_v9 = vshrl.u32 %v10875_v32, 16  ;;  %v5183_v49 = vshll.u32 %v10875_v32, 16  ;;  %v11926_v5 = vpop.f32.mrb[132].mxu0  ;;  %v5512_v32 = vld [vmem:[#allocation4 + $0x20] sm:$0x1] }
 0x23b   : > { %v10876_v3 = vpack.c.bf16 %v4941_v28, %v4941_v28  ;;  %v5199_v24 = vrot.slane %v5197_v38, 7  ;;  %v5205_v57 = vshrl.u32 %v10878_v45, 16  ;;  %v5208_v42 = vshll.u32 %v10878_v45, 16  ;;  %v4829_v25 = vpop.f32.mrb[133].mxu0 }
 0x23c   : > { %v13989_v27 = vadd.f32 %v11407_v58, %v4615_v20  ;;  %v4838_v59 = vadd.f32 %v11926_v5, %v13737_v40  ;;  %v5182_v62 = vrot.slane %v5180_v9, 7  ;;  %v4830_v20 = vadd.f32 %v4829_v25, %v13731_v18  ;;  %v11927_v7 = vpop.f32.mrb[134].mxu0 }
 0x23d   : > { %v5188_v6 = vshrl.u32 %v10876_v3, 16  ;;  %v5191_v36 = vshll.u32 %v10876_v3, 16  ;;  %v5202_v10 = vor.u32 %v5200_v48, %v5199_v24  ;;  %v5203_v2 = vrot.slane %v5199_v24, 4  ;;  %v4832_v63 = vpop.f32.mrb[135].mxu0 }
 0x23e   : > { %v5207_v51 = vrot.slane %v5205_v57, 7  ;;  %v4946_v40 = vmax.f32 %v4838_v59, 0.0  ;;  %v5185_v53 = vor.u32 %v5183_v49, %v5182_v62  ;;  %v5186_v1 = vrot.slane %v5182_v62, 4  ;;  %v12191_v57 = vld [vmem:[%s15504_s2 + $0x160] sm:$0xff]  }
 0x23f   : > { %v5190_v28 = vrot.slane %v5188_v6, 7  ;;  %v4944_v38 = vmax.f32 %v4830_v20, 0.0  ;;  %v5509_v18 = vsel %vm13994_vm13, %v5202_v10, %v5508_v21  ;;  %v14018_v21 = vsel %vm12423_vm4, %v6369_v19, %v6370_v43  ;;  %v12192_v62 = vld [vmem:[%s15504_s2 + $0x120] sm:$0xff]   ;;  %11664 = vmatprep.subr.bf16.mxu1 %v12191_v57 }
 0x240   : > { %v5210_v48 = vor.u32 %v5208_v42, %v5207_v51  ;;  %v5212_v45 = vrot.slane %v5207_v51, 4  ;;  %v10881_v9 = vpack.c.bf16 %v4946_v40, %v4946_v40  ;;  %5510 = vst [vmem:[#allocation4 + $0x18] sm:$0xf] %v5509_v18  ;;  %v5502_v49 = vsel %vm13994_vm13, %v5185_v53, %v5501_v8  ;;  %11665 = vmatpush3.bf16.msra.mxu1 %v12192_v62  ;;  %v5522_v53 = vld [vmem:[#allocation4 + $0x30] sm:$0xf] }
 0x241   : > { %v5193_v3 = vor.u32 %v5191_v36, %v5190_v28  ;;  %v5195_v5 = vrot.slane %v5190_v28, 4  ;;  %v10879_v24 = vpack.c.bf16 %v4944_v38, %v4944_v38  ;;  %5503 = vst [vmem:[#allocation4 + $0xc] sm:$0xf] %v5502_v49  ;;  %v4841_v19 = vadd.f32 %v11927_v7, %v13739_v61  ;;  %v5515_v7 = vld [vmem:[#allocation4 + $0x24] sm:$0xf] }
 0x242   : > { %v5211_v59 = vsel %vm14001_vm14, %v5203_v2, %v5210_v48  ;;  %v5513_v42 = vsel %vm13759_vm8, %v5212_v45, %v5512_v32  ;;  %v5231_v25 = vshrl.u32 %v10881_v9, 16  ;;  %v5234_v20 = vshll.u32 %v10881_v9, 16 }
 0x243   : > { %5511 = vst [vmem:[#allocation4 + $0x1c] sm:$0xf] %v5211_v59  ;;  %5514 = vst [vmem:[#allocation4 + $0x20] sm:$0x1] %v5513_v42  ;;  %v5194_v6 = vsel %vm14001_vm14, %v5186_v1, %v5193_v3  ;;  %v5506_v36 = vsel %vm13759_vm8, %v5195_v5, %v5505_v23  ;;  %v5214_v10 = vshrl.u32 %v10879_v24, 16  ;;  %v11930_v2 = vpop.f32.mrb[136].mxu0  ;;  %v4833_v8 = vadd.f32 %v4832_v63, %v13733_v22 }
 0x244   : > { %5504 = vst [vmem:[#allocation4 + $0x10] sm:$0xf] %v5194_v6  ;;  %5507 = vst [vmem:[#allocation4 + $0x14] sm:$0x1] %v5506_v36  ;;  %v14027_v43 = vrot.slane %v5231_v25, 7  ;;  %v4854_v51 = vadd.f32 %v11930_v2, %v13790_v29  ;;  %v4845_v40 = vpop.f32.mrb[137].mxu0  ;;  %v10569_v18 = vcombine.low %v13981_v12, %v14018_v21 }
 0x245   : > { %v14032_v1 = vrot.slane %v5214_v10, 7  ;;  %v5217_v32 = vshll.u32 %v10879_v24, 16  ;;  %v4846_v28 = vadd.f32 %v4845_v40, %v13755_v54  ;;  %v11931_v38 = vpop.f32.mrb[138].mxu0  ;;  %v4947_v22 = vmax.f32 %v4841_v19, 0.0  ;;  %v12188_v25 = vld [vmem:[%s15504_s2 + $0x180] sm:$0xff]  }
 0x246   : > { %v5236_v48 = vor.u32 %v5234_v20, %v14027_v43  ;;  %v5237_v61 = vrot.slane %v14027_v43, 4  ;;  %v4945_v63 = vmax.f32 %v4833_v8, 0.0  ;;  %v4848_v29 = vpop.f32.mrb[139].mxu0  ;;  %v4950_v9 = vmax.f32 %v4854_v51, 0.0  ;;  %v5526_v20 = vld [vmem:[#allocation4 + $0x38] sm:$0x1] }
 0x247   : > { %v5219_v45 = vor.u32 %v5217_v32, %v14032_v1  ;;  %v5220_v23 = vrot.slane %v14032_v1, 4  ;;  %v4948_v49 = vmax.f32 %v4846_v28, 0.0  ;;  %v10882_v3 = vpack.c.bf16 %v4947_v22, %v4947_v22  ;;  %v5519_v10 = vld [vmem:[#allocation4 + $0x2c] sm:$0x1] }
 0x248   : > { %v5523_v54 = vsel %vm13994_vm13, %v5236_v48, %v5522_v53  ;;  %v10880_v5 = vpack.c.bf16 %v4945_v63, %v4945_v63  ;;  %v4857_v12 = vadd.f32 %v11931_v38, %v13797_v16  ;;  %v10885_v57 = vpack.c.bf16 %v4950_v9, %v4950_v9 }
 0x249   : > { %5524 = vst [vmem:[#allocation4 + $0x30] sm:$0xf] %v5523_v54  ;;  %v5516_v24 = vsel %vm13994_vm13, %v5219_v45, %v5515_v7  ;;  %v10883_v59 = vpack.c.bf16 %v4948_v49, %v4948_v49  ;;  %v4849_v42 = vadd.f32 %v4848_v29, %v13765_v46  ;;  %v5239_v21 = vshrl.u32 %v10882_v3, 16  ;;  %v5536_v46 = vld [vmem:[#allocation4 + $0x48] sm:$0xf] }
 0x24a   : > { %5517 = vst [vmem:[#allocation4 + $0x24] sm:$0xf] %v5516_v24  ;;  %v5242_v62 = vshll.u32 %v10882_v3, 16  ;;  %v5222_v6 = vshrl.u32 %v10880_v5, 16  ;;  %v5225_v36 = vshll.u32 %v10880_v5, 16  ;;  %v5265_v16 = vshrl.u32 %v10885_v57, 16 }
 0x24b   : > { %v5268_v2 = vshll.u32 %v10885_v57, 16  ;;  %v5248_v43 = vshrl.u32 %v10883_v59, 16  ;;  %v5251_v19 = vshll.u32 %v10883_v59, 16  ;;  %v11934_v8 = vpop.f32.mrb[140].mxu0  ;;  %v12163_v51 = vld [vmem:[#allocation4 + $0xc] sm:$0xff]   ;;  %v5241_v40 = vrot.slane %v5239_v21, 7 }
 0x24c   : > { %v5224_v53 = vrot.slane %v5222_v6, 7  ;;  %v4951_v1 = vmax.f32 %v4857_v12, 0.0  ;;  %v4949_v32 = vmax.f32 %v4849_v42, 0.0  ;;  %v4861_v28 = vpop.f32.mrb[141].mxu0  ;;  %v14050_v38 = vrot.slane %v5265_v16, 7  ;;  %9399 = vmatprep.mubr.bf16.mxu0 %v12163_v51  ;;  %v12164_v29 = vld [vmem:[#allocation4 + $0x18] sm:$0xff]  }
 0x24d   : > { %v14052_v48 = vrot.slane %v5248_v43, 7  ;;  %v4870_v7 = vadd.f32 %v11934_v8, %v13819_v60  ;;  %v4862_v22 = vadd.f32 %v4861_v28, %v13811_v15  ;;  %v11935_v63 = vpop.f32.mrb[142].mxu0  ;;  %v5244_v45 = vor.u32 %v5242_v62, %v5241_v40  ;;  %v5529_v3 = vld [vmem:[#allocation4 + $0x3c] sm:$0xf]  ;;  %9400 = vmatmul.mubr.bf16.vlgmr.msra.gmra.mrb[160].mxu0 %v10569_v18  ;;  %v12195_v8 = vld [vmem:[%s15504_s2 + $0x1c8] sm:$0xff]  }
 0x24e   : > { %v5246_v9 = vrot.slane %v5241_v40, 4  ;;  %v5227_v49 = vor.u32 %v5225_v36, %v5224_v53  ;;  %v5229_v54 = vrot.slane %v5224_v53, 4  ;;  %v4864_v5 = vpop.f32.mrb[143].mxu0  ;;  %v5270_v12 = vor.u32 %v5268_v2, %v14050_v38  ;;  %9407 = vmatprep.mubr.bf16.mxu0 %v12164_v29  ;;  %11769 = vmatpush3.bf16.msra.mxu0 %v12188_v25  ;;  %v5540_v51 = vld [vmem:[#allocation4 + $0x50] sm:$0x1] }
 0x24f   : > { %v5271_v24 = vrot.slane %v14050_v38, 4  ;;  %v5253_v57 = vor.u32 %v5251_v19, %v14052_v48  ;;  %v5254_v60 = vrot.slane %v14052_v48, 4  ;;  %v5245_v15 = vsel %vm14001_vm14, %v5237_v61, %v5244_v45  ;;  %11770 = vmatprep.subr.bf16.mxu0 %v12195_v8 }
 0x250   : > { %v5527_v59 = vsel %vm13759_vm8, %v5246_v9, %v5526_v20  ;;  %v5228_v42 = vsel %vm14001_vm14, %v5220_v23, %v5227_v49  ;;  %v5520_v18 = vsel %vm13759_vm8, %v5229_v54, %v5519_v10  ;;  %5525 = vst [vmem:[#allocation4 + $0x34] sm:$0xf] %v5245_v15  ;;  %v5537_v21 = vsel %vm13994_vm13, %v5270_v12, %v5536_v46  ;;  %v5533_v12 = vld [vmem:[#allocation4 + $0x44] sm:$0x1] }
 0x251   : > { %5528 = vst [vmem:[#allocation4 + $0x38] sm:$0x1] %v5527_v59  ;;  %5518 = vst [vmem:[#allocation4 + $0x28] sm:$0xf] %v5228_v42  ;;  %v5530_v25 = vsel %vm13994_vm13, %v5253_v57, %v5529_v3  ;;  %v10886_v61 = vpack.c.bf16 %v4951_v1, %v4951_v1  ;;  %v10884_v62 = vpack.c.bf16 %v4949_v32, %v4949_v32  ;;  %v4954_v6 = vmax.f32 %v4870_v7, 0.0 }
 0x252   : > { %5521 = vst [vmem:[#allocation4 + $0x2c] sm:$0x1] %v5520_v18  ;;  %5538 = vst [vmem:[#allocation4 + $0x48] sm:$0xf] %v5537_v21  ;;  %v4952_v36 = vmax.f32 %v4862_v22, 0.0  ;;  %v4873_v23 = vadd.f32 %v11935_v63, %v13830_v47  ;;  %v4865_v20 = vadd.f32 %v4864_v5, %v13813_v34  ;;  %v12196_v47 = vld [vmem:[%s15504_s2 + $0x188] sm:$0xff]  }
 0x253   : > { %5531 = vst [vmem:[#allocation4 + $0x3c] sm:$0xf] %v5530_v25  ;;  %v5273_v10 = vshrl.u32 %v10886_v61, 16  ;;  %v5276_v16 = vshll.u32 %v10886_v61, 16  ;;  %v5256_v2 = vshrl.u32 %v10884_v62, 16  ;;  %v5259_v43 = vshll.u32 %v10884_v62, 16  ;;  %11771 = vmatpush3.bf16.msra.mxu0 %v12196_v47 }
 0x254   : > { %v11938_v19 = vpop.f32.mrb[144].mxu0  ;;  %v10889_v40 = vpack.c.bf16 %v4954_v6, %v4954_v6  ;;  %v10887_v53 = vpack.c.bf16 %v4952_v36, %v4952_v36  ;;  %v4955_v46 = vmax.f32 %v4873_v23, 0.0  ;;  %v4953_v1 = vmax.f32 %v4865_v20, 0.0  ;;  %v12199_v22 = vld [vmem:[%s15504_s2 + $0x168] sm:$0xff]   ;;  %v5550_v61 = vld [vmem:[#allocation4 + $0x60] sm:$0xf] }
 0x255   : > { %v4877_v32 = vpop.f32.mrb[145].mxu0  ;;  %v5275_v34 = vrot.slane %v5273_v10, 7  ;;  %v5258_v28 = vrot.slane %v5256_v2, 7  ;;  %v14081_v38 = vadd.f32 %v11938_v19, %v13884_v55  ;;  %v12200_v55 = vld [vmem:[%s15504_s2 + $0x128] sm:$0xff]   ;;  %11666 = vmatprep.subr.bf16.mxu1 %v12199_v22  ;;  %v5760_v20 = vld [vmem:[#allocation4 + $0xc] sm:$0xf] }
 0x256   : > { %v14084_v48 = vadd.f32 %v4877_v32, %v13871_v26  ;;  %v11939_v7 = vpop.f32.mrb[146].mxu0  ;;  %v5299_v63 = vshrl.u32 %v10889_v40, 16  ;;  %v5302_v29 = vshll.u32 %v10889_v40, 16  ;;  %v5282_v45 = vshrl.u32 %v10887_v53, 16  ;;  %11667 = vmatpush3.bf16.msra.mxu1 %v12200_v55  ;;  %v5543_v62 = vld [vmem:[#allocation4 + $0x54] sm:$0xf] }
 0x257   : > { %v5285_v9 = vshll.u32 %v10887_v53, 16  ;;  %v4880_v49 = vpop.f32.mrb[147].mxu0  ;;  %v5278_v54 = vor.u32 %v5276_v16, %v5275_v34  ;;  %v5280_v3 = vrot.slane %v5275_v34, 4  ;;  %v5261_v26 = vor.u32 %v5259_v43, %v5258_v28  ;;  %v12203_v53 = vld [vmem:[%s15504_s2 + $0x1d0] sm:$0xff]  }
 0x258   : > { %v5263_v5 = vrot.slane %v5258_v28, 4  ;;  %v5301_v57 = vrot.slane %v5299_v63, 7  ;;  %v5284_v15 = vrot.slane %v5282_v45, 7  ;;  %v10890_v59 = vpack.c.bf16 %v4955_v46, %v4955_v46  ;;  %v5547_v63 = vld [vmem:[#allocation4 + $0x5c] sm:$0x1]  ;;  %11772 = vmatprep.subr.bf16.mxu0 %v12203_v53 }
 0x259   : > { %v10888_v42 = vpack.c.bf16 %v4953_v1, %v4953_v1  ;;  %v5279_v18 = vsel %vm14001_vm14, %v5271_v24, %v5278_v54  ;;  %v5541_v21 = vsel %vm13759_vm8, %v5280_v3, %v5540_v51  ;;  %v5262_v25 = vsel %vm14001_vm14, %v5254_v60, %v5261_v26  ;;  %v5554_v1 = vld [vmem:[#allocation4 + $0x68] sm:$0x1] }
 0x25a   : > { %5539 = vst [vmem:[#allocation4 + $0x4c] sm:$0xf] %v5279_v18  ;;  %5542 = vst [vmem:[#allocation4 + $0x50] sm:$0x1] %v5541_v21  ;;  %v5534_v6 = vsel %vm13759_vm8, %v5263_v5, %v5533_v12  ;;  %v5304_v36 = vor.u32 %v5302_v29, %v5301_v57  ;;  %v5287_v23 = vor.u32 %v5285_v9, %v5284_v15  ;;  %v5305_v10 = vrot.slane %v5301_v57, 4 }
 0x25b   : > { %5532 = vst [vmem:[#allocation4 + $0x40] sm:$0xf] %v5262_v25  ;;  %5535 = vst [vmem:[#allocation4 + $0x44] sm:$0x1] %v5534_v6  ;;  %v5288_v24 = vrot.slane %v5284_v15, 4  ;;  %v5307_v16 = vshrl.u32 %v10890_v59, 16  ;;  %v4889_v34 = vadd.f32 %v11939_v7, %v13886_v14  ;;  %v4881_v29 = vadd.f32 %v4880_v49, %v13875_v52 }
 0x25c   : > { %v5310_v2 = vshll.u32 %v10890_v59, 16  ;;  %v14100_v43 = vpop.f32.mrb[148].mxu0  ;;  %v5551_v60 = vsel %vm13994_vm13, %v5304_v36, %v5550_v61  ;;  %v5544_v19 = vsel %vm13994_vm13, %v5287_v23, %v5543_v62  ;;  %v5290_v8 = vshrl.u32 %v10888_v42, 16  ;;  %v5761_v59 = vld [vmem:[#allocation4 + $0x10] sm:$0xf] }
 0x25d   : > { %v5293_v51 = vshll.u32 %v10888_v42, 16  ;;  %v14106_v40 = vpop.f32.mrb[149].mxu0  ;;  %5552 = vst [vmem:[#allocation4 + $0x60] sm:$0xf] %v5551_v60  ;;  %5545 = vst [vmem:[#allocation4 + $0x54] sm:$0xf] %v5544_v19 }
 0x25e   : > { %v5309_v46 = vrot.slane %v5307_v16, 7  ;;  %v4958_v32 = vmax.f32 %v14081_v38, 0.0  ;;  %v4956_v47 = vmax.f32 %v14084_v48, 0.0  ;;  %v14114_v28 = vpop.f32.mrb[150].mxu0  ;;  %v5292_v22 = vrot.slane %v5290_v8, 7  ;;  %v12204_v38 = vld [vmem:[%s15504_s2 + $0x190] sm:$0xff]  }
 0x25f   : > { %v5830_v45 = vshrl.u32 %v5760_v20, 16  ;;  %v5833_v9 = vshll.u32 %v5760_v20, 16  ;;  %v14117_v55 = vpop.f32.mrb[151].mxu0  ;;  %v4959_v7 = vmax.f32 %v4889_v34, 0.0  ;;  %v4957_v12 = vmax.f32 %v4881_v29, 0.0  ;;  %11773 = vmatpush3.bf16.msra.mxu0 %v12204_v38 }
 0x260   : > { %v5312_v54 = vor.u32 %v5310_v2, %v5309_v46  ;;  %v5314_v3 = vrot.slane %v5309_v46, 4  ;;  %v10893_v26 = vpack.c.bf16 %v4958_v32, %v4958_v32  ;;  %v10891_v5 = vpack.c.bf16 %v4956_v47, %v4956_v47  ;;  %v5564_v21 = vld [vmem:[#allocation4 + $0x78] sm:$0xf]  ;;  %v5557_v6 = vld [vmem:[#allocation4 + $0x6c] sm:$0xf] }
 0x261   : > { %v5295_v14 = vor.u32 %v5293_v51, %v5292_v22  ;;  %v5297_v48 = vrot.slane %v5292_v22, 4  ;;  %v10894_v36 = vpack.c.bf16 %v4959_v7, %v4959_v7  ;;  %v10892_v23 = vpack.c.bf16 %v4957_v12, %v4957_v12  ;;  %v5762_v32 = vld [vmem:[#allocation4 + $0x14] sm:$0x1] }
 0x262   : > { %v5313_v52 = vsel %vm14001_vm14, %v5305_v10, %v5312_v54  ;;  %v5555_v49 = vsel %vm13759_vm8, %v5314_v3, %v5554_v1  ;;  %v5333_v57 = vshrl.u32 %v10893_v26, 16  ;;  %v5336_v15 = vshll.u32 %v10893_v26, 16  ;;  %v6273_v54 = vld [vmem:[#allocation4 + $0x10] sm:$0xf]  ;;  %v6286_v33 = vld [vmem:[#allocation4 + $0x44] sm:$0x1] }
 0x263   : > { %5553 = vst [vmem:[#allocation4 + $0x64] sm:$0xf] %v5313_v52  ;;  %5556 = vst [vmem:[#allocation4 + $0x68] sm:$0x1] %v5555_v49  ;;  %v5296_v42 = vsel %vm14001_vm14, %v5288_v24, %v5295_v14  ;;  %v5548_v18 = vsel %vm13759_vm8, %v5297_v48, %v5547_v63  ;;  %v5316_v25 = vshrl.u32 %v10891_v5, 16  ;;  %v5319_v61 = vshll.u32 %v10891_v5, 16 }
 0x264   : > { %5546 = vst [vmem:[#allocation4 + $0x58] sm:$0xf] %v5296_v42  ;;  %5549 = vst [vmem:[#allocation4 + $0x5c] sm:$0x1] %v5548_v18  ;;  %v5335_v62 = vrot.slane %v5333_v57, 7  ;;  %v5832_v20 = vrot.slane %v5830_v45, 4 }
 0x265   : > { %v14130_v10 = vpop.f32.mrb[152].mxu0  ;;  %v5318_v16 = vrot.slane %v5316_v25, 7  ;;  %v5835_v2 = vrot.slane %v5833_v9, 5  ;;  %v5839_v60 = vshll.u32 %v5761_v59, 16  ;;  %v5843_v19 = vshrl.u32 %v5761_v59, 16  ;;  %v12207_v57 = vld [vmem:[%s15504_s2 + $0x170] sm:$0xff]  }
 0x266   : > { %v6272_v24 = vld [vmem:[#allocation4 + $0xc] sm:$0xe]  ;;  %v14132_v8 = vpop.f32.mrb[153].mxu0  ;;  %v5338_v51 = vor.u32 %v5336_v15, %v5335_v62  ;;  %v5339_v53 = vrot.slane %v5335_v62, 4  ;;  %v5341_v46 = vshrl.u32 %v10894_v36, 16  ;;  %v5344_v1 = vshll.u32 %v10894_v36, 16  ;;  %11668 = vmatprep.subr.bf16.mxu1 %v12207_v57 }
 0x267   : > { %v14134_v47 = vpop.f32.mrb[154].mxu0  ;;  %v5321_v34 = vor.u32 %v5319_v61, %v5318_v16  ;;  %v5322_v22 = vrot.slane %v5318_v16, 4  ;;  %v5568_v63 = vld [vmem:[#allocation4 + $0x80] sm:$0x1]  ;;  %v5324_v29 = vshrl.u32 %v10892_v23, 16  ;;  %v5327_v45 = vshll.u32 %v10892_v23, 16 }
 0x268   : > { %v14136_v3 = vpop.f32.mrb[155].mxu0  ;;  %v5565_v9 = vsel %vm13994_vm13, %v5338_v51, %v5564_v21  ;;  %v5343_v26 = vrot.slane %v5341_v46, 7  ;;  %v5561_v5 = vld [vmem:[#allocation4 + $0x74] sm:$0x1]  ;;  %v5836_v38 = vor.u32 %v5835_v2, %v5832_v20  ;;  %v5841_v14 = vrot.slane %v5839_v60, 5  ;;  %v12167_v57 = vld [vmem:[#allocation4 + $0xc] sm:$0xff]  }
 0x269   : > { %v6274_v48 = vld [vmem:[#allocation4 + $0x14] sm:$0x1]  ;;  %5566 = vst [vmem:[#allocation4 + $0x78] sm:$0xf] %v5565_v9  ;;  %v5558_v7 = vsel %vm13994_vm13, %v5321_v34, %v5557_v6  ;;  %v5326_v12 = vrot.slane %v5324_v29, 7  ;;  %v5845_v52 = vrot.slane %v5843_v19, 4 }
 0x26a   : > { %v5849_v49 = vshll.u32 %v5762_v32, 16  ;;  %5559 = vst [vmem:[#allocation4 + $0x6c] sm:$0xf] %v5558_v7  ;;  %v5346_v15 = vor.u32 %v5344_v1, %v5343_v26  ;;  %v5348_v59 = vrot.slane %v5343_v26, 4  ;;  %v5837_v42 = vrot.slane %v5836_v38, 4 }
 0x26b   : > { %v10554_v18 = vrot.slane %v6272_v24, 9  ;;  %v5329_v21 = vor.u32 %v5327_v45, %v5326_v12  ;;  %v5331_v25 = vrot.slane %v5326_v12, 4  ;;  %v5846_v61 = vor.u32 %v5845_v52, %v5841_v14  ;;  %v5763_v36 = vld [vmem:[#allocation4 + $0x18] sm:$0xf]  ;;  %v5764_v2 = vld [vmem:[#allocation4 + $0x1c] sm:$0xf] }
 0x26c   : > { %v5851_v62 = vrot.slane %v5849_v49, 5  ;;  %v5347_v6 = vsel %vm14001_vm14, %v5339_v53, %v5346_v15  ;;  %v5569_v23 = vsel %vm13759_vm8, %v5348_v59, %v5568_v63  ;;  %v5842_v20 = vsel %vm12429_vm5, %v5837_v42, %v5841_v14  ;;  %v5765_v60 = vld [vmem:[#allocation4 + $0x20] sm:$0x1]  ;;  %v14151_v19 = vpop.f32.mrb[156].mxu0  ;;  %v6275_v45 = vld [vmem:[#allocation4 + $0x18] sm:$0xe] }
 0x26d   : > { %v6374_v16 = vrot.slane %v6273_v54, 5  ;;  %5567 = vst [vmem:[#allocation4 + $0x7c] sm:$0xf] %v5347_v6  ;;  %5570 = vst [vmem:[#allocation4 + $0x80] sm:$0x1] %v5569_v23  ;;  %v5330_v24 = vsel %vm14001_vm14, %v5322_v22, %v5329_v21  ;;  %v5562_v51 = vsel %vm13759_vm8, %v5331_v25, %v5561_v5  ;;  %v5847_v53 = vrot.slane %v5846_v61, 4 }
 0x26e   : > { %v6377_v46 = vrot.slane %v6274_v48, 5  ;;  %v14157_v1 = vpop.f32.mrb[157].mxu0  ;;  %5560 = vst [vmem:[#allocation4 + $0x70] sm:$0xf] %v5330_v24  ;;  %5563 = vst [vmem:[#allocation4 + $0x74] sm:$0x1] %v5562_v51  ;;  %v4902_v25 = vadd.f32 %v14100_v43, %v13918_v37  ;;  %v4894_v61 = vadd.f32 %v14106_v40, %v13901_v30  ;;  %v4897_v6 = vadd.f32 %v14117_v55, %v13903_v41 }
 0x26f   : > { %v6375_v32 = vsel %vm12423_vm4, %v10554_v18, %v6374_v16  ;;  %v6376_v34 = vrot.slane %v6374_v16, 4  ;;  %v5854_v63 = vshrl.u32 %v5763_v36, 16  ;;  %v5857_v29 = vshll.u32 %v5763_v36, 16  ;;  %v14161_v54 = vpop.f32.mrb[158].mxu0  ;;  %v6276_v38 = vld [vmem:[#allocation4 + $0x1c] sm:$0xf] }
 0x270   : > { %v5852_v22 = vsel %vm12429_vm5, %v5847_v53, %v5851_v62  ;;  %v5863_v9 = vshll.u32 %v5764_v2, 16  ;;  %v5867_v26 = vshrl.u32 %v5764_v2, 16  ;;  %v5873_v5 = vshll.u32 %v5765_v60, 16  ;;  %v14165_v14 = vpop.f32.mrb[159].mxu0  ;;  %v12168_v18 = vld [vmem:[#allocation4 + $0x24] sm:$0xff]  }
 0x271   : > { %v10538_v48 = vcombine.low %v5842_v20, %v5852_v22  ;;  %v6378_v7 = vsel %vm12423_vm4, %v6376_v34, %v6377_v46  ;;  %v5856_v12 = vrot.slane %v5854_v63, 4  ;;  %v5859_v52 = vrot.slane %v5857_v29, 5  ;;  %v6277_v23 = vld [vmem:[#allocation4 + $0x20] sm:$0x1]  ;;  %v14177_v43 = vld [vmem:[#allocation4 + $0x24] sm:$0xf] }
 0x272   : > { %v10570_v49 = vcombine.low %v6375_v32, %v6378_v7  ;;  %v5865_v15 = vrot.slane %v5863_v9, 5  ;;  %v5869_v59 = vrot.slane %v5867_v26, 4  ;;  %v5875_v42 = vrot.slane %v5873_v5, 5  ;;  %v5578_v26 = vld [vmem:[#allocation4 + $0x90] sm:$0xf] }
 0x273   : > { %9246 = vmatprep.mubr.bf16.mxu1 %v10538_v48  ;;  %v5860_v21 = vor.u32 %v5859_v52, %v5856_v12  ;;  %v4905_v62 = vadd.f32 %v14114_v28, %v13920_v35  ;;  %v10555_v20 = vrot.slane %v6275_v45, 9  ;;  %v6381_v16 = vrot.slane %v6276_v38, 5  ;;  %v5571_v38 = vld [vmem:[#allocation4 + $0x84] sm:$0xf]  ;;  %v12169_v52 = vld [vmem:[#allocation4 + $0x18] sm:$0xff]  }
 0x274   : > { %9408 = vmatmul.mubr.bf16.gmra.mrb[164].mxu0 %v10570_v49  ;;  %9247 = vmatmul.mubr.bf16.gmra.mrb[132].mxu1 %v12167_v57  ;;  %v5870_v36 = vor.u32 %v5869_v59, %v5865_v15  ;;  %v4962_v60 = vmax.f32 %v4902_v25, 0.0  ;;  %v4960_v24 = vmax.f32 %v4894_v61, 0.0  ;;  %v4961_v40 = vmax.f32 %v4897_v6, 0.0 }
 0x275   : > { %9415 = vmatprep.mubr.bf16.mxu0 %v12168_v18  ;;  %v5861_v2 = vrot.slane %v5860_v21, 4  ;;  %v4963_v37 = vmax.f32 %v4905_v62, 0.0  ;;  %v6382_v35 = vsel %vm12423_vm4, %v10555_v20, %v6381_v16  ;;  %v6383_v28 = vrot.slane %v6381_v16, 4  ;;  %v12170_v62 = vld [vmem:[#allocation4 + $0x30] sm:$0xff]  }
 0x276   : > { %v5871_v30 = vrot.slane %v5870_v36, 4  ;;  %v10897_v41 = vpack.c.bf16 %v4962_v60, %v4962_v60  ;;  %v10895_v55 = vpack.c.bf16 %v4960_v24, %v4960_v24  ;;  %v10896_v32 = vpack.c.bf16 %v4961_v40, %v4961_v40  ;;  %v5767_v36 = vld [vmem:[#allocation4 + $0x28] sm:$0xf]  ;;  %v5768_v60 = vld [vmem:[#allocation4 + $0x2c] sm:$0x1] }
 0x277   : > { %v5866_v51 = vsel %vm12429_vm5, %v5861_v2, %v5865_v15  ;;  %v10898_v53 = vpack.c.bf16 %v4963_v37, %v4963_v37  ;;  %v6384_v34 = vrot.slane %v6277_v23, 5  ;;  %v5878_v63 = vshrl.u32 %v14177_v43, 16  ;;  %v5582_v15 = vld [vmem:[#allocation4 + $0x98] sm:$0x1] }
 0x278   : > { %v5876_v46 = vsel %vm12429_vm5, %v5871_v30, %v5875_v42  ;;  %v5367_v45 = vshrl.u32 %v10897_v41, 16  ;;  %v5370_v22 = vshll.u32 %v10897_v41, 16  ;;  %v5350_v9 = vshrl.u32 %v10895_v55, 16  ;;  %v5575_v42 = vld [vmem:[#allocation4 + $0x8c] sm:$0x1] }
 0x279   : > { %v10539_v29 = vcombine.low %v5866_v51, %v5876_v46  ;;  %v5353_v5 = vshll.u32 %v10895_v55, 16  ;;  %v5375_v48 = vshrl.u32 %v10898_v53, 16  ;;  %v5378_v7 = vshll.u32 %v10898_v53, 16 }
 0x27a   : > { %v5358_v12 = vshrl.u32 %v10896_v32, 16  ;;  %v5369_v49 = vrot.slane %v5367_v45, 7  ;;  %v5352_v57 = vrot.slane %v5350_v9, 7  ;;  %v5361_v59 = vshll.u32 %v10896_v32, 16 }
 0x27b   : > { %9254 = vmatprep.mubr.bf16.mxu1 %v10539_v29  ;;  %v6385_v18 = vsel %vm12423_vm4, %v6383_v28, %v6384_v34  ;;  %v5377_v21 = vrot.slane %v5375_v48, 7  ;;  %v5880_v6 = vrot.slane %v5878_v63, 4  ;;  %v5881_v51 = vshll.u32 %v14177_v43, 16  ;;  %v6278_v34 = vld [vmem:[#allocation4 + $0x24] sm:$0xe] }
 0x27c   : > { %v5360_v25 = vrot.slane %v5358_v12, 7  ;;  %v10571_v61 = vcombine.low %v6382_v35, %v6385_v18  ;;  %9255 = vmatmul.mubr.bf16.gmra.mrb[136].mxu1 %v12169_v52  ;;  %v5372_v23 = vor.u32 %v5370_v22, %v5369_v49  ;;  %v5373_v20 = vrot.slane %v5369_v49, 4  ;;  %v6279_v22 = vld [vmem:[#allocation4 + $0x28] sm:$0xf]  ;;  %v6280_v48 = vld [vmem:[#allocation4 + $0x2c] sm:$0x1] }
 0x27d   : > { %v5355_v16 = vor.u32 %v5353_v5, %v5352_v57  ;;  %v5356_v2 = vrot.slane %v5352_v57, 4  ;;  %v5380_v24 = vor.u32 %v5378_v7, %v5377_v21  ;;  %v5382_v37 = vrot.slane %v5377_v21, 4 }
 0x27e   : > { %v5363_v30 = vor.u32 %v5361_v59, %v5360_v25  ;;  %v5365_v40 = vrot.slane %v5360_v25, 4  ;;  %9416 = vmatmul.mubr.bf16.gmra.mrb[168].mxu0 %v10571_v61  ;;  %v5579_v28 = vsel %vm13994_vm13, %v5372_v23, %v5578_v26  ;;  %v5887_v41 = vshll.u32 %v5767_v36, 16 }
 0x27f   : > { %v5572_v35 = vsel %vm13994_vm13, %v5355_v16, %v5571_v38  ;;  %9423 = vmatprep.mubr.bf16.mxu0 %v12170_v62  ;;  %5580 = vst [vmem:[#allocation4 + $0x90] sm:$0xf] %v5579_v28  ;;  %v5381_v55 = vsel %vm14001_vm14, %v5373_v20, %v5380_v24  ;;  %v5583_v53 = vsel %vm13759_vm8, %v5382_v37, %v5582_v15  ;;  %v5883_v43 = vrot.slane %v5881_v51, 5  ;;  %v5585_v24 = vld [vmem:[#allocation4 + $0x9c] sm:$0xf] }
 0x280   : > { %5573 = vst [vmem:[#allocation4 + $0x84] sm:$0xf] %v5572_v35  ;;  %v5364_v46 = vsel %vm14001_vm14, %v5356_v2, %v5363_v30  ;;  %v5576_v32 = vsel %vm13759_vm8, %v5365_v40, %v5575_v42  ;;  %5581 = vst [vmem:[#allocation4 + $0x94] sm:$0xf] %v5381_v55  ;;  %v5889_v63 = vrot.slane %v5887_v41, 5  ;;  %v5891_v29 = vshrl.u32 %v5767_v36, 16 }
 0x281   : > { %5584 = vst [vmem:[#allocation4 + $0x98] sm:$0x1] %v5583_v53  ;;  %5574 = vst [vmem:[#allocation4 + $0x88] sm:$0xf] %v5364_v46  ;;  %v5897_v45 = vshll.u32 %v5768_v60, 16  ;;  %v4918_v9 = vadd.f32 %v14130_v10, %v13943_v50  ;;  %v4910_v26 = vadd.f32 %v14132_v8, %v13933_v39  ;;  %v4921_v5 = vadd.f32 %v14134_v47, %v13945_v44  ;;  %v12208_v39 = vld [vmem:[%s15504_s2 + $0x130] sm:$0xff]  }
 0x282   : > { %5577 = vst [vmem:[#allocation4 + $0x8c] sm:$0x1] %v5576_v32  ;;  %v4913_v38 = vadd.f32 %v14136_v3, %v13937_v13  ;;  %v5884_v7 = vor.u32 %v5883_v43, %v5880_v6  ;;  %v5893_v12 = vrot.slane %v5891_v29, 4  ;;  %v10556_v49 = vrot.slane %v6278_v34, 9  ;;  %v5769_v36 = vld [vmem:[#allocation4 + $0x30] sm:$0xf]  ;;  %11669 = vmatpush3.bf16.msra.mxu1 %v12208_v39 }
 0x283   : > { %v5899_v52 = vrot.slane %v5897_v45, 5  ;;  %v4966_v57 = vmax.f32 %v4918_v9, 0.0  ;;  %v4964_v15 = vmax.f32 %v4910_v26, 0.0  ;;  %v4967_v59 = vmax.f32 %v4921_v5, 0.0  ;;  %v5592_v60 = vld [vmem:[#allocation4 + $0xa8] sm:$0xf] }
 0x284   : > { %v4965_v42 = vmax.f32 %v4913_v38, 0.0  ;;  %v5885_v18 = vrot.slane %v5884_v7, 4  ;;  %v5894_v50 = vor.u32 %v5893_v12, %v5889_v63  ;;  %v6388_v10 = vrot.slane %v6279_v22, 5  ;;  %v12173_v32 = vld [vmem:[#allocation4 + $0x24] sm:$0xff]   ;;  %v5596_v22 = vld [vmem:[#allocation4 + $0xb0] sm:$0x1] }
 0x285   : > { %v6391_v21 = vrot.slane %v6280_v48, 5  ;;  %v10901_v44 = vpack.c.bf16 %v4966_v57, %v4966_v57  ;;  %v10899_v8 = vpack.c.bf16 %v4964_v15, %v4964_v15  ;;  %v10902_v13 = vpack.c.bf16 %v4967_v59, %v4967_v59  ;;  %v5589_v9 = vld [vmem:[#allocation4 + $0xa4] sm:$0x1]  ;;  %v5770_v7 = vld [vmem:[#allocation4 + $0x34] sm:$0xf]  ;;  %v12174_v15 = vld [vmem:[#allocation4 + $0x3c] sm:$0xff]  }
 0x286   : > { %v10900_v47 = vpack.c.bf16 %v4965_v42, %v4965_v42  ;;  %v5890_v3 = vsel %vm12429_vm5, %v5885_v18, %v5889_v63  ;;  %v5895_v25 = vrot.slane %v5894_v50, 4  ;;  %v6389_v61 = vsel %vm12423_vm4, %v10556_v49, %v6388_v10  ;;  %v5771_v12 = vld [vmem:[#allocation4 + $0x38] sm:$0x1] }
 0x287   : > { %v6390_v62 = vrot.slane %v6388_v10, 4  ;;  %v5401_v6 = vshrl.u32 %v10901_v44, 16  ;;  %v5404_v23 = vshll.u32 %v10901_v44, 16  ;;  %v5384_v20 = vshrl.u32 %v10899_v8, 16 }
 0x288   : > { %v5387_v16 = vshll.u32 %v10899_v8, 16  ;;  %v5900_v2 = vsel %vm12429_vm5, %v5895_v25, %v5899_v52  ;;  %v5409_v37 = vshrl.u32 %v10902_v13, 16  ;;  %v5412_v30 = vshll.u32 %v10902_v13, 16 }
 0x289   : > { %v5392_v40 = vshrl.u32 %v10900_v47, 16  ;;  %v10540_v28 = vcombine.low %v5890_v3, %v5900_v2  ;;  %v5403_v35 = vrot.slane %v5401_v6, 7  ;;  %v5386_v51 = vrot.slane %v5384_v20, 7 }
 0x28a   : > { %v5395_v41 = vshll.u32 %v10900_v47, 16  ;;  %v5411_v55 = vrot.slane %v5409_v37, 7  ;;  %v6392_v46 = vsel %vm12423_vm4, %v6390_v62, %v6391_v21  ;;  %v5902_v34 = vshrl.u32 %v5769_v36, 16  ;;  %v6282_v62 = vld [vmem:[#allocation4 + $0x34] sm:$0xf] }
 0x28b   : > { %v5394_v53 = vrot.slane %v5392_v40, 7  ;;  %9262 = vmatprep.mubr.bf16.mxu1 %v10540_v28  ;;  %v5406_v43 = vor.u32 %v5404_v23, %v5403_v35  ;;  %v5407_v63 = vrot.slane %v5403_v35, 4  ;;  %v5389_v29 = vor.u32 %v5387_v16, %v5386_v51  ;;  %v6283_v40 = vld [vmem:[#allocation4 + $0x38] sm:$0x1] }
 0x28c   : > { %v5390_v45 = vrot.slane %v5386_v51, 4  ;;  %v5414_v26 = vor.u32 %v5412_v30, %v5411_v55  ;;  %v5416_v5 = vrot.slane %v5411_v55, 4  ;;  %9263 = vmatmul.mubr.bf16.gmra.mrb[140].mxu1 %v12173_v32  ;;  %v10572_v57 = vcombine.low %v6389_v61, %v6392_v46  ;;  %v6281_v61 = vld [vmem:[#allocation4 + $0x30] sm:$0xe] }
 0x28d   : > { %v5397_v38 = vor.u32 %v5395_v41, %v5394_v53  ;;  %v5399_v48 = vrot.slane %v5394_v53, 4  ;;  %v5593_v52 = vsel %vm13994_vm13, %v5406_v43, %v5592_v60  ;;  %v5586_v49 = vsel %vm13994_vm13, %v5389_v29, %v5585_v24  ;;  %v12211_v41 = vld [vmem:[%s15504_s2 + $0x1d8] sm:$0xff]   ;;  %v5599_v29 = vld [vmem:[#allocation4 + $0xb4] sm:$0xf] }
 0x28e   : > { %v5904_v59 = vrot.slane %v5902_v34, 4  ;;  %5594 = vst [vmem:[#allocation4 + $0xa8] sm:$0xf] %v5593_v52  ;;  %5587 = vst [vmem:[#allocation4 + $0x9c] sm:$0xf] %v5586_v49  ;;  %v5415_v42 = vsel %vm14001_vm14, %v5407_v63, %v5414_v26  ;;  %v5597_v18 = vsel %vm13759_vm8, %v5416_v5, %v5596_v22  ;;  %9424 = vmatmul.mubr.bf16.gmra.mrb[172].mxu0 %v10572_v57  ;;  %v5905_v21 = vshll.u32 %v5769_v36, 16 }
 0x28f   : > { %v5398_v50 = vsel %vm14001_vm14, %v5390_v45, %v5397_v38  ;;  %v5590_v10 = vsel %vm13759_vm8, %v5399_v48, %v5589_v9  ;;  %5595 = vst [vmem:[#allocation4 + $0xac] sm:$0xf] %v5415_v42  ;;  %5598 = vst [vmem:[#allocation4 + $0xb0] sm:$0x1] %v5597_v18  ;;  %v5911_v39 = vshll.u32 %v5770_v7, 16  ;;  %v5915_v44 = vshrl.u32 %v5770_v7, 16  ;;  %9431 = vmatprep.mubr.bf16.mxu0 %v12174_v15 }
 0x290   : > { %5588 = vst [vmem:[#allocation4 + $0xa0] sm:$0xf] %v5398_v50  ;;  %5591 = vst [vmem:[#allocation4 + $0xa4] sm:$0x1] %v5590_v10  ;;  %v5921_v8 = vshll.u32 %v5771_v12, 16  ;;  %v4934_v13 = vadd.f32 %v14151_v19, %v13984_v11  ;;  %v4926_v47 = vadd.f32 %v14157_v1, %v13961_v31  ;;  %v4937_v3 = vadd.f32 %v14161_v54, %v13989_v27  ;;  %v12175_v7 = vld [vmem:[#allocation4 + $0x30] sm:$0xff]  }
 0x291   : > { %v4929_v25 = vadd.f32 %v14165_v14, %v13963_v0  ;;  %v5907_v6 = vrot.slane %v5905_v21, 5  ;;  %v5913_v36 = vrot.slane %v5911_v39, 5  ;;  %v5917_v23 = vrot.slane %v5915_v44, 4  ;;  %v14240_v0 = vld [vmem:[#allocation4 + $0x3c] sm:$0xf]  ;;  %11774 = vmatprep.subr.bf16.mxu0 %v12211_v41 }
 0x292   : > { %v5923_v20 = vrot.slane %v5921_v8, 5  ;;  %v4970_v16 = vmax.f32 %v4934_v13, 0.0  ;;  %v4968_v2 = vmax.f32 %v4926_v47, 0.0  ;;  %v4971_v60 = vmax.f32 %v4937_v3, 0.0  ;;  %v5606_v63 = vld [vmem:[#allocation4 + $0xc0] sm:$0xf] }
 0x293   : > { %v4969_v24 = vmax.f32 %v4929_v25, 0.0  ;;  %v5908_v11 = vor.u32 %v5907_v6, %v5904_v59  ;;  %v5918_v19 = vor.u32 %v5917_v23, %v5913_v36  ;;  %v10557_v37 = vrot.slane %v6281_v61, 9  ;;  %v5610_v38 = vld [vmem:[#allocation4 + $0xc8] sm:$0x1]  ;;  %v5773_v57 = vld [vmem:[#allocation4 + $0x40] sm:$0xf] }
 0x294   : > { %v6395_v31 = vrot.slane %v6282_v62, 5  ;;  %v10905_v1 = vpack.c.bf16 %v4970_v16, %v4970_v16  ;;  %v10903_v30 = vpack.c.bf16 %v4968_v2, %v4968_v2  ;;  %v10906_v27 = vpack.c.bf16 %v4971_v60, %v4971_v60  ;;  %v5774_v15 = vld [vmem:[#allocation4 + $0x44] sm:$0x1]  ;;  %v5603_v21 = vld [vmem:[#allocation4 + $0xbc] sm:$0x1]  ;;  %v12176_v60 = vld [vmem:[#allocation4 + $0x48] sm:$0xff]  }
 0x295   : > { %v10904_v54 = vpack.c.bf16 %v4969_v24, %v4969_v24  ;;  %v5909_v14 = vrot.slane %v5908_v11, 4  ;;  %v5919_v28 = vrot.slane %v5918_v19, 4  ;;  %v6398_v49 = vrot.slane %v6283_v40, 5  ;;  %v6284_v39 = vld [vmem:[#allocation4 + $0x3c] sm:$0xe]  ;;  %v12213_v24 = vld [vmem:[%s15504_s2 + $0x1e0] sm:$0xff]  }
 0x296   : > { %v6396_v35 = vsel %vm12423_vm4, %v10557_v37, %v6395_v31  ;;  %v6397_v51 = vrot.slane %v6395_v31, 4  ;;  %v5435_v55 = vshrl.u32 %v10905_v1, 16  ;;  %v5438_v53 = vshll.u32 %v10905_v1, 16  ;;  %v6285_v6 = vld [vmem:[#allocation4 + $0x40] sm:$0xf] }
 0x297   : > { %v5418_v46 = vshrl.u32 %v10903_v30, 16  ;;  %v5421_v32 = vshll.u32 %v10903_v30, 16  ;;  %v5914_v34 = vsel %vm12429_vm5, %v5909_v14, %v5913_v36  ;;  %v5924_v43 = vsel %vm12429_vm5, %v5919_v28, %v5923_v20  ;;  %v12212_v36 = vld [vmem:[%s15504_s2 + $0x198] sm:$0xff]   ;;  %v5775_v1 = vld [vmem:[#allocation4 + $0x48] sm:$0xf] }
 0x298   : > { %v5443_v45 = vshrl.u32 %v10906_v27, 16  ;;  %v5446_v22 = vshll.u32 %v10906_v27, 16  ;;  %v10541_v9 = vcombine.low %v5914_v34, %v5924_v43  ;;  %v5437_v26 = vrot.slane %v5435_v55, 7  ;;  %v5776_v14 = vld [vmem:[#allocation4 + $0x4c] sm:$0xf]  ;;  %11775 = vmatpush3.bf16.msra.mxu0 %v12212_v36  ;;  %v12218_v36 = vld [vmem:[%s15504_s2 + $0x138] sm:$0xff]  }
 0x299   : > { %v5420_v5 = vrot.slane %v5418_v46, 7  ;;  %v5426_v48 = vshrl.u32 %v10904_v54, 16  ;;  %v5429_v52 = vshll.u32 %v10904_v54, 16  ;;  %v5926_v59 = vshrl.u32 %v14240_v0, 16  ;;  %v5777_v28 = vld [vmem:[#allocation4 + $0x50] sm:$0x1]  ;;  %11776 = vmatprep.subr.bf16.mxu0 %v12213_v24 }
 0x29a   : > { %v5445_v12 = vrot.slane %v5443_v45, 7  ;;  %9270 = vmatprep.mubr.bf16.mxu1 %v10541_v9  ;;  %v5440_v42 = vor.u32 %v5438_v53, %v5437_v26  ;;  %v5441_v18 = vrot.slane %v5437_v26, 4  ;;  %v6399_v47 = vsel %vm12423_vm4, %v6397_v51, %v6398_v49  ;;  %v6287_v55 = vld [vmem:[#allocation4 + $0x48] sm:$0xe]  ;;  %v6289_v45 = vld [vmem:[#allocation4 + $0x50] sm:$0x1] }
 0x29b   : > { %v5423_v50 = vor.u32 %v5421_v32, %v5420_v5  ;;  %v5424_v10 = vrot.slane %v5420_v5, 4  ;;  %v5428_v13 = vrot.slane %v5426_v48, 7  ;;  %9271 = vmatmul.mubr.bf16.gmra.mrb[144].mxu1 %v12175_v7  ;;  %v10573_v61 = vcombine.low %v6396_v35, %v6399_v47  ;;  %v12216_v48 = vld [vmem:[%s15504_s2 + $0x178] sm:$0xff]  }
 0x29c   : > { %v5448_v44 = vor.u32 %v5446_v22, %v5445_v12  ;;  %v5450_v8 = vrot.slane %v5445_v12, 4  ;;  %v5607_v3 = vsel %vm13994_vm13, %v5440_v42, %v5606_v63  ;;  %v5928_v62 = vrot.slane %v5926_v59, 4  ;;  %11670 = vmatprep.subr.bf16.mxu1 %v12216_v48  ;;  %v5781_v24 = vld [vmem:[#allocation4 + $0x60] sm:$0xf] }
 0x29d   : > { %v5600_v25 = vsel %vm13994_vm13, %v5423_v50, %v5599_v29  ;;  %5608 = vst [vmem:[#allocation4 + $0xc0] sm:$0xf] %v5607_v3  ;;  %v5431_v16 = vor.u32 %v5429_v52, %v5428_v13  ;;  %v5433_v2 = vrot.slane %v5428_v13, 4  ;;  %9432 = vmatmul.mubr.bf16.gmra.mrb[176].mxu0 %v10573_v61  ;;  %v5929_v11 = vshll.u32 %v14240_v0, 16  ;;  %v6288_v29 = vld [vmem:[#allocation4 + $0x4c] sm:$0xf]  ;;  %11671 = vmatpush3.bf16.msra.mxu1 %v12218_v36 }
 0x29e   : > { %5601 = vst [vmem:[#allocation4 + $0xb4] sm:$0xf] %v5600_v25  ;;  %v5449_v23 = vsel %vm14001_vm14, %v5441_v18, %v5448_v44  ;;  %v5611_v20 = vsel %vm13759_vm8, %v5450_v8, %v5610_v38  ;;  %v5935_v19 = vshll.u32 %v5773_v57, 16  ;;  %v5939_v37 = vshrl.u32 %v5773_v57, 16  ;;  %9439 = vmatprep.mubr.bf16.mxu0 %v12176_v60  ;;  %v5778_v38 = vld [vmem:[#allocation4 + $0x54] sm:$0xf] }
 0x29f   : > { %5609 = vst [vmem:[#allocation4 + $0xc4] sm:$0xf] %v5449_v23  ;;  %5612 = vst [vmem:[#allocation4 + $0xc8] sm:$0x1] %v5611_v20  ;;  %v5945_v31 = vshll.u32 %v5774_v15, 16  ;;  %v5432_v30 = vsel %vm14001_vm14, %v5424_v10, %v5431_v16  ;;  %v5604_v27 = vsel %vm13759_vm8, %v5433_v2, %v5603_v21  ;;  %v10558_v54 = vrot.slane %v6284_v39, 9 }
 0x2a0   : > { %v6402_v40 = vrot.slane %v6285_v6, 5  ;;  %5602 = vst [vmem:[#allocation4 + $0xb8] sm:$0xf] %v5432_v30  ;;  %5605 = vst [vmem:[#allocation4 + $0xbc] sm:$0x1] %v5604_v27  ;;  %v5931_v35 = vrot.slane %v5929_v11, 5 }
 0x2a1   : > { %v5937_v0 = vrot.slane %v5935_v19, 5  ;;  %v5941_v51 = vrot.slane %v5939_v37, 4  ;;  %v5947_v41 = vrot.slane %v5945_v31, 5  ;;  %v6405_v56 = vrot.slane %v6286_v33, 5  ;;  %v12217_v57 = vld [vmem:[%s15504_s2 + $0x1a0] sm:$0xff]   ;;  %v12180_v15 = vld [vmem:[#allocation4 + $0x54] sm:$0xff]  }
 0x2a2   : > { %v6403_v58 = vsel %vm12423_vm4, %v10558_v54, %v6402_v40  ;;  %v6404_v53 = vrot.slane %v6402_v40, 4  ;;  %v5950_v46 = vshrl.u32 %v5775_v1, 16  ;;  %v5932_v32 = vor.u32 %v5931_v35, %v5928_v62  ;;  %v5779_v8 = vld [vmem:[#allocation4 + $0x58] sm:$0xf]  ;;  %v5780_v13 = vld [vmem:[#allocation4 + $0x5c] sm:$0x1]  ;;  %11777 = vmatpush3.bf16.msra.mxu0 %v12217_v57 }
 0x2a3   : > { %v5942_v34 = vor.u32 %v5941_v51, %v5937_v0  ;;  %v5953_v43 = vshll.u32 %v5775_v1, 16  ;;  %v5959_v63 = vshll.u32 %v5776_v14, 16  ;;  %v5963_v26 = vshrl.u32 %v5776_v14, 16  ;;  %v12179_v3 = vld [vmem:[#allocation4 + $0x3c] sm:$0xff]   ;;  %v6290_v6 = vld [vmem:[#allocation4 + $0x54] sm:$0xe] }
 0x2a4   : > { %v6406_v22 = vsel %vm12423_vm4, %v6404_v53, %v6405_v56  ;;  %v5952_v9 = vrot.slane %v5950_v46, 4  ;;  %v5969_v5 = vshll.u32 %v5777_v28, 16  ;;  %v5933_v7 = vrot.slane %v5932_v32, 4  ;;  %v6291_v60 = vld [vmem:[#allocation4 + $0x58] sm:$0xf]  ;;  %v12219_v11 = vld [vmem:[%s15504_s2 + $0x1e8] sm:$0xff]  }
 0x2a5   : > { %v5943_v12 = vrot.slane %v5942_v34, 4  ;;  %v10574_v52 = vcombine.low %v6403_v58, %v6406_v22  ;;  %v5955_v49 = vrot.slane %v5953_v43, 5  ;;  %v5961_v59 = vrot.slane %v5959_v63, 5  ;;  %v6292_v33 = vld [vmem:[#allocation4 + $0x5c] sm:$0x1]  ;;  %11778 = vmatprep.subr.bf16.mxu0 %v12219_v11  ;;  %v12220_v46 = vld [vmem:[%s15504_s2 + $0x1a8] sm:$0xff]  }
 0x2a6   : > { %v5965_v42 = vrot.slane %v5963_v26, 4  ;;  %v5971_v18 = vrot.slane %v5969_v5, 5  ;;  %v10559_v50 = vrot.slane %v6287_v55, 9  ;;  %v5938_v10 = vsel %vm12429_vm5, %v5933_v7, %v5937_v0  ;;  %v5782_v51 = vld [vmem:[#allocation4 + $0x64] sm:$0xf]  ;;  %v12221_v32 = vld [vmem:[%s15504_s2 + $0x1f0] sm:$0xff]   ;;  %11779 = vmatpush3.bf16.msra.mxu0 %v12220_v46 }
 0x2a7   : > { %v5948_v21 = vsel %vm12429_vm5, %v5943_v12, %v5947_v41  ;;  %9440 = vmatmul.mubr.bf16.gmra.mrb[180].mxu0 %v10574_v52  ;;  %v5956_v39 = vor.u32 %v5955_v49, %v5952_v9  ;;  %v6409_v44 = vrot.slane %v6288_v29, 5  ;;  %v6412_v61 = vrot.slane %v6289_v45, 5  ;;  %v5783_v56 = vld [vmem:[#allocation4 + $0x68] sm:$0x1]  ;;  %v12182_v34 = vld [vmem:[#allocation4 + $0x60] sm:$0xff]   ;;  %11780 = vmatprep.subr.bf16.mxu0 %v12221_v32 }
 0x2a8   : > { %v10542_v47 = vcombine.low %v5938_v10, %v5948_v21  ;;  %9447 = vmatprep.mubr.bf16.mxu0 %v12180_v15  ;;  %v5966_v25 = vor.u32 %v5965_v42, %v5961_v59  ;;  %v5974_v62 = vshrl.u32 %v5778_v38, 16  ;;  %v5977_v2 = vshll.u32 %v5778_v38, 16  ;;  %v6293_v22 = vld [vmem:[#allocation4 + $0x60] sm:$0xe]  ;;  %v12181_v9 = vld [vmem:[#allocation4 + $0x48] sm:$0xff]   ;;  %v12223_v42 = vld [vmem:[%s15504_s2 + $0x1b0] sm:$0xff]  }
 0x2a9   : > { %v5957_v23 = vrot.slane %v5956_v39, 4  ;;  %v6410_v20 = vsel %vm12423_vm4, %v10559_v50, %v6409_v44  ;;  %v6411_v16 = vrot.slane %v6409_v44, 4  ;;  %v5983_v31 = vshll.u32 %v5779_v8, 16  ;;  %v6294_v7 = vld [vmem:[#allocation4 + $0x64] sm:$0xf] }
 0x2aa   : > { %9278 = vmatprep.mubr.bf16.mxu1 %v10542_v47  ;;  %v5967_v19 = vrot.slane %v5966_v25, 4  ;;  %v5976_v37 = vrot.slane %v5974_v62, 4  ;;  %v5987_v1 = vshrl.u32 %v5779_v8, 16  ;;  %v5979_v54 = vrot.slane %v5977_v2, 5  ;;  %v6295_v12 = vld [vmem:[#allocation4 + $0x68] sm:$0x1]  ;;  %11781 = vmatpush3.bf16.msra.mxu0 %v12223_v42 }
 0x2ab   : > { %9279 = vmatmul.mubr.bf16.gmra.mrb[148].mxu1 %v12179_v3  ;;  %v5962_v30 = vsel %vm12429_vm5, %v5957_v23, %v5961_v59  ;;  %v6413_v27 = vsel %vm12423_vm4, %v6411_v16, %v6412_v61  ;;  %v5993_v40 = vshll.u32 %v5780_v13, 16  ;;  %v5985_v35 = vrot.slane %v5983_v31, 5  ;;  %v5784_v59 = vld [vmem:[#allocation4 + $0x6c] sm:$0xf]  ;;  %v12224_v39 = vld [vmem:[%s15504_s2 + $0x1f8] sm:$0xff]  }
 0x2ac   : > { %v5972_v14 = vsel %vm12429_vm5, %v5967_v19, %v5971_v18  ;;  %v10575_v28 = vcombine.low %v6410_v20, %v6413_v27  ;;  %v5989_v0 = vrot.slane %v5987_v1, 4  ;;  %v5980_v55 = vor.u32 %v5979_v54, %v5976_v37  ;;  %v5785_v3 = vld [vmem:[#allocation4 + $0x70] sm:$0xf]  ;;  %v5786_v36 = vld [vmem:[#allocation4 + $0x74] sm:$0x1]  ;;  %11782 = vmatprep.subr.bf16.mxu0 %v12224_v39 }
 0x2ad   : > { %v10543_v41 = vcombine.low %v5962_v30, %v5972_v14  ;;  %v5995_v58 = vrot.slane %v5993_v40, 5  ;;  %v10560_v53 = vrot.slane %v6290_v6, 9  ;;  %v6416_v63 = vrot.slane %v6291_v60, 5  ;;  %v12186_v23 = vld [vmem:[#allocation4 + $0x6c] sm:$0xff]   ;;  %v6298_v1 = vld [vmem:[#allocation4 + $0x74] sm:$0x1] }
 0x2ae   : > { %v5990_v43 = vor.u32 %v5989_v0, %v5985_v35  ;;  %v6419_v29 = vrot.slane %v6292_v33, 5  ;;  %v5998_v45 = vshrl.u32 %v5781_v24, 16  ;;  %v5981_v26 = vrot.slane %v5980_v55, 4  ;;  %v6296_v33 = vld [vmem:[#allocation4 + $0x6c] sm:$0xe] }
 0x2af   : > { %9286 = vmatprep.mubr.bf16.mxu1 %v10543_v41  ;;  %9448 = vmatmul.mubr.bf16.gmra.mrb[184].mxu0 %v10575_v28  ;;  %v6001_v5 = vshll.u32 %v5781_v24, 16  ;;  %v6007_v38 = vshll.u32 %v5782_v51, 16  ;;  %v6011_v48 = vshrl.u32 %v5782_v51, 16  ;;  %v6417_v49 = vsel %vm12423_vm4, %v10560_v53, %v6416_v63  ;;  %v6297_v24 = vld [vmem:[#allocation4 + $0x70] sm:$0xf]  ;;  %v12225_v28 = vld [vmem:[%s15504_s2 + $0x1b8] sm:$0xff]  }
 0x2b0   : > { %9455 = vmatprep.mubr.bf16.mxu0 %v12182_v34  ;;  %v5991_v52 = vrot.slane %v5990_v43, 4  ;;  %v6418_v57 = vrot.slane %v6416_v63, 4  ;;  %v6000_v15 = vrot.slane %v5998_v45, 4  ;;  %v5986_v18 = vsel %vm12429_vm5, %v5981_v26, %v5985_v35  ;;  %v5787_v30 = vld [vmem:[#allocation4 + $0x78] sm:$0xf]  ;;  %v14333_v55 = vld [vmem:[%s15504_s2 + $0x200] sm:$0xff]   ;;  %11783 = vmatpush3.bf16.msra.mxu0 %v12225_v28 }
 0x2b1   : > { %v6003_v50 = vrot.slane %v6001_v5, 5  ;;  %v6009_v10 = vrot.slane %v6007_v38, 5  ;;  %v6013_v21 = vrot.slane %v6011_v48, 4  ;;  %v6017_v13 = vshll.u32 %v5783_v56, 16  ;;  %v5788_v45 = vld [vmem:[#allocation4 + $0x7c] sm:$0xf]  ;;  %11952 = vmatprep.subr.bf16.mxu1 %v14333_v55 }
 0x2b2   : > { %v5996_v44 = vsel %vm12429_vm5, %v5991_v52, %v5995_v58  ;;  %v6420_v8 = vsel %vm12423_vm4, %v6418_v57, %v6419_v29  ;;  %v10561_v47 = vrot.slane %v6293_v22, 9  ;;  %v6423_v16 = vrot.slane %v6294_v7, 5  ;;  %v12185_v58 = vld [vmem:[#allocation4 + $0x54] sm:$0xff]   ;;  %v5789_v22 = vld [vmem:[#allocation4 + $0x80] sm:$0x1] }
 0x2b3   : > { %9287 = vmatmul.mubr.bf16.gmra.mrb[152].mxu1 %v12181_v9  ;;  %v10544_v25 = vcombine.low %v5986_v18, %v5996_v44  ;;  %v10576_v61 = vcombine.low %v6417_v49, %v6420_v8  ;;  %v6004_v62 = vor.u32 %v6003_v50, %v6000_v15  ;;  %v6014_v6 = vor.u32 %v6013_v21, %v6009_v10  ;;  %v6299_v48 = vld [vmem:[#allocation4 + $0x78] sm:$0xe]  ;;  %v6300_v57 = vld [vmem:[#allocation4 + $0x7c] sm:$0xf] }
 0x2b4   : > { %v6019_v20 = vrot.slane %v6017_v13, 5  ;;  %v6426_v2 = vrot.slane %v6295_v12, 5  ;;  %v6022_v60 = vshrl.u32 %v5784_v59, 16  ;;  %v6025_v37 = vshll.u32 %v5784_v59, 16  ;;  %v12190_v15 = vld [vmem:[#allocation4 + $0x78] sm:$0xff]  }
 0x2b5   : > { %9294 = vmatprep.mubr.bf16.mxu1 %v10544_v25  ;;  %v6005_v11 = vrot.slane %v6004_v62, 4  ;;  %v6015_v19 = vrot.slane %v6014_v6, 4  ;;  %v6031_v31 = vshll.u32 %v5785_v3, 16  ;;  %v6424_v27 = vsel %vm12423_vm4, %v10561_v47, %v6423_v16  ;;  %v5790_v13 = vld [vmem:[#allocation4 + $0x84] sm:$0xf] }
 0x2b6   : > { %v6425_v54 = vrot.slane %v6423_v16, 4  ;;  %v6024_v40 = vrot.slane %v6022_v60, 4  ;;  %v6035_v14 = vshrl.u32 %v5785_v3, 16  ;;  %v6027_v51 = vrot.slane %v6025_v37, 5  ;;  %v5791_v47 = vld [vmem:[#allocation4 + $0x88] sm:$0xf] }
 0x2b7   : > { %9456 = vmatmul.mubr.bf16.gmra.mrb[188].mxu0 %v10576_v61  ;;  %v6010_v35 = vsel %vm12429_vm5, %v6005_v11, %v6009_v10  ;;  %v6020_v0 = vsel %vm12429_vm5, %v6015_v19, %v6019_v20  ;;  %v6033_v41 = vrot.slane %v6031_v31, 5  ;;  %v6041_v32 = vshll.u32 %v5786_v36, 16  ;;  %v6301_v10 = vld [vmem:[#allocation4 + $0x80] sm:$0x1]  ;;  %v5792_v16 = vld [vmem:[#allocation4 + $0x8c] sm:$0x1] }
 0x2b8   : > { %9463 = vmatprep.mubr.bf16.mxu0 %v12186_v23  ;;  %v10545_v53 = vcombine.low %v6010_v35, %v6020_v0  ;;  %v6427_v56 = vsel %vm12423_vm4, %v6425_v54, %v6426_v2  ;;  %v6037_v46 = vrot.slane %v6035_v14, 4  ;;  %v6028_v43 = vor.u32 %v6027_v51, %v6024_v40  ;;  %v12189_v2 = vld [vmem:[#allocation4 + $0x60] sm:$0xff]   ;;  %v6304_v35 = vld [vmem:[#allocation4 + $0x8c] sm:$0x1] }
 0x2b9   : > { %v10577_v34 = vcombine.low %v6424_v27, %v6427_v56  ;;  %v10562_v63 = vrot.slane %v6296_v33, 9  ;;  %v6430_v29 = vrot.slane %v6297_v24, 5  ;;  %v6043_v26 = vrot.slane %v6041_v32, 5  ;;  %v6302_v19 = vld [vmem:[#allocation4 + $0x84] sm:$0xe] }
 0x2ba   : > { %v6038_v9 = vor.u32 %v6037_v46, %v6033_v41  ;;  %v6433_v5 = vrot.slane %v6298_v1, 5  ;;  %v6046_v38 = vshrl.u32 %v5787_v30, 16  ;;  %v6029_v7 = vrot.slane %v6028_v43, 4  ;;  %v6303_v27 = vld [vmem:[#allocation4 + $0x88] sm:$0xf] }
 0x2bb   : > { %9295 = vmatmul.mubr.bf16.gmra.mrb[156].mxu1 %v12185_v58  ;;  %v14340_v12 = vsel %vm12423_vm4, %v10562_v63, %v6430_v29  ;;  %v6432_v52 = vrot.slane %v6430_v29, 4  ;;  %v6049_v49 = vshll.u32 %v5787_v30, 16  ;;  %v6055_v18 = vshll.u32 %v5788_v45, 16  ;;  %v5794_v43 = vld [vmem:[#allocation4 + $0x94] sm:$0xf]  ;;  %v12194_v63 = vld [vmem:[#allocation4 + $0x84] sm:$0xff]  }
 0x2bc   : > { %9302 = vmatprep.mubr.bf16.mxu1 %v10545_v53  ;;  %v6039_v59 = vrot.slane %v6038_v9, 4  ;;  %v6048_v42 = vrot.slane %v6046_v38, 4  ;;  %v6059_v50 = vshrl.u32 %v5788_v45, 16  ;;  %v6034_v21 = vsel %vm12429_vm5, %v6029_v7, %v6033_v41  ;;  %v5793_v53 = vld [vmem:[#allocation4 + $0x90] sm:$0xf] }
 0x2bd   : > { %v6434_v39 = vsel %vm12423_vm4, %v6432_v52, %v6433_v5  ;;  %v6051_v44 = vrot.slane %v6049_v49, 5  ;;  %v6065_v8 = vshll.u32 %v5789_v22, 16  ;;  %v6057_v61 = vrot.slane %v6055_v18, 5 }
 0x2be   : > { %v6044_v3 = vsel %vm12429_vm5, %v6039_v59, %v6043_v26  ;;  %v10578_v25 = vcombine.low %v14340_v12, %v6434_v39  ;;  %v6061_v62 = vrot.slane %v6059_v50, 4  ;;  %v10563_v20 = vrot.slane %v6299_v48, 9  ;;  %v5795_v48 = vld [vmem:[#allocation4 + $0x98] sm:$0x1]  ;;  %v12193_v59 = vld [vmem:[#allocation4 + $0x6c] sm:$0xff]  }
 0x2bf   : > { %9464 = vmatmul.mubr.bf16.gmra.mrb[192].mxu0 %v10577_v34  ;;  %v10546_v6 = vcombine.low %v6034_v21, %v6044_v3  ;;  %v6052_v36 = vor.u32 %v6051_v44, %v6048_v42  ;;  %v6067_v23 = vrot.slane %v6065_v8, 5  ;;  %v6437_v33 = vrot.slane %v6300_v57, 5  ;;  %v6306_v21 = vld [vmem:[#allocation4 + $0x94] sm:$0xf]  ;;  %v5796_v3 = vld [vmem:[#allocation4 + $0x9c] sm:$0xf] }
 0x2c0   : > { %9471 = vmatprep.mubr.bf16.mxu0 %v12190_v15  ;;  %v6062_v60 = vor.u32 %v6061_v62, %v6057_v61  ;;  %v6440_v24 = vrot.slane %v6301_v10, 5  ;;  %v6070_v11 = vshrl.u32 %v5790_v13, 16  ;;  %v6073_v31 = vshll.u32 %v5790_v13, 16  ;;  %v6305_v15 = vld [vmem:[#allocation4 + $0x90] sm:$0xe] }
 0x2c1   : > { %v6053_v37 = vrot.slane %v6052_v36, 4  ;;  %v6079_v1 = vshll.u32 %v5791_v47, 16  ;;  %v6083_v30 = vshrl.u32 %v5791_v47, 16  ;;  %v14351_v40 = vsel %vm12423_vm4, %v10563_v20, %v6437_v33  ;;  %v6307_v47 = vld [vmem:[#allocation4 + $0x98] sm:$0x1] }
 0x2c2   : > { %v6063_v54 = vrot.slane %v6062_v60, 4  ;;  %v6439_v14 = vrot.slane %v6437_v33, 4  ;;  %v6072_v28 = vrot.slane %v6070_v11, 4  ;;  %v6075_v51 = vrot.slane %v6073_v31, 5  ;;  %v5798_v60 = vld [vmem:[#allocation4 + $0xa4] sm:$0x1] }
 0x2c3   : > { %9303 = vmatmul.mubr.bf16.gmra.mrb[160].mxu1 %v12189_v2  ;;  %v6058_v0 = vsel %vm12429_vm5, %v6053_v37, %v6057_v61  ;;  %v6081_v41 = vrot.slane %v6079_v1, 5  ;;  %v6085_v58 = vrot.slane %v6083_v30, 4  ;;  %v6089_v32 = vshll.u32 %v5792_v16, 16  ;;  %v5797_v2 = vld [vmem:[#allocation4 + $0xa0] sm:$0xf]  ;;  %v12198_v31 = vld [vmem:[#allocation4 + $0x90] sm:$0xff]  }
 0x2c4   : > { %9310 = vmatprep.mubr.bf16.mxu1 %v10546_v6  ;;  %v6068_v56 = vsel %vm12429_vm5, %v6063_v54, %v6067_v23  ;;  %v6441_v46 = vsel %vm12423_vm4, %v6439_v14, %v6440_v24  ;;  %v10564_v34 = vrot.slane %v6302_v19, 9  ;;  %v6076_v22 = vor.u32 %v6075_v51, %v6072_v28  ;;  %v6308_v37 = vld [vmem:[#allocation4 + $0x9c] sm:$0xe] }
 0x2c5   : > { %v10547_v29 = vcombine.low %v6058_v0, %v6068_v56  ;;  %v10579_v45 = vcombine.low %v14351_v40, %v6441_v46  ;;  %v6086_v9 = vor.u32 %v6085_v58, %v6081_v41  ;;  %v6091_v26 = vrot.slane %v6089_v32, 5  ;;  %v6309_v0 = vld [vmem:[#allocation4 + $0xa0] sm:$0xf]  ;;  %v6310_v56 = vld [vmem:[#allocation4 + $0xa4] sm:$0x1] }
 0x2c6   : > { %v6444_v5 = vrot.slane %v6303_v27, 5  ;;  %v6447_v38 = vrot.slane %v6304_v35, 5  ;;  %v6094_v7 = vshrl.u32 %v5793_v53, 16  ;;  %v6077_v12 = vrot.slane %v6076_v22, 4  ;;  %v5799_v46 = vld [vmem:[#allocation4 + $0xa8] sm:$0xf] }
 0x2c7   : > { %9472 = vmatmul.mubr.bf16.gmra.mrb[196].mxu0 %v10578_v25  ;;  %v6087_v52 = vrot.slane %v6086_v9, 4  ;;  %v6097_v49 = vshll.u32 %v5793_v53, 16  ;;  %v6103_v57 = vshll.u32 %v5794_v43, 16  ;;  %v6107_v10 = vshrl.u32 %v5794_v43, 16 }
 0x2c8   : > { %9479 = vmatprep.mubr.bf16.mxu0 %v12194_v63  ;;  %v14362_v42 = vsel %vm12423_vm4, %v10564_v34, %v6444_v5  ;;  %v6446_v18 = vrot.slane %v6444_v5, 4  ;;  %v6096_v50 = vrot.slane %v6094_v7, 4  ;;  %v6082_v39 = vsel %vm12429_vm5, %v6077_v12, %v6081_v41 }
 0x2c9   : > { %v6092_v44 = vsel %vm12429_vm5, %v6087_v52, %v6091_v26  ;;  %v6099_v8 = vrot.slane %v6097_v49, 5  ;;  %v6105_v13 = vrot.slane %v6103_v57, 5  ;;  %v6109_v62 = vrot.slane %v6107_v10, 4  ;;  %v6311_v49 = vld [vmem:[#allocation4 + $0xa8] sm:$0xe] }
 0x2ca   : > { %v10548_v25 = vcombine.low %v6082_v39, %v6092_v44  ;;  %v14370_v61 = vsel %vm12423_vm4, %v6446_v18, %v6447_v38  ;;  %v6113_v6 = vshll.u32 %v5795_v48, 16  ;;  %v10565_v20 = vrot.slane %v6305_v15, 9  ;;  %v5801_v38 = vld [vmem:[#allocation4 + $0xb0] sm:$0x1] }
 0x2cb   : > { %9311 = vmatmul.mubr.bf16.gmra.mrb[164].mxu1 %v12193_v59  ;;  %v10580_v36 = vcombine.low %v14362_v42, %v14370_v61  ;;  %v6100_v23 = vor.u32 %v6099_v8, %v6096_v50  ;;  %v6451_v16 = vrot.slane %v6306_v21, 5  ;;  %v6110_v33 = vor.u32 %v6109_v62, %v6105_v13  ;;  %v6312_v50 = vld [vmem:[#allocation4 + $0xac] sm:$0xf]  ;;  %v6313_v10 = vld [vmem:[#allocation4 + $0xb0] sm:$0x1] }
 0x2cc   : > { %9318 = vmatprep.mubr.bf16.mxu1 %v10547_v29  ;;  %v6115_v24 = vrot.slane %v6113_v6, 5  ;;  %v6454_v11 = vrot.slane %v6307_v47, 5  ;;  %v6118_v19 = vshrl.u32 %v5796_v3, 16  ;;  %v6121_v54 = vshll.u32 %v5796_v3, 16  ;;  %v5800_v29 = vld [vmem:[#allocation4 + $0xac] sm:$0xf] }
 0x2cd   : > { %v6101_v1 = vrot.slane %v6100_v23, 4  ;;  %v14376_v30 = vsel %vm12423_vm4, %v10565_v20, %v6451_v16  ;;  %v6453_v27 = vrot.slane %v6451_v16, 4  ;;  %v6111_v40 = vrot.slane %v6110_v33, 4  ;;  %v5802_v21 = vld [vmem:[#allocation4 + $0xb4] sm:$0xf]  ;;  %v12202_v23 = vld [vmem:[#allocation4 + $0x9c] sm:$0xff]  }
 0x2ce   : > { %v6120_v14 = vrot.slane %v6118_v19, 4  ;;  %v6127_v28 = vshll.u32 %v5797_v2, 16  ;;  %v6131_v35 = vshrl.u32 %v5797_v2, 16  ;;  %v6123_v58 = vrot.slane %v6121_v54, 5  ;;  %v12201_v33 = vld [vmem:[#allocation4 + $0x84] sm:$0xff]  }
 0x2cf   : > { %9480 = vmatmul.mubr.bf16.gmra.mrb[200].mxu0 %v10579_v45  ;;  %v6106_v51 = vsel %vm12429_vm5, %v6101_v1, %v6105_v13  ;;  %v14382_v41 = vsel %vm12423_vm4, %v6453_v27, %v6454_v11  ;;  %v6137_v53 = vshll.u32 %v5798_v60, 16  ;;  %v6116_v32 = vsel %vm12429_vm5, %v6111_v40, %v6115_v24  ;;  %v12197_v45 = vld [vmem:[#allocation4 + $0x78] sm:$0xff]  }
 0x2d0   : > { %9487 = vmatprep.mubr.bf16.mxu0 %v12198_v31  ;;  %v10581_v34 = vcombine.low %v14376_v30, %v14382_v41  ;;  %v6129_v43 = vrot.slane %v6127_v28, 5  ;;  %v6133_v63 = vrot.slane %v6131_v35, 4  ;;  %v10549_v22 = vcombine.low %v6106_v51, %v6116_v32  ;;  %v5803_v60 = vld [vmem:[#allocation4 + $0xb8] sm:$0xf]  ;;  %v5804_v31 = vld [vmem:[#allocation4 + $0xbc] sm:$0x1] }
 0x2d1   : > { %v6124_v9 = vor.u32 %v6123_v58, %v6120_v14  ;;  %v6139_v26 = vrot.slane %v6137_v53, 5  ;;  %v10566_v5 = vrot.slane %v6308_v37, 9  ;;  %v6458_v7 = vrot.slane %v6309_v0, 5  ;;  %v6314_v14 = vld [vmem:[#allocation4 + $0xb4] sm:$0xe] }
 0x2d2   : > { %v6134_v48 = vor.u32 %v6133_v63, %v6129_v43  ;;  %v6461_v12 = vrot.slane %v6310_v56, 5  ;;  %v6142_v52 = vshrl.u32 %v5799_v46, 16  ;;  %v6145_v15 = vshll.u32 %v5799_v46, 16  ;;  %v6315_v61 = vld [vmem:[#allocation4 + $0xb8] sm:$0xf] }
 0x2d3   : > { %9319 = vmatmul.mubr.bf16.gmra.mrb[168].mxu1 %v12197_v45  ;;  %v6125_v57 = vrot.slane %v6124_v9, 4  ;;  %v6151_v59 = vshll.u32 %v5800_v29, 16  ;;  %v6155_v18 = vshrl.u32 %v5800_v29, 16  ;;  %v14390_v44 = vsel %vm12423_vm4, %v10566_v5, %v6458_v7  ;;  %v6316_v56 = vld [vmem:[#allocation4 + $0xbc] sm:$0x1] }
 0x2d4   : > { %9326 = vmatprep.mubr.bf16.mxu1 %v10548_v25  ;;  %v6135_v39 = vrot.slane %v6134_v48, 4  ;;  %v6460_v8 = vrot.slane %v6458_v7, 4  ;;  %v6144_v13 = vrot.slane %v6142_v52, 4  ;;  %v6147_v3 = vrot.slane %v6145_v15, 5  ;;  %v7646_v29 = vld [vmem:[#allocation4 + $0x18] sm:$0xf] }
 0x2d5   : > { %v6130_v47 = vsel %vm12429_vm5, %v6125_v57, %v6129_v43  ;;  %v6153_v62 = vrot.slane %v6151_v59, 5  ;;  %v6157_v6 = vrot.slane %v6155_v18, 4  ;;  %v6161_v16 = vshll.u32 %v5801_v38, 16  ;;  %v7647_v52 = vld [vmem:[#allocation4 + $0x1c] sm:$0xf] }
 0x2d6   : > { %v6140_v20 = vsel %vm12429_vm5, %v6135_v39, %v6139_v26  ;;  %v14398_v25 = vsel %vm12423_vm4, %v6460_v8, %v6461_v12  ;;  %v10567_v2 = vrot.slane %v6311_v49, 9  ;;  %v6148_v19 = vor.u32 %v6147_v3, %v6144_v13  ;;  %v12206_v49 = vld [vmem:[#allocation4 + $0xa8] sm:$0xff]  }
 0x2d7   : > { %9488 = vmatmul.mubr.bf16.gmra.mrb[204].mxu0 %v10580_v36  ;;  %v14403_v24 = vcombine.low %v6130_v47, %v6140_v20  ;;  %v10582_v11 = vcombine.low %v14390_v44, %v14398_v25  ;;  %v6158_v37 = vor.u32 %v6157_v6, %v6153_v62  ;;  %v6163_v1 = vrot.slane %v6161_v16, 5  ;;  %v7213_v13 = vld [vmem:[#allocation4 + $0xc] sm:$0xe]  ;;  %v7215_v16 = vld [vmem:[#allocation4 + $0x14] sm:$0x1] }
 0x2d8   : > { %9495 = vmatprep.mubr.bf16.mxu0 %v12202_v23  ;;  %v6465_v27 = vrot.slane %v6312_v50, 5  ;;  %v6468_v54 = vrot.slane %v6313_v10, 5  ;;  %v6166_v40 = vshrl.u32 %v5802_v21, 16  ;;  %v6149_v28 = vrot.slane %v6148_v19, 4  ;;  %v12205_v50 = vld [vmem:[#allocation4 + $0x90] sm:$0xff]  }
 0x2d9   : > { %v6159_v35 = vrot.slane %v6158_v37, 4  ;;  %v6169_v0 = vshll.u32 %v5802_v21, 16  ;;  %v6175_v42 = vshll.u32 %v5803_v60, 16  ;;  %v6179_v53 = vshrl.u32 %v5803_v60, 16  ;;  %v7214_v23 = vld [vmem:[#allocation4 + $0x10] sm:$0xf] }
 0x2da   : > { %v14409_v36 = vsel %vm12423_vm4, %v10567_v2, %v6465_v27  ;;  %v6467_v51 = vrot.slane %v6465_v27, 4  ;;  %v6168_v58 = vrot.slane %v6166_v40, 4  ;;  %v6154_v46 = vsel %vm12429_vm5, %v6149_v28, %v6153_v62  ;;  %v6701_v2 = vld [vmem:[#allocation4 + $0xc] sm:$0xf] }
 0x2db   : > { %9327 = vmatmul.mubr.bf16.gmra.mrb[172].mxu1 %v12201_v33  ;;  %v6164_v32 = vsel %vm12429_vm5, %v6159_v35, %v6163_v1  ;;  %v6171_v43 = vrot.slane %v6169_v0, 5  ;;  %v6177_v63 = vrot.slane %v6175_v42, 5  ;;  %v6181_v26 = vrot.slane %v6179_v53, 4  ;;  %v6703_v0 = vld [vmem:[#allocation4 + $0x14] sm:$0x1] }
 0x2dc   : > { %9334 = vmatprep.mubr.bf16.mxu1 %v10549_v22  ;;  %v14415_v45 = vcombine.low %v6154_v46, %v6164_v32  ;;  %v14419_v9 = vsel %vm12423_vm4, %v6467_v51, %v6468_v54  ;;  %v6185_v5 = vshll.u32 %v5804_v31, 16  ;;  %v10568_v7 = vrot.slane %v6314_v14, 9  ;;  %v7648_v22 = vld [vmem:[#allocation4 + $0x20] sm:$0x1]  ;;  %v6702_v31 = vld [vmem:[#allocation4 + $0x10] sm:$0xf] }
 0x2dd   : > { %v10583_v38 = vcombine.low %v14409_v36, %v14419_v9  ;;  %v6172_v48 = vor.u32 %v6171_v43, %v6168_v58  ;;  %v6472_v12 = vrot.slane %v6315_v61, 5  ;;  %v6182_v57 = vor.u32 %v6181_v26, %v6177_v63  ;;  %v12210_v46 = vld [vmem:[#allocation4 + $0xb4] sm:$0xff]   ;;  %v14447_v26 = vpop.f32.mrb[128].mxu1  ;;  %v7651_v25 = vld [vmem:[#allocation4 + $0x2c] sm:$0x1] }
 0x2de   : > { %v6187_v15 = vrot.slane %v6185_v5, 5  ;;  %v6475_v59 = vrot.slane %v6316_v56, 5  ;;  %v7695_v18 = vshrl.u32 %v7646_v29, 16  ;;  %v7698_v8 = vshll.u32 %v7646_v29, 16  ;;  %v7649_v56 = vld [vmem:[#allocation4 + $0x24] sm:$0xf] }
 0x2df   : > { %9496 = vmatmul.mubr.bf16.gmra.mrb[208].mxu0 %v10581_v34  ;;  %v6173_v10 = vrot.slane %v6172_v48, 4  ;;  %v14428_v21 = vsel %vm12423_vm4, %v10568_v7, %v6472_v12  ;;  %v6474_v39 = vrot.slane %v6472_v12, 4  ;;  %v6183_v47 = vrot.slane %v6182_v57, 4  ;;  %v7650_v12 = vld [vmem:[#allocation4 + $0x28] sm:$0xf] }
 0x2e0   : > { %9503 = vmatprep.mubr.bf16.mxu0 %v12206_v49  ;;  %v7697_v3 = vrot.slane %v7695_v18, 4  ;;  %v7704_v62 = vshll.u32 %v7647_v52, 16  ;;  %v7708_v6 = vshrl.u32 %v7647_v52, 16  ;;  %v7700_v41 = vrot.slane %v7698_v8, 5  ;;  %v14454_v52 = vpop.f32.mrb[129].mxu1  ;;  %v12209_v49 = vld [vmem:[#allocation4 + $0x9c] sm:$0xff]  }
 0x2e1   : > { %v6178_v20 = vsel %vm12429_vm5, %v6173_v10, %v6177_v63  ;;  %v14434_v30 = vsel %vm12423_vm4, %v6474_v39, %v6475_v59  ;;  %v7714_v34 = vshll.u32 %v7648_v22, 16  ;;  %v6188_v60 = vsel %vm12429_vm5, %v6183_v47, %v6187_v15  ;;  %v7216_v10 = vld [vmem:[#allocation4 + $0x18] sm:$0xe]  ;;  %v7217_v39 = vld [vmem:[#allocation4 + $0x1c] sm:$0xf] }
 0x2e2   : > { %v10584_v33 = vcombine.low %v14428_v21, %v14434_v30  ;;  %v7706_v19 = vrot.slane %v7704_v62, 5  ;;  %v7710_v37 = vrot.slane %v7708_v6, 4  ;;  %v14440_v1 = vcombine.low %v6178_v20, %v6188_v60 }
 0x2e3   : > { %9335 = vmatmul.mubr.bf16.gmra.mrb[176].mxu1 %v12205_v50  ;;  %v7701_v27 = vor.u32 %v7700_v41, %v7697_v3  ;;  %v7716_v54 = vrot.slane %v7714_v34, 5  ;;  %v10617_v40 = vrot.slane %v7213_v13, 9  ;;  %v7311_v28 = vrot.slane %v7214_v23, 5  ;;  %v7218_v41 = vld [vmem:[#allocation4 + $0x20] sm:$0x1] }
 0x2e4   : > { %9342 = vmatprep.mubr.bf16.mxu1 %v14403_v24  ;;  %v7711_v14 = vor.u32 %v7710_v37, %v7706_v19  ;;  %v7314_v35 = vrot.slane %v7215_v16, 5  ;;  %v6750_v42 = vshrl.u32 %v6701_v2, 16  ;;  %v6753_v51 = vshll.u32 %v6701_v2, 16 }
 0x2e5   : > { %v7702_v61 = vrot.slane %v7701_v27, 4  ;;  %v6759_v58 = vshll.u32 %v6702_v31, 16  ;;  %v6763_v53 = vshrl.u32 %v6702_v31, 16  ;;  %v14445_v43 = vsel %vm12423_vm4, %v10617_v40, %v7311_v28  ;;  %v6705_v40 = vld [vmem:[#allocation4 + $0x1c] sm:$0xf] }
 0x2e6   : > { %v7712_v32 = vrot.slane %v7711_v14, 4  ;;  %v7313_v63 = vrot.slane %v7311_v28, 4  ;;  %v6752_v29 = vrot.slane %v6750_v42, 4  ;;  %v6755_v5 = vrot.slane %v6753_v51, 5  ;;  %v6706_v14 = vld [vmem:[#allocation4 + $0x20] sm:$0x1] }
 0x2e7   : > { %9504 = vmatmul.mubr.bf16.gmra.mrb[212].mxu0 %v10582_v11  ;;  %v7707_v24 = vsel %vm12429_vm5, %v7702_v61, %v7706_v19  ;;  %v6761_v48 = vrot.slane %v6759_v58, 5  ;;  %v6765_v7 = vrot.slane %v6763_v53, 4  ;;  %v6769_v44 = vshll.u32 %v6703_v0, 16  ;;  %v6704_v19 = vld [vmem:[#allocation4 + $0x18] sm:$0xf]  ;;  %v12215_v28 = vld [vmem:[#allocation4 + $0xc0] sm:$0xff]  }
 0x2e8   : > { %9511 = vmatprep.mubr.bf16.mxu0 %v12210_v46  ;;  %v7717_v57 = vsel %vm12429_vm5, %v7712_v32, %v7716_v54  ;;  %v14460_v15 = vsel %vm12423_vm4, %v7313_v63, %v7314_v35  ;;  %v7719_v11 = vshrl.u32 %v7649_v56, 16  ;;  %v6756_v18 = vor.u32 %v6755_v5, %v6752_v29  ;;  %v14477_v61 = vpop.f32.mrb[130].mxu1  ;;  %v7652_v46 = vld [vmem:[#allocation4 + $0x30] sm:$0xf] }
 0x2e9   : > { %v14462_v59 = vcombine.low %v7707_v24, %v7717_v57  ;;  %v10633_v22 = vcombine.low %v14445_v43, %v14460_v15  ;;  %v6766_v50 = vor.u32 %v6765_v7, %v6761_v48  ;;  %v6771_v8 = vrot.slane %v6769_v44, 5  ;;  %v14482_v32 = vpop.f32.mrb[131].mxu1  ;;  %v12214_v7 = vld [vmem:[#allocation4 + $0xa8] sm:$0xff]  }
 0x2ea   : > { %v7721_v13 = vrot.slane %v7719_v11, 4  ;;  %v7722_v47 = vshll.u32 %v7649_v56, 16  ;;  %v7728_v3 = vshll.u32 %v7650_v12, 16  ;;  %v6757_v62 = vrot.slane %v6756_v18, 4 }
 0x2eb   : > { %9343 = vmatmul.mubr.bf16.gmra.mrb[180].mxu1 %v12209_v49  ;;  %v6767_v6 = vrot.slane %v6766_v50, 4  ;;  %v7732_v23 = vshrl.u32 %v7650_v12, 16  ;;  %v7738_v20 = vshll.u32 %v7651_v25, 16  ;;  %v10618_v2 = vrot.slane %v7216_v10, 9 }
 0x2ec   : > { %9350 = vmatprep.mubr.bf16.mxu1 %v14415_v45  ;;  %v7724_v34 = vrot.slane %v7722_v47, 5  ;;  %v7730_v16 = vrot.slane %v7728_v3, 5  ;;  %v7318_v60 = vrot.slane %v7217_v39, 5  ;;  %v6762_v37 = vsel %vm12429_vm5, %v6757_v62, %v6761_v48  ;;  %v7653_v48 = vld [vmem:[#allocation4 + $0x34] sm:$0xf] }
 0x2ed   : > { %v6772_v31 = vsel %vm12429_vm5, %v6767_v6, %v6771_v8  ;;  %v7734_v27 = vrot.slane %v7732_v23, 4  ;;  %v7740_v54 = vrot.slane %v7738_v20, 5  ;;  %v7321_v58 = vrot.slane %v7218_v41, 5  ;;  %v7219_v8 = vld [vmem:[#allocation4 + $0x24] sm:$0xe] }
 0x2ee   : > { %v14471_v35 = vcombine.low %v6762_v37, %v6772_v31  ;;  %v7725_v0 = vor.u32 %v7724_v34, %v7721_v13  ;;  %v14475_v45 = vsel %vm12423_vm4, %v10618_v2, %v7318_v60  ;;  %v7320_v42 = vrot.slane %v7318_v60, 4  ;;  %v7220_v6 = vld [vmem:[#allocation4 + $0x28] sm:$0xf]  ;;  %v7221_v23 = vld [vmem:[#allocation4 + $0x2c] sm:$0x1] }
 0x2ef   : > { %9512 = vmatmul.mubr.bf16.gmra.mrb[216].mxu0 %v10583_v38  ;;  %v7735_v51 = vor.u32 %v7734_v27, %v7730_v16  ;;  %v6774_v53 = vshrl.u32 %v6704_v19, 16  ;;  %v6777_v56 = vshll.u32 %v6704_v19, 16  ;;  %v6783_v29 = vshll.u32 %v6705_v40, 16  ;;  %v7654_v38 = vld [vmem:[#allocation4 + $0x38] sm:$0x1] }
 0x2f0   : > { %9519 = vmatprep.mubr.bf16.mxu0 %v12215_v28  ;;  %v7726_v63 = vrot.slane %v7725_v0, 4  ;;  %v6787_v24 = vshrl.u32 %v6705_v40, 16  ;;  %v6793_v5 = vshll.u32 %v6706_v14, 16  ;;  %v14486_v49 = vsel %vm12423_vm4, %v7320_v42, %v7321_v58  ;;  %v6707_v2 = vld [vmem:[#allocation4 + $0x24] sm:$0xf] }
 0x2f1   : > { %v7736_v12 = vrot.slane %v7735_v51, 4  ;;  %v6776_v36 = vrot.slane %v6774_v53, 4  ;;  %v6779_v9 = vrot.slane %v6777_v56, 5  ;;  %v10634_v44 = vcombine.low %v14475_v45, %v14486_v49  ;;  %v6708_v14 = vld [vmem:[#allocation4 + $0x28] sm:$0xf]  ;;  %v12222_v53 = vld [vmem:[#allocation4 + $0xb4] sm:$0xff]  }
 0x2f2   : > { %v7731_v57 = vsel %vm12429_vm5, %v7726_v63, %v7730_v16  ;;  %v6785_v25 = vrot.slane %v6783_v29, 5  ;;  %v6789_v11 = vrot.slane %v6787_v24, 4  ;;  %v6795_v10 = vrot.slane %v6793_v5, 5  ;;  %v6709_v51 = vld [vmem:[#allocation4 + $0x2c] sm:$0x1]  ;;  %v12233_v45 = vld [vmem:[%s15504_s2 + $0x210] sm:$0xff]  }
 0x2f3   : > { %9351 = vmatmul.mubr.bf16.gmra.mrb[184].mxu1 %v12214_v7  ;;  %v7741_v18 = vsel %vm12429_vm5, %v7736_v12, %v7740_v54  ;;  %v6780_v50 = vor.u32 %v6779_v9, %v6776_v36  ;;  %v7743_v39 = vshrl.u32 %v7652_v46, 16  ;;  %v7746_v3 = vshll.u32 %v7652_v46, 16  ;;  %v7655_v24 = vld [vmem:[#allocation4 + $0x3c] sm:$0xf]  ;;  %v7656_v36 = vld [vmem:[#allocation4 + $0x40] sm:$0xf] }
 0x2f4   : > { %9358 = vmatprep.mubr.bf16.mxu1 %v14440_v1  ;;  %v14495_v13 = vcombine.low %v7731_v57, %v7741_v18  ;;  %v6790_v47 = vor.u32 %v6789_v11, %v6785_v25  ;;  %v7752_v62 = vshll.u32 %v7653_v48, 16  ;;  %v7756_v34 = vshrl.u32 %v7653_v48, 16  ;;  %v7657_v11 = vld [vmem:[#allocation4 + $0x44] sm:$0x1]  ;;  %v12226_v18 = vld [vmem:[#allocation4 + $0x18] sm:$0xff]  }
 0x2f5   : > { %v6781_v20 = vrot.slane %v6780_v50, 4  ;;  %v7745_v41 = vrot.slane %v7743_v39, 4  ;;  %v7762_v16 = vshll.u32 %v7654_v38, 16  ;;  %v7748_v19 = vrot.slane %v7746_v3, 5 }
 0x2f6   : > { %v6791_v60 = vrot.slane %v6790_v47, 4  ;;  %v7754_v37 = vrot.slane %v7752_v62, 5  ;;  %v10619_v31 = vrot.slane %v7219_v8, 9  ;;  %v7758_v27 = vrot.slane %v7756_v34, 4  ;;  %v7222_v47 = vld [vmem:[#allocation4 + $0x30] sm:$0xe] }
 0x2f7   : > { %9520 = vmatmul.mubr.bf16.gmra.mrb[220].mxu0 %v10584_v33  ;;  %v6786_v1 = vsel %vm12429_vm5, %v6781_v20, %v6785_v25  ;;  %v7764_v54 = vrot.slane %v7762_v16, 5  ;;  %v7325_v40 = vrot.slane %v7220_v6, 5  ;;  %v7749_v0 = vor.u32 %v7748_v19, %v7745_v41  ;;  %v7223_v62 = vld [vmem:[#allocation4 + $0x34] sm:$0xf]  ;;  %v7224_v6 = vld [vmem:[#allocation4 + $0x38] sm:$0x1] }
 0x2f8   : > { %9721 = vmatprep.mubr.bf16.mxu0 %v14462_v59  ;;  %v6796_v28 = vsel %vm12429_vm5, %v6791_v60, %v6795_v10  ;;  %v7328_v42 = vrot.slane %v7221_v23, 5  ;;  %v6798_v58 = vshrl.u32 %v6707_v2, 16  ;;  %v7759_v21 = vor.u32 %v7758_v27, %v7754_v37  ;;  %v6710_v16 = vld [vmem:[#allocation4 + $0x30] sm:$0xf] }
 0x2f9   : > { %v14505_v56 = vcombine.low %v6786_v1, %v6796_v28  ;;  %v14509_v30 = vsel %vm12423_vm4, %v10619_v31, %v7325_v40  ;;  %v7327_v33 = vrot.slane %v7325_v40, 4  ;;  %v7750_v46 = vrot.slane %v7749_v0, 4 }
 0x2fa   : > { %v6800_v63 = vrot.slane %v6798_v58, 4  ;;  %v6801_v29 = vshll.u32 %v6707_v2, 16  ;;  %v6807_v59 = vshll.u32 %v6708_v14, 16  ;;  %v7760_v5 = vrot.slane %v7759_v21, 4 }
 0x2fb   : > { %9359 = vmatmul.mubr.bf16.gmra.mrb[188].mxu1 %v12222_v53  ;;  %v14513_v48 = vsel %vm12423_vm4, %v7327_v33, %v7328_v42  ;;  %v6811_v7 = vshrl.u32 %v6708_v14, 16  ;;  %v6817_v12 = vshll.u32 %v6709_v51, 16  ;;  %v7755_v9 = vsel %vm12429_vm5, %v7750_v46, %v7754_v37  ;;  %v12230_v37 = vld [vmem:[%s15504_s2 + $0x208] sm:$0xff]   ;;  %v6712_v33 = vld [vmem:[#allocation4 + $0x38] sm:$0x1] }
 0x2fc   : > { %9560 = vmatprep.mubr.bf16.mxu1 %v10633_v22  ;;  %v10635_v38 = vcombine.low %v14509_v30, %v14513_v48  ;;  %v6803_v57 = vrot.slane %v6801_v29, 5  ;;  %v6809_v25 = vrot.slane %v6807_v59, 5  ;;  %v7765_v50 = vsel %vm12429_vm5, %v7760_v5, %v7764_v54  ;;  %v6711_v42 = vld [vmem:[#allocation4 + $0x34] sm:$0xf]  ;;  %v7658_v59 = vld [vmem:[#allocation4 + $0x48] sm:$0xf] }
 0x2fd   : > { %v6813_v10 = vrot.slane %v6811_v7, 4  ;;  %v6819_v39 = vrot.slane %v6817_v12, 5  ;;  %v7767_v8 = vshrl.u32 %v7655_v24, 16  ;;  %v10667_v3 = vcombine.low %v7755_v9, %v7765_v50  ;;  %v6715_v30 = vld [vmem:[#allocation4 + $0x44] sm:$0x1]  ;;  %v12239_v48 = vld [vmem:[%s15504_s2 + $0x220] sm:$0xff]  }
 0x2fe   : > { %v6804_v43 = vor.u32 %v6803_v57, %v6800_v63  ;;  %v7770_v15 = vshll.u32 %v7655_v24, 16  ;;  %v7776_v22 = vshll.u32 %v7656_v36, 16  ;;  %v7780_v41 = vshrl.u32 %v7656_v36, 16  ;;  %v12228_v24 = vld [vmem:[#allocation4 + $0x24] sm:$0xff]   ;;  %v7659_v57 = vld [vmem:[#allocation4 + $0x4c] sm:$0xf] }
 0x2ff   : > { %9722 = vmatmul.mubr.bf16.vlgmr.msra.gmra.mrb[224].mxu0 %v12226_v18  ;;  %v6814_v23 = vor.u32 %v6813_v10, %v6809_v25  ;;  %v7769_v20 = vrot.slane %v7767_v8, 4  ;;  %v7786_v34 = vshll.u32 %v7657_v11, 16  ;;  %v10620_v31 = vrot.slane %v7222_v47, 9 }
 0x300   : > { %9729 = vmatprep.mubr.bf16.mxu0 %v14495_v13  ;;  %v6805_v2 = vrot.slane %v6804_v43, 4  ;;  %v7772_v60 = vrot.slane %v7770_v15, 5  ;;  %v7778_v19 = vrot.slane %v7776_v22, 5  ;;  %v7782_v27 = vrot.slane %v7780_v41, 4  ;;  %v7226_v22 = vld [vmem:[#allocation4 + $0x40] sm:$0xf] }
 0x301   : > { %v6815_v1 = vrot.slane %v6814_v23, 4  ;;  %v7788_v54 = vrot.slane %v7786_v34, 5  ;;  %v7332_v40 = vrot.slane %v7223_v62, 5  ;;  %v7335_v0 = vrot.slane %v7224_v6, 5  ;;  %v7227_v62 = vld [vmem:[#allocation4 + $0x44] sm:$0x1] }
 0x302   : > { %v6810_v14 = vsel %vm12429_vm5, %v6805_v2, %v6809_v25  ;;  %v7773_v28 = vor.u32 %v7772_v60, %v7769_v20  ;;  %v6822_v51 = vshrl.u32 %v6710_v16, 16  ;;  %v7783_v58 = vor.u32 %v7782_v27, %v7778_v19  ;;  %v7660_v25 = vld [vmem:[#allocation4 + $0x50] sm:$0x1]  ;;  %v12236_v34 = vld [vmem:[%s15504_s2 + $0x218] sm:$0xff]   ;;  %v6713_v27 = vld [vmem:[#allocation4 + $0x3c] sm:$0xf] }
 0x303   : > { %9561 = vmatmul.mubr.bf16.vlgmr.msra.gmra.mrb[192].mxu1 %v14471_v35  ;;  %v6820_v13 = vsel %vm12429_vm5, %v6815_v1, %v6819_v39  ;;  %v14535_v53 = vsel %vm12423_vm4, %v10620_v31, %v7332_v40  ;;  %v7334_v21 = vrot.slane %v7332_v40, 4  ;;  %v6825_v29 = vshll.u32 %v6710_v16, 16  ;;  %v7225_v39 = vld [vmem:[#allocation4 + $0x3c] sm:$0xe] }
 0x304   : > { %9568 = vmatprep.mubr.bf16.mxu1 %v10634_v44  ;;  %11953 = vmatpush3.bf16.msra.mxu1 %v14333_v55  ;;  %v14541_v46 = vcombine.low %v6810_v14, %v6820_v13  ;;  %v7774_v63 = vrot.slane %v7773_v28, 4  ;;  %v6824_v35 = vrot.slane %v6822_v51, 4  ;;  %v7784_v5 = vrot.slane %v7783_v58, 4 }
 0x305   : > { %11954 = vmatprep.subr.bf16.mxu1 %v12230_v37  ;;  %v14545_v7 = vsel %vm12423_vm4, %v7334_v21, %v7335_v0  ;;  %v6831_v12 = vshll.u32 %v6711_v42, 16  ;;  %v6835_v36 = vshrl.u32 %v6711_v42, 16  ;;  %v6827_v44 = vrot.slane %v6825_v29, 5  ;;  %v6714_v0 = vld [vmem:[#allocation4 + $0x40] sm:$0xf]  ;;  %v12229_v42 = vld [vmem:[#allocation4 + $0x30] sm:$0xff]  }
 0x306   : > { %v7779_v55 = vsel %vm12429_vm5, %v7774_v63, %v7778_v19  ;;  %v10636_v49 = vcombine.low %v14535_v53, %v14545_v7  ;;  %v6841_v9 = vshll.u32 %v6712_v33, 16  ;;  %v7789_v11 = vsel %vm12429_vm5, %v7784_v5, %v7788_v54 }
 0x307   : > { %9730 = vmatmul.mubr.bf16.gmra.mrb[228].mxu0 %v12228_v24  ;;  %v6833_v18 = vrot.slane %v6831_v12, 5  ;;  %v6837_v50 = vrot.slane %v6835_v36, 4  ;;  %v7791_v10 = vshrl.u32 %v7658_v59, 16  ;;  %v10668_v8 = vcombine.low %v7779_v55, %v7789_v11  ;;  %v7662_v12 = vld [vmem:[#allocation4 + $0x58] sm:$0xf] }
 0x308   : > { %9737 = vmatprep.mubr.bf16.mxu0 %v10667_v3  ;;  %11955 = vmatpush3.bf16.msra.mxu1 %v12230_v37  ;;  %v6828_v47 = vor.u32 %v6827_v44, %v6824_v35  ;;  %v6843_v43 = vrot.slane %v6841_v9, 5  ;;  %v7794_v15 = vshll.u32 %v7658_v59, 16  ;;  %v7800_v20 = vshll.u32 %v7659_v57, 16  ;;  %v7661_v35 = vld [vmem:[#allocation4 + $0x54] sm:$0xf] }
 0x309   : > { %v6838_v6 = vor.u32 %v6837_v50, %v6833_v18  ;;  %v7793_v23 = vrot.slane %v7791_v10, 4  ;;  %v7804_v41 = vshrl.u32 %v7659_v57, 16  ;;  %11956 = vmatprep.subr.bf16.mxu1 %v12233_v45  ;;  %v7810_v60 = vshll.u32 %v7660_v25, 16  ;;  %v7663_v9 = vld [vmem:[#allocation4 + $0x5c] sm:$0x1]  ;;  %v12242_v10 = vld [vmem:[%s15504_s2 + $0x228] sm:$0xff]  }
 0x30a   : > { %v6829_v16 = vrot.slane %v6828_v47, 4  ;;  %v7796_v2 = vrot.slane %v7794_v15, 5  ;;  %v10621_v3 = vrot.slane %v7225_v39, 9  ;;  %v7802_v37 = vrot.slane %v7800_v20, 5  ;;  %v7228_v57 = vld [vmem:[#allocation4 + $0x48] sm:$0xe] }
 0x30b   : > { %9569 = vmatmul.mubr.bf16.gmra.mrb[196].mxu1 %v14505_v56  ;;  %v6839_v19 = vrot.slane %v6838_v6, 4  ;;  %v7806_v31 = vrot.slane %v7804_v41, 4  ;;  %v7339_v1 = vrot.slane %v7226_v22, 5  ;;  %v7812_v14 = vrot.slane %v7810_v60, 5  ;;  %v7229_v15 = vld [vmem:[#allocation4 + $0x4c] sm:$0xf] }
 0x30c   : > { %9576 = vmatprep.mubr.bf16.mxu1 %v10635_v38  ;;  %v6834_v54 = vsel %vm12429_vm5, %v6829_v16, %v6833_v18  ;;  %v7797_v40 = vor.u32 %v7796_v2, %v7793_v23  ;;  %v7342_v28 = vrot.slane %v7227_v62, 5  ;;  %11957 = vmatpush3.bf16.msra.mxu1 %v12233_v45  ;;  %v6846_v33 = vshrl.u32 %v6713_v27, 16  ;;  %v7230_v20 = vld [vmem:[#allocation4 + $0x50] sm:$0x1]  ;;  %v6716_v60 = vld [vmem:[#allocation4 + $0x48] sm:$0xf] }
 0x30d   : > { %v6844_v56 = vsel %vm12429_vm5, %v6839_v19, %v6843_v43  ;;  %v7807_v51 = vor.u32 %v7806_v31, %v7802_v37  ;;  %v14569_v13 = vsel %vm12423_vm4, %v10621_v3, %v7339_v1  ;;  %v7341_v58 = vrot.slane %v7339_v1, 4  ;;  %11958 = vmatprep.subr.bf16.mxu1 %v12236_v34  ;;  %v12231_v3 = vld [vmem:[#allocation4 + $0x3c] sm:$0xff]  }
 0x30e   : > { %v14574_v38 = vcombine.low %v6834_v54, %v6844_v56  ;;  %v7798_v21 = vrot.slane %v7797_v40, 4  ;;  %v6849_v63 = vshll.u32 %v6713_v27, 16  ;;  %v6855_v24 = vshll.u32 %v6714_v0, 16  ;;  %v12245_v1 = vld [vmem:[%s15504_s2 + $0x230] sm:$0xff]   ;;  %v6717_v54 = vld [vmem:[#allocation4 + $0x4c] sm:$0xf] }
 0x30f   : > { %9738 = vmatmul.mubr.bf16.gmra.mrb[232].mxu0 %v12229_v42  ;;  %v7808_v29 = vrot.slane %v7807_v51, 4  ;;  %v14578_v59 = vsel %vm12423_vm4, %v7341_v58, %v7342_v28  ;;  %v6859_v5 = vshrl.u32 %v6714_v0, 16  ;;  %v6848_v55 = vrot.slane %v6846_v33, 4  ;;  %v6718_v0 = vld [vmem:[#allocation4 + $0x50] sm:$0x1] }
 0x310   : > { %9745 = vmatprep.mubr.bf16.mxu0 %v10668_v8  ;;  %v7803_v36 = vsel %vm12429_vm5, %v7798_v21, %v7802_v37  ;;  %v10637_v45 = vcombine.low %v14569_v13, %v14578_v59  ;;  %v6851_v44 = vrot.slane %v6849_v63, 5  ;;  %11959 = vmatpush3.bf16.msra.mxu1 %v12236_v34  ;;  %v6857_v11 = vrot.slane %v6855_v24, 5  ;;  %v7664_v56 = vld [vmem:[#allocation4 + $0x60] sm:$0xf] }
 0x311   : > { %v7813_v25 = vsel %vm12429_vm5, %v7808_v29, %v7812_v14  ;;  %v6861_v18 = vrot.slane %v6859_v5, 4  ;;  %v6865_v50 = vshll.u32 %v6715_v30, 16  ;;  %11960 = vmatprep.subr.bf16.mxu1 %v12239_v48  ;;  %v7815_v47 = vshrl.u32 %v7661_v35, 16  ;;  %v12248_v21 = vld [vmem:[%s15504_s2 + $0x238] sm:$0xff]  }
 0x312   : > { %v10669_v39 = vcombine.low %v7803_v36, %v7813_v25  ;;  %v6852_v8 = vor.u32 %v6851_v44, %v6848_v55  ;;  %v7818_v43 = vshll.u32 %v7661_v35, 16  ;;  %v7824_v6 = vshll.u32 %v7662_v12, 16  ;;  %v7665_v55 = vld [vmem:[#allocation4 + $0x64] sm:$0xf] }
 0x313   : > { %9577 = vmatmul.mubr.bf16.gmra.mrb[200].mxu1 %v14541_v46  ;;  %v6862_v22 = vor.u32 %v6861_v18, %v6857_v11  ;;  %v6867_v62 = vrot.slane %v6865_v50, 5  ;;  %v7828_v23 = vshrl.u32 %v7662_v12, 16  ;;  %v7817_v34 = vrot.slane %v7815_v47, 4  ;;  %v7231_v18 = vld [vmem:[#allocation4 + $0x54] sm:$0xe] }
 0x314   : > { %9584 = vmatprep.mubr.bf16.mxu1 %v10636_v49  ;;  %v6853_v41 = vrot.slane %v6852_v8, 4  ;;  %v7820_v16 = vrot.slane %v7818_v43, 5  ;;  %v7834_v2 = vshll.u32 %v7663_v9, 16  ;;  %11961 = vmatpush3.bf16.msra.mxu1 %v12239_v48  ;;  %v7826_v37 = vrot.slane %v7824_v6, 5  ;;  %v7232_v47 = vld [vmem:[#allocation4 + $0x58] sm:$0xf] }
 0x315   : > { %v6863_v19 = vrot.slane %v6862_v22, 4  ;;  %v7830_v31 = vrot.slane %v7828_v23, 4  ;;  %v10622_v46 = vrot.slane %v7228_v57, 9  ;;  %11962 = vmatprep.subr.bf16.mxu1 %v12242_v10  ;;  %v7346_v27 = vrot.slane %v7229_v15, 5  ;;  %v7233_v6 = vld [vmem:[#allocation4 + $0x5c] sm:$0x1] }
 0x316   : > { %v6858_v53 = vsel %vm12429_vm5, %v6853_v41, %v6857_v11  ;;  %v7821_v7 = vor.u32 %v7820_v16, %v7817_v34  ;;  %v7836_v49 = vrot.slane %v7834_v2, 5  ;;  %v7349_v28 = vrot.slane %v7230_v20, 5  ;;  %v7666_v11 = vld [vmem:[#allocation4 + $0x68] sm:$0x1]  ;;  %v6719_v16 = vld [vmem:[#allocation4 + $0x54] sm:$0xf] }
 0x317   : > { %9746 = vmatmul.mubr.bf16.gmra.mrb[236].mxu0 %v12231_v3  ;;  %v6868_v40 = vsel %vm12429_vm5, %v6863_v19, %v6867_v62  ;;  %v7831_v14 = vor.u32 %v7830_v31, %v7826_v37  ;;  %v6870_v42 = vshrl.u32 %v6716_v60, 16  ;;  %v14602_v30 = vsel %vm12423_vm4, %v10622_v46, %v7346_v27  ;;  %v6720_v31 = vld [vmem:[#allocation4 + $0x58] sm:$0xf] }
 0x318   : > { %9753 = vmatprep.mubr.bf16.mxu0 %v10669_v39  ;;  %v10605_v51 = vcombine.low %v6858_v53, %v6868_v40  ;;  %v7822_v58 = vrot.slane %v7821_v7, 4  ;;  %v7348_v48 = vrot.slane %v7346_v27, 4  ;;  %11963 = vmatpush3.bf16.msra.mxu1 %v12242_v10  ;;  %v6873_v35 = vshll.u32 %v6716_v60, 16  ;;  %v6721_v40 = vld [vmem:[#allocation4 + $0x5c] sm:$0x1] }
 0x319   : > { %v7832_v33 = vrot.slane %v7831_v14, 4  ;;  %v6872_v63 = vrot.slane %v6870_v42, 4  ;;  %v6879_v29 = vshll.u32 %v6717_v54, 16  ;;  %11964 = vmatprep.subr.bf16.mxu1 %v12245_v1  ;;  %v6883_v12 = vshrl.u32 %v6717_v54, 16 }
 0x31a   : > { %v7827_v24 = vsel %vm12429_vm5, %v7822_v58, %v7826_v37  ;;  %v7350_v5 = vsel %vm12423_vm4, %v7348_v48, %v7349_v28  ;;  %v6889_v36 = vshll.u32 %v6718_v0, 16  ;;  %v6875_v57 = vrot.slane %v6873_v35, 5  ;;  %v12234_v28 = vld [vmem:[#allocation4 + $0x54] sm:$0xff]  }
 0x31b   : > { %9585 = vmatmul.mubr.bf16.gmra.mrb[204].mxu1 %v14574_v38  ;;  %v7837_v44 = vsel %vm12429_vm5, %v7832_v33, %v7836_v49  ;;  %v10638_v9 = vcombine.low %v14602_v30, %v7350_v5  ;;  %v6881_v25 = vrot.slane %v6879_v29, 5  ;;  %v6885_v10 = vrot.slane %v6883_v12, 4  ;;  %v12232_v38 = vld [vmem:[#allocation4 + $0x48] sm:$0xff]   ;;  %v7668_v29 = vld [vmem:[#allocation4 + $0x70] sm:$0xf] }
 0x31c   : > { %9592 = vmatprep.mubr.bf16.mxu1 %v10637_v45  ;;  %v10670_v50 = vcombine.low %v7827_v24, %v7837_v44  ;;  %v6891_v39 = vrot.slane %v6889_v36, 5  ;;  %v7839_v8 = vshrl.u32 %v7664_v56, 16  ;;  %11965 = vmatpush3.bf16.msra.mxu1 %v12245_v1  ;;  %v6876_v43 = vor.u32 %v6875_v57, %v6872_v63  ;;  %v7667_v30 = vld [vmem:[#allocation4 + $0x6c] sm:$0xf]  ;;  %v7234_v44 = vld [vmem:[#allocation4 + $0x60] sm:$0xe] }
 0x31d   : > { %v7842_v15 = vshll.u32 %v7664_v56, 16  ;;  %v7848_v22 = vshll.u32 %v7665_v55, 16  ;;  %v7852_v62 = vshrl.u32 %v7665_v55, 16  ;;  %11966 = vmatprep.subr.bf16.mxu1 %v12248_v21  ;;  %v6886_v23 = vor.u32 %v6885_v10, %v6881_v25  ;;  %v7669_v55 = vld [vmem:[#allocation4 + $0x74] sm:$0x1] }
 0x31e   : > { %v7841_v20 = vrot.slane %v7839_v8, 4  ;;  %v7858_v41 = vshll.u32 %v7666_v11, 16  ;;  %v10623_v34 = vrot.slane %v7231_v18, 9  ;;  %v6877_v13 = vrot.slane %v6876_v43, 4  ;;  %v7236_v43 = vld [vmem:[#allocation4 + $0x68] sm:$0x1] }
 0x31f   : > { %9754 = vmatmul.mubr.bf16.gmra.mrb[240].mxu0 %v12232_v38  ;;  %v7844_v59 = vrot.slane %v7842_v15, 5  ;;  %v7850_v45 = vrot.slane %v7848_v22, 5  ;;  %v7854_v2 = vrot.slane %v7852_v62, 4  ;;  %v6887_v60 = vrot.slane %v6886_v23, 4  ;;  %v6722_v23 = vld [vmem:[#allocation4 + $0x60] sm:$0xf] }
 0x320   : > { %9761 = vmatprep.mubr.bf16.mxu0 %v10670_v50  ;;  %v7860_v3 = vrot.slane %v7858_v41, 5  ;;  %v7353_v19 = vrot.slane %v7232_v47, 5  ;;  %v7356_v37 = vrot.slane %v7233_v6, 5  ;;  %11967 = vmatpush3.bf16.msra.mxu1 %v12248_v21  ;;  %v6882_v46 = vsel %vm12429_vm5, %v6877_v13, %v6881_v25  ;;  %v14624_v48 = vpop.f32.mrb[160].mxu0  ;;  %v7235_v50 = vld [vmem:[#allocation4 + $0x64] sm:$0xf] }
 0x321   : > { %v7845_v1 = vor.u32 %v7844_v59, %v7841_v20  ;;  %v7855_v53 = vor.u32 %v7854_v2, %v7850_v45  ;;  %v6894_v7 = vshrl.u32 %v6719_v16, 16  ;;  %v6892_v49 = vsel %vm12429_vm5, %v6887_v60, %v6891_v39  ;;  %v14628_v24 = vpop.f32.mrb[161].mxu0  ;;  %v6723_v13 = vld [vmem:[#allocation4 + $0x64] sm:$0xf] }
 0x322   : > { %v7354_v27 = vsel %vm12423_vm4, %v10623_v34, %v7353_v19  ;;  %v7355_v54 = vrot.slane %v7353_v19, 4  ;;  %v6897_v14 = vshll.u32 %v6719_v16, 16  ;;  %v10606_v0 = vcombine.low %v6882_v46, %v6892_v49 }
 0x323   : > { %9593 = vmatmul.mubr.bf16.gmra.mrb[208].mxu1 %v10605_v51  ;;  %v7846_v42 = vrot.slane %v7845_v1, 4  ;;  %v7856_v56 = vrot.slane %v7855_v53, 4  ;;  %v6896_v58 = vrot.slane %v6894_v7, 4  ;;  %v6903_v63 = vshll.u32 %v6720_v31, 16  ;;  %v6724_v53 = vld [vmem:[#allocation4 + $0x68] sm:$0x1] }
 0x324   : > { %9600 = vmatprep.mubr.bf16.mxu1 %v10638_v9  ;;  %v7357_v21 = vsel %vm12423_vm4, %v7355_v54, %v7356_v37  ;;  %v6899_v33 = vrot.slane %v6897_v14, 5  ;;  %v6907_v35 = vshrl.u32 %v6720_v31, 16  ;;  %v6913_v36 = vshll.u32 %v6721_v40, 16  ;;  %v14634_v9 = vpop.f32.mrb[162].mxu0 }
 0x325   : > { %v7851_v51 = vsel %vm12429_vm5, %v7846_v42, %v7850_v45  ;;  %v7861_v5 = vsel %vm12429_vm5, %v7856_v56, %v7860_v3  ;;  %v10639_v12 = vcombine.low %v7354_v27, %v7357_v21  ;;  %v6905_v11 = vrot.slane %v6903_v63, 5  ;;  %v14636_v10 = vpop.f32.mrb[163].mxu0  ;;  %v12235_v27 = vld [vmem:[#allocation4 + $0x60] sm:$0xff]  }
 0x326   : > { %v10671_v57 = vcombine.low %v7851_v51, %v7861_v5  ;;  %v6900_v25 = vor.u32 %v6899_v33, %v6896_v58  ;;  %v6909_v18 = vrot.slane %v6907_v35, 4  ;;  %v6915_v39 = vrot.slane %v6913_v36, 5  ;;  %v7672_v36 = vld [vmem:[#allocation4 + $0x80] sm:$0x1] }
 0x327   : > { %9762 = vmatmul.mubr.bf16.gmra.mrb[244].mxu0 %v12234_v28  ;;  %v7863_v8 = vshrl.u32 %v7667_v30, 16  ;;  %v7866_v47 = vshll.u32 %v7667_v30, 16  ;;  %v7872_v38 = vshll.u32 %v7668_v29, 16  ;;  %v7876_v62 = vshrl.u32 %v7668_v29, 16  ;;  %v7671_v29 = vld [vmem:[#allocation4 + $0x7c] sm:$0xf] }
 0x328   : > { %9769 = vmatprep.mubr.bf16.mxu0 %v10671_v57  ;;  %v6901_v15 = vrot.slane %v6900_v25, 4  ;;  %v6910_v22 = vor.u32 %v6909_v18, %v6905_v11  ;;  %v7882_v6 = vshll.u32 %v7669_v55, 16  ;;  %v10624_v16 = vrot.slane %v7234_v44, 9  ;;  %v7237_v44 = vld [vmem:[#allocation4 + $0x6c] sm:$0xe] }
 0x329   : > { %v7865_v20 = vrot.slane %v7863_v8, 4  ;;  %v7868_v41 = vrot.slane %v7866_v47, 5  ;;  %v7874_v34 = vrot.slane %v7872_v38, 5  ;;  %v7878_v2 = vrot.slane %v7876_v62, 4 }
 0x32a   : > { %v6906_v59 = vsel %vm12429_vm5, %v6901_v15, %v6905_v11  ;;  %v6911_v45 = vrot.slane %v6910_v22, 4  ;;  %v7884_v60 = vrot.slane %v7882_v6, 5  ;;  %v7360_v19 = vrot.slane %v7235_v50, 5  ;;  %v7238_v50 = vld [vmem:[#allocation4 + $0x70] sm:$0xf] }
 0x32b   : > { %9601 = vmatmul.mubr.bf16.gmra.mrb[212].mxu1 %v10606_v0  ;;  %v7869_v3 = vor.u32 %v7868_v41, %v7865_v20  ;;  %v7363_v37 = vrot.slane %v7236_v43, 5  ;;  %v6918_v31 = vshrl.u32 %v6722_v23, 16  ;;  %v7879_v1 = vor.u32 %v7878_v2, %v7874_v34  ;;  %v7670_v0 = vld [vmem:[#allocation4 + $0x78] sm:$0xf]  ;;  %v7239_v43 = vld [vmem:[#allocation4 + $0x74] sm:$0x1] }
 0x32c   : > { %9608 = vmatprep.mubr.bf16.mxu1 %v10639_v12  ;;  %v6916_v46 = vsel %vm12429_vm5, %v6911_v45, %v6915_v39  ;;  %v6921_v7 = vshll.u32 %v6722_v23, 16  ;;  %v6927_v49 = vshll.u32 %v6723_v13, 16  ;;  %v7361_v14 = vsel %vm12423_vm4, %v10624_v16, %v7360_v19  ;;  %v6725_v23 = vld [vmem:[#allocation4 + $0x6c] sm:$0xf] }
 0x32d   : > { %v10607_v54 = vcombine.low %v6906_v59, %v6916_v46  ;;  %v7870_v40 = vrot.slane %v7869_v3, 4  ;;  %v7362_v28 = vrot.slane %v7360_v19, 4  ;;  %v7880_v42 = vrot.slane %v7879_v1, 4  ;;  %v12237_v59 = vld [vmem:[#allocation4 + $0x6c] sm:$0xff]   ;;  %v6727_v46 = vld [vmem:[#allocation4 + $0x74] sm:$0x1] }
 0x32e   : > { %v6920_v56 = vrot.slane %v6918_v31, 4  ;;  %v6923_v58 = vrot.slane %v6921_v7, 5  ;;  %v6929_v30 = vrot.slane %v6927_v49, 5  ;;  %v6931_v63 = vshrl.u32 %v6723_v13, 16  ;;  %v6726_v13 = vld [vmem:[#allocation4 + $0x70] sm:$0xf] }
 0x32f   : > { %9770 = vmatmul.mubr.bf16.gmra.mrb[248].mxu0 %v12235_v27  ;;  %v7875_v21 = vsel %vm12429_vm5, %v7870_v40, %v7874_v34  ;;  %v7364_v33 = vsel %vm12423_vm4, %v7362_v28, %v7363_v37  ;;  %v6937_v35 = vshll.u32 %v6724_v53, 16  ;;  %v7885_v51 = vsel %vm12429_vm5, %v7880_v42, %v7884_v60  ;;  %v7674_v42 = vld [vmem:[#allocation4 + $0x88] sm:$0xf] }
 0x330   : > { %v10640_v5 = vcombine.low %v7361_v14, %v7364_v33  ;;  %v6924_v12 = vor.u32 %v6923_v58, %v6920_v56  ;;  %v7887_v55 = vshrl.u32 %v7670_v0, 16  ;;  %v10672_v57 = vcombine.low %v7875_v21, %v7885_v51 }
 0x331   : > { %v6933_v25 = vrot.slane %v6931_v63, 4  ;;  %v6939_v11 = vrot.slane %v6937_v35, 5  ;;  %v7890_v18 = vshll.u32 %v7670_v0, 16  ;;  %v7896_v47 = vshll.u32 %v7671_v29, 16 }
 0x332   : > { %v6925_v39 = vrot.slane %v6924_v12, 4  ;;  %v7889_v8 = vrot.slane %v7887_v55, 4  ;;  %v7900_v38 = vshrl.u32 %v7671_v29, 16  ;;  %9777 = vmatprep.mubr.bf16.mxu0 %v10672_v57  ;;  %v7906_v62 = vshll.u32 %v7672_v36, 16  ;;  %v7675_v29 = vld [vmem:[#allocation4 + $0x8c] sm:$0x1] }
 0x333   : > { %9609 = vmatmul.mubr.bf16.gmra.mrb[216].mxu1 %v10607_v54  ;;  %v6934_v15 = vor.u32 %v6933_v25, %v6929_v30  ;;  %v7892_v22 = vrot.slane %v7890_v18, 5  ;;  %v10625_v6 = vrot.slane %v7237_v44, 9  ;;  %v7898_v41 = vrot.slane %v7896_v47, 5  ;;  %v7673_v54 = vld [vmem:[#allocation4 + $0x84] sm:$0xf]  ;;  %v12238_v12 = vld [vmem:[#allocation4 + $0x78] sm:$0xff]  }
 0x334   : > { %9616 = vmatprep.mubr.bf16.mxu1 %v10640_v5  ;;  %v6930_v20 = vsel %vm12429_vm5, %v6925_v39, %v6929_v30  ;;  %v7902_v34 = vrot.slane %v7900_v38, 4  ;;  %v7367_v16 = vrot.slane %v7238_v50, 5  ;;  %v7908_v60 = vrot.slane %v7906_v62, 5  ;;  %v7240_v57 = vld [vmem:[#allocation4 + $0x78] sm:$0xe] }
 0x335   : > { %v6935_v45 = vrot.slane %v6934_v15, 4  ;;  %v7893_v2 = vor.u32 %v7892_v22, %v7889_v8  ;;  %v7370_v3 = vrot.slane %v7239_v43, 5  ;;  %v6942_v1 = vshrl.u32 %v6725_v23, 16  ;;  %v7241_v25 = vld [vmem:[#allocation4 + $0x7c] sm:$0xf] }
 0x336   : > { %v7903_v19 = vor.u32 %v7902_v34, %v7898_v41  ;;  %v7368_v37 = vsel %vm12423_vm4, %v10625_v6, %v7367_v16  ;;  %v7369_v31 = vrot.slane %v7367_v16, 4  ;;  %v6945_v49 = vshll.u32 %v6725_v23, 16  ;;  %v7242_v8 = vld [vmem:[#allocation4 + $0x80] sm:$0x1]  ;;  %v6728_v22 = vld [vmem:[#allocation4 + $0x78] sm:$0xf] }
 0x337   : > { %9778 = vmatmul.mubr.bf16.gmra.mrb[252].mxu0 %v12237_v59  ;;  %v6940_v53 = vsel %vm12429_vm5, %v6935_v45, %v6939_v11  ;;  %v7894_v7 = vrot.slane %v7893_v2, 4  ;;  %v6951_v27 = vshll.u32 %v6726_v13, 16  ;;  %v6944_v0 = vrot.slane %v6942_v1, 4 }
 0x338   : > { %v10608_v40 = vcombine.low %v6930_v20, %v6940_v53  ;;  %v7904_v14 = vrot.slane %v7903_v19, 4  ;;  %v7371_v28 = vsel %vm12423_vm4, %v7369_v31, %v7370_v3  ;;  %v6947_v30 = vrot.slane %v6945_v49, 5  ;;  %v6730_v49 = vld [vmem:[#allocation4 + $0x80] sm:$0x1] }
 0x339   : > { %v7899_v56 = vsel %vm12429_vm5, %v7894_v7, %v7898_v41  ;;  %v10641_v58 = vcombine.low %v7368_v37, %v7371_v28  ;;  %v6953_v21 = vrot.slane %v6951_v27, 5  ;;  %v6955_v63 = vshrl.u32 %v6726_v13, 16  ;;  %v6729_v41 = vld [vmem:[#allocation4 + $0x7c] sm:$0xf] }
 0x33a   : > { %v7909_v33 = vsel %vm12429_vm5, %v7904_v14, %v7908_v60  ;;  %v6961_v35 = vshll.u32 %v6727_v46, 16  ;;  %v7911_v51 = vshrl.u32 %v7673_v54, 16  ;;  %v6948_v36 = vor.u32 %v6947_v30, %v6944_v0 }
 0x33b   : > { %9617 = vmatmul.mubr.bf16.gmra.mrb[220].mxu1 %v10608_v40  ;;  %v10673_v5 = vcombine.low %v7899_v56, %v7909_v33  ;;  %v7914_v55 = vshll.u32 %v7673_v54, 16  ;;  %v7920_v44 = vshll.u32 %v7674_v42, 16  ;;  %v6957_v11 = vrot.slane %v6955_v63, 4  ;;  %v7676_v54 = vld [vmem:[#allocation4 + $0x90] sm:$0xf] }
 0x33c   : > { %9624 = vmatprep.mubr.bf16.mxu1 %v10641_v58  ;;  %v6963_v18 = vrot.slane %v6961_v35, 5  ;;  %v7913_v50 = vrot.slane %v7911_v51, 4  ;;  %v7924_v39 = vshrl.u32 %v7674_v42, 16  ;;  %v6949_v47 = vrot.slane %v6948_v36, 4  ;;  %v7677_v42 = vld [vmem:[#allocation4 + $0x94] sm:$0xf] }
 0x33d   : > { %9785 = vmatprep.mubr.bf16.mxu0 %v10673_v5  ;;  %v7916_v38 = vrot.slane %v7914_v55, 5  ;;  %v7922_v43 = vrot.slane %v7920_v44, 5  ;;  %v7930_v15 = vshll.u32 %v7675_v29, 16  ;;  %v6958_v62 = vor.u32 %v6957_v11, %v6953_v21  ;;  %v7678_v33 = vld [vmem:[#allocation4 + $0x98] sm:$0x1]  ;;  %v12240_v35 = vld [vmem:[#allocation4 + $0x84] sm:$0xff]  }
 0x33e   : > { %v7926_v6 = vrot.slane %v7924_v39, 4  ;;  %v10626_v23 = vrot.slane %v7240_v57, 9  ;;  %v7374_v20 = vrot.slane %v7241_v25, 5  ;;  %v6954_v34 = vsel %vm12429_vm5, %v6949_v47, %v6953_v21  ;;  %v7244_v25 = vld [vmem:[#allocation4 + $0x88] sm:$0xf] }
 0x33f   : > { %9786 = vmatmul.mubr.bf16.gmra.mrb[0].mxu0 %v12238_v12  ;;  %v7917_v16 = vor.u32 %v7916_v38, %v7913_v50  ;;  %v7932_v13 = vrot.slane %v7930_v15, 5  ;;  %v7377_v59 = vrot.slane %v7242_v8, 5  ;;  %v6959_v45 = vrot.slane %v6958_v62, 4  ;;  %v7243_v12 = vld [vmem:[#allocation4 + $0x84] sm:$0xe] }
 0x340   : > { %v7927_v2 = vor.u32 %v7926_v6, %v7922_v43  ;;  %v7375_v60 = vsel %vm12423_vm4, %v10626_v23, %v7374_v20  ;;  %v7376_v3 = vrot.slane %v7374_v20, 4  ;;  %v6966_v37 = vshrl.u32 %v6728_v22, 16  ;;  %v7245_v11 = vld [vmem:[#allocation4 + $0x8c] sm:$0x1]  ;;  %v6731_v47 = vld [vmem:[#allocation4 + $0x84] sm:$0xf] }
 0x341   : > { %v7918_v19 = vrot.slane %v7917_v16, 4  ;;  %v6969_v31 = vshll.u32 %v6728_v22, 16  ;;  %v6975_v46 = vshll.u32 %v6729_v41, 16  ;;  %v6964_v1 = vsel %vm12429_vm5, %v6959_v45, %v6963_v18  ;;  %v6732_v38 = vld [vmem:[#allocation4 + $0x88] sm:$0xf] }
 0x342   : > { %v7928_v53 = vrot.slane %v7927_v2, 4  ;;  %v7378_v7 = vsel %vm12423_vm4, %v7376_v3, %v7377_v59  ;;  %v6979_v27 = vshrl.u32 %v6729_v41, 16  ;;  %v10609_v40 = vcombine.low %v6954_v34, %v6964_v1 }
 0x343   : > { %v7923_v14 = vsel %vm12429_vm5, %v7918_v19, %v7922_v43  ;;  %v10642_v28 = vcombine.low %v7375_v60, %v7378_v7  ;;  %v6968_v0 = vrot.slane %v6966_v37, 4  ;;  %v6971_v58 = vrot.slane %v6969_v31, 5  ;;  %v6733_v31 = vld [vmem:[#allocation4 + $0x8c] sm:$0x1] }
 0x344   : > { %v7933_v56 = vsel %vm12429_vm5, %v7928_v53, %v7932_v13  ;;  %v6977_v30 = vrot.slane %v6975_v46, 5  ;;  %v6981_v21 = vrot.slane %v6979_v27, 4  ;;  %9625 = vmatmul.mubr.bf16.gmra.mrb[224].mxu1 %v10609_v40  ;;  %v6985_v29 = vshll.u32 %v6730_v49, 16 }
 0x345   : > { %v10674_v63 = vcombine.low %v7923_v14, %v7933_v56  ;;  %v7935_v51 = vshrl.u32 %v7676_v54, 16  ;;  %v7938_v5 = vshll.u32 %v7676_v54, 16  ;;  %9632 = vmatprep.mubr.bf16.mxu1 %v10642_v28  ;;  %v6972_v36 = vor.u32 %v6971_v58, %v6968_v0 }
 0x346   : > { %v6982_v55 = vor.u32 %v6981_v21, %v6977_v30  ;;  %v7944_v44 = vshll.u32 %v7677_v42, 16  ;;  %v7948_v57 = vshrl.u32 %v7677_v42, 16  ;;  %v6987_v18 = vrot.slane %v6985_v29, 5  ;;  %v7680_v21 = vld [vmem:[#allocation4 + $0xa0] sm:$0xf] }
 0x347   : > { %9793 = vmatprep.mubr.bf16.mxu0 %v10674_v63  ;;  %v7937_v50 = vrot.slane %v7935_v51, 4  ;;  %v7940_v39 = vrot.slane %v7938_v5, 5  ;;  %v7954_v8 = vshll.u32 %v7678_v33, 16  ;;  %v14674_v43 = vpop.f32.mrb[164].mxu0  ;;  %v14676_v15 = vpop.f32.mrb[132].mxu1  ;;  %v6973_v22 = vrot.slane %v6972_v36, 4 }
 0x348   : > { %9794 = vmatmul.mubr.bf16.gmra.mrb[4].mxu0 %v12240_v35  ;;  %v6983_v62 = vrot.slane %v6982_v55, 4  ;;  %v7946_v6 = vrot.slane %v7944_v44, 5  ;;  %v7950_v23 = vrot.slane %v7948_v57, 4  ;;  %v14678_v20 = vpop.f32.mrb[165].mxu0  ;;  %v14680_v41 = vpop.f32.mrb[133].mxu1  ;;  %v10627_v13 = vrot.slane %v7243_v12, 9 }
 0x349   : > { %v7941_v34 = vor.u32 %v7940_v39, %v7937_v50  ;;  %v7956_v16 = vrot.slane %v7954_v8, 5  ;;  %v7381_v59 = vrot.slane %v7244_v25, 5  ;;  %v14682_v45 = vpop.f32.mrb[166].mxu0  ;;  %v14684_v2 = vpop.f32.mrb[134].mxu1  ;;  %v6978_v60 = vsel %vm12429_vm5, %v6973_v22, %v6977_v30  ;;  %v7679_v30 = vld [vmem:[#allocation4 + $0x9c] sm:$0xf] }
 0x34a   : > { %v6988_v3 = vsel %vm12429_vm5, %v6983_v62, %v6987_v18  ;;  %v7951_v19 = vor.u32 %v7950_v23, %v7946_v6  ;;  %v7384_v37 = vrot.slane %v7245_v11, 5  ;;  %v14690_v46 = vpop.f32.mrb[167].mxu0  ;;  %v14692_v1 = vpop.f32.mrb[135].mxu1  ;;  %v6990_v40 = vshrl.u32 %v6731_v47, 16  ;;  %v12241_v35 = vld [vmem:[#allocation4 + $0x90] sm:$0xff]  }
 0x34b   : > { %v10610_v53 = vcombine.low %v6978_v60, %v6988_v3  ;;  %v7942_v7 = vrot.slane %v7941_v34, 4  ;;  %v7382_v49 = vsel %vm12423_vm4, %v10627_v13, %v7381_v59  ;;  %v7383_v27 = vrot.slane %v7381_v59, 4  ;;  %v7681_v5 = vld [vmem:[#allocation4 + $0xa4] sm:$0x1]  ;;  %v7246_v12 = vld [vmem:[#allocation4 + $0x90] sm:$0xe] }
 0x34c   : > { %v7952_v54 = vrot.slane %v7951_v19, 4  ;;  %v6993_v14 = vshll.u32 %v6731_v47, 16  ;;  %v6999_v28 = vshll.u32 %v6732_v38, 16  ;;  %v7003_v56 = vshrl.u32 %v6732_v38, 16  ;;  %v7247_v25 = vld [vmem:[#allocation4 + $0x94] sm:$0xf] }
 0x34d   : > { %9633 = vmatmul.mubr.bf16.gmra.mrb[228].mxu1 %v10610_v53  ;;  %v7947_v0 = vsel %vm12429_vm5, %v7942_v7, %v7946_v6  ;;  %v7385_v42 = vsel %vm12423_vm4, %v7383_v27, %v7384_v37  ;;  %v7009_v58 = vshll.u32 %v6733_v31, 16  ;;  %v6992_v29 = vrot.slane %v6990_v40, 4  ;;  %v7248_v47 = vld [vmem:[#allocation4 + $0x98] sm:$0x1]  ;;  %v14709_v34 = vld [vmem:[%s15506_s4] ss:$0 sm:$0xff] }
 0x34e   : > { %v7957_v33 = vsel %vm12429_vm5, %v7952_v54, %v7956_v16  ;;  %v10643_v63 = vcombine.low %v7382_v49, %v7385_v42  ;;  %v6995_v51 = vrot.slane %v6993_v14, 5  ;;  %v7001_v55 = vrot.slane %v6999_v28, 5 }
 0x34f   : > { %v10675_v36 = vcombine.low %v7947_v0, %v7957_v33  ;;  %v7005_v44 = vrot.slane %v7003_v56, 4  ;;  %v7011_v57 = vrot.slane %v7009_v58, 5  ;;  %v14702_v11 = vpop.f32.mrb[136].mxu1  ;;  %v7959_v50 = vshrl.u32 %v7679_v30, 16  ;;  %v6734_v33 = vld [vmem:[#allocation4 + $0x90] sm:$0xf] }
 0x350   : > { %9640 = vmatprep.mubr.bf16.mxu1 %v10643_v63  ;;  %v6996_v18 = vor.u32 %v6995_v51, %v6992_v29  ;;  %v7962_v39 = vshll.u32 %v7679_v30, 16  ;;  %v7968_v8 = vshll.u32 %v7680_v21, 16  ;;  %v14704_v38 = vpop.f32.mrb[137].mxu1  ;;  %v7972_v62 = vshrl.u32 %v7680_v21, 16 }
 0x351   : > { %9801 = vmatprep.mubr.bf16.mxu0 %v10675_v36  ;;  %v7006_v22 = vor.u32 %v7005_v44, %v7001_v55  ;;  %v7978_v6 = vshll.u32 %v7681_v5, 16  ;;  %v10628_v23 = vrot.slane %v7246_v12, 9  ;;  %v14711_v16 = vpop.f32.mrb[168].mxu0  ;;  %v14713_v13 = vpop.f32.mrb[138].mxu1  ;;  %v7961_v60 = vrot.slane %v7959_v50, 4 }
 0x352   : > { %9802 = vmatmul.mubr.bf16.gmra.mrb[8].mxu0 %v12241_v35  ;;  %v6997_v59 = vrot.slane %v6996_v18, 4  ;;  %v7964_v3 = vrot.slane %v7962_v39, 5  ;;  %v7970_v19 = vrot.slane %v7968_v8, 5  ;;  %v14715_v37 = vpop.f32.mrb[169].mxu0  ;;  %v14717_v31 = vpop.f32.mrb[139].mxu1  ;;  %v7974_v7 = vrot.slane %v7972_v62, 4 }
 0x353   : > { %v7007_v53 = vrot.slane %v7006_v22, 4  ;;  %v7980_v49 = vrot.slane %v7978_v6, 5  ;;  %v7388_v27 = vrot.slane %v7247_v25, 5  ;;  %v14719_v54 = vpop.f32.mrb[170].mxu0  ;;  %v7391_v28 = vrot.slane %v7248_v47, 5 }
 0x354   : > { %v7002_v40 = vsel %vm12429_vm5, %v6997_v59, %v7001_v55  ;;  %v7965_v14 = vor.u32 %v7964_v3, %v7961_v60  ;;  %v11450_v0 = vadd.f32 %v14454_v52, %v14447_v26  ;;  %v14725_v42 = vpop.f32.mrb[171].mxu0  ;;  %v7975_v58 = vor.u32 %v7974_v7, %v7970_v19  ;;  %v6735_v5 = vld [vmem:[#allocation4 + $0x94] sm:$0xf]  ;;  %v6736_v25 = vld [vmem:[#allocation4 + $0x98] sm:$0x1] }
 0x355   : > { %v7012_v56 = vsel %vm12429_vm5, %v7007_v53, %v7011_v57  ;;  %v7389_v30 = vsel %vm12423_vm4, %v10628_v23, %v7388_v27  ;;  %v7390_v21 = vrot.slane %v7388_v27, 4  ;;  %v11453_v51 = vadd.f32 %v14482_v32, %v14477_v61  ;;  %v7682_v32 = vld [vmem:[#allocation4 + $0xa8] sm:$0xf]  ;;  %v7684_v62 = vld [vmem:[#allocation4 + $0xb0] sm:$0x1] }
 0x356   : > { %v10611_v63 = vcombine.low %v7002_v40, %v7012_v56  ;;  %v7966_v35 = vrot.slane %v7965_v14, 4  ;;  %v9241_v29 = vadd.f32 %v11450_v0, %v14709_v34  ;;  %v7976_v26 = vrot.slane %v7975_v58, 4  ;;  %v7249_v3 = vld [vmem:[#allocation4 + $0x9c] sm:$0xe]  ;;  %v7250_v27 = vld [vmem:[#allocation4 + $0xa0] sm:$0xf] }
 0x357   : > { %v7392_v52 = vsel %vm12423_vm4, %v7390_v21, %v7391_v28  ;;  %v11562_v12 = vadd.f32 %v14628_v24, %v14624_v48  ;;  %v11565_v36 = vadd.f32 %v14636_v10, %v14634_v9  ;;  %v9244_v57 = vadd.f32 %v11453_v51, %v14709_v34  ;;  %v7683_v24 = vld [vmem:[#allocation4 + $0xac] sm:$0xf]  ;;  %v12243_v10 = vld [vmem:[#allocation4 + $0x9c] sm:$0xff]   ;;  %v7251_v56 = vld [vmem:[#allocation4 + $0xa4] sm:$0x1] }
 0x358   : > { %9641 = vmatmul.mubr.bf16.gmra.mrb[232].mxu1 %v10611_v63  ;;  %v7971_v55 = vsel %vm12429_vm5, %v7966_v35, %v7970_v19  ;;  %v10644_v44 = vcombine.low %v7389_v30, %v7392_v52  ;;  %v7014_v61 = vshrl.u32 %v6734_v33, 16  ;;  %v7981_v18 = vsel %vm12429_vm5, %v7976_v26, %v7980_v49 }
 0x359   : > { %v14745_v50 = vadd.f32 %v11562_v12, %v9241_v29  ;;  %v7017_v39 = vshll.u32 %v6734_v33, 16  ;;  %v7023_v48 = vshll.u32 %v6735_v5, 16  ;;  %v10676_v8 = vcombine.low %v7971_v55, %v7981_v18 }
 0x35a   : > { %9648 = vmatprep.mubr.bf16.mxu1 %v10644_v44  ;;  %v14747_v9 = vadd.f32 %v11565_v36, %v9244_v57  ;;  %v7016_v47 = vrot.slane %v7014_v61, 4  ;;  %v7027_v22 = vshrl.u32 %v6735_v5, 16  ;;  %v7033_v59 = vshll.u32 %v6736_v25, 16  ;;  %v6737_v61 = vld [vmem:[#allocation4 + $0x9c] sm:$0xf] }
 0x35b   : > { %15620 = vst [vmem:[#allocation30_spill] sm:$0xff] %v14745_v50  ;;  %v7019_v6 = vrot.slane %v7017_v39, 5  ;;  %v7025_v23 = vrot.slane %v7023_v48, 5  ;;  %v7983_v60 = vshrl.u32 %v7682_v32, 16  ;;  %9809 = vmatprep.mubr.bf16.mxu0 %v10676_v8  ;;  %v7986_v53 = vshll.u32 %v7682_v32, 16 }
 0x35c   : > { %15621 = vst [vmem:[#allocation6_spill] sm:$0xff] %v14747_v9  ;;  %v7029_v19 = vrot.slane %v7027_v22, 4  ;;  %v7992_v7 = vshll.u32 %v7683_v24, 16  ;;  %v7996_v49 = vshrl.u32 %v7683_v24, 16  ;;  %9810 = vmatmul.mubr.bf16.gmra.mrb[12].mxu0 %v12243_v10  ;;  %v7035_v14 = vrot.slane %v7033_v59, 5 }
 0x35d   : > { %v7020_v40 = vor.u32 %v7019_v6, %v7016_v47  ;;  %v7985_v28 = vrot.slane %v7983_v60, 4  ;;  %v8002_v0 = vshll.u32 %v7684_v62, 16  ;;  %v7988_v30 = vrot.slane %v7986_v53, 5  ;;  %v6738_v8 = vld [vmem:[#allocation4 + $0xa0] sm:$0xf] }
 0x35e   : > { %v7030_v58 = vor.u32 %v7029_v19, %v7025_v23  ;;  %v7994_v21 = vrot.slane %v7992_v7, 5  ;;  %v7998_v33 = vrot.slane %v7996_v49, 4  ;;  %v10629_v29 = vrot.slane %v7249_v3, 9  ;;  %v6739_v62 = vld [vmem:[#allocation4 + $0xa4] sm:$0x1]  ;;  %v12244_v7 = vld [vmem:[#allocation4 + $0xa8] sm:$0xff]  }
 0x35f   : > { %v7021_v63 = vrot.slane %v7020_v40, 4  ;;  %v8004_v35 = vrot.slane %v8002_v0, 5  ;;  %v7395_v51 = vrot.slane %v7250_v27, 5  ;;  %v7989_v26 = vor.u32 %v7988_v30, %v7985_v28  ;;  %v14749_v36 = vpop.f32.mrb[140].mxu1  ;;  %v7685_v6 = vld [vmem:[#allocation4 + $0xb4] sm:$0xf] }
 0x360   : > { %v7031_v5 = vrot.slane %v7030_v58, 4  ;;  %v7999_v52 = vor.u32 %v7998_v33, %v7994_v21  ;;  %v7398_v12 = vrot.slane %v7251_v56, 5  ;;  %v14757_v25 = vadd.f32 %v14678_v20, %v14674_v43  ;;  %v14759_v32 = vpop.f32.mrb[141].mxu1  ;;  %v7686_v3 = vld [vmem:[#allocation4 + $0xb8] sm:$0xf] }
 0x361   : > { %v7026_v55 = vsel %vm12429_vm5, %v7021_v63, %v7025_v23  ;;  %v7396_v44 = vsel %vm12423_vm4, %v10629_v29, %v7395_v51  ;;  %v7397_v57 = vrot.slane %v7395_v51, 4  ;;  %v7990_v39 = vrot.slane %v7989_v26, 4  ;;  %v14767_v10 = vpop.f32.mrb[142].mxu1  ;;  %v14779_v23 = vpop.f32.mrb[172].mxu0  ;;  %v7687_v19 = vld [vmem:[#allocation4 + $0xbc] sm:$0x1] }
 0x362   : > { %v7036_v18 = vsel %vm12429_vm5, %v7031_v5, %v7035_v14  ;;  %v8000_v48 = vrot.slane %v7999_v52, 4  ;;  %v14765_v24 = vadd.f32 %v14680_v41, %v14676_v15  ;;  %v14773_v20 = vadd.f32 %v14690_v46, %v14682_v45  ;;  %v14781_v15 = vpop.f32.mrb[143].mxu1  ;;  %v14787_v45 = vpop.f32.mrb[173].mxu0  ;;  %v7252_v29 = vld [vmem:[#allocation4 + $0xa8] sm:$0xe] }
 0x363   : > { %v10612_v47 = vcombine.low %v7026_v55, %v7036_v18  ;;  %v7399_v43 = vsel %vm12423_vm4, %v7397_v57, %v7398_v12  ;;  %v14777_v22 = vadd.f32 %v14692_v1, %v14684_v2  ;;  %v7995_v41 = vsel %vm12429_vm5, %v7990_v39, %v7994_v21  ;;  %v14789_v53 = vpop.f32.mrb[174].mxu0  ;;  %v7253_v21 = vld [vmem:[#allocation4 + $0xac] sm:$0xf]  ;;  %v7254_v12 = vld [vmem:[#allocation4 + $0xb0] sm:$0x1] }
 0x364   : > { %v8005_v59 = vsel %vm12429_vm5, %v8000_v48, %v8004_v35  ;;  %v10645_v60 = vcombine.low %v7396_v44, %v7399_v43  ;;  %v7038_v2 = vshrl.u32 %v6737_v61, 16  ;;  %v7041_v1 = vshll.u32 %v6737_v61, 16  ;;  %v14791_v28 = vpop.f32.mrb[175].mxu0 }
 0x365   : > { %9649 = vmatmul.mubr.bf16.gmra.mrb[236].mxu1 %v10612_v47  ;;  %v10677_v46 = vcombine.low %v7995_v41, %v8005_v59  ;;  %v7047_v49 = vshll.u32 %v6738_v8, 16  ;;  %v7051_v27 = vshrl.u32 %v6738_v8, 16  ;;  %v7057_v40 = vshll.u32 %v6739_v62, 16 }
 0x366   : > { %9656 = vmatprep.mubr.bf16.mxu1 %v10645_v60  ;;  %v8007_v14 = vshrl.u32 %v7685_v6, 16  ;;  %v7040_v0 = vrot.slane %v7038_v2, 4  ;;  %v7043_v56 = vrot.slane %v7041_v1, 5  ;;  %v8010_v58 = vshll.u32 %v7685_v6, 16 }
 0x367   : > { %9817 = vmatprep.mubr.bf16.mxu0 %v10677_v46  ;;  %v8016_v30 = vshll.u32 %v7686_v3, 16  ;;  %v7049_v33 = vrot.slane %v7047_v49, 5  ;;  %v7053_v63 = vrot.slane %v7051_v27, 4  ;;  %v8020_v52 = vshrl.u32 %v7686_v3, 16  ;;  %v6740_v46 = vld [vmem:[#allocation4 + $0xa8] sm:$0xf] }
 0x368   : > { %9818 = vmatmul.mubr.bf16.gmra.mrb[16].mxu0 %v12244_v7  ;;  %v8009_v35 = vrot.slane %v8007_v14, 4  ;;  %v7044_v51 = vor.u32 %v7043_v56, %v7040_v0  ;;  %v8012_v5 = vrot.slane %v8010_v58, 5  ;;  %v7059_v44 = vrot.slane %v7057_v40, 5  ;;  %v6741_v49 = vld [vmem:[#allocation4 + $0xac] sm:$0xf] }
 0x369   : > { %v8018_v26 = vrot.slane %v8016_v30, 5  ;;  %v7054_v55 = vor.u32 %v7053_v63, %v7049_v33  ;;  %v8026_v57 = vshll.u32 %v7687_v19, 16  ;;  %v7402_v61 = vrot.slane %v7253_v21, 5  ;;  %v6742_v27 = vld [vmem:[#allocation4 + $0xb0] sm:$0x1]  ;;  %v12246_v21 = vld [vmem:[#allocation4 + $0xb4] sm:$0xff]  }
 0x36a   : > { %v7045_v18 = vrot.slane %v7044_v51, 4  ;;  %v8013_v39 = vor.u32 %v8012_v5, %v8009_v35  ;;  %v8022_v48 = vrot.slane %v8020_v52, 4  ;;  %v10630_v8 = vrot.slane %v7252_v29, 9  ;;  %v7689_v29 = vld [vmem:[#allocation4 + $0xc4] sm:$0xf] }
 0x36b   : > { %v7055_v47 = vrot.slane %v7054_v55, 4  ;;  %v8028_v43 = vrot.slane %v8026_v57, 5  ;;  %v7404_v62 = vrot.slane %v7402_v61, 4  ;;  %v7405_v6 = vrot.slane %v7254_v12, 5 }
 0x36c   : > { %v7050_v41 = vsel %vm12429_vm5, %v7045_v18, %v7049_v33  ;;  %v8014_v59 = vrot.slane %v8013_v39, 4  ;;  %v8023_v60 = vor.u32 %v8022_v48, %v8018_v26  ;;  %v14797_v3 = vadd.f32 %v14715_v37, %v14711_v16 }
 0x36d   : > { %v7060_v2 = vsel %vm12429_vm5, %v7055_v47, %v7059_v44  ;;  %v7406_v1 = vsel %vm12423_vm4, %v7404_v62, %v7405_v6  ;;  %v14805_v19 = vadd.f32 %v14704_v38, %v14702_v11  ;;  %v14809_v7 = vadd.f32 %v14725_v42, %v14719_v54  ;;  %v7688_v42 = vld [vmem:[#allocation4 + $0xc0] sm:$0xf] }
 0x36e   : > { %v10613_v40 = vcombine.low %v7050_v41, %v7060_v2  ;;  %v8019_v16 = vsel %vm12429_vm5, %v8014_v59, %v8018_v26  ;;  %v8024_v37 = vrot.slane %v8023_v60, 4  ;;  %v7403_v14 = vsel %vm12423_vm4, %v10630_v8, %v7402_v61  ;;  %v14815_v0 = vpop.f32.mrb[144].mxu1  ;;  %v7690_v26 = vld [vmem:[#allocation4 + $0xc8] sm:$0x1]  ;;  %v7255_v61 = vld [vmem:[#allocation4 + $0xb4] sm:$0xe] }
 0x36f   : > { %v10646_v56 = vcombine.low %v7403_v14, %v7406_v1  ;;  %v14819_v11 = vadd.f32 %v14717_v31, %v14713_v13  ;;  %v7062_v38 = vshrl.u32 %v6740_v46, 16  ;;  %v7065_v54 = vshll.u32 %v6740_v46, 16  ;;  %v14821_v58 = vpop.f32.mrb[145].mxu1  ;;  %v7257_v46 = vld [vmem:[#allocation4 + $0xbc] sm:$0x1] }
 0x370   : > { %9657 = vmatmul.mubr.bf16.gmra.mrb[240].mxu1 %v10613_v40  ;;  %v8029_v30 = vsel %vm12429_vm5, %v8024_v37, %v8028_v43  ;;  %v7071_v33 = vshll.u32 %v6741_v49, 16  ;;  %v7075_v63 = vshrl.u32 %v6741_v49, 16  ;;  %v7081_v35 = vshll.u32 %v6742_v27, 16  ;;  %v14825_v51 = vpop.f32.mrb[146].mxu1  ;;  %v14827_v52 = vpop.f32.mrb[176].mxu0 }
 0x371   : > { %v10678_v5 = vcombine.low %v8019_v16, %v8029_v30  ;;  %9664 = vmatprep.mubr.bf16.mxu1 %v10646_v56  ;;  %v7064_v13 = vrot.slane %v7062_v38, 4  ;;  %v7067_v31 = vrot.slane %v7065_v54, 5  ;;  %v14829_v12 = vpop.f32.mrb[147].mxu1  ;;  %v8031_v57 = vshrl.u32 %v7688_v42, 16  ;;  %v14831_v18 = vpop.f32.mrb[177].mxu0 }
 0x372   : > { %v7073_v55 = vrot.slane %v7071_v33, 5  ;;  %v7077_v44 = vrot.slane %v7075_v63, 4  ;;  %v8034_v48 = vshll.u32 %v7688_v42, 16  ;;  %v8040_v8 = vshll.u32 %v7689_v29, 16  ;;  %v7256_v43 = vld [vmem:[#allocation4 + $0xb8] sm:$0xf] }
 0x373   : > { %9825 = vmatprep.mubr.bf16.mxu0 %v10678_v5  ;;  %v7068_v39 = vor.u32 %v7067_v31, %v7064_v13  ;;  %v8044_v47 = vshrl.u32 %v7689_v29, 16  ;;  %v14833_v62 = vpop.f32.mrb[178].mxu0  ;;  %v7083_v41 = vrot.slane %v7081_v35, 5  ;;  %v8033_v59 = vrot.slane %v8031_v57, 4 }
 0x374   : > { %9826 = vmatmul.mubr.bf16.gmra.mrb[20].mxu0 %v12246_v21  ;;  %v7078_v6 = vor.u32 %v7077_v44, %v7073_v55  ;;  %v8050_v60 = vshll.u32 %v7690_v26, 16  ;;  %v14835_v2 = vpop.f32.mrb[179].mxu0  ;;  %v8036_v49 = vrot.slane %v8034_v48, 5  ;;  %v8042_v27 = vrot.slane %v8040_v8, 5  ;;  %v6743_v21 = vld [vmem:[#allocation4 + $0xb4] sm:$0xf] }
 0x375   : > { %v7069_v1 = vrot.slane %v7068_v39, 4  ;;  %v8046_v40 = vrot.slane %v8044_v47, 4  ;;  %v10631_v14 = vrot.slane %v7255_v61, 9  ;;  %v7409_v56 = vrot.slane %v7256_v43, 5  ;;  %v6745_v39 = vld [vmem:[#allocation4 + $0xbc] sm:$0x1] }
 0x376   : > { %v7079_v16 = vrot.slane %v7078_v6, 4  ;;  %v8052_v37 = vrot.slane %v8050_v60, 5  ;;  %v8037_v38 = vor.u32 %v8036_v49, %v8033_v59  ;;  %v7412_v42 = vrot.slane %v7257_v46, 5  ;;  %v7259_v8 = vld [vmem:[#allocation4 + $0xc4] sm:$0xf] }
 0x377   : > { %v8047_v54 = vor.u32 %v8046_v40, %v8042_v27  ;;  %v14839_v30 = vadd.f32 %v14787_v45, %v14779_v23  ;;  %v7074_v33 = vsel %vm12429_vm5, %v7069_v1, %v7073_v55  ;;  %v7411_v35 = vrot.slane %v7409_v56, 4  ;;  %v6744_v23 = vld [vmem:[#allocation4 + $0xb8] sm:$0xf]  ;;  %v12247_v59 = vld [vmem:[#allocation4 + $0xc0] sm:$0xff]   ;;  %v7260_v1 = vld [vmem:[#allocation4 + $0xc8] sm:$0x1] }
 0x378   : > { %v7084_v63 = vsel %vm12429_vm5, %v7079_v16, %v7083_v41  ;;  %v14847_v29 = vadd.f32 %v14759_v32, %v14749_v36  ;;  %v8038_v13 = vrot.slane %v8037_v38, 4  ;;  %v14851_v26 = vadd.f32 %v14791_v28, %v14789_v53 }
 0x379   : > { %v10614_v5 = vcombine.low %v7074_v33, %v7084_v63  ;;  %v8048_v31 = vrot.slane %v8047_v54, 4  ;;  %v7410_v55 = vsel %vm12423_vm4, %v10631_v14, %v7409_v56  ;;  %v7413_v44 = vsel %vm12423_vm4, %v7411_v35, %v7412_v42  ;;  %v6746_v14 = vld [vmem:[#allocation4 + $0xc0] sm:$0xf] }
 0x37a   : > { %v14853_v45 = vpop.f32.mrb[180].mxu0  ;;  %v14861_v36 = vadd.f32 %v14781_v15, %v14767_v10  ;;  %v7086_v32 = vshrl.u32 %v6743_v21, 16  ;;  %v8043_v53 = vsel %vm12429_vm5, %v8038_v13, %v8042_v27  ;;  %v10647_v61 = vcombine.low %v7410_v55, %v7413_v44  ;;  %v7258_v15 = vld [vmem:[#allocation4 + $0xc0] sm:$0xe]  ;;  %v7691_v55 = vld [vmem:[#allocation4 + $0xcc] sm:$0xf] }
 0x37b   : > { %v14863_v57 = vpop.f32.mrb[181].mxu0  ;;  %9665 = vmatmul.mubr.bf16.gmra.mrb[244].mxu1 %v10614_v5  ;;  %v8053_v28 = vsel %vm12429_vm5, %v8048_v31, %v8052_v37  ;;  %v7089_v48 = vshll.u32 %v6743_v21, 16  ;;  %v7095_v10 = vshll.u32 %v6744_v23, 16  ;;  %v7099_v46 = vshrl.u32 %v6744_v23, 16  ;;  %v6747_v21 = vld [vmem:[#allocation4 + $0xc4] sm:$0xf] }
 0x37c   : > { %v14869_v47 = vpop.f32.mrb[182].mxu0  ;;  %v10679_v43 = vcombine.low %v8043_v53, %v8053_v28  ;;  %v7088_v6 = vrot.slane %v7086_v32, 4  ;;  %9672 = vmatprep.mubr.bf16.mxu1 %v10647_v61  ;;  %v7105_v40 = vshll.u32 %v6745_v39, 16  ;;  %v7416_v16 = vrot.slane %v7259_v8, 5  ;;  %v7692_v28 = vld [vmem:[#allocation4 + $0xd0] sm:$0xf] }
 0x37d   : > { %v14871_v41 = vpop.f32.mrb[183].mxu0  ;;  %v7091_v60 = vrot.slane %v7089_v48, 5  ;;  %v7097_v27 = vrot.slane %v7095_v10, 5  ;;  %v14877_v37 = vadd.f32 %v14831_v18, %v14827_v52  ;;  %v7101_v54 = vrot.slane %v7099_v46, 4  ;;  %v6748_v18 = vld [vmem:[#allocation4 + $0xc8] sm:$0x1] }
 0x37e   : > { %v14873_v49 = vpop.f32.mrb[148].mxu1  ;;  %9833 = vmatprep.mubr.bf16.mxu0 %v10679_v43  ;;  %v14883_v42 = vadd.f32 %v14821_v58, %v14815_v0  ;;  %v10632_v63 = vrot.slane %v7258_v15, 9  ;;  %v7418_v35 = vrot.slane %v7416_v16, 4  ;;  %v14889_v5 = vadd.f32 %v14835_v2, %v14833_v62  ;;  %v7693_v43 = vld [vmem:[#allocation4 + $0xd4] sm:$0x1] }
 0x37f   : > { %v14879_v56 = vpop.f32.mrb[149].mxu1  ;;  %9834 = vmatmul.mubr.bf16.gmra.mrb[24].mxu0 %v12247_v59  ;;  %v7092_v38 = vor.u32 %v7091_v60, %v7088_v6  ;;  %v14893_v52 = vadd.f32 %v14829_v12, %v14825_v51  ;;  %v7102_v23 = vor.u32 %v7101_v54, %v7097_v27  ;;  %v7419_v0 = vrot.slane %v7260_v1, 5  ;;  %v14903_v51 = vld [vmem:[#allocation4 + $0x28] sm:$0xf] }
 0x380   : > { %v14885_v33 = vpop.f32.mrb[150].mxu1  ;;  %15622 = vst [vmem:[#allocation31_spill] sm:$0xff] %v14889_v5  ;;  %v7110_v58 = vshrl.u32 %v6746_v14, 16  ;;  %v7107_v32 = vrot.slane %v7105_v40, 5  ;;  %v7417_v53 = vsel %vm12423_vm4, %v10632_v63, %v7416_v16  ;;  %v7113_v62 = vshll.u32 %v6746_v14, 16 }
 0x381   : > { %v14895_v13 = vpop.f32.mrb[151].mxu1  ;;  %v7093_v31 = vrot.slane %v7092_v38, 4  ;;  %v7119_v2 = vshll.u32 %v6747_v21, 16  ;;  %v7103_v39 = vrot.slane %v7102_v23, 4  ;;  %v7420_v48 = vsel %vm12423_vm4, %v7418_v35, %v7419_v0  ;;  %v8158_v14 = vld [vmem:[#allocation4 + $0x18] sm:$0xe] }
 0x382   : > { %v14897_v44 = vpop.f32.mrb[184].mxu0  ;;  %v7112_v8 = vrot.slane %v7110_v58, 4  ;;  %v7115_v10 = vrot.slane %v7113_v62, 5  ;;  %v7123_v59 = vshrl.u32 %v6747_v21, 16  ;;  %v7129_v60 = vshll.u32 %v6748_v18, 16 }
 0x383   : > { %v14901_v61 = vpop.f32.mrb[185].mxu0  ;;  %v7098_v12 = vsel %vm12429_vm5, %v7093_v31, %v7097_v27  ;;  %v7121_v15 = vrot.slane %v7119_v2, 5  ;;  %v7108_v1 = vsel %vm12429_vm5, %v7103_v39, %v7107_v32  ;;  %v8055_v40 = vshrl.u32 %v7691_v55, 16  ;;  %v8159_v23 = vld [vmem:[#allocation4 + $0x1c] sm:$0xf] }
 0x384   : > { %v14909_v6 = vpop.f32.mrb[186].mxu0  ;;  %v8058_v16 = vshll.u32 %v7691_v55, 16  ;;  %v8064_v27 = vshll.u32 %v7692_v28, 16  ;;  %v10615_v54 = vcombine.low %v7098_v12, %v7108_v1  ;;  %v10648_v63 = vcombine.low %v7417_v53, %v7420_v48  ;;  %v8160_v0 = vld [vmem:[#allocation4 + $0x20] sm:$0x1] }
 0x385   : > { %v14911_v46 = vpop.f32.mrb[187].mxu0  ;;  %v7116_v35 = vor.u32 %v7115_v10, %v7112_v8  ;;  %v7125_v31 = vrot.slane %v7123_v59, 4  ;;  %v8057_v21 = vrot.slane %v8055_v40, 4  ;;  %v8068_v2 = vshrl.u32 %v7692_v28, 16 }
 0x386   : > { %v14915_v38 = vpop.f32.mrb[152].mxu1  ;;  %v8060_v18 = vrot.slane %v8058_v16, 5  ;;  %v8066_v62 = vrot.slane %v8064_v27, 5  ;;  %v8263_v32 = vrot.slane %v14903_v51, 5  ;;  %9673 = vmatmul.mubr.bf16.gmra.mrb[248].mxu1 %v10615_v54  ;;  %v7131_v39 = vrot.slane %v7129_v60, 5 }
 0x387   : > { %v11485_v58 = vpop.f32.mrb[153].mxu1  ;;  %v7126_v55 = vor.u32 %v7125_v31, %v7121_v15  ;;  %v8074_v50 = vshll.u32 %v7693_v43, 16  ;;  %9680 = vmatprep.mubr.bf16.mxu1 %v10648_v63  ;;  %v7117_v12 = vrot.slane %v7116_v35, 4  ;;  %v8070_v48 = vrot.slane %v8068_v2, 4  ;;  %v8167_v51 = vld [vmem:[#allocation4 + $0x3c] sm:$0xe] }
 0x388   : > { %v11487_v9 = vpop.f32.mrb[154].mxu1  ;;  %v8061_v53 = vor.u32 %v8060_v18, %v8057_v21  ;;  %v8256_v8 = vrot.slane %v8159_v23, 5  ;;  %v10681_v1 = vrot.slane %v8158_v14, 9  ;;  %v8259_v40 = vrot.slane %v8160_v0, 5  ;;  %v8163_v18 = vld [vmem:[#allocation4 + $0x2c] sm:$0x1] }
 0x389   : > { %v11488_v5 = vpop.f32.mrb[155].mxu1  ;;  %v7127_v59 = vrot.slane %v7126_v55, 4  ;;  %v14922_v28 = vadd.f32 %v14863_v57, %v14853_v45  ;;  %v8071_v54 = vor.u32 %v8070_v48, %v8066_v62  ;;  %v8076_v60 = vrot.slane %v8074_v50, 5  ;;  %v8165_v57 = vld [vmem:[#allocation4 + $0x34] sm:$0xf] }
 0x38a   : > { %v14918_v10 = vpop.f32.mrb[188].mxu0  ;;  %v8062_v27 = vrot.slane %v8061_v53, 4  ;;  %v8258_v43 = vrot.slane %v8256_v8, 4  ;;  %v14928_v35 = vadd.f32 %v14879_v56, %v14873_v49  ;;  %v14932_v14 = vadd.f32 %v14871_v41, %v14869_v47 }
 0x38b   : > { %v11603_v16 = vpop.f32.mrb[189].mxu0  ;;  %v7132_v63 = vsel %vm12429_vm5, %v7127_v59, %v7131_v39  ;;  %v14936_v45 = vadd.f32 %v14895_v13, %v14885_v33  ;;  %v7122_v50 = vsel %vm12429_vm5, %v7117_v12, %v7121_v15  ;;  %v8072_v21 = vrot.slane %v8071_v54, 4  ;;  %v12249_v13 = vld [vmem:[#allocation4 + $0xcc] sm:$0xff]   ;;  %v8166_v39 = vld [vmem:[#allocation4 + $0x38] sm:$0x1] }
 0x38c   : > { %v11605_v31 = vpop.f32.mrb[190].mxu0  ;;  %v8067_v0 = vsel %vm12429_vm5, %v8062_v27, %v8066_v62  ;;  %v8260_v49 = vsel %vm12423_vm4, %v8258_v43, %v8259_v40  ;;  %v8265_v47 = vrot.slane %v8263_v32, 4  ;;  %v10616_v41 = vcombine.low %v7122_v50, %v7132_v63  ;;  %v8161_v62 = vld [vmem:[#allocation4 + $0x24] sm:$0xe]  ;;  %v8164_v59 = vld [vmem:[#allocation4 + $0x30] sm:$0xe] }
 0x38d   : > { %v11606_v23 = vpop.f32.mrb[191].mxu0  ;;  %v8257_v33 = vsel %vm12423_vm4, %v10681_v1, %v8256_v8  ;;  %v8077_v15 = vsel %vm12429_vm5, %v8072_v21, %v8076_v60  ;;  %v8270_v12 = vrot.slane %v8165_v57, 5  ;;  %v14952_v40 = vadd.f32 %v14901_v61, %v14897_v44  ;;  %v8168_v27 = vld [vmem:[#allocation4 + $0x40] sm:$0xf]  ;;  %v8171_v60 = vld [vmem:[#allocation4 + $0x4c] sm:$0xf] }
 0x38e   : > { %v11490_v56 = vpop.f32.mrb[156].mxu1  ;;  %v10697_v55 = vcombine.low %v8257_v33, %v8260_v49  ;;  %9681 = vmatmul.mubr.bf16.gmra.mrb[252].mxu1 %v10616_v41  ;;  %v10680_v48 = vcombine.low %v8067_v0, %v8077_v15  ;;  %v8266_v1 = vrot.slane %v8163_v18, 5  ;;  %v14955_v17 = vadd.f32 %v11485_v58, %v14915_v38 }
 0x38f   : > { %v11491_v2 = vpop.f32.mrb[157].mxu1  ;;  %v8272_v54 = vrot.slane %v8270_v12, 4  ;;  %v8273_v63 = vrot.slane %v8166_v39, 5  ;;  %v14959_v57 = vadd.f32 %v14911_v46, %v14909_v6  ;;  %v14961_v50 = vadd.f32 %v11488_v5, %v11487_v9  ;;  %v8169_v6 = vld [vmem:[#allocation4 + $0x44] sm:$0x1] }
 0x390   : > { %v11493_v53 = vpop.f32.mrb[158].mxu1  ;;  %11968 = vmatprep.mubr.bf16.mxu1 %v10697_v55  ;;  %9841 = vmatprep.mubr.bf16.mxu0 %v10680_v48  ;;  %v10682_v61 = vrot.slane %v8161_v62, 9  ;;  %v8267_v0 = vsel %vm12423_vm4, %v8265_v47, %v8266_v1  ;;  %v10683_v21 = vrot.slane %v8164_v59, 9  ;;  %v8277_v49 = vrot.slane %v8168_v27, 5  ;;  %v8172_v48 = vld [vmem:[#allocation4 + $0x50] sm:$0x1] }
 0x391   : > { %v11494_v8 = vpop.f32.mrb[159].mxu1  ;;  %9842 = vmatmul.mubr.bf16.gmra.mrb[28].mxu0 %v12249_v13  ;;  %v8274_v58 = vsel %vm12423_vm4, %v8272_v54, %v8273_v63  ;;  %v8284_v41 = vrot.slane %v8171_v60, 5  ;;  %v14974_v46 = vadd.f32 %v11603_v16, %v14918_v10  ;;  %v14976_v15 = vadd.f32 %v11491_v2, %v11490_v56  ;;  %v14982_v1 = vld [vmem:[#allocation4 + $0x58] sm:$0xf]  ;;  %v8170_v16 = vld [vmem:[#allocation4 + $0x48] sm:$0xe] }
 0x392   : > { %v11608_v43 = vpop.f32.mrb[192].mxu0  ;;  %v8264_v9 = vsel %vm12423_vm4, %v10682_v61, %v8263_v32  ;;  %v8271_v5 = vsel %vm12423_vm4, %v10683_v21, %v8270_v12  ;;  %v8279_v18 = vrot.slane %v8277_v49, 4  ;;  %v14978_v55 = vadd.f32 %v11606_v23, %v11605_v31  ;;  %v14984_v54 = vld [vmem:[#allocation4 + $0x64] sm:$0xf] }
 0x393   : > { %v11609_v44 = vpop.f32.mrb[193].mxu0  ;;  %v10698_v13 = vcombine.low %v8264_v9, %v8267_v0  ;;  %v10699_v39 = vcombine.low %v8271_v5, %v8274_v58  ;;  %v14980_v59 = vadd.f32 %v11494_v8, %v11493_v53  ;;  %v8280_v12 = vrot.slane %v8169_v6, 5 }
 0x394   : > { %v11611_v38 = vpop.f32.mrb[194].mxu0  ;;  %v8286_v27 = vrot.slane %v8284_v41, 4  ;;  %v10684_v31 = vrot.slane %v8167_v51, 9  ;;  %v8287_v2 = vrot.slane %v8172_v48, 5  ;;  %v14988_v60 = vadd.f32 %v11609_v44, %v11608_v43  ;;  %v8178_v48 = vld [vmem:[#allocation4 + $0x68] sm:$0x1] }
 0x395   : > { %v11612_v33 = vpop.f32.mrb[195].mxu0  ;;  %v8281_v23 = vsel %vm12423_vm4, %v8279_v18, %v8280_v12  ;;  %v8291_v8 = vrot.slane %v14982_v1, 5  ;;  %v10685_v58 = vrot.slane %v8170_v16, 9  ;;  %v8298_v5 = vrot.slane %v14984_v54, 5  ;;  %v8175_v18 = vld [vmem:[#allocation4 + $0x5c] sm:$0x1] }
 0x396   : > { %v11496_v47 = vpop.f32.mrb[160].mxu1  ;;  %11969 = vmatmul.mubr.bf16.vlgmr.msra.gmra.mrb[0].mxu1 %v10698_v13  ;;  %v14993_v61 = vadd.f32 %v11612_v33, %v11611_v38  ;;  %v8288_v9 = vsel %vm12423_vm4, %v8286_v27, %v8287_v2  ;;  %v8278_v43 = vsel %vm12423_vm4, %v10684_v31, %v8277_v49  ;;  %v15008_v38 = vadd.f32 %v14777_v22, %v14709_v34  ;;  %v15024_v1 = vld [vmem:[#allocation4 + $0x7c] sm:$0xf]  ;;  %v8176_v31 = vld [vmem:[#allocation4 + $0x60] sm:$0xe] }
 0x397   : > { %v11497_v62 = vpop.f32.mrb[161].mxu1  ;;  %11972 = vmatprep.mubr.bf16.mxu1 %v10699_v39  ;;  %v10700_v33 = vcombine.low %v8278_v43, %v8281_v23  ;;  %v8285_v13 = vsel %vm12423_vm4, %v10685_v58, %v8284_v41  ;;  %v15014_v39 = vadd.f32 %v14805_v19, %v14709_v34  ;;  %v8293_v51 = vrot.slane %v8291_v8, 4  ;;  %v8173_v41 = vld [vmem:[#allocation4 + $0x54] sm:$0xe]  ;;  %v15040_v2 = vld [vmem:[#allocation4 + $0x88] sm:$0xf] }
 0x398   : > { %v11499_v32 = vpop.f32.mrb[162].mxu1  ;;  %v14991_v63 = vadd.f32 %v11497_v62, %v11496_v47  ;;  %15623 = vst [vmem:[#allocation7_spill] sm:$0xff] %v14993_v61  ;;  %v15004_v47 = vadd.f32 %v14765_v24, %v14709_v34  ;;  %v10701_v49 = vcombine.low %v8285_v13, %v8288_v9  ;;  %v15022_v22 = vadd.f32 %v14819_v11, %v14709_v34 }
 0x399   : > { %v11500_v10 = vpop.f32.mrb[163].mxu1  ;;  %v8300_v27 = vrot.slane %v8298_v5, 4  ;;  %v15032_v54 = vadd.f32 %v14847_v29, %v14709_v34  ;;  %v8294_v11 = vrot.slane %v8175_v18, 5  ;;  %v15048_v29 = vadd.f32 %v14893_v52, %v14709_v34 }
 0x39a   : > { %v11614_v56 = vpop.f32.mrb[196].mxu0  ;;  %v14995_v0 = vadd.f32 %v11500_v10, %v11499_v32  ;;  %v15016_v32 = vld [vmem:[#allocation4 + $0x70] sm:$0xf]  ;;  %v8301_v58 = vrot.slane %v8178_v48, 5  ;;  %v10686_v43 = vrot.slane %v8173_v41, 9  ;;  %v10687_v18 = vrot.slane %v8176_v31, 9 }
 0x39b   : > { %v11615_v53 = vpop.f32.mrb[197].mxu0  ;;  %v8181_v41 = vld [vmem:[#allocation4 + $0x74] sm:$0x1] }
 0x39c   : > { %v11617_v21 = vpop.f32.mrb[198].mxu0  ;;  %v15018_v24 = vadd.f32 %v11615_v53, %v11614_v56  ;;  %v15036_v56 = vadd.f32 %v14861_v36, %v14709_v34  ;;  %v8305_v36 = vrot.slane %v15016_v32, 5  ;;  %v8302_v52 = vsel %vm12423_vm4, %v8300_v27, %v8301_v58 }
 0x39d   : > { %v11618_v6 = vpop.f32.mrb[199].mxu0  ;;  %v8292_v32 = vsel %vm12423_vm4, %v10686_v43, %v8291_v8 }
 0x39e   : > { %v11502_v44 = vpop.f32.mrb[164].mxu1  ;;  %15624 = vst [vmem:[#allocation36_spill] sm:$0xff] %v15018_v24  ;;  %11973 = vmatmul.mubr.bf16.gmra.mrb[4].mxu1 %v10700_v33  ;;  %v15028_v19 = vadd.f32 %v11618_v6, %v11617_v21  ;;  %v15044_v21 = vadd.f32 %v14883_v42, %v14709_v34  ;;  %v15053_v6 = vadd.f32 %v14928_v35, %v14709_v34  ;;  %v8312_v33 = vrot.slane %v15024_v1, 5  ;;  %v15058_v42 = vld [vmem:[#allocation4 + $0x94] sm:$0xf] }
 0x39f   : > { %v11503_v62 = vpop.f32.mrb[165].mxu1  ;;  %11976 = vmatprep.mubr.bf16.mxu1 %v10701_v49  ;;  %v15067_v35 = vadd.f32 %v14936_v45, %v14709_v34  ;;  %v8307_v31 = vrot.slane %v8305_v36, 4  ;;  %v8184_v45 = vld [vmem:[#allocation4 + $0x80] sm:$0x1]  ;;  %v8326_v58 = vrot.slane %v15058_v42, 5  ;;  %v8308_v42 = vrot.slane %v8181_v41, 5 }
 0x3a0   : > { %v11505_v12 = vpop.f32.mrb[166].mxu1  ;;  %v15026_v10 = vadd.f32 %v11503_v62, %v11502_v44  ;;  %15625 = vst [vmem:[#allocation8_spill] sm:$0xff] %v15028_v19  ;;  %v8295_v44 = vsel %vm12423_vm4, %v8293_v51, %v8294_v11  ;;  %v15071_v51 = vadd.f32 %v14955_v17, %v14709_v34  ;;  %v8299_v11 = vsel %vm12423_vm4, %v10687_v18, %v8298_v5  ;;  %v8185_v62 = vld [vmem:[#allocation4 + $0x84] sm:$0xe] }
 0x3a1   : > { %v11506_v16 = vpop.f32.mrb[167].mxu1  ;;  %v15082_v17 = vadd.f32 %v14961_v50, %v14709_v34  ;;  %v10703_v8 = vcombine.low %v8299_v11, %v8302_v52  ;;  %v8314_v43 = vrot.slane %v8312_v33, 4  ;;  %v15090_v5 = vadd.f32 %v14980_v59, %v14709_v34 }
 0x3a2   : > { %v15038_v23 = vadd.f32 %v11506_v16, %v11505_v12  ;;  %v11620_v53 = vpop.f32.mrb[200].mxu0  ;;  %v8179_v12 = vld [vmem:[#allocation4 + $0x6c] sm:$0xe]  ;;  %v10702_v16 = vcombine.low %v8292_v32, %v8295_v44  ;;  %v15086_v44 = vadd.f32 %v14976_v15, %v14709_v34  ;;  %v15628_v18 = vrot.slane %v15040_v2, 5  ;;  %v8190_v32 = vld [vmem:[#allocation4 + $0x98] sm:$0x1] }
 0x3a3   : > { %v11621_v9 = vpop.f32.mrb[201].mxu0  ;;  %v10688_v11 = vrot.slane %v8179_v12, 9  ;;  %v15102_v59 = vadd.f32 %v14995_v0, %v14709_v34  ;;  %v8309_v41 = vsel %vm12423_vm4, %v8307_v31, %v8308_v42  ;;  %v10690_v61 = vrot.slane %v8185_v62, 9  ;;  %v15126_v62 = vld [vmem:[#allocation4 + $0xac] sm:$0xf] }
 0x3a4   : > { %v11623_v13 = vpop.f32.mrb[202].mxu0  ;;  %v15063_v49 = vadd.f32 %v11621_v9, %v11620_v53  ;;  %v8182_v53 = vld [vmem:[#allocation4 + $0x78] sm:$0xe]  ;;  %v8321_v50 = vrot.slane %v15628_v18, 4  ;;  %v8328_v18 = vrot.slane %v8326_v58, 4  ;;  %v8329_v0 = vrot.slane %v8190_v32, 5 }
 0x3a5   : > { %v11624_v48 = vpop.f32.mrb[203].mxu0  ;;  %v10689_v24 = vrot.slane %v8182_v53, 9  ;;  %v15122_v53 = vld [vmem:[%s15506_s4] ss:$0 sm:$0xff] }
 0x3a6   : > { %15626 = vst [vmem:[#allocation37_spill] sm:$0xff] %v15063_v49  ;;  %v11508_v1 = vpop.f32.mrb[168].mxu1  ;;  %v15075_v27 = vadd.f32 %v11624_v48, %v11623_v13  ;;  %v8187_v49 = vld [vmem:[#allocation4 + $0x8c] sm:$0x1]  ;;  %11977 = vmatmul.mubr.bf16.gmra.mrb[8].mxu1 %v10702_v16 }
 0x3a7   : > { %v11509_v9 = vpop.f32.mrb[169].mxu1  ;;  %11980 = vmatprep.mubr.bf16.mxu1 %v10703_v8  ;;  %v8322_v16 = vrot.slane %v8187_v49, 5 }
 0x3a8   : > { %15627 = vst [vmem:[#allocation9_spill] sm:$0xff] %v15075_v27  ;;  %v11510_v13 = vadd.f32 %v11509_v9, %v11508_v1  ;;  %v11511_v48 = vpop.f32.mrb[170].mxu1  ;;  %v15096_v1 = vadd.f32 %v14991_v63, %v14709_v34  ;;  %v8315_v9 = vrot.slane %v8184_v45, 5  ;;  %v15098_v27 = vld [vmem:[#allocation4 + $0xa0] sm:$0xf]  ;;  %v8306_v63 = vsel %vm12423_vm4, %v10688_v11, %v8305_v36 }
 0x3a9   : > { %v11512_v52 = vpop.f32.mrb[171].mxu1  ;;  %v8188_v45 = vld [vmem:[#allocation4 + $0x90] sm:$0xe]  ;;  %v15114_v34 = vsel %vm12423_vm4, %v8321_v50, %v8322_v16  ;;  %v8333_v49 = vrot.slane %v15098_v27, 5  ;;  %v10704_v42 = vcombine.low %v8306_v63, %v8309_v41  ;;  %v8313_v36 = vsel %vm12423_vm4, %v10689_v24, %v8312_v33 }
 0x3aa   : > { %v11513_v15 = vadd.f32 %v11512_v52, %v11511_v48  ;;  %v11626_v19 = vpop.f32.mrb[204].mxu0  ;;  %v8316_v12 = vsel %vm12423_vm4, %v8314_v43, %v8315_v9  ;;  %v15629_v11 = vrot.slane %v15040_v2, 5  ;;  %v10691_v24 = vrot.slane %v8188_v45, 9 }
 0x3ab   : > { %v11627_v8 = vpop.f32.mrb[205].mxu0  ;;  %v10705_v32 = vcombine.low %v8313_v36, %v8316_v12  ;;  %v8330_v33 = vsel %vm12423_vm4, %v8328_v18, %v8329_v0  ;;  %v9316_v16 = vadd.f32 %v15122_v53, %v15038_v23  ;;  %v15141_v12 = vadd.f32 %v14757_v25, %v15004_v47 }
 0x3ac   : > { %v15110_v48 = vadd.f32 %v11627_v8, %v11626_v19  ;;  %v11629_v52 = vpop.f32.mrb[206].mxu0  ;;  %v9313_v19 = vadd.f32 %v15122_v53, %v15026_v10  ;;  %v8320_v9 = vsel %vm12423_vm4, %v10690_v61, %v15629_v11  ;;  %v8327_v61 = vsel %vm12423_vm4, %v10691_v24, %v8326_v58  ;;  %v8196_v11 = vld [vmem:[#allocation4 + $0xb0] sm:$0x1] }
 0x3ad   : > { %v11630_v31 = vpop.f32.mrb[207].mxu0  ;;  %v10706_v10 = vcombine.low %v8320_v9, %v15114_v34  ;;  %v8335_v2 = vrot.slane %v8333_v49, 4  ;;  %v8340_v18 = vrot.slane %v15126_v62, 5  ;;  %v15150_v23 = vadd.f32 %v14773_v20, %v15008_v38  ;;  %v15634_v9 = vld [vmem:[#allocation37_spill] sm:$0xff] }
 0x3ae   : > { %v11514_v43 = vpop.f32.mrb[172].mxu1  ;;  %v15128_v50 = vadd.f32 %v11630_v31, %v11629_v52  ;;  %11981 = vmatmul.mubr.bf16.gmra.mrb[12].mxu1 %v10704_v42  ;;  %v10707_v52 = vcombine.low %v8327_v61, %v8330_v33  ;;  %v9321_v34 = vadd.f32 %v15122_v53, %v11510_v13  ;;  %v15155_v0 = vadd.f32 %v14797_v3, %v15014_v39 }
 0x3af   : > { %v11515_v41 = vpop.f32.mrb[173].mxu1  ;;  %11984 = vmatprep.mubr.bf16.mxu1 %v10705_v32  ;;  %v9324_v58 = vadd.f32 %v15122_v53, %v11513_v15  ;;  %v15160_v42 = vadd.f32 %v14809_v7, %v15022_v22  ;;  %v15164_v20 = vadd.f32 %v14839_v30, %v15032_v54  ;;  %v15168_v38 = vadd.f32 %v14851_v26, %v15036_v56  ;;  %v15630_v22 = vld [vmem:[#allocation31_spill] sm:$0xff]  ;;  %v15633_v32 = vld [vmem:[#allocation8_spill] sm:$0xff]  ;;  %v15635_v33 = vld [vmem:[#allocation9_spill] sm:$0xff] }
 0x3b0   : > { %v11516_v8 = vadd.f32 %v11515_v41, %v11514_v43  ;;  %v11517_v63 = vpop.f32.mrb[174].mxu1  ;;  %v15176_v36 = vadd.f32 %v14877_v37, %v15044_v21  ;;  %v15180_v30 = vadd.f32 %v15630_v22, %v15048_v29  ;;  %v15184_v26 = vadd.f32 %v14922_v28, %v15053_v6 }
 0x3b1   : > { %v11518_v45 = vpop.f32.mrb[175].mxu1  ;;  %v15188_v54 = vadd.f32 %v14932_v14, %v15067_v35  ;;  %v15192_v56 = vadd.f32 %v14952_v40, %v15071_v51  ;;  %v15198_v21 = vadd.f32 %v14959_v57, %v15082_v17  ;;  %v15202_v29 = vadd.f32 %v14974_v46, %v15086_v44  ;;  %v8193_v14 = vld [vmem:[#allocation4 + $0xa4] sm:$0x1]  ;;  %v15631_v35 = vld [vmem:[#allocation7_spill] sm:$0xff]  ;;  %v15632_v57 = vld [vmem:[#allocation36_spill] sm:$0xff] }
 0x3b2   : > { %v11519_v25 = vadd.f32 %v11518_v45, %v11517_v63  ;;  %v11632_v47 = vpop.f32.mrb[208].mxu0  ;;  %v9329_v13 = vadd.f32 %v15122_v53, %v11516_v8  ;;  %v15206_v28 = vadd.f32 %v14978_v55, %v15090_v5  ;;  %v15210_v40 = vadd.f32 %v14988_v60, %v15096_v1  ;;  %v8191_v44 = vld [vmem:[#allocation4 + $0x9c] sm:$0xe]  ;;  %v8194_v8 = vld [vmem:[#allocation4 + $0xa8] sm:$0xe] }
 0x3b3   : > { %v11633_v31 = vpop.f32.mrb[209].mxu0  ;;  %v15214_v51 = vadd.f32 %v15631_v35, %v15102_v59  ;;  %v15217_v17 = vadd.f32 %v15632_v57, %v9313_v19  ;;  %v15220_v46 = vadd.f32 %v15633_v32, %v9316_v16  ;;  %v15223_v24 = vadd.f32 %v15634_v9, %v9321_v34  ;;  %v8198_v19 = vld [vmem:[#allocation4 + $0xb8] sm:$0xf]  ;;  %v8201_v63 = vld [vmem:[#allocation4 + $0xc4] sm:$0xf] }
 0x3b4   : > { %v9332_v3 = vadd.f32 %v15122_v53, %v11519_v25  ;;  %v15172_v39 = vadd.f32 %v11633_v31, %v11632_v47  ;;  %v11635_v15 = vpop.f32.mrb[210].mxu0  ;;  %v15226_v60 = vadd.f32 %v15635_v33, %v9324_v58  ;;  %v15229_v1 = vadd.f32 %v15110_v48, %v9329_v13  ;;  %v8204_v35 = vld [vmem:[#allocation4 + $0xd0] sm:$0xf]  ;;  %v8200_v33 = vld [vmem:[#allocation4 + $0xc0] sm:$0xe] }
 0x3b5   : > { %v11636_v7 = vpop.f32.mrb[211].mxu0  ;;  %v8342_v59 = vrot.slane %v8340_v18, 4  ;;  %v8336_v16 = vrot.slane %v8193_v14, 5  ;;  %v10692_v34 = vrot.slane %v8191_v44, 9  ;;  %v8343_v25 = vrot.slane %v8196_v11, 5 }
 0x3b6   : > { %v11520_v43 = vpop.f32.mrb[176].mxu1  ;;  %v15194_v37 = vadd.f32 %v11636_v7, %v11635_v15  ;;  %11985 = vmatmul.mubr.bf16.gmra.mrb[16].mxu1 %v10706_v10  ;;  %v8347_v48 = vrot.slane %v8198_v19, 5  ;;  %v15238_v13 = vadd.f32 %v15128_v50, %v9332_v3  ;;  %v10693_v15 = vrot.slane %v8194_v8, 9  ;;  %v8199_v3 = vld [vmem:[#allocation4 + $0xbc] sm:$0x1] }
 0x3b7   : > { %v11521_v6 = vpop.f32.mrb[177].mxu1  ;;  %11988 = vmatprep.mubr.bf16.mxu1 %v10707_v52  ;;  %v8337_v58 = vsel %vm12423_vm4, %v8335_v2, %v8336_v16  ;;  %v8344_v52 = vsel %vm12423_vm4, %v8342_v59, %v8343_v25  ;;  %v8354_v7 = vrot.slane %v8201_v63, 5  ;;  %v8197_v44 = vld [vmem:[#allocation4 + $0xb4] sm:$0xe]  ;;  %v8350_v62 = vrot.slane %v8199_v3, 5 }
 0x3b8   : > { %v11522_v55 = vadd.f32 %v11521_v6, %v11520_v43  ;;  %v11523_v5 = vpop.f32.mrb[178].mxu1  ;;  %v8334_v43 = vsel %vm12423_vm4, %v10692_v34, %v8333_v49  ;;  %v8341_v50 = vsel %vm12423_vm4, %v10693_v15, %v8340_v18  ;;  %v8349_v11 = vrot.slane %v8347_v48, 4  ;;  %v8205_v34 = vld [vmem:[#allocation4 + $0xd4] sm:$0x1] }
 0x3b9   : > { %v11524_v41 = vpop.f32.mrb[179].mxu1  ;;  %v10708_v6 = vcombine.low %v8334_v43, %v8337_v58  ;;  %v10709_v32 = vcombine.low %v8341_v50, %v8344_v52  ;;  %v8356_v59 = vrot.slane %v8354_v7, 4  ;;  %v8361_v16 = vrot.slane %v8204_v35, 5 }
 0x3ba   : > { %v11525_v61 = vadd.f32 %v11524_v41, %v11523_v5  ;;  %v11638_v45 = vpop.f32.mrb[212].mxu0  ;;  %v8202_v5 = vld [vmem:[#allocation4 + $0xc8] sm:$0x1]  ;;  %v9337_v27 = vadd.f32 %v15122_v53, %v11522_v55  ;;  %v8203_v41 = vld [vmem:[#allocation4 + $0xcc] sm:$0xe]  ;;  %v10694_v63 = vrot.slane %v8197_v44, 9 }
 0x3bb   : > { %v11639_v47 = vpop.f32.mrb[213].mxu0  ;;  %v8363_v50 = vrot.slane %v8361_v16, 4  ;;  %v8364_v3 = vrot.slane %v8205_v34, 5 }
 0x3bc   : > { %v15235_v31 = vadd.f32 %v11639_v47, %v11638_v45  ;;  %v11641_v10 = vpop.f32.mrb[214].mxu0  ;;  %v8357_v45 = vrot.slane %v8202_v5, 5  ;;  %v8351_v47 = vsel %vm12423_vm4, %v8349_v11, %v8350_v62  ;;  %v9340_v55 = vadd.f32 %v15122_v53, %v11525_v61 }
 0x3bd   : > { %v11642_v22 = vpop.f32.mrb[215].mxu0  ;;  %v15259_v15 = vadd.f32 %v15172_v39, %v9337_v27  ;;  %v8348_v52 = vsel %vm12423_vm4, %v10694_v63, %v8347_v48 }
 0x3be   : > { %v11526_v14 = vpop.f32.mrb[180].mxu1  ;;  %v15246_v2 = vadd.f32 %v11642_v22, %v11641_v10  ;;  %11989 = vmatmul.mubr.bf16.gmra.mrb[20].mxu1 %v10708_v6  ;;  %v10695_v22 = vrot.slane %v8200_v33, 9  ;;  %v8358_v43 = vsel %vm12423_vm4, %v8356_v59, %v8357_v45  ;;  %v10696_v6 = vrot.slane %v8203_v41, 9 }
 0x3bf   : > { %v11527_v57 = vpop.f32.mrb[181].mxu1  ;;  %11992 = vmatprep.mubr.bf16.mxu1 %v10709_v32  ;;  %v10710_v61 = vcombine.low %v8348_v52, %v8351_v47  ;;  %v15268_v48 = vadd.f32 %v15194_v37, %v9340_v55  ;;  %v8365_v33 = vsel %vm12423_vm4, %v8363_v50, %v8364_v3 }
 0x3c0   : > { %v11528_v9 = vadd.f32 %v11527_v57, %v11526_v14  ;;  %v11529_v49 = vpop.f32.mrb[182].mxu1  ;;  %v8355_v32 = vsel %vm12423_vm4, %v10695_v22, %v8354_v7 }
 0x3c1   : > { %v11530_v19 = vpop.f32.mrb[183].mxu1  ;;  %v10711_v39 = vcombine.low %v8355_v32, %v8358_v43 }
 0x3c2   : > { %v11531_v18 = vadd.f32 %v11530_v19, %v11529_v49  ;;  %v11644_v8 = vpop.f32.mrb[216].mxu0  ;;  %v8362_v49 = vsel %vm12423_vm4, %v10696_v6, %v8361_v16  ;;  %v9345_v7 = vadd.f32 %v15122_v53, %v11528_v9 }
 0x3c3   : > { %v11645_v25 = vpop.f32.mrb[217].mxu0  ;;  %v10712_v63 = vcombine.low %v8362_v49, %v8365_v33 }
 0x3c4   : > { %v15256_v58 = vadd.f32 %v11645_v25, %v11644_v8  ;;  %v11647_v10 = vpop.f32.mrb[218].mxu0  ;;  %v9348_v25 = vadd.f32 %v15122_v53, %v11531_v18  ;;  %v15277_v55 = vadd.f32 %v15235_v31, %v9345_v7 }
 0x3c5   : > { %v11648_v14 = vpop.f32.mrb[219].mxu0 }
 0x3c6   : > { %v11532_v35 = vpop.f32.mrb[184].mxu1  ;;  %v11649_v57 = vadd.f32 %v11648_v14, %v11647_v10  ;;  %11993 = vmatmul.mubr.bf16.gmra.mrb[24].mxu1 %v10710_v61  ;;  %v15280_v43 = vadd.f32 %v15246_v2, %v9348_v25 }
 0x3c7   : > { %v11533_v44 = vpop.f32.mrb[185].mxu1  ;;  %11996 = vmatprep.mubr.bf16.mxu1 %v10711_v39  ;;  %v15636_v39 = vld [vmem:[#allocation30_spill] sm:$0xff] }
 0x3c8   : > { %v11534_v11 = vadd.f32 %v11533_v44, %v11532_v35  ;;  %v11535_v5 = vpop.f32.mrb[186].mxu1 }
 0x3c9   : > { %v11536_v27 = vpop.f32.mrb[187].mxu1 }
 0x3ca   : > { %v11537_v59 = vadd.f32 %v11536_v27, %v11535_v5  ;;  %v11650_v19 = vpop.f32.mrb[220].mxu0  ;;  %v9353_v31 = vadd.f32 %v15122_v53, %v11534_v11 }
 0x3cb   : > { %v11651_v62 = vpop.f32.mrb[221].mxu0 }
 0x3cc   : > { %v11652_v41 = vadd.f32 %v11651_v62, %v11650_v19  ;;  %v11653_v8 = vpop.f32.mrb[222].mxu0  ;;  %v9356_v2 = vadd.f32 %v15122_v53, %v11537_v59  ;;  %v15637_v19 = vld [vmem:[#allocation6_spill] sm:$0xff] }
 0x3cd   : > { %v11654_v45 = vpop.f32.mrb[223].mxu0 }
 0x3ce   : > { %v11538_v37 = vpop.f32.mrb[188].mxu1  ;;  %v11655_v34 = vadd.f32 %v11654_v45, %v11653_v8  ;;  %11997 = vmatmul.mubr.bf16.gmra.mrb[28].mxu1 %v10712_v63  ;;  %v15291_v63 = vadd.f32 %v15256_v58, %v9353_v31 }
 0x3cf   : > { %v11539_v47 = vpop.f32.mrb[189].mxu1 }
 0x3d0   : > { %v11540_v16 = vadd.f32 %v11539_v47, %v11538_v37  ;;  %v11541_v4 = vpop.f32.mrb[190].mxu1 }
 0x3d1   : > { %v11542_v10 = vpop.f32.mrb[191].mxu1 }
 0x3d2   : > { %v11543_v52 = vadd.f32 %v11542_v10, %v11541_v4  ;;  %v11784_v22 = vpop.f32.mrb[224].mxu0  ;;  %v9361_v47 = vadd.f32 %v15122_v53, %v11540_v16 }
 0x3d3   : > { %v11785_v9 = vpop.f32.mrb[225].mxu0 }
 0x3d4   : > { %v15282_v14 = vadd.f32 %v11785_v9, %v11784_v22  ;;  %v11787_v6 = vpop.f32.mrb[226].mxu0  ;;  %v15294_v22 = vadd.f32 %v11649_v57, %v9356_v2 }
 0x3d5   : > { %v11788_v50 = vpop.f32.mrb[227].mxu0 }
 0x3d6   : > { %v11672_v3 = vpop.f32.mrb[192].mxu1  ;;  %v15284_v18 = vadd.f32 %v11788_v50, %v11787_v6 }
 0x3d7   : > { %v11673_v35 = vpop.f32.mrb[193].mxu1 }
 0x3d8   : > { %v11674_v61 = vadd.f32 %v11673_v35, %v11672_v3  ;;  %v11675_v32 = vpop.f32.mrb[194].mxu1  ;;  %v9364_v35 = vadd.f32 %v15122_v53, %v11543_v52 }
 0x3d9   : > { %v11676_v44 = vpop.f32.mrb[195].mxu1 }
 0x3da   : > { %v9563_v5 = vadd.f32 %v11674_v61, %v15636_v39  ;;  %v11677_v27 = vadd.f32 %v11676_v44, %v11675_v32  ;;  %v11790_v49 = vpop.f32.mrb[228].mxu0  ;;  %v15299_v32 = vadd.f32 %v11652_v41, %v9361_v47 }
 0x3db   : > { %v11791_v33 = vpop.f32.mrb[229].mxu0 }
 0x3dc   : > { %v9566_v7 = vadd.f32 %v11677_v27, %v15637_v19  ;;  %v11792_v62 = vadd.f32 %v11791_v33, %v11790_v49  ;;  %v11793_v8 = vpop.f32.mrb[230].mxu0  ;;  %v15301_v33 = vadd.f32 %v11655_v34, %v9364_v35  ;;  %v15309_v35 = vadd.f32 %v15282_v14, %v9563_v5 }
 0x3dd   : > { %v11794_v45 = vpop.f32.mrb[231].mxu0 }
 0x3de   : > { %v11678_v37 = vpop.f32.mrb[196].mxu1  ;;  %v11795_v11 = vadd.f32 %v11794_v45, %v11793_v8 }
 0x3df   : > { %v11679_v25 = vpop.f32.mrb[197].mxu1 }
 0x3e0   : > { %v11680_v4 = vadd.f32 %v11679_v25, %v11678_v37  ;;  %v11681_v10 = vpop.f32.mrb[198].mxu1 }
 0x3e1   : > { %v11682_v9 = vpop.f32.mrb[199].mxu1 }
 0x3e2   : > { %v9571_v59 = vadd.f32 %v11680_v4, %v15141_v12  ;;  %v11683_v6 = vadd.f32 %v11682_v9, %v11681_v10  ;;  %v11796_v50 = vpop.f32.mrb[232].mxu0 }
 0x3e3   : > { %v11797_v3 = vpop.f32.mrb[233].mxu0 }
 0x3e4   : > { %v9574_v58 = vadd.f32 %v11683_v6, %v15150_v23  ;;  %v11798_v31 = vadd.f32 %v11797_v3, %v11796_v50  ;;  %v11799_v61 = vpop.f32.mrb[234].mxu0  ;;  %v15304_v52 = vadd.f32 %v11792_v62, %v9571_v59 }
 0x3e5   : > { %v11800_v44 = vpop.f32.mrb[235].mxu0 }
 0x3e6   : > { %v11684_v16 = vpop.f32.mrb[200].mxu1  ;;  %v11801_v39 = vadd.f32 %v11800_v44, %v11799_v61  ;;  %v15312_v61 = vadd.f32 %v11795_v11, %v9574_v58 }
 0x3e7   : > { %v11685_v27 = vpop.f32.mrb[201].mxu1 }
 0x3e8   : > { %v11686_v57 = vadd.f32 %v11685_v27, %v11684_v16  ;;  %v11687_v49 = vpop.f32.mrb[202].mxu1  ;;  %v15315_v16 = vadd.f32 %v15284_v18, %v9566_v7 }
 0x3e9   : > { %v11688_v12 = vpop.f32.mrb[203].mxu1 }
 0x3ea   : > { %v9579_v2 = vadd.f32 %v11686_v57, %v15155_v0  ;;  %v11689_v19 = vadd.f32 %v11688_v12, %v11687_v49  ;;  %v11802_v8 = vpop.f32.mrb[236].mxu0 }
 0x3eb   : > { %v11803_v53 = vpop.f32.mrb[237].mxu0 }
 0x3ec   : > { %v9582_v23 = vadd.f32 %v11689_v19, %v15160_v42  ;;  %v11804_v41 = vadd.f32 %v11803_v53, %v11802_v8  ;;  %v11805_v45 = vpop.f32.mrb[238].mxu0 }
 0x3ed   : > { %v11806_v37 = vpop.f32.mrb[239].mxu0 }
 0x3ee   : > { %v11690_v25 = vpop.f32.mrb[204].mxu1  ;;  %v11807_v47 = vadd.f32 %v11806_v37, %v11805_v45  ;;  %v15320_v45 = vadd.f32 %v11798_v31, %v9579_v2 }
 0x3ef   : > { %v11691_v4 = vpop.f32.mrb[205].mxu1 }
 0x3f0   : > { %v11692_v10 = vadd.f32 %v11691_v4, %v11690_v25  ;;  %v11693_v9 = vpop.f32.mrb[206].mxu1 }
 0x3f1   : > { %v11694_v34 = vpop.f32.mrb[207].mxu1 }
 0x3f2   : > { %v9587_v6 = vadd.f32 %v11692_v10, %v15164_v20  ;;  %v11695_v50 = vadd.f32 %v11694_v34, %v11693_v9  ;;  %v11808_v0 = vpop.f32.mrb[240].mxu0 }
 0x3f3   : > { %v11809_v3 = vpop.f32.mrb[241].mxu0 }
 0x3f4   : > { %v9590_v62 = vadd.f32 %v11695_v50, %v15168_v38  ;;  %v11810_v42 = vadd.f32 %v11809_v3, %v11808_v0  ;;  %v11811_v59 = vpop.f32.mrb[242].mxu0  ;;  %v15317_v49 = vadd.f32 %v11804_v41, %v9587_v6  ;;  %v15325_v41 = vadd.f32 %v11801_v39, %v9582_v23 }
 0x3f5   : > { %v11812_v44 = vpop.f32.mrb[243].mxu0 }
 0x3f6   : > { %v11696_v27 = vpop.f32.mrb[208].mxu1  ;;  %v11813_v57 = vadd.f32 %v11812_v44, %v11811_v59  ;;  %v15323_v7 = vadd.f32 %v11807_v47, %v9590_v62 }
 0x3f7   : > { %v11697_v20 = vpop.f32.mrb[209].mxu1 }
 0x3f8   : > { %v11698_v12 = vadd.f32 %v11697_v20, %v11696_v27  ;;  %v11699_v19 = vpop.f32.mrb[210].mxu1 }
 0x3f9   : > { %v11700_v8 = vpop.f32.mrb[211].mxu1 }
 0x3fa   : > { %v9595_v14 = vadd.f32 %v11698_v12, %v15176_v36  ;;  %v11701_v5 = vadd.f32 %v11700_v8, %v11699_v19  ;;  %v11814_v38 = vpop.f32.mrb[244].mxu0 }
 0x3fb   : > { %v11815_v53 = vpop.f32.mrb[245].mxu0 }
 0x3fc   : > { %v9598_v11 = vadd.f32 %v11701_v5, %v15180_v30  ;;  %v11816_v58 = vadd.f32 %v11815_v53, %v11814_v38  ;;  %v11817_v18 = vpop.f32.mrb[246].mxu0  ;;  %v15328_v0 = vadd.f32 %v11810_v42, %v9595_v14 }
 0x3fd   : > { %v11818_v37 = vpop.f32.mrb[247].mxu0 }
 0x3fe   : > { %v11702_v25 = vpop.f32.mrb[212].mxu1  ;;  %v11819_v4 = vadd.f32 %v11818_v37, %v11817_v18  ;;  %v15333_v23 = vadd.f32 %v11813_v57, %v9598_v11 }
 0x3ff   : > { %v11703_v10 = vpop.f32.mrb[213].mxu1 }
 0x400   : > { %v11704_v9 = vadd.f32 %v11703_v10, %v11702_v25  ;;  %v11705_v34 = vpop.f32.mrb[214].mxu1 }
 0x401   : > { %v11706_v36 = vpop.f32.mrb[215].mxu1 }
 0x402   : > { %v9603_v6 = vadd.f32 %v11704_v9, %v15184_v26  ;;  %v11707_v50 = vadd.f32 %v11706_v36, %v11705_v34  ;;  %v11820_v31 = vpop.f32.mrb[248].mxu0 }
 0x403   : > { %v11821_v2 = vpop.f32.mrb[249].mxu0 }
 0x404   : > { %v9606_v30 = vadd.f32 %v11707_v50, %v15188_v54  ;;  %v11822_v47 = vadd.f32 %v11821_v2, %v11820_v31  ;;  %v11823_v3 = vpop.f32.mrb[250].mxu0  ;;  %v15331_v62 = vadd.f32 %v11816_v58, %v9603_v6 }
 0x405   : > { %v11824_v39 = vpop.f32.mrb[251].mxu0 }
 0x406   : > { %v11708_v59 = vpop.f32.mrb[216].mxu1  ;;  %v11825_v44 = vadd.f32 %v11824_v39, %v11823_v3  ;;  %v15335_v27 = vadd.f32 %v11819_v4, %v9606_v30 }
 0x407   : > { %v11709_v20 = vpop.f32.mrb[217].mxu1 }
 0x408   : > { %v11710_v26 = vadd.f32 %v11709_v20, %v11708_v59  ;;  %v11711_v12 = vpop.f32.mrb[218].mxu1 }
 0x409   : > { %v11712_v19 = vpop.f32.mrb[219].mxu1 }
 0x40a   : > { %v9611_v42 = vadd.f32 %v11710_v26, %v15192_v56  ;;  %v11713_v8 = vadd.f32 %v11712_v19, %v11711_v12  ;;  %v11826_v14 = vpop.f32.mrb[252].mxu0 }
 0x40b   : > { %v11827_v54 = vpop.f32.mrb[253].mxu0 }
 0x40c   : > { %v9614_v5 = vadd.f32 %v11713_v8, %v15198_v21  ;;  %v11828_v38 = vadd.f32 %v11827_v54, %v11826_v14  ;;  %v11829_v53 = vpop.f32.mrb[254].mxu0  ;;  %v15339_v58 = vadd.f32 %v11822_v47, %v9611_v42 }
 0x40d   : > { %v11830_v57 = vpop.f32.mrb[255].mxu0 }
 0x40e   : > { %v11714_v11 = vpop.f32.mrb[220].mxu1  ;;  %v11831_v18 = vadd.f32 %v11830_v57, %v11829_v53  ;;  %v15341_v37 = vadd.f32 %v11825_v44, %v9614_v5 }
 0x40f   : > { %v11715_v25 = vpop.f32.mrb[221].mxu1 }
 0x410   : > { %v11716_v4 = vadd.f32 %v11715_v25, %v11714_v11  ;;  %v11717_v10 = vpop.f32.mrb[222].mxu1 }
 0x411   : > { %v11718_v9 = vpop.f32.mrb[223].mxu1 }
 0x412   : > { %v9619_v56 = vadd.f32 %v11716_v4, %v15202_v29  ;;  %v11719_v34 = vadd.f32 %v11718_v9, %v11717_v10  ;;  %v11832_v36 = vpop.f32.mrb[0].mxu0 }
 0x413   : > { %v11833_v6 = vpop.f32.mrb[1].mxu0 }
 0x414   : > { %v9622_v21 = vadd.f32 %v11719_v34, %v15206_v28  ;;  %v11834_v50 = vadd.f32 %v11833_v6, %v11832_v36  ;;  %v11835_v31 = vpop.f32.mrb[2].mxu0  ;;  %v15345_v2 = vadd.f32 %v11828_v38, %v9619_v56 }
 0x415   : > { %v11836_v30 = vpop.f32.mrb[3].mxu0 }
 0x416   : > { %v11837_v47 = vadd.f32 %v11836_v30, %v11835_v31  ;;  %v15347_v3 = vadd.f32 %v11831_v18, %v9622_v21 }
 0x417   : > { %v11720_v39 = vpop.f32.mrb[224].mxu1 }
 0x418   : > { %v11721_v59 = vpop.f32.mrb[225].mxu1 }
 0x419   : > { %v11722_v44 = vadd.f32 %v11721_v59, %v11720_v39  ;;  %v11723_v20 = vpop.f32.mrb[226].mxu1 }
 0x41a   : > { %v11724_v26 = vpop.f32.mrb[227].mxu1 }
 0x41b   : > { %v11838_v12 = vpop.f32.mrb[4].mxu0  ;;  %v9627_v29 = vadd.f32 %v11722_v44, %v15210_v40  ;;  %v11725_v19 = vadd.f32 %v11724_v26, %v11723_v20 }
 0x41c   : > { %v11839_v42 = vpop.f32.mrb[5].mxu0 }
 0x41d   : > { %v11840_v8 = vadd.f32 %v11839_v42, %v11838_v12  ;;  %v11841_v28 = vpop.f32.mrb[6].mxu0  ;;  %v9630_v14 = vadd.f32 %v11725_v19, %v15214_v51  ;;  %v15351_v5 = vadd.f32 %v11834_v50, %v9627_v29 }
 0x41e   : > { %v11842_v54 = vpop.f32.mrb[7].mxu0 }
 0x41f   : > { %v11843_v38 = vadd.f32 %v11842_v54, %v11841_v28  ;;  %v15353_v57 = vadd.f32 %v11837_v47, %v9630_v14 }
 0x420   : > { %v11726_v53 = vpop.f32.mrb[228].mxu1 }
 0x421   : > { %v11727_v11 = vpop.f32.mrb[229].mxu1 }
 0x422   : > { %v11728_v18 = vadd.f32 %v11727_v11, %v11726_v53  ;;  %v11729_v25 = vpop.f32.mrb[230].mxu1 }
 0x423   : > { %v11730_v4 = vpop.f32.mrb[231].mxu1 }
 0x424   : > { %v9635_v10 = vadd.f32 %v11728_v18, %v15217_v17  ;;  %v11731_v40 = vadd.f32 %v11730_v4, %v11729_v25 }
 0x425   : > { %v11844_v9 = vpop.f32.mrb[8].mxu0 }
 0x426   : > { %v9638_v56 = vadd.f32 %v11731_v40, %v15220_v46  ;;  %v11845_v34 = vpop.f32.mrb[9].mxu0  ;;  %v15357_v36 = vadd.f32 %v11840_v8, %v9635_v10 }
 0x427   : > { %v11846_v51 = vadd.f32 %v11845_v34, %v11844_v9  ;;  %v11847_v6 = vpop.f32.mrb[10].mxu0 }
 0x428   : > { %v11848_v21 = vpop.f32.mrb[11].mxu0  ;;  %v15359_v50 = vadd.f32 %v11843_v38, %v9638_v56 }
 0x429   : > { %v11849_v31 = vadd.f32 %v11848_v21, %v11847_v6 }
 0x42b   : > { %v11732_v30 = vpop.f32.mrb[232].mxu1 }
 0x42c   : > { %v11733_v47 = vpop.f32.mrb[233].mxu1 }
 0x42d   : > { %v11734_v39 = vadd.f32 %v11733_v47, %v11732_v30  ;;  %v11735_v59 = vpop.f32.mrb[234].mxu1 }
 0x42e   : > { %v11736_v44 = vpop.f32.mrb[235].mxu1 }
 0x42f   : > { %v9643_v17 = vadd.f32 %v11734_v39, %v15223_v24  ;;  %v11737_v20 = vadd.f32 %v11736_v44, %v11735_v59  ;;  %v11850_v26 = vpop.f32.mrb[12].mxu0 }
 0x430   : > { %v11851_v12 = vpop.f32.mrb[13].mxu0 }
 0x431   : > { %v9646_v46 = vadd.f32 %v11737_v20, %v15226_v60  ;;  %v15363_v29 = vadd.f32 %v11846_v51, %v9643_v17  ;;  %v11852_v19 = vadd.f32 %v11851_v12, %v11850_v26  ;;  %v11853_v42 = vpop.f32.mrb[14].mxu0 }
 0x432   : > { %v11854_v8 = vpop.f32.mrb[15].mxu0 }
 0x433   : > { %v15365_v28 = vadd.f32 %v11849_v31, %v9646_v46  ;;  %v11855_v14 = vadd.f32 %v11854_v8, %v11853_v42 }
 0x438   : > { %v11738_v54 = vpop.f32.mrb[236].mxu1 }
 0x439   : > { %v11739_v38 = vpop.f32.mrb[237].mxu1 }
 0x43a   : > { %v11740_v53 = vadd.f32 %v11739_v38, %v11738_v54  ;;  %v11741_v11 = vpop.f32.mrb[238].mxu1 }
 0x43b   : > { %v11742_v18 = vpop.f32.mrb[239].mxu1  ;;  %v11856_v25 = vpop.f32.mrb[16].mxu0 }
 0x43c   : > { %v9651_v24 = vadd.f32 %v11740_v53, %v15229_v1  ;;  %v11743_v4 = vadd.f32 %v11742_v18, %v11741_v11  ;;  %v11857_v10 = vpop.f32.mrb[17].mxu0 }
 0x43d   : > { %v11858_v60 = vadd.f32 %v11857_v10, %v11856_v25  ;;  %v11859_v40 = vpop.f32.mrb[18].mxu0 }
 0x43e   : > { %v9654_v9 = vadd.f32 %v11743_v4, %v15238_v13  ;;  %v11860_v56 = vpop.f32.mrb[19].mxu0  ;;  %v15369_v34 = vadd.f32 %v11852_v19, %v9651_v24 }
 0x43f   : > { %v11861_v51 = vadd.f32 %v11860_v56, %v11859_v40 }
 0x440   : > { %v15371_v6 = vadd.f32 %v11855_v14, %v9654_v9 }
 0x443   : > { %v11744_v21 = vpop.f32.mrb[240].mxu1 }
 0x444   : > { %v11745_v31 = vpop.f32.mrb[241].mxu1 }
 0x445   : > { %v11746_v30 = vadd.f32 %v11745_v31, %v11744_v21  ;;  %v11747_v47 = vpop.f32.mrb[242].mxu1 }
 0x446   : > { %v11748_v39 = vpop.f32.mrb[243].mxu1 }
 0x447   : > { %v9659_v59 = vadd.f32 %v11746_v30, %v15259_v15  ;;  %v11749_v1 = vadd.f32 %v11748_v39, %v11747_v47  ;;  %v11862_v44 = vpop.f32.mrb[20].mxu0 }
 0x448   : > { %v11863_v17 = vpop.f32.mrb[21].mxu0 }
 0x449   : > { %v9662_v20 = vadd.f32 %v11749_v1, %v15268_v48  ;;  %v11864_v26 = vadd.f32 %v11863_v17, %v11862_v44  ;;  %v11865_v13 = vpop.f32.mrb[22].mxu0  ;;  %v15375_v46 = vadd.f32 %v11858_v60, %v9659_v59 }
 0x44a   : > { %v11866_v12 = vpop.f32.mrb[23].mxu0 }
 0x44b   : > { %v11867_v19 = vadd.f32 %v11866_v12, %v11865_v13  ;;  %v15377_v42 = vadd.f32 %v11861_v51, %v9662_v20 }
 0x44e   : > { %v11750_v8 = vpop.f32.mrb[244].mxu1 }
 0x44f   : > { %v11751_v14 = vpop.f32.mrb[245].mxu1 }
 0x450   : > { %v11752_v54 = vadd.f32 %v11751_v14, %v11750_v8  ;;  %v11753_v38 = vpop.f32.mrb[246].mxu1 }
 0x451   : > { %v11754_v53 = vpop.f32.mrb[247].mxu1 }
 0x452   : > { %v9667_v15 = vadd.f32 %v11752_v54, %v15277_v55  ;;  %v11755_v11 = vadd.f32 %v11754_v53, %v11753_v38  ;;  %v11868_v18 = vpop.f32.mrb[24].mxu0 }
 0x453   : > { %v11869_v25 = vpop.f32.mrb[25].mxu0 }
 0x454   : > { %v9670_v48 = vadd.f32 %v11755_v11, %v15280_v43  ;;  %v11870_v24 = vadd.f32 %v11869_v25, %v11868_v18  ;;  %v11871_v4 = vpop.f32.mrb[26].mxu0  ;;  %v15381_v10 = vadd.f32 %v11864_v26, %v9667_v15  ;;  %v10715_v15 = vld [vmem:[%s12395_s10 + $0x31] sm:$0xff]  ;;  %v10713_v25 = vld [vmem:[%s12395_s10 + $0x19] sm:$0xff] }
 0x455   : > { %v11872_v60 = vpop.f32.mrb[27].mxu0 }
 0x456   : > { %v11873_v40 = vadd.f32 %v11872_v60, %v11871_v4  ;;  %v15383_v9 = vadd.f32 %v11867_v19, %v9670_v48  ;;  %v10716_v4 = vld [vmem:[%s12395_s10 + $0x39] sm:$0xff] }
 0x459   : > { %v11756_v56 = vpop.f32.mrb[248].mxu1 }
 0x45a   : > { %v11757_v51 = vpop.f32.mrb[249].mxu1 }
 0x45b   : > { %v11758_v21 = vadd.f32 %v11757_v51, %v11756_v56  ;;  %v11759_v31 = vpop.f32.mrb[250].mxu1  ;;  %v10714_v56 = vld [vmem:[%s12395_s10 + $0x21] sm:$0xff] }
 0x45c   : > { %v11760_v30 = vpop.f32.mrb[251].mxu1 }
 0x45d   : > { %v9675_v55 = vadd.f32 %v11758_v21, %v15291_v63  ;;  %v11761_v47 = vadd.f32 %v11760_v30, %v11759_v31 }
 0x45f   : > { %v9678_v39 = vadd.f32 %v11761_v47, %v15294_v22  ;;  %v15387_v59 = vadd.f32 %v11870_v24, %v9675_v55 }
 0x461   : > { %v11762_v43 = vpop.f32.mrb[252].mxu1  ;;  %v15389_v1 = vadd.f32 %v11873_v40, %v9678_v39  ;;  %v10719_v39 = vld [vmem:[%s12395_s10 + $0x61] sm:$0xff] }
 0x462   : > { %v11763_v44 = vpop.f32.mrb[253].mxu1 }
 0x463   : > { %v11764_v17 = vadd.f32 %v11763_v44, %v11762_v43  ;;  %v11765_v20 = vpop.f32.mrb[254].mxu1 }
 0x464   : > { %v11874_v26 = vpop.f32.mrb[28].mxu0  ;;  %v11766_v13 = vpop.f32.mrb[255].mxu1 }
 0x465   : > { %v9683_v12 = vadd.f32 %v11764_v17, %v15299_v32  ;;  %v11767_v19 = vadd.f32 %v11766_v13, %v11765_v20  ;;  %v11875_v63 = vpop.f32.mrb[29].mxu0  ;;  %v10717_v17 = vld [vmem:[%s12395_s10 + $0x49] sm:$0xff] }
 0x466   : > { %v11876_v8 = vadd.f32 %v11875_v63, %v11874_v26  ;;  %v11877_v22 = vpop.f32.mrb[30].mxu0  ;;  %v10720_v26 = vld [vmem:[%s12395_s10 + $0x69] sm:$0xff]  ;;  %v10718_v63 = vld [vmem:[%s12395_s10 + $0x51] sm:$0xff] }
 0x467   : > { %v9686_v14 = vadd.f32 %v11767_v19, %v15301_v33  ;;  %v11878_v54 = vpop.f32.mrb[31].mxu0 }
 0x468   : > { %v11879_v38 = vadd.f32 %v11878_v54, %v11877_v22  ;;  %v15393_v53 = vadd.f32 %v11876_v8, %v9683_v12 }
 0x469   : > { %v11970_v11 = vpop.f32.mrb[0].mxu1 }
 0x46a   : > { %v9893_v18 = vadd.f32 %v11970_v11, %v15304_v52  ;;  %v9884_v48 = vpop.f32.mrb[1].mxu1  ;;  %v15399_v32 = vadd.f32 %v11879_v38, %v9686_v14 }
 0x46b   : > { %v9885_v24 = vadd.f32 %v9884_v48, %v15309_v35  ;;  %v11971_v60 = vpop.f32.mrb[2].mxu1  ;;  %v10721_v48 = vld [vmem:[%s12395_s10 + $0x79] sm:$0xff] }
 0x46c   : > { %v10013_v33 = vadd.f32 %v10715_v15, %v9893_v18  ;;  %v9896_v40 = vadd.f32 %v11971_v60, %v15312_v61  ;;  %v9887_v51 = vpop.f32.mrb[3].mxu1  ;;  %v10723_v18 = vld [vmem:[%s12395_s10 + $0x91] sm:$0xff] }
 0x46d   : > { %v10011_v52 = vadd.f32 %v10713_v25, %v9885_v24  ;;  %v9888_v35 = vadd.f32 %v9887_v51, %v15315_v16 }
 0x46e   : > { %v10045_v21 = vmax.f32 %v10013_v33, 0.0  ;;  %v10014_v31 = vadd.f32 %v10716_v4, %v9896_v40  ;;  %v10724_v4 = vld [vmem:[%s12395_s10 + $0x99] sm:$0xff] }
 0x46f   : > { %v10043_v30 = vmax.f32 %v10011_v52, 0.0  ;;  %v10012_v61 = vadd.f32 %v10714_v56, %v9888_v35  ;;  %v10722_v56 = vld [vmem:[%s12395_s10 + $0x81] sm:$0xff] }
 0x470   : > { %10077 = vst [vmem:[%s15408_s19 + $0x10] sm:$0xff] %v10045_v21  ;;  %v10046_v55 = vmax.f32 %v10014_v31, 0.0 }
 0x471   : > { %10075 = vst [vmem:[%s15408_s19] sm:$0xff] %v10043_v30  ;;  %v10044_v47 = vmax.f32 %v10012_v61, 0.0  ;;  %v11974_v43 = vpop.f32.mrb[4].mxu1 }
 0x472   : > { %10078 = vst [vmem:[%s15408_s19 + $0x18] sm:$0xff] %v10046_v55  ;;  %v9909_v44 = vadd.f32 %v11974_v43, %v15317_v49  ;;  %v9900_v20 = vpop.f32.mrb[5].mxu1  ;;  %v10727_v55 = vld [vmem:[%s12395_s10 + $0xc1] sm:$0xff] }
 0x473   : > { %10076 = vst [vmem:[%s15408_s19 + $0x8] sm:$0xff] %v10044_v47  ;;  %v9901_v16 = vadd.f32 %v9900_v20, %v15320_v45  ;;  %v11975_v13 = vpop.f32.mrb[6].mxu1 }
 0x474   : > { %v10017_v12 = vadd.f32 %v10719_v39, %v9909_v44  ;;  %v9912_v19 = vadd.f32 %v11975_v13, %v15323_v7  ;;  %v9903_v8 = vpop.f32.mrb[7].mxu1  ;;  %v10725_v39 = vld [vmem:[%s12395_s10 + $0xa9] sm:$0xff] }
 0x475   : > { %v10015_v22 = vadd.f32 %v10717_v17, %v9901_v16  ;;  %v9904_v49 = vadd.f32 %v9903_v8, %v15325_v41  ;;  %v10728_v44 = vld [vmem:[%s12395_s10 + $0xc9] sm:$0xff] }
 0x476   : > { %v10049_v14 = vmax.f32 %v10017_v12, 0.0  ;;  %v10018_v54 = vadd.f32 %v10720_v26, %v9912_v19  ;;  %v10726_v26 = vld [vmem:[%s12395_s10 + $0xb1] sm:$0xff] }
 0x477   : > { %v10047_v38 = vmax.f32 %v10015_v22, 0.0  ;;  %v10016_v15 = vadd.f32 %v10718_v63, %v9904_v49 }
 0x478   : > { %10081 = vst [vmem:[%s15408_s19 + $0x30] sm:$0xff] %v10049_v14  ;;  %v10050_v45 = vmax.f32 %v10018_v54, 0.0  ;;  %v10731_v14 = vld [vmem:[%s12395_s10 + $0xf1] sm:$0xff] }
 0x479   : > { %10079 = vst [vmem:[%s15408_s19 + $0x20] sm:$0xff] %v10047_v38  ;;  %v10048_v11 = vmax.f32 %v10016_v15, 0.0  ;;  %v11978_v25 = vpop.f32.mrb[8].mxu1  ;;  %v10729_v38 = vld [vmem:[%s12395_s10 + $0xd9] sm:$0xff] }
 0x47a   : > { %10082 = vst [vmem:[%s15408_s19 + $0x38] sm:$0xff] %v10050_v45  ;;  %v9925_v7 = vadd.f32 %v11978_v25, %v15331_v62  ;;  %v9916_v24 = vpop.f32.mrb[9].mxu1  ;;  %v10732_v45 = vld [vmem:[%s12395_s10 + $0xf9] sm:$0xff] }
 0x47b   : > { %10080 = vst [vmem:[%s15408_s19 + $0x28] sm:$0xff] %v10048_v11  ;;  %v9917_v41 = vadd.f32 %v9916_v24, %v15328_v0  ;;  %v11979_v60 = vpop.f32.mrb[10].mxu1 }
 0x47c   : > { %v10021_v33 = vadd.f32 %v10723_v18, %v9925_v7  ;;  %v9928_v40 = vadd.f32 %v11979_v60, %v15335_v27  ;;  %v9919_v51 = vpop.f32.mrb[11].mxu1  ;;  %v10730_v7 = vld [vmem:[%s12395_s10 + $0xe1] sm:$0xff] }
 0x47d   : > { %v10019_v52 = vadd.f32 %v10721_v48, %v9917_v41  ;;  %v9920_v62 = vadd.f32 %v9919_v51, %v15333_v23 }
 0x47e   : > { %v10053_v35 = vmax.f32 %v10021_v33, 0.0  ;;  %v10022_v21 = vadd.f32 %v10724_v4, %v9928_v40 }
 0x47f   : > { %v10051_v31 = vmax.f32 %v10019_v52, 0.0  ;;  %v10020_v30 = vadd.f32 %v10722_v56, %v9920_v62  ;;  %v10735_v56 = vld [vmem:[%s12395_s10 + $0x121] sm:$0xff]  ;;  %v10733_v52 = vld [vmem:[%s12395_s10 + $0x109] sm:$0xff] }
 0x480   : > { %10085 = vst [vmem:[%s15408_s19 + $0x50] sm:$0xff] %v10053_v35  ;;  %v10054_v0 = vmax.f32 %v10022_v21, 0.0  ;;  %v10736_v35 = vld [vmem:[%s12395_s10 + $0x129] sm:$0xff] }
 0x481   : > { %10083 = vst [vmem:[%s15408_s19 + $0x40] sm:$0xff] %v10051_v31  ;;  %v10052_v61 = vmax.f32 %v10020_v30, 0.0  ;;  %v11982_v47 = vpop.f32.mrb[12].mxu1 }
 0x482   : > { %10086 = vst [vmem:[%s15408_s19 + $0x58] sm:$0xff] %v10054_v0  ;;  %v9941_v27 = vadd.f32 %v11982_v47, %v15345_v2  ;;  %v9932_v43 = vpop.f32.mrb[13].mxu1  ;;  %v10734_v0 = vld [vmem:[%s12395_s10 + $0x111] sm:$0xff] }
 0x483   : > { %10084 = vst [vmem:[%s15408_s19 + $0x48] sm:$0xff] %v10052_v61  ;;  %v9933_v23 = vadd.f32 %v9932_v43, %v15339_v58  ;;  %v11983_v17 = vpop.f32.mrb[14].mxu1 }
 0x484   : > { %v10025_v20 = vadd.f32 %v10727_v55, %v9941_v27  ;;  %v9944_v16 = vadd.f32 %v11983_v17, %v15347_v3  ;;  %v9935_v13 = vpop.f32.mrb[15].mxu1 }
 0x485   : > { %v10023_v12 = vadd.f32 %v10725_v39, %v9933_v23  ;;  %v9936_v2 = vadd.f32 %v9935_v13, %v15341_v37 }
 0x486   : > { %v10057_v19 = vmax.f32 %v10025_v20, 0.0  ;;  %v10026_v63 = vadd.f32 %v10728_v44, %v9944_v16  ;;  %v10739_v44 = vld [vmem:[%s12395_s10 + $0x151] sm:$0xff]  ;;  %v10737_v20 = vld [vmem:[%s12395_s10 + $0x139] sm:$0xff] }
 0x487   : > { %v10055_v8 = vmax.f32 %v10023_v12, 0.0  ;;  %v10024_v22 = vadd.f32 %v10726_v26, %v9936_v2  ;;  %v10740_v26 = vld [vmem:[%s12395_s10 + $0x159] sm:$0xff] }
 0x488   : > { %10089 = vst [vmem:[%s15408_s19 + $0x70] sm:$0xff] %v10057_v19  ;;  %v10058_v58 = vmax.f32 %v10026_v63, 0.0  ;;  %v10738_v19 = vld [vmem:[%s12395_s10 + $0x141] sm:$0xff] }
 0x489   : > { %10087 = vst [vmem:[%s15408_s19 + $0x60] sm:$0xff] %v10055_v8  ;;  %v10056_v49 = vmax.f32 %v10024_v22, 0.0  ;;  %v11986_v54 = vpop.f32.mrb[16].mxu1 }
 0x48a   : > { %10090 = vst [vmem:[%s15408_s19 + $0x78] sm:$0xff] %v10058_v58  ;;  %v9957_v3 = vadd.f32 %v11986_v54, %v15357_v36  ;;  %v9948_v15 = vpop.f32.mrb[17].mxu1 }
 0x48b   : > { %10088 = vst [vmem:[%s15408_s19 + $0x68] sm:$0xff] %v10056_v49  ;;  %v9949_v37 = vadd.f32 %v9948_v15, %v15351_v5  ;;  %v11987_v11 = vpop.f32.mrb[18].mxu1  ;;  %v10741_v15 = vld [vmem:[%s12395_s10 + $0x169] sm:$0xff] }
 0x48c   : > { %v10029_v18 = vadd.f32 %v10731_v14, %v9957_v3  ;;  %v9960_v25 = vadd.f32 %v11987_v11, %v15359_v50  ;;  %v9951_v48 = vpop.f32.mrb[19].mxu1  ;;  %v10743_v3 = vld [vmem:[%s12395_s10 + $0x181] sm:$0xff] }
 0x48d   : > { %v10027_v24 = vadd.f32 %v10729_v38, %v9949_v37  ;;  %v9952_v36 = vadd.f32 %v9951_v48, %v15353_v57 }
 0x48e   : > { %v10061_v41 = vmax.f32 %v10029_v18, 0.0  ;;  %v10030_v4 = vadd.f32 %v10732_v45, %v9960_v25  ;;  %v10744_v45 = vld [vmem:[%s12395_s10 + $0x189] sm:$0xff] }
 0x48f   : > { %v10059_v60 = vmax.f32 %v10027_v24, 0.0  ;;  %v10028_v33 = vadd.f32 %v10730_v7, %v9952_v36  ;;  %v10742_v7 = vld [vmem:[%s12395_s10 + $0x171] sm:$0xff] }
 0x490   : > { %10093 = vst [vmem:[%s15408_s19 + $0x90] sm:$0xff] %v10061_v41  ;;  %v10062_v5 = vmax.f32 %v10030_v4, 0.0 }
 0x491   : > { %10091 = vst [vmem:[%s15408_s19 + $0x80] sm:$0xff] %v10059_v60  ;;  %v10060_v40 = vmax.f32 %v10028_v33, 0.0  ;;  %v11990_v51 = vpop.f32.mrb[20].mxu1 }
 0x492   : > { %10094 = vst [vmem:[%s15408_s19 + $0x98] sm:$0xff] %v10062_v5  ;;  %v9973_v50 = vadd.f32 %v11990_v51, %v15369_v34  ;;  %v9964_v62 = vpop.f32.mrb[21].mxu1 }
 0x493   : > { %10092 = vst [vmem:[%s15408_s19 + $0x88] sm:$0xff] %v10060_v40  ;;  %v9965_v57 = vadd.f32 %v9964_v62, %v15363_v29  ;;  %v11991_v21 = vpop.f32.mrb[22].mxu1 }
 0x494   : > { %v10033_v31 = vadd.f32 %v10735_v56, %v9973_v50  ;;  %v9976_v30 = vadd.f32 %v11991_v21, %v15371_v6  ;;  %v9967_v61 = vpop.f32.mrb[23].mxu1 }
 0x495   : > { %v10031_v55 = vadd.f32 %v10733_v52, %v9965_v57  ;;  %v9968_v34 = vadd.f32 %v9967_v61, %v15365_v28 }
 0x496   : > { %v10065_v47 = vmax.f32 %v10033_v31, 0.0  ;;  %v10034_v27 = vadd.f32 %v10736_v35, %v9976_v30 }
 0x497   : > { %v10063_v39 = vmax.f32 %v10031_v55, 0.0  ;;  %v10032_v43 = vadd.f32 %v10734_v0, %v9968_v34 }
 0x498   : > { %10097 = vst [vmem:[%s15408_s19 + $0xb0] sm:$0xff] %v10065_v47  ;;  %v10066_v29 = vmax.f32 %v10034_v27, 0.0 }
 0x499   : > { %10095 = vst [vmem:[%s15408_s19 + $0xa0] sm:$0xff] %v10063_v39  ;;  %v10064_v23 = vmax.f32 %v10032_v43, 0.0  ;;  %v11994_v17 = vpop.f32.mrb[24].mxu1 }
 0x49a   : > { %10098 = vst [vmem:[%s15408_s19 + $0xb8] sm:$0xff] %v10066_v29  ;;  %v9989_v6 = vadd.f32 %v11994_v17, %v15381_v10  ;;  %v9980_v16 = vpop.f32.mrb[25].mxu1 }
 0x49b   : > { %10096 = vst [vmem:[%s15408_s19 + $0xa8] sm:$0xff] %v10064_v23  ;;  %v9981_v28 = vadd.f32 %v9980_v16, %v15375_v46  ;;  %v11995_v13 = vpop.f32.mrb[26].mxu1 }
 0x49c   : > { %v10037_v12 = vadd.f32 %v10739_v44, %v9989_v6  ;;  %v9992_v2 = vadd.f32 %v11995_v13, %v15383_v9  ;;  %v9983_v63 = vpop.f32.mrb[27].mxu1 }
 0x49d   : > { %v10035_v8 = vadd.f32 %v10737_v20, %v9981_v28  ;;  %v9984_v10 = vadd.f32 %v9983_v63, %v15377_v42 }
 0x49e   : > { %v10069_v22 = vmax.f32 %v10037_v12, 0.0  ;;  %v10038_v58 = vadd.f32 %v10740_v26, %v9992_v2 }
 0x49f   : > { %v10067_v49 = vmax.f32 %v10035_v8, 0.0  ;;  %v10036_v14 = vadd.f32 %v10738_v19, %v9984_v10 }
 0x4a0   : > { %10101 = vst [vmem:[%s15408_s19 + $0xd0] sm:$0xff] %v10069_v22  ;;  %v10070_v46 = vmax.f32 %v10038_v58, 0.0 }
 0x4a1   : > { %10099 = vst [vmem:[%s15408_s19 + $0xc0] sm:$0xff] %v10067_v49  ;;  %v10068_v54 = vmax.f32 %v10036_v14, 0.0  ;;  %v11998_v38 = vpop.f32.mrb[28].mxu1 }
 0x4a2   : > { %10102 = vst [vmem:[%s15408_s19 + $0xd8] sm:$0xff] %v10070_v46  ;;  %v10005_v9 = vadd.f32 %v11998_v38, %v15393_v53  ;;  %v9996_v37 = vpop.f32.mrb[29].mxu1 }
 0x4a3   : > { %10100 = vst [vmem:[%s15408_s19 + $0xc8] sm:$0xff] %v10068_v54  ;;  %v9997_v42 = vadd.f32 %v9996_v37, %v15387_v59  ;;  %v11999_v11 = vpop.f32.mrb[30].mxu1 }
 0x4a4   : > { %v10041_v18 = vadd.f32 %v10743_v3, %v10005_v9  ;;  %v10008_v25 = vadd.f32 %v11999_v11, %v15399_v32  ;;  %v9999_v48 = vpop.f32.mrb[31].mxu1 }
 0x4a5   : > { %v10039_v24 = vadd.f32 %v10741_v15, %v9997_v42  ;;  %v10000_v36 = vadd.f32 %v9999_v48, %v15389_v1 }
 0x4a6   : > { %v10073_v53 = vmax.f32 %v10041_v18, 0.0  ;;  %v10042_v41 = vadd.f32 %v10744_v45, %v10008_v25 }
 0x4a7   : > { %v10071_v4 = vmax.f32 %v10039_v24, 0.0  ;;  %v10040_v60 = vadd.f32 %v10742_v7, %v10000_v36 }
 0x4a8   : > { %10105 = vst [vmem:[%s15408_s19 + $0xf0] sm:$0xff] %v10073_v53  ;;  %v10074_v33 = vmax.f32 %v10042_v41, 0.0 }
 0x4a9   : > { %10103 = vst [vmem:[%s15408_s19 + $0xe0] sm:$0xff] %v10071_v4  ;;  %v10072_v59 = vmax.f32 %v10040_v60, 0.0 }
 0x4aa   : > { %10106 = vst [vmem:[%s15408_s19 + $0xf8] sm:$0xff] %v10074_v33 }
 0x4ab   : > { %10104 = vst [vmem:[%s15408_s19 + $0xe8] sm:$0xff] %v10072_v59 }
 0x4ac PF: > { %s15_s18 = sadd.s32 1, %s12257_s18  }
 0x4ad   : > { %p12_p4 = scmp.ge.s32.totalorder %s15_s18, 4  }
 0x4af   :  { %14 = sbr.rel (!%p12_p4) target bundleno = 1 (0x1), region = 76 }

</bundles_post_ra>
